<compile_context>
chip_gen: v6e
topology: v6e:2x2x1
jax: 0.10.0
libtpu: 0.0.40
codegen_flags: <defaults>
</compile_context>

<pallas_src>
import jax
import jax.numpy as jnp
from jax.experimental import pallas as pl
from jax.experimental.pallas import tpu as pltpu

EPS = 1e-5  # torch.nn.BatchNorm1d default eps


def _round_up(n, m):
    return ((n + m - 1) // m) * m


# ----------------------------------------------------------------------------
# Fused kernel: whole MLP6 forward for one batch tile.
# ----------------------------------------------------------------------------
def _mlp6_fused_kernel(x_ref, w1_ref, w2_ref, w3_ref, w4_ref, w5_ref, w6_ref,
                       bias_ref, o_ref):
    """x_ref: (TILE_B, C0p) bf16.  w*_ref: (Cin_p, Cout_p) bf16, BN folded in.
    bias_ref: (8, 1024) f32, row l = folded bias of layer l (zero-padded).
    o_ref: (TILE_B, 128) f32."""

    def layer(h, w_ref, idx, out_dtype=jnp.bfloat16):
        c_out = w_ref.shape[1]
        y = jnp.dot(h, w_ref[...], preferred_element_type=jnp.float32)
        y = y + bias_ref[idx:idx + 1, :c_out]      # folded Linear-bias + BN
        y = jnp.maximum(y, 0.0)                    # Dropout(eval)=id, then ReLU
        return y.astype(out_dtype)

    x = x_ref[...]                                 # already bf16
    h1 = layer(x, w1_ref, 0)                       # l1 = L1(x)
    h2 = layer(h1, w2_ref, 1)                      # l2 = L2(l1)
    h3 = layer(h1 + h2, w3_ref, 2)                 # l3 = L3(l1 + l2)   (bf16 add)
    h4 = layer(h2 + h3, w4_ref, 3)                 # l4 = L4(l2 + l3)   (bf16 add)
    h5 = layer(h4, w5_ref, 4)                      # l5 = L5(l4)
    h6 = layer(h5, w6_ref, 5, out_dtype=o_ref.dtype)   # l6, keep f32
    o_ref[...] = h6


# ----------------------------------------------------------------------------
# Wrapper
# ----------------------------------------------------------------------------
def mlp6_forward(x, weights, bias_all, out_features=71, *, tile_b=512):
    """x: (B, c_in) f32.  weights: list of 6 padded bf16 (Cin_p, Cout_p) arrays
    with BN folded in.  bias_all: (8, 1024) f32 folded biases.  Returns
    (B, out_features) f32."""
    B, c_in = x.shape
    c_in_p = weights[0].shape[0]
    c_out_p = weights[-1].shape[1]

    # Always a multiple of 16 (bf16 sublane packing + (8,128) BlockSpec rule).
    tile_b = max(16, _round_up(tile_b, 16))
    # Tiny-batch path: one grid step, one core -> no duplicate weight DMA.
    if _round_up(B, 16) <= tile_b:
        tile_b = _round_up(B, 16)
    b_pad = _round_up(B, tile_b)
    grid = (b_pad // tile_b,)

    # Zero-pad batch + input features, cast to bf16 (pads are harmless: the
    # corresponding weight rows are zero too).
    x_p = (jnp.zeros((b_pad, c_in_p), jnp.bfloat16)
           .at[:B, :c_in].set(x.astype(jnp.bfloat16)))

    # Weights / bias: constant index_map, fetched once -> single-buffered.
    w_specs = [pl.BlockSpec(w.shape, lambda i: (0, 0),
                            pipeline_mode=pl.Buffered(1)) for w in weights]
    bias_spec = pl.BlockSpec(bias_all.shape, lambda i: (0, 0),
                             pipeline_mode=pl.Buffered(1))
    in_specs = ([pl.BlockSpec((tile_b, c_in_p), lambda i: (i, 0))]
                + w_specs + [bias_spec])
    out_specs = pl.BlockSpec((tile_b, c_out_p), lambda i: (i, 0))

    # Single-step grids run on one TC; multi-step grids shard the batch axis
    # over both TensorCores on v7x.
    semantics = ("arbitrary",) if grid[0] == 1 else ("parallel",)

    out = pl.pallas_call(
        _mlp6_fused_kernel,
        out_shape=jax.ShapeDtypeStruct((b_pad, c_out_p), jnp.float32),
        grid=grid,
        in_specs=in_specs,
        out_specs=out_specs,
        compiler_params=pltpu.CompilerParams(
            dimension_semantics=semantics,
            vmem_limit_bytes=48 * 1024 * 1024,  # v5e scoped default is ~16 MiB
        ),
    )(x_p, *weights, bias_all)

    return out[:B, :out_features]


# ----------------------------------------------------------------------------
# Parameter construction (torch-default init) and BN fold / padding / packing.
# ----------------------------------------------------------------------------
def mlp6_layer_dims(K):
    c0 = 40 * (2 * K + 1)
    return [(c0, 1024), (1024, 1024), (1024, 1024),
            (1024, 512), (512, 256), (256, 71)]


def init_perceptron_params(key, c_in, c_out):
    """Matches PerceptronLayer(c_in, c_out) parameter shapes / default init.
    Linear weight is stored transposed as (c_in, c_out)."""
    kw, kb = jax.random.split(key)
    bound = 1.0 / (c_in ** 0.5)
    return dict(
        w=jax.random.uniform(kw, (c_in, c_out), jnp.float32, -bound, bound),
        b=jax.random.uniform(kb, (c_out,), jnp.float32, -bound, bound),
        gamma=jnp.ones((c_out,), jnp.float32),
        beta=jnp.zeros((c_out,), jnp.float32),
        mean=jnp.zeros((c_out,), jnp.float32),
        var=jnp.ones((c_out,), jnp.float32),
    )


def _fold_bn(p):
    """Fold eval-mode BatchNorm1d into the preceding Linear."""
    scale = p["gamma"] * jax.lax.rsqrt(p["var"] + EPS)          # (c_out,)
    w_f = p["w"] * scale[None, :]
    b_f = (p["b"] - p["mean"]) * scale + p["beta"]
    return w_f, b_f


def prepare_mlp6_params(raw_params, weight_dtype=jnp.bfloat16):
    """BN-fold, pad every feature dim to a multiple of 128 (zeros), cast weights
    to bf16, and pack all folded biases into one (8, max_C) f32 array."""
    weights, biases = [], []
    for p in raw_params:
        w_f, b_f = _fold_bn(p)
        c_in, c_out = w_f.shape
        c_in_p, c_out_p = _round_up(c_in, 128), _round_up(c_out, 128)
        w_p = jnp.zeros((c_in_p, c_out_p), jnp.float32).at[:c_in, :c_out].set(w_f)
        b_p = jnp.zeros((c_out_p,), jnp.float32).at[:c_out].set(b_f)
        weights.append(w_p.astype(weight_dtype))
        biases.append(b_p)

    max_c = max(b.shape[0] for b in biases)
    n_rows = _round_up(len(biases), 8)
    bias_all = jnp.zeros((n_rows, max_c), jnp.float32)
    for i, b_p in enumerate(biases):
        bias_all = bias_all.at[i, :b_p.shape[0]].set(b_p)
    return weights, bias_all


# ----------------------------------------------------------------------------
# Pure-JAX reference (same folded bf16 weights / bf16 activation casts as the
# kernel, f32 accumulation).
# ----------------------------------------------------------------------------
def mlp6_reference(x, weights, bias_all, out_features=71):
    c_in = x.shape[1]
    c_in_p = weights[0].shape[0]
    h = (jnp.zeros((x.shape[0], c_in_p), jnp.bfloat16)
         .at[:, :c_in].set(x.astype(jnp.bfloat16)))

    def layer(h_bf16, w, idx, keep_f32=False):
        c_out = w.shape[1]
        y = jnp.dot(h_bf16.astype(jnp.float32), w.astype(jnp.float32),
                    precision=jax.lax.Precision.HIGHEST)
        y = y + bias_all[idx:idx + 1, :c_out]
        y = jnp.maximum(y, 0.0)
        return y if keep_f32 else y.astype(jnp.bfloat16)

    h1 = layer(h, weights[0], 0)
    h2 = layer(h1, weights[1], 1)
    h3 = layer(h1 + h2, weights[2], 2)
    h4 = layer(h2 + h3, weights[3], 3)
    h5 = layer(h4, weights[4], 4)
    h6 = layer(h5, weights[5], 5, keep_f32=True)
    return h6[:, :out_features]


if __name__ == "__main__":
    K = 1                      # context size -> input dim 40*(2K+1) = 120
    batch = 16
    in_features = 40 * (2 * K + 1)
    out_features = 71

    root = jax.random.PRNGKey(0)
    k_x, k_p = jax.random.split(root)

    x = jax.random.normal(k_x, (batch, in_features), dtype=jnp.float32)

    keys = jax.random.split(k_p, 6)
    dims = mlp6_layer_dims(K)
    raw = [init_perceptron_params(keys[i], *dims[i]) for i in range(6)]
    weights, bias_all = prepare_mlp6_params(raw)

    out = mlp6_forward(x, weights, bias_all, out_features)
    out = jax.block_until_ready(out)

    assert out.shape == (batch, out_features), out.shape
    assert out.dtype == jnp.float32
    assert bool(jnp.all(out >= 0.0))  # ReLU output

    ref = mlp6_reference(x, weights, bias_all, out_features)
    max_err = float(jnp.max(jnp.abs(out - ref)))
    assert jnp.allclose(out, ref, rtol=1e-2, atol=1e-2), max_err

    print("KERNEL_OK")
</pallas_src>

<mosaic_0001>
module attributes {stable_mosaic.version = 11 : i64} {
  func.func @_mlp6_fused_kernel(%arg0: i32, %arg1: memref<16x128xbf16, #tpu.memory_space<vmem>>, %arg2: memref<128x1024xbf16, #tpu.memory_space<vmem>>, %arg3: memref<1024x1024xbf16, #tpu.memory_space<vmem>>, %arg4: memref<1024x1024xbf16, #tpu.memory_space<vmem>>, %arg5: memref<1024x512xbf16, #tpu.memory_space<vmem>>, %arg6: memref<512x256xbf16, #tpu.memory_space<vmem>>, %arg7: memref<256x128xbf16, #tpu.memory_space<vmem>>, %arg8: memref<8x1024xf32, #tpu.memory_space<vmem>>, %arg9: memref<16x128xf32, #tpu.memory_space<vmem>>) attributes {dimension_semantics = [#tpu.dimension_semantics<arbitrary>], iteration_bounds = array<i64: 1>, scalar_prefetch = 0 : i64, scratch_operands = 0 : i64, tpu.core_type = #tpu.core_type<tc>, window_params = [{transform_indices = @transform_0, window_bounds = array<i64: 16, 128>}, {pipeline_mode = #tpu.pipeline_mode<synchronous>, transform_indices = @transform_1, window_bounds = array<i64: 128, 1024>}, {pipeline_mode = #tpu.pipeline_mode<synchronous>, transform_indices = @transform_2, window_bounds = array<i64: 1024, 1024>}, {pipeline_mode = #tpu.pipeline_mode<synchronous>, transform_indices = @transform_3, window_bounds = array<i64: 1024, 1024>}, {pipeline_mode = #tpu.pipeline_mode<synchronous>, transform_indices = @transform_4, window_bounds = array<i64: 1024, 512>}, {pipeline_mode = #tpu.pipeline_mode<synchronous>, transform_indices = @transform_5, window_bounds = array<i64: 512, 256>}, {pipeline_mode = #tpu.pipeline_mode<synchronous>, transform_indices = @transform_6, window_bounds = array<i64: 256, 128>}, {pipeline_mode = #tpu.pipeline_mode<synchronous>, transform_indices = @transform_7, window_bounds = array<i64: 8, 1024>}, {transform_indices = @transform_8, window_bounds = array<i64: 16, 128>}]} {
    %c0 = arith.constant 0 : index
    %c0_0 = arith.constant 0 : index
    %0 = vector.load %arg1[%c0, %c0_0] : memref<16x128xbf16, #tpu.memory_space<vmem>>, vector<16x128xbf16>
    %c0_1 = arith.constant 0 : index
    %c0_2 = arith.constant 0 : index
    %1 = vector.load %arg2[%c0_1, %c0_2] : memref<128x1024xbf16, #tpu.memory_space<vmem>>, vector<128x1024xbf16>
    %cst = arith.constant dense<0.000000e+00> : vector<16x1024xf32>
    %2 = tpu.matmul %0, %1, %cst {dimension_numbers = #tpu.dot_dimension_numbers<[1], [0], [0], [1], [0, 0, 1, 1], [], []>} : vector<16x128xbf16>, vector<128x1024xbf16>, vector<16x1024xf32> -> vector<16x1024xf32>
    %c0_3 = arith.constant 0 : index
    %c0_4 = arith.constant 0 : index
    %3 = vector.load %arg8[%c0_3, %c0_4] : memref<8x1024xf32, #tpu.memory_space<vmem>>, vector<1x1024xf32>
    %4 = vector.broadcast %3 : vector<1x1024xf32> to vector<16x1024xf32>
    %5 = arith.addf %2, %4 : vector<16x1024xf32>
    %cst_5 = arith.constant 0.000000e+00 : f32
    %6 = vector.broadcast %cst_5 : f32 to vector<16x1024xf32>
    %7 = arith.maximumf %5, %6 : vector<16x1024xf32>
    %8 = arith.truncf %7 : vector<16x1024xf32> to vector<16x1024xbf16>
    %c0_6 = arith.constant 0 : index
    %c0_7 = arith.constant 0 : index
    %9 = vector.load %arg3[%c0_6, %c0_7] : memref<1024x1024xbf16, #tpu.memory_space<vmem>>, vector<1024x1024xbf16>
    %cst_8 = arith.constant dense<0.000000e+00> : vector<16x1024xf32>
    %10 = tpu.matmul %8, %9, %cst_8 {dimension_numbers = #tpu.dot_dimension_numbers<[1], [0], [0], [1], [0, 0, 1, 1], [], []>} : vector<16x1024xbf16>, vector<1024x1024xbf16>, vector<16x1024xf32> -> vector<16x1024xf32>
    %c1 = arith.constant 1 : index
    %c0_9 = arith.constant 0 : index
    %11 = vector.load %arg8[%c1, %c0_9] : memref<8x1024xf32, #tpu.memory_space<vmem>>, vector<1x1024xf32>
    %12 = vector.broadcast %11 : vector<1x1024xf32> to vector<16x1024xf32>
    %13 = arith.addf %10, %12 : vector<16x1024xf32>
    %cst_10 = arith.constant 0.000000e+00 : f32
    %14 = vector.broadcast %cst_10 : f32 to vector<16x1024xf32>
    %15 = arith.maximumf %13, %14 : vector<16x1024xf32>
    %16 = arith.truncf %15 : vector<16x1024xf32> to vector<16x1024xbf16>
    %17 = arith.addf %8, %16 : vector<16x1024xbf16>
    %c0_11 = arith.constant 0 : index
    %c0_12 = arith.constant 0 : index
    %18 = vector.load %arg4[%c0_11, %c0_12] : memref<1024x1024xbf16, #tpu.memory_space<vmem>>, vector<1024x1024xbf16>
    %cst_13 = arith.constant dense<0.000000e+00> : vector<16x1024xf32>
    %19 = tpu.matmul %17, %18, %cst_13 {dimension_numbers = #tpu.dot_dimension_numbers<[1], [0], [0], [1], [0, 0, 1, 1], [], []>} : vector<16x1024xbf16>, vector<1024x1024xbf16>, vector<16x1024xf32> -> vector<16x1024xf32>
    %c2 = arith.constant 2 : index
    %c0_14 = arith.constant 0 : index
    %20 = vector.load %arg8[%c2, %c0_14] : memref<8x1024xf32, #tpu.memory_space<vmem>>, vector<1x1024xf32>
    %21 = vector.broadcast %20 : vector<1x1024xf32> to vector<16x1024xf32>
    %22 = arith.addf %19, %21 : vector<16x1024xf32>
    %cst_15 = arith.constant 0.000000e+00 : f32
    %23 = vector.broadcast %cst_15 : f32 to vector<16x1024xf32>
    %24 = arith.maximumf %22, %23 : vector<16x1024xf32>
    %25 = arith.truncf %24 : vector<16x1024xf32> to vector<16x1024xbf16>
    %26 = arith.addf %16, %25 : vector<16x1024xbf16>
    %c0_16 = arith.constant 0 : index
    %c0_17 = arith.constant 0 : index
    %27 = vector.load %arg5[%c0_16, %c0_17] : memref<1024x512xbf16, #tpu.memory_space<vmem>>, vector<1024x512xbf16>
    %cst_18 = arith.constant dense<0.000000e+00> : vector<16x512xf32>
    %28 = tpu.matmul %26, %27, %cst_18 {dimension_numbers = #tpu.dot_dimension_numbers<[1], [0], [0], [1], [0, 0, 1, 1], [], []>} : vector<16x1024xbf16>, vector<1024x512xbf16>, vector<16x512xf32> -> vector<16x512xf32>
    %c3 = arith.constant 3 : index
    %c0_19 = arith.constant 0 : index
    %29 = vector.load %arg8[%c3, %c0_19] : memref<8x1024xf32, #tpu.memory_space<vmem>>, vector<1x512xf32>
    %30 = vector.broadcast %29 : vector<1x512xf32> to vector<16x512xf32>
    %31 = arith.addf %28, %30 : vector<16x512xf32>
    %cst_20 = arith.constant 0.000000e+00 : f32
    %32 = vector.broadcast %cst_20 : f32 to vector<16x512xf32>
    %33 = arith.maximumf %31, %32 : vector<16x512xf32>
    %34 = arith.truncf %33 : vector<16x512xf32> to vector<16x512xbf16>
    %c0_21 = arith.constant 0 : index
    %c0_22 = arith.constant 0 : index
    %35 = vector.load %arg6[%c0_21, %c0_22] : memref<512x256xbf16, #tpu.memory_space<vmem>>, vector<512x256xbf16>
    %cst_23 = arith.constant dense<0.000000e+00> : vector<16x256xf32>
    %36 = tpu.matmul %34, %35, %cst_23 {dimension_numbers = #tpu.dot_dimension_numbers<[1], [0], [0], [1], [0, 0, 1, 1], [], []>} : vector<16x512xbf16>, vector<512x256xbf16>, vector<16x256xf32> -> vector<16x256xf32>
    %c4 = arith.constant 4 : index
    %c0_24 = arith.constant 0 : index
    %37 = vector.load %arg8[%c4, %c0_24] : memref<8x1024xf32, #tpu.memory_space<vmem>>, vector<1x256xf32>
    %38 = vector.broadcast %37 : vector<1x256xf32> to vector<16x256xf32>
    %39 = arith.addf %36, %38 : vector<16x256xf32>
    %cst_25 = arith.constant 0.000000e+00 : f32
    %40 = vector.broadcast %cst_25 : f32 to vector<16x256xf32>
    %41 = arith.maximumf %39, %40 : vector<16x256xf32>
    %42 = arith.truncf %41 : vector<16x256xf32> to vector<16x256xbf16>
    %c0_26 = arith.constant 0 : index
    %c0_27 = arith.constant 0 : index
    %43 = vector.load %arg7[%c0_26, %c0_27] : memref<256x128xbf16, #tpu.memory_space<vmem>>, vector<256x128xbf16>
    %cst_28 = arith.constant dense<0.000000e+00> : vector<16x128xf32>
    %44 = tpu.matmul %42, %43, %cst_28 {dimension_numbers = #tpu.dot_dimension_numbers<[1], [0], [0], [1], [0, 0, 1, 1], [], []>} : vector<16x256xbf16>, vector<256x128xbf16>, vector<16x128xf32> -> vector<16x128xf32>
    %c5 = arith.constant 5 : index
    %c0_29 = arith.constant 0 : index
    %45 = vector.load %arg8[%c5, %c0_29] : memref<8x1024xf32, #tpu.memory_space<vmem>>, vector<1x128xf32>
    %46 = vector.broadcast %45 : vector<1x128xf32> to vector<16x128xf32>
    %47 = arith.addf %44, %46 : vector<16x128xf32>
    %cst_30 = arith.constant 0.000000e+00 : f32
    %48 = vector.broadcast %cst_30 : f32 to vector<16x128xf32>
    %49 = arith.maximumf %47, %48 : vector<16x128xf32>
    %c0_31 = arith.constant 0 : index
    %c0_32 = arith.constant 0 : index
    %50 = vector.load %arg9[%c0_31, %c0_32] : memref<16x128xf32, #tpu.memory_space<vmem>>, vector<16x128xf32>
    tpu.vector_store %arg9[%c0_31, %c0_32], %49 {strides = array<i32>} : memref<16x128xf32, #tpu.memory_space<vmem>>, vector<16x128xf32>,
    return
  }
  func.func @transform_0(%arg0: i32) -> (i32, i32) {
    %c0_i32 = arith.constant 0 : i32
    %c0_i32_0 = arith.constant 0 : i32
    return %arg0, %c0_i32 : i32, i32
  }
  func.func @transform_1(%arg0: i32) -> (i32, i32) {
    %c0_i32 = arith.constant 0 : i32
    %c0_i32_0 = arith.constant 0 : i32
    %c0_i32_1 = arith.constant 0 : i32
    return %c0_i32, %c0_i32_0 : i32, i32
  }
  func.func @transform_2(%arg0: i32) -> (i32, i32) {
    %c0_i32 = arith.constant 0 : i32
    %c0_i32_0 = arith.constant 0 : i32
    %c0_i32_1 = arith.constant 0 : i32
    return %c0_i32, %c0_i32_0 : i32, i32
  }
  func.func @transform_3(%arg0: i32) -> (i32, i32) {
    %c0_i32 = arith.constant 0 : i32
    %c0_i32_0 = arith.constant 0 : i32
    %c0_i32_1 = arith.constant 0 : i32
    return %c0_i32, %c0_i32_0 : i32, i32
  }
  func.func @transform_4(%arg0: i32) -> (i32, i32) {
    %c0_i32 = arith.constant 0 : i32
    %c0_i32_0 = arith.constant 0 : i32
    %c0_i32_1 = arith.constant 0 : i32
    return %c0_i32, %c0_i32_0 : i32, i32
  }
  func.func @transform_5(%arg0: i32) -> (i32, i32) {
    %c0_i32 = arith.constant 0 : i32
    %c0_i32_0 = arith.constant 0 : i32
    %c0_i32_1 = arith.constant 0 : i32
    return %c0_i32, %c0_i32_0 : i32, i32
  }
  func.func @transform_6(%arg0: i32) -> (i32, i32) {
    %c0_i32 = arith.constant 0 : i32
    %c0_i32_0 = arith.constant 0 : i32
    %c0_i32_1 = arith.constant 0 : i32
    return %c0_i32, %c0_i32_0 : i32, i32
  }
  func.func @transform_7(%arg0: i32) -> (i32, i32) {
    %c0_i32 = arith.constant 0 : i32
    %c0_i32_0 = arith.constant 0 : i32
    %c0_i32_1 = arith.constant 0 : i32
    return %c0_i32, %c0_i32_0 : i32, i32
  }
  func.func @transform_8(%arg0: i32) -> (i32, i32) {
    %c0_i32 = arith.constant 0 : i32
    %c0_i32_0 = arith.constant 0 : i32
    return %arg0, %c0_i32 : i32, i32
  }
}

</mosaic_0001>

<bundles_post_ra>
// kernel: tpu_custom_call.1
= control target key start
LH: loop header
LB: loop body
LE: loop exit
PB: predicated region body
PF: predicated region fallthrough
CT: control target
= control target key end

     0   :  { %13 = vsyncpa [#allocation3], 0  ;;  %s13767_s0 = inlined_call_operand.hbm [shape: bf16[16,128], index: 0, kind: input, shape index: {}]   ;;  %s13768_s1 = inlined_call_operand.hbm [shape: bf16[128,1024], index: 1, kind: input, shape index: {}]   ;;  %s13769_s2 = inlined_call_operand.hbm [shape: bf16[1024,1024], index: 2, kind: input, shape index: {}]   ;;  %s13770_s3 = inlined_call_operand.hbm [shape: bf16[1024,1024], index: 3, kind: input, shape index: {}]   ;;  %s13771_s4 = inlined_call_operand.hbm [shape: bf16[1024,512], index: 4, kind: input, shape index: {}]   ;;  %s13772_s5 = inlined_call_operand.hbm [shape: bf16[512,256], index: 5, kind: input, shape index: {}]   ;;  %s13773_s6 = inlined_call_operand.hbm [shape: bf16[256,128], index: 6, kind: input, shape index: {}]   ;;  %s13774_s7 = inlined_call_operand.hbm [shape: f32[8,1024], index: 7, kind: input, shape index: {}]   ;;  %s13775_s8 = inlined_call_operand.hbm [shape: f32[16,128], index: 8, kind: output, shape index: {}]  }
   0x1   :  { %14 = vsyncpa [#allocation6], 0 }
   0x2   :  { %15 = vsyncpa [#allocation9], 0 }
   0x3   :  { %16 = vsyncpa [#allocation12], 0 }
   0x4   :  { %17 = vsyncpa [#allocation15], 0 }
   0x5   :  { %18 = vsyncpa [#allocation4], 0  ;;  %s13197_s27 = smov [#allocation5]  }
   0x6   :  { %s36_s28 = sshll.u32 %s13197_s27, 4  ;;  %s37_s28 = int_to_ptr.vmem [resolvable:$true] %s36_s28 }
   0x7   :  { %s13013_s29 = scalar_lea.vmem %s37_s28, 8192  ;;  %p13018_p1 = scmp.lt.s32.totalorder %s37_s28, %s37_s28 }
   0x8   :  { %p13014_p0 = scmp.ne.s32.totalorder %s37_s28, %s13013_s29  ;;  %p13019_p2 = scmp.lt.s32.totalorder %s13013_s29, %s13013_s29 }
   0xa   :  { %p13020_p3 = por %p13019_p2, %p13018_p1 }
   0xc   :  { %p13021_p4 = pnand %p13020_p3, %p13014_p0 }
   0xe   :  { %13024 = shalt.err (!%p13021_p4)
}
   0xf   :  { %s13198_s30 = smov 512   ;;  %s13199_s9 = smov 32  }
  0x10   :  { %42 = dma.hbm_to_vmem [thread:$0]  %s13768_s1, 8192, %s37_s28, [#allocation6], %s13198_s30, %s13198_s30, %s13199_s9  }
  0x11   :  { %s13200_s12 = smov [#allocation8]   ;;  %s13201_s14 = smov [#allocation11]  }
  0x12   :  { %s60_s13 = sshll.u32 %s13200_s12, 4  ;;  %s84_s15 = sshll.u32 %s13201_s14, 4  ;;  %s61_s13 = int_to_ptr.vmem [resolvable:$true] %s60_s13  ;;  %s85_s15 = int_to_ptr.vmem [resolvable:$true] %s84_s15 }
  0x13   :  { %s13033_s16 = scalar_lea.vmem %s61_s13, 65536  ;;  %p13038_p6 = scmp.lt.s32.totalorder %s61_s13, %s61_s13 }
  0x14   :  { %p13034_p5 = scmp.ne.s32.totalorder %s61_s13, %s13033_s16  ;;  %p13039_p7 = scmp.lt.s32.totalorder %s13033_s16, %s13033_s16 }
  0x16   :  { %p13040_p8 = por %p13039_p7, %p13038_p6 }
  0x18   :  { %p13041_p9 = pnand %p13040_p8, %p13034_p5 }
  0x1a   :  { %13044 = shalt.err (!%p13041_p9)
}
  0x1b   :  { %66 = dma.hbm_to_vmem [thread:$0]  %s13770_s3, 65536, %s61_s13, [#allocation9], %s13198_s30, %s13198_s30, %s13199_s9  }
  0x1c   :  { %s13053_s1 = scalar_lea.vmem %s85_s15, 8192  ;;  %p13058_p11 = scmp.lt.s32.totalorder %s85_s15, %s85_s15 }
  0x1d   :  { %p13054_p10 = scmp.ne.s32.totalorder %s85_s15, %s13053_s1  ;;  %p13059_p12 = scmp.lt.s32.totalorder %s13053_s1, %s13053_s1 }
  0x1f   :  { %p13060_p13 = por %p13059_p12, %p13058_p11 }
  0x21   :  { %p13061_p0 = pnand %p13060_p13, %p13054_p10 }
  0x23   :  { %13064 = shalt.err (!%p13061_p0)
}
  0x24   :  { %s13202_s19 = smov 128   ;;  %s13203_s20 = smov 8  }
  0x25   :  { %90 = dma.hbm_to_vmem [thread:$0]  %s13772_s5, 8192, %s85_s15, [#allocation12], %s13202_s19, %s13202_s19, %s13203_s20  }
  0x26   :  { %s13204_s23 = smov [#allocation2]  }
  0x27   :  { %s24_s24 = sshll.u32 %s13204_s23, 4  ;;  %s25_s24 = int_to_ptr.vmem [resolvable:$true] %s24_s24 }
  0x28   :  { %s13073_s3 = scalar_lea.vmem %s25_s24, 128  ;;  %p13078_p2 = scmp.lt.s32.totalorder %s25_s24, %s25_s24 }
  0x29   :  { %p13074_p1 = scmp.ne.s32.totalorder %s25_s24, %s13073_s3  ;;  %p13079_p3 = scmp.lt.s32.totalorder %s13073_s3, %s13073_s3 }
  0x2b   :  { %p13080_p4 = por %p13079_p3, %p13078_p2 }
  0x2d   :  { %p13081_p5 = pnand %p13080_p4, %p13074_p1 }
  0x2f   :  { %13084 = shalt.err (!%p13081_p5)
}
  0x30   :  { %s13205_s25 = smov 64   ;;  %s13206_s26 = smov 4  }
  0x31   :  { %30 = dma.hbm_to_vmem [thread:$0]  %s13767_s0, 128, %s25_s24, [#allocation3], %s13205_s25, %s13205_s25, %s13206_s26  }
  0x32   :  { %s13207_s5 = smov [#allocation7]   ;;  %s13208_s10 = smov [#allocation10]  }
  0x33   :  { %s48_s29 = sshll.u32 %s13207_s5, 4  ;;  %s72_s11 = sshll.u32 %s13208_s10, 4  ;;  %s49_s29 = int_to_ptr.vmem [resolvable:$true] %s48_s29  ;;  %s73_s11 = int_to_ptr.vmem [resolvable:$true] %s72_s11 }
  0x34   :  { %s13093_s12 = scalar_lea.vmem %s49_s29, 65536  ;;  %p13098_p7 = scmp.lt.s32.totalorder %s49_s29, %s49_s29 }
  0x35   :  { %p13094_p6 = scmp.ne.s32.totalorder %s49_s29, %s13093_s12  ;;  %p13099_p8 = scmp.lt.s32.totalorder %s13093_s12, %s13093_s12 }
  0x37   :  { %p13100_p9 = por %p13099_p8, %p13098_p7 }
  0x39   :  { %p13101_p10 = pnand %p13100_p9, %p13094_p6 }
  0x3b   :  { %13104 = shalt.err (!%p13101_p10)
}
  0x3c   :  { %54 = dma.hbm_to_vmem [thread:$0]  %s13769_s2, 65536, %s49_s29, [#allocation6], %s13198_s30, %s13198_s30, %s13199_s9  }
  0x3d   :  { %s13113_s0 = scalar_lea.vmem %s73_s11, 32768  ;;  %p13118_p12 = scmp.lt.s32.totalorder %s73_s11, %s73_s11 }
  0x3e   :  { %p13114_p11 = scmp.ne.s32.totalorder %s73_s11, %s13113_s0  ;;  %p13119_p13 = scmp.lt.s32.totalorder %s13113_s0, %s13113_s0 }
  0x40   :  { %p13120_p0 = por %p13119_p13, %p13118_p12 }
  0x42   :  { %p13121_p1 = pnand %p13120_p0, %p13114_p11 }
  0x44   :  { %13124 = shalt.err (!%p13121_p1)
}
  0x45   :  { %s13209_s15 = smov 256   ;;  %s13210_s16 = smov 16  }
  0x46   :  { %78 = dma.hbm_to_vmem [thread:$0]  %s13771_s4, 32768, %s73_s11, [#allocation9], %s13209_s15, %s13209_s15, %s13210_s16  }
  0x47   :  { %s13211_s1 = smov [#allocation13]   ;;  %s13212_s22 = smov [#allocation14]  }
  0x48   :  { %s96_s21 = sshll.u32 %s13211_s1, 4  ;;  %s109_s23 = sshll.u32 %s13212_s22, 4  ;;  %s97_s21 = int_to_ptr.vmem [resolvable:$true] %s96_s21  ;;  %s110_s23 = int_to_ptr.vmem [resolvable:$true] %s109_s23 }
  0x49   :  { %s13133_s2 = scalar_lea.vmem %s97_s21, 2048  ;;  %p13138_p3 = scmp.lt.s32.totalorder %s97_s21, %s97_s21 }
  0x4a   :  { %p13134_p2 = scmp.ne.s32.totalorder %s97_s21, %s13133_s2  ;;  %p13139_p4 = scmp.lt.s32.totalorder %s13133_s2, %s13133_s2 }
  0x4c   :  { %p13140_p5 = por %p13139_p4, %p13138_p3 }
  0x4e   :  { %p13141_p6 = pnand %p13140_p5, %p13134_p2 }
  0x50   :  { %13144 = shalt.err (!%p13141_p6)
}
  0x51   :  { %102 = dma.hbm_to_vmem [thread:$0]  %s13773_s6, 2048, %s97_s21, [#allocation12], %s13205_s25, %s13205_s25, %s13206_s26  }
  0x52   :  { %s13153_s4 = scalar_lea.vmem %s110_s23, 1024  ;;  %p13158_p8 = scmp.lt.s32.totalorder %s110_s23, %s110_s23 }
  0x53   :  { %p13154_p7 = scmp.ne.s32.totalorder %s110_s23, %s13153_s4  ;;  %p13159_p9 = scmp.lt.s32.totalorder %s13153_s4, %s13153_s4 }
  0x55   :  { %p13160_p10 = por %p13159_p9, %p13158_p8 }
  0x57   :  { %p13161_p11 = pnand %p13160_p10, %p13154_p7 }
  0x59   :  { %13164 = shalt.err (!%p13161_p11)
}
  0x5a   :  { %112 = dma.hbm_to_vmem [thread:$0]  %s13774_s7, 1024, %s110_s23, [#allocation15]  }
  0x5b   :  { %13185 = dma.done.wait [#allocation3], 128  }
  0x5c   :  { %13186 = vsyncadd [#allocation3], 4294967168 }
  0x5d   :  { %13187 = dma.done.wait [#allocation6], 73728  }
  0x5e   :  { %13188 = vsyncadd [#allocation6], 4294893568 }
  0x5f   :  { %13189 = dma.done.wait [#allocation9], 98304  }
  0x60   :  { %13190 = vsyncadd [#allocation9], 4294868992 }
  0x61   :  { %13191 = dma.done.wait [#allocation12], 10240  }
  0x62   :  { %13192 = vsyncadd [#allocation12], 4294957056 }
  0x63   :  { %13193 = dma.done.wait [#allocation15], 1024  }
  0x64   :  { %13194 = vsyncadd [#allocation15], 4294966272  ;;  %v13213_v0 = vmov 0   ;;  %v196_v1 = vld [vmem:[#allocation5 + $0x1c0] sm:$0xff]  ;;  %v197_v3 = vld [vmem:[#allocation5 + $0x1c8] sm:$0xff]  ;;  %s13214_s6 = smov [#allocation16]  }
  0x65   :  { %606 = vmatprep.mubr.bf16.mxu0 %v13213_v0  ;;  %649 = vmatprep.mubr.bf16.mxu1 %v13213_v0  ;;  %v200_v2 = vld [vmem:[#allocation5 + $0x1e0] sm:$0xff]  ;;  %v201_v5 = vld [vmem:[#allocation5 + $0x1e8] sm:$0xff]  ;;  %v198_v63 = vld [vmem:[#allocation5 + $0x1d0] sm:$0xff]  ;;  %s11027_s7 = sshll.u32 %s13214_s6, 4  ;;  %s11028_s7 = int_to_ptr.vmem [resolvable:$true] %s11027_s7 }
  0x66   :  { %v11101_v4 = vcombine.high %v196_v1, %v200_v2  ;;  %v11100_v6 = vcombine.low %v196_v1, %v200_v2  ;;  %v188_v7 = vld [vmem:[#allocation5 + $0x180] sm:$0xff]  ;;  %v11103_v9 = vcombine.high %v197_v3, %v201_v5  ;;  %v11102_v10 = vcombine.low %v197_v3, %v201_v5  ;;  %v189_v12 = vld [vmem:[#allocation5 + $0x188] sm:$0xff]  ;;  %v202_v1 = vld [vmem:[#allocation5 + $0x1f0] sm:$0xff]  ;;  %s13165_s25 = scalar_lea.vmem %s11028_s7, 256  ;;  %p13170_p13 = scmp.lt.s32.totalorder %s11028_s7, %s11028_s7 }
  0x67   :  { %v192_v8 = vld [vmem:[#allocation5 + $0x1a0] sm:$0xff]  ;;  %v193_v13 = vld [vmem:[#allocation5 + $0x1a8] sm:$0xff]  ;;  %v199_v2 = vld [vmem:[#allocation5 + $0x1d8] sm:$0xff]  ;;  %p13166_p12 = scmp.ne.s32.totalorder %s11028_s7, %s13165_s25  ;;  %p13171_p0 = scmp.lt.s32.totalorder %s13165_s25, %s13165_s25 }
  0x68   :  { %v11093_v11 = vcombine.high %v188_v7, %v192_v8  ;;  %v180_v14 = vld [vmem:[#allocation5 + $0x140] sm:$0xff]  ;;  %574 = vmatprep.subr.bf16.mxu0 %v11101_v4  ;;  %v11095_v15 = vcombine.high %v189_v12, %v193_v13  ;;  %v181_v17 = vld [vmem:[#allocation5 + $0x148] sm:$0xff]  ;;  %617 = vmatprep.subr.bf16.mxu1 %v11103_v9  ;;  %v11092_v19 = vcombine.low %v188_v7, %v192_v8  ;;  %v203_v3 = vld [vmem:[#allocation5 + $0x1f8] sm:$0xff] }
  0x69   :  { %v184_v16 = vld [vmem:[#allocation5 + $0x160] sm:$0xff]  ;;  %v185_v18 = vld [vmem:[#allocation5 + $0x168] sm:$0xff]  ;;  %575 = vmatpush1.bf16.msra.mxu0 %v11100_v6  ;;  %618 = vmatpush1.bf16.msra.mxu1 %v11102_v10  ;;  %v11094_v20 = vcombine.low %v189_v12, %v193_v13  ;;  %v11105_v6 = vcombine.high %v198_v63, %v202_v1  ;;  %v11107_v7 = vcombine.high %v199_v2, %v203_v3  ;;  %v190_v8 = vld [vmem:[#allocation5 + $0x190] sm:$0xff]  ;;  %p13172_p1 = por %p13171_p0, %p13170_p13 }
  0x6a   :  { %576 = vmatprep.subr.bf16.mxu0 %v11093_v11  ;;  %v11085_v21 = vcombine.high %v180_v14, %v184_v16  ;;  %619 = vmatprep.subr.bf16.mxu1 %v11095_v15  ;;  %v11087_v22 = vcombine.high %v181_v17, %v185_v18  ;;  %v172_v23 = vld [vmem:[#allocation5 + $0x100] sm:$0xff]  ;;  %v173_v25 = vld [vmem:[#allocation5 + $0x108] sm:$0xff]  ;;  %v11084_v27 = vcombine.low %v180_v14, %v184_v16  ;;  %v194_v9 = vld [vmem:[#allocation5 + $0x1b0] sm:$0xff] }
  0x6b   :  { %v176_v24 = vld [vmem:[#allocation5 + $0x120] sm:$0xff]  ;;  %v177_v26 = vld [vmem:[#allocation5 + $0x128] sm:$0xff]  ;;  %v11086_v28 = vcombine.low %v181_v17, %v185_v18  ;;  %v13304_v10 = vld [vmem:[#allocation2] sm:$0xff]   ;;  %v11104_v13 = vcombine.low %v198_v63, %v202_v1  ;;  %v11106_v14 = vcombine.low %v199_v2, %v203_v3  ;;  %v11097_v15 = vcombine.high %v190_v8, %v194_v9  ;;  %p13173_p2 = pnand %p13172_p1, %p13166_p12 }
  0x6c   :  { %v11077_v29 = vcombine.high %v172_v23, %v176_v24  ;;  %v11079_v30 = vcombine.high %v173_v25, %v177_v26  ;;  %v164_v31 = vld [vmem:[#allocation5 + $0xc0] sm:$0xff]  ;;  %v165_v33 = vld [vmem:[#allocation5 + $0xc8] sm:$0xff]  ;;  %v11076_v35 = vcombine.low %v172_v23, %v176_v24  ;;  %v11078_v36 = vcombine.low %v173_v25, %v177_v26  ;;  %v191_v11 = vld [vmem:[#allocation5 + $0x198] sm:$0xff] }
  0x6d   :  { %577 = vmatpush1.bf16.msra.mxu0 %v11092_v19  ;;  %620 = vmatpush1.bf16.msra.mxu1 %v11094_v20  ;;  %v168_v32 = vld [vmem:[#allocation5 + $0xe0] sm:$0xff]  ;;  %v169_v34 = vld [vmem:[#allocation5 + $0xe8] sm:$0xff]  ;;  %v195_v12 = vld [vmem:[#allocation5 + $0x1b8] sm:$0xff] }
  0x6e   :  { %578 = vmatprep.subr.bf16.mxu0 %v11085_v21  ;;  %621 = vmatprep.subr.bf16.mxu1 %v11087_v22  ;;  %v11069_v37 = vcombine.high %v164_v31, %v168_v32  ;;  %v11071_v38 = vcombine.high %v165_v33, %v169_v34  ;;  %v156_v39 = vld [vmem:[#allocation5 + $0x80] sm:$0xff]  ;;  %v157_v41 = vld [vmem:[#allocation5 + $0x88] sm:$0xff]  ;;  %v11068_v43 = vcombine.low %v164_v31, %v168_v32  ;;  %v182_v17 = vld [vmem:[#allocation5 + $0x150] sm:$0xff] }
  0x6f   :  { %v160_v40 = vld [vmem:[#allocation5 + $0xa0] sm:$0xff]  ;;  %v161_v42 = vld [vmem:[#allocation5 + $0xa8] sm:$0xff]  ;;  %v11070_v44 = vcombine.low %v165_v33, %v169_v34  ;;  %v11099_v16 = vcombine.high %v191_v11, %v195_v12  ;;  %v186_v18 = vld [vmem:[#allocation5 + $0x170] sm:$0xff]  ;;  %v11096_v21 = vcombine.low %v190_v8, %v194_v9  ;;  %v11098_v22 = vcombine.low %v191_v11, %v195_v12 }
  0x70   :  { %v11061_v45 = vcombine.high %v156_v39, %v160_v40  ;;  %v11063_v46 = vcombine.high %v157_v41, %v161_v42  ;;  %v148_v47 = vld [vmem:[#allocation5 + $0x40] sm:$0xff]  ;;  %v149_v49 = vld [vmem:[#allocation5 + $0x48] sm:$0xff]  ;;  %v11060_v51 = vcombine.low %v156_v39, %v160_v40  ;;  %v11062_v52 = vcombine.low %v157_v41, %v161_v42  ;;  %v183_v19 = vld [vmem:[#allocation5 + $0x158] sm:$0xff] }
  0x71   :  { %579 = vmatpush1.bf16.msra.mxu0 %v11084_v27  ;;  %622 = vmatpush1.bf16.msra.mxu1 %v11086_v28  ;;  %v152_v48 = vld [vmem:[#allocation5 + $0x60] sm:$0xff]  ;;  %v153_v50 = vld [vmem:[#allocation5 + $0x68] sm:$0xff]  ;;  %v187_v20 = vld [vmem:[#allocation5 + $0x178] sm:$0xff]  ;;  %v11089_v23 = vcombine.high %v182_v17, %v186_v18 }
  0x72   :  { %580 = vmatprep.subr.bf16.mxu0 %v11077_v29  ;;  %623 = vmatprep.subr.bf16.mxu1 %v11079_v30  ;;  %v11053_v53 = vcombine.high %v148_v47, %v152_v48  ;;  %v11055_v54 = vcombine.high %v149_v49, %v153_v50  ;;  %v140_v55 = vld [vmem:[#allocation5] sm:$0xff]  ;;  %v141_v57 = vld [vmem:[#allocation5 + $0x8] sm:$0xff]  ;;  %v11052_v59 = vcombine.low %v148_v47, %v152_v48  ;;  %v174_v25 = vld [vmem:[#allocation5 + $0x110] sm:$0xff] }
  0x73   :  { %v144_v56 = vld [vmem:[#allocation5 + $0x20] sm:$0xff]  ;;  %v145_v58 = vld [vmem:[#allocation5 + $0x28] sm:$0xff]  ;;  %v11054_v60 = vcombine.low %v149_v49, %v153_v50  ;;  %v11091_v24 = vcombine.high %v183_v19, %v187_v20  ;;  %v178_v26 = vld [vmem:[#allocation5 + $0x130] sm:$0xff]  ;;  %v11088_v29 = vcombine.low %v182_v17, %v186_v18  ;;  %v11090_v32 = vcombine.low %v183_v19, %v187_v20 }
  0x74   :  { %v11045_v61 = vcombine.high %v140_v55, %v144_v56  ;;  %v11047_v62 = vcombine.high %v141_v57, %v145_v58  ;;  %v11044_v4 = vcombine.low %v140_v55, %v144_v56  ;;  %v11046_v5 = vcombine.low %v141_v57, %v145_v58  ;;  %v175_v27 = vld [vmem:[#allocation5 + $0x118] sm:$0xff]  ;;  %v166_v30 = vld [vmem:[#allocation5 + $0xd0] sm:$0xff]  ;;  %v954_v2 = vld [vmem:[#allocation7 + $0x5c0] sm:$0xff] }
  0x75   :  { %581 = vmatpush1.bf16.msra.mxu0 %v11076_v35  ;;  %624 = vmatpush1.bf16.msra.mxu1 %v11078_v36  ;;  %v179_v28 = vld [vmem:[#allocation5 + $0x138] sm:$0xff]  ;;  %v170_v31 = vld [vmem:[#allocation5 + $0xf0] sm:$0xff]  ;;  %v11081_v33 = vcombine.high %v174_v25, %v178_v26  ;;  %v958_v3 = vld [vmem:[#allocation7 + $0x5e0] sm:$0xff] }
  0x76   :  { %582 = vmatprep.subr.bf16.mxu0 %v11069_v37  ;;  %625 = vmatprep.subr.bf16.mxu1 %v11071_v38  ;;  %v167_v34 = vld [vmem:[#allocation5 + $0xd8] sm:$0xff]  ;;  %v11083_v36 = vcombine.high %v175_v27, %v179_v28  ;;  %v11080_v37 = vcombine.low %v174_v25, %v178_v26  ;;  %v158_v38 = vld [vmem:[#allocation5 + $0x90] sm:$0xff]  ;;  %v11082_v40 = vcombine.low %v175_v27, %v179_v28  ;;  %v946_v11 = vld [vmem:[#allocation7 + $0x580] sm:$0xff] }
  0x77   :  { %v171_v35 = vld [vmem:[#allocation5 + $0xf8] sm:$0xff]  ;;  %v162_v39 = vld [vmem:[#allocation5 + $0xb0] sm:$0xff]  ;;  %v950_v12 = vld [vmem:[#allocation7 + $0x5a0] sm:$0xff]  ;;  %v11292_v17 = vcombine.low %v954_v2, %v958_v3 }
  0x78   :  { %v159_v41 = vld [vmem:[#allocation5 + $0x98] sm:$0xff]  ;;  %v11074_v47 = vcombine.low %v167_v34, %v171_v35  ;;  %v11065_v48 = vcombine.high %v158_v38, %v162_v39  ;;  %v938_v19 = vld [vmem:[#allocation7 + $0x540] sm:$0xff]  ;;  %v11284_v25 = vcombine.low %v946_v11, %v950_v12 }
  0x79   :  { %583 = vmatpush1.bf16.msra.mxu0 %v11068_v43  ;;  %626 = vmatpush1.bf16.msra.mxu1 %v11070_v44  ;;  %v163_v42 = vld [vmem:[#allocation5 + $0xb8] sm:$0xff]  ;;  %v11075_v43 = vcombine.high %v167_v34, %v171_v35  ;;  %v11072_v44 = vcombine.low %v166_v30, %v170_v31  ;;  %v942_v20 = vld [vmem:[#allocation7 + $0x560] sm:$0xff] }
  0x7a   :  { %584 = vmatprep.subr.bf16.mxu0 %v11061_v45  ;;  %627 = vmatprep.subr.bf16.mxu1 %v11063_v46  ;;  %v150_v45 = vld [vmem:[#allocation5 + $0x50] sm:$0xff]  ;;  %v151_v49 = vld [vmem:[#allocation5 + $0x58] sm:$0xff]  ;;  %v11066_v55 = vcombine.low %v159_v41, %v163_v42  ;;  %v930_v27 = vld [vmem:[#allocation7 + $0x500] sm:$0xff] }
  0x7b   :  { %v154_v46 = vld [vmem:[#allocation5 + $0x70] sm:$0xff]  ;;  %v155_v50 = vld [vmem:[#allocation5 + $0x78] sm:$0xff]  ;;  %v934_v28 = vld [vmem:[#allocation7 + $0x520] sm:$0xff] }
  0x7c   :  { %v11057_v56 = vcombine.high %v150_v45, %v154_v46  ;;  %v143_v57 = vld [vmem:[#allocation5 + $0x18] sm:$0xff]  ;;  %v11058_v63 = vcombine.low %v151_v49, %v155_v50  ;;  %v922_v34 = vld [vmem:[#allocation7 + $0x4c0] sm:$0xff] }
  0x7d   :  { %585 = vmatpush1.bf16.msra.mxu0 %v11060_v51  ;;  %628 = vmatpush1.bf16.msra.mxu1 %v11062_v52  ;;  %v11067_v51 = vcombine.high %v159_v41, %v163_v42  ;;  %v11064_v52 = vcombine.low %v158_v38, %v162_v39  ;;  %v147_v58 = vld [vmem:[#allocation5 + $0x38] sm:$0xff]  ;;  %v926_v35 = vld [vmem:[#allocation7 + $0x4e0] sm:$0xff] }
  0x7e   :  { %586 = vmatprep.subr.bf16.mxu0 %v11053_v53  ;;  %629 = vmatprep.subr.bf16.mxu1 %v11055_v54  ;;  %v142_v53 = vld [vmem:[#allocation5 + $0x10] sm:$0xff]  ;;  %v11050_v8 = vcombine.low %v143_v57, %v147_v58  ;;  %v786_v38 = vld [vmem:[#allocation7 + $0x80] sm:$0xff] }
  0x7f   :  { %v146_v54 = vld [vmem:[#allocation5 + $0x30] sm:$0xff]  ;;  %v790_v39 = vld [vmem:[#allocation7 + $0xa0] sm:$0xff] }
  0x80   :  { %v11049_v1 = vcombine.high %v142_v53, %v146_v54  ;;  %v914_v41 = vld [vmem:[#allocation7 + $0x480] sm:$0xff] }
  0x81   :  { %587 = vmatpush1.bf16.msra.mxu0 %v11052_v59  ;;  %630 = vmatpush1.bf16.msra.mxu1 %v11054_v60  ;;  %v11059_v59 = vcombine.high %v151_v49, %v155_v50  ;;  %v11056_v60 = vcombine.low %v150_v45, %v154_v46  ;;  %v918_v42 = vld [vmem:[#allocation7 + $0x4a0] sm:$0xff] }
  0x82   :  { %588 = vmatprep.subr.bf16.mxu0 %v11045_v61  ;;  %631 = vmatprep.subr.bf16.mxu1 %v11047_v62  ;;  %v826_v61 = vld [vmem:[#allocation7 + $0x1c0] sm:$0xff] }
  0x83   :  { %v830_v62 = vld [vmem:[#allocation7 + $0x1e0] sm:$0xff] }
  0x84   :  { %v11165_v9 = vcombine.high %v826_v61, %v830_v62  ;;  %v778_v45 = vld [vmem:[#allocation7 + $0x40] sm:$0xff] }
  0x85   :  { %589 = vmatpush1.bf16.msra.mxu0 %v11044_v4  ;;  %632 = vmatpush1.bf16.msra.mxu1 %v11046_v5  ;;  %v11051_v4 = vcombine.high %v143_v57, %v147_v58  ;;  %v11048_v5 = vcombine.low %v142_v53, %v146_v54  ;;  %v782_v46 = vld [vmem:[#allocation7 + $0x60] sm:$0xff] }
  0x86   :  { %660 = vmatprep.subr.bf16.mxu0 %v11105_v6  ;;  %703 = vmatprep.subr.bf16.mxu1 %v11107_v7  ;;  %v818_v6 = vld [vmem:[#allocation7 + $0x180] sm:$0xff] }
  0x87   :  { %v822_v7 = vld [vmem:[#allocation7 + $0x1a0] sm:$0xff] }
  0x88   :  { %607 = vmatmul.mubr.bf16.vlgmr.msra.gmra.mxu0 %v13304_v10  ;;  %650 = vmatmul.mubr.bf16.vlgmr.msra.gmra.mxu1 %v13304_v10  ;;  %v11157_v18 = vcombine.high %v818_v6, %v822_v7  ;;  %v906_v49 = vld [vmem:[#allocation7 + $0x440] sm:$0xff] }
  0x89   :  { %661 = vmatpush1.bf16.msra.mxu0 %v11104_v13  ;;  %704 = vmatpush1.bf16.msra.mxu1 %v11106_v14  ;;  %v11293_v13 = vcombine.high %v954_v2, %v958_v3  ;;  %v11164_v14 = vcombine.low %v826_v61, %v830_v62  ;;  %v910_v50 = vld [vmem:[#allocation7 + $0x460] sm:$0xff] }
  0x8a   :  { %662 = vmatprep.subr.bf16.mxu0 %v11097_v15  ;;  %705 = vmatprep.subr.bf16.mxu1 %v11099_v16  ;;  %v810_v15 = vld [vmem:[#allocation7 + $0x140] sm:$0xff] }
  0x8b   :  { %692 = vmatprep.mubr.bf16.mxu0 %v13213_v0  ;;  %735 = vmatprep.mubr.bf16.mxu1 %v13213_v0  ;;  %v11073_v0 = vcombine.high %v166_v30, %v170_v31  ;;  %v814_v16 = vld [vmem:[#allocation7 + $0x160] sm:$0xff] }
  0x8c   :  { %v11149_v26 = vcombine.high %v810_v15, %v814_v16  ;;  %v11148_v30 = vcombine.low %v810_v15, %v814_v16  ;;  %v794_v31 = vld [vmem:[#allocation7 + $0xc0] sm:$0xff] }
  0x8d   :  { %663 = vmatpush1.bf16.msra.mxu0 %v11096_v21  ;;  %706 = vmatpush1.bf16.msra.mxu1 %v11098_v22  ;;  %v11285_v21 = vcombine.high %v946_v11, %v950_v12  ;;  %v11156_v22 = vcombine.low %v818_v6, %v822_v7  ;;  %v770_v53 = vld [vmem:[#allocation7] sm:$0xff] }
  0x8e   :  { %664 = vmatprep.subr.bf16.mxu0 %v11089_v23  ;;  %707 = vmatprep.subr.bf16.mxu1 %v11091_v24  ;;  %v802_v23 = vld [vmem:[#allocation7 + $0x100] sm:$0xff] }
  0x8f   :  { %v806_v24 = vld [vmem:[#allocation7 + $0x120] sm:$0xff] }
  0x90   :  { %v774_v54 = vld [vmem:[#allocation7 + $0x20] sm:$0xff] }
  0x91   :  { %665 = vmatpush1.bf16.msra.mxu0 %v11088_v29  ;;  %708 = vmatpush1.bf16.msra.mxu1 %v11090_v32  ;;  %v11277_v29 = vcombine.high %v938_v19, %v942_v20  ;;  %v798_v32 = vld [vmem:[#allocation7 + $0xe0] sm:$0xff] }
  0x92   :  { %666 = vmatprep.subr.bf16.mxu0 %v11081_v33  ;;  %709 = vmatprep.subr.bf16.mxu1 %v11083_v36  ;;  %v11276_v33 = vcombine.low %v938_v19, %v942_v20  ;;  %v11269_v36 = vcombine.high %v930_v27, %v934_v28  ;;  %v898_v57 = vld [vmem:[#allocation7 + $0x400] sm:$0xff] }
  0x93   :  { %v902_v58 = vld [vmem:[#allocation7 + $0x420] sm:$0xff] }
  0x94   :  { %v890_v61 = vld [vmem:[#allocation7 + $0x3c0] sm:$0xff] }
  0x95   :  { %667 = vmatpush1.bf16.msra.mxu0 %v11080_v37  ;;  %710 = vmatpush1.bf16.msra.mxu1 %v11082_v40  ;;  %v11140_v37 = vcombine.low %v802_v23, %v806_v24  ;;  %v11268_v40 = vcombine.low %v930_v27, %v934_v28  ;;  %v894_v62 = vld [vmem:[#allocation7 + $0x3e0] sm:$0xff] }
  0x96   :  { %668 = vmatprep.subr.bf16.mxu0 %v11073_v0  ;;  %711 = vmatprep.subr.bf16.mxu1 %v11075_v43  ;;  %v11133_v0 = vcombine.high %v794_v31, %v798_v32  ;;  %v11261_v43 = vcombine.high %v922_v34, %v926_v35  ;;  %v1018_v2 = vld [vmem:[#allocation7 + $0x7c0] sm:$0xff] }
  0x97   :  { %v1022_v3 = vld [vmem:[#allocation7 + $0x7e0] sm:$0xff] }
  0x98   :  { %v882_v6 = vld [vmem:[#allocation7 + $0x380] sm:$0xff]  ;;  %v11356_v15 = vcombine.low %v1018_v2, %v1022_v3 }
  0x99   :  { %669 = vmatpush1.bf16.msra.mxu0 %v11072_v44  ;;  %712 = vmatpush1.bf16.msra.mxu1 %v11074_v47  ;;  %v11132_v44 = vcombine.low %v794_v31, %v798_v32  ;;  %v11260_v47 = vcombine.low %v922_v34, %v926_v35  ;;  %v886_v7 = vld [vmem:[#allocation7 + $0x3a0] sm:$0xff] }
  0x9a   :  { %670 = vmatprep.subr.bf16.mxu0 %v11065_v48  ;;  %713 = vmatprep.subr.bf16.mxu1 %v11067_v51  ;;  %v11125_v48 = vcombine.high %v786_v38, %v790_v39  ;;  %v11253_v51 = vcombine.high %v914_v41, %v918_v42  ;;  %v1010_v11 = vld [vmem:[#allocation7 + $0x780] sm:$0xff]  ;;  %v11221_v16 = vcombine.high %v882_v6, %v886_v7 }
  0x9b   :  { %v1014_v12 = vld [vmem:[#allocation7 + $0x7a0] sm:$0xff] }
  0x9c   :  { %v878_v19 = vld [vmem:[#allocation7 + $0x360] sm:$0xff] }
  0x9d   :  { %671 = vmatpush1.bf16.msra.mxu0 %v11064_v52  ;;  %714 = vmatpush1.bf16.msra.mxu1 %v11066_v55  ;;  %v11124_v52 = vcombine.low %v786_v38, %v790_v39  ;;  %v11252_v55 = vcombine.low %v914_v41, %v918_v42  ;;  %v1002_v20 = vld [vmem:[#allocation7 + $0x740] sm:$0xff] }
  0x9e   :  { %672 = vmatprep.subr.bf16.mxu0 %v11057_v56  ;;  %715 = vmatprep.subr.bf16.mxu1 %v11059_v59  ;;  %v11117_v56 = vcombine.high %v778_v45, %v782_v46  ;;  %v11245_v59 = vcombine.high %v906_v49, %v910_v50  ;;  %v870_v27 = vld [vmem:[#allocation7 + $0x320] sm:$0xff] }
  0x9f   :  { %v994_v28 = vld [vmem:[#allocation7 + $0x700] sm:$0xff] }
  0xa0   :  { %v862_v34 = vld [vmem:[#allocation7 + $0x2e0] sm:$0xff] }
  0xa1   :  { %673 = vmatpush1.bf16.msra.mxu0 %v11056_v60  ;;  %716 = vmatpush1.bf16.msra.mxu1 %v11058_v63  ;;  %v11116_v60 = vcombine.low %v778_v45, %v782_v46  ;;  %v11244_v63 = vcombine.low %v906_v49, %v910_v50  ;;  %v986_v35 = vld [vmem:[#allocation7 + $0x6c0] sm:$0xff] }
  0xa2   :  { %674 = vmatprep.subr.bf16.mxu0 %v11049_v1  ;;  %717 = vmatprep.subr.bf16.mxu1 %v11051_v4  ;;  %v11109_v1 = vcombine.high %v770_v53, %v774_v54  ;;  %v11237_v4 = vcombine.high %v898_v57, %v902_v58  ;;  %v850_v38 = vld [vmem:[#allocation7 + $0x280] sm:$0xff] }
  0xa3   :  { %v854_v39 = vld [vmem:[#allocation7 + $0x2a0] sm:$0xff] }
  0xa4   :  { %v978_v41 = vld [vmem:[#allocation7 + $0x680] sm:$0xff] }
  0xa5   :  { %675 = vmatpush1.bf16.msra.mxu0 %v11048_v5  ;;  %718 = vmatpush1.bf16.msra.mxu1 %v11050_v8  ;;  %v11108_v5 = vcombine.low %v770_v53, %v774_v54  ;;  %v11236_v8 = vcombine.low %v898_v57, %v902_v58  ;;  %v982_v42 = vld [vmem:[#allocation7 + $0x6a0] sm:$0xff]  ;;  %v11189_v54 = vcombine.high %v850_v38, %v854_v39 }
  0xa6   :  { %3887 = vmatprep.subr.bf16.mxu0 %v11165_v9  ;;  %3930 = vmatprep.subr.bf16.mxu1 %v11293_v13  ;;  %v11229_v9 = vcombine.high %v890_v61, %v894_v62  ;;  %v11357_v13 = vcombine.high %v1018_v2, %v1022_v3  ;;  %v13314_v45 = vld [vmem:[#allocation7 + $0x9e0] sm:$0xff]  ;;  %v11188_v58 = vcombine.low %v850_v38, %v854_v39 }
  0xa7   :  { %v13316_v46 = vld [vmem:[#allocation7 + $0xdc0] sm:$0xff] }
  0xa8   :  { %693 = vmatmul.mubr.bf16.vlgmr.msra.gmra.mxu0 %v13304_v10  ;;  %736 = vmatmul.mubr.bf16.vlgmr.msra.gmra.mxu1 %v13304_v10  ;;  %v11141_v10 = vcombine.high %v802_v23, %v806_v24  ;;  %v11348_v23 = vcombine.low %v1010_v11, %v1014_v12  ;;  %v842_v49 = vld [vmem:[#allocation7 + $0x240] sm:$0xff] }
  0xa9   :  { %3888 = vmatpush1.bf16.msra.mxu0 %v11164_v14  ;;  %3931 = vmatpush1.bf16.msra.mxu1 %v11292_v17  ;;  %v11228_v14 = vcombine.low %v890_v61, %v894_v62  ;;  %v11349_v17 = vcombine.high %v1010_v11, %v1014_v12  ;;  %v846_v50 = vld [vmem:[#allocation7 + $0x260] sm:$0xff]  ;;  %v11316_v61 = vcombine.low %v978_v41, %v982_v42  ;;  %v208_v12 = vlaneseq }
  0xaa   :  { %3889 = vmatprep.subr.bf16.mxu0 %v11157_v18  ;;  %3932 = vmatprep.subr.bf16.mxu1 %v11285_v21  ;;  %v874_v18 = vld [vmem:[#allocation7 + $0x340] sm:$0xff]  ;;  %v11181_v62 = vcombine.high %v842_v49, %v846_v50  ;;  %v11180_v3 = vcombine.low %v842_v49, %v846_v50 }
  0xab   :  { %v1006_v21 = vld [vmem:[#allocation7 + $0x760] sm:$0xff]  ;;  %v11213_v24 = vcombine.high %v874_v18, %v878_v19 }
  0xac   :  { %v11340_v31 = vcombine.low %v1002_v20, %v1006_v21  ;;  %v974_v57 = vld [vmem:[#allocation7 + $0x660] sm:$0xff] }
  0xad   :  { %3890 = vmatpush1.bf16.msra.mxu0 %v11156_v22  ;;  %3933 = vmatpush1.bf16.msra.mxu1 %v11284_v25  ;;  %v11220_v22 = vcombine.low %v882_v6, %v886_v7  ;;  %v11341_v25 = vcombine.high %v1002_v20, %v1006_v21  ;;  %v966_v2 = vld [vmem:[#allocation7 + $0x620] sm:$0xff] }
  0xae   :  { %3891 = vmatprep.subr.bf16.mxu0 %v11149_v26  ;;  %3934 = vmatprep.subr.bf16.mxu1 %v11277_v29  ;;  %v866_v26 = vld [vmem:[#allocation7 + $0x300] sm:$0xff] }
  0xaf   :  { %v998_v29 = vld [vmem:[#allocation7 + $0x720] sm:$0xff]  ;;  %v11205_v32 = vcombine.high %v866_v26, %v870_v27 }
  0xb1   :  { %3892 = vmatpush1.bf16.msra.mxu0 %v11148_v30  ;;  %3935 = vmatpush1.bf16.msra.mxu1 %v11276_v33  ;;  %v11212_v30 = vcombine.low %v874_v18, %v878_v19  ;;  %v11333_v33 = vcombine.high %v994_v28, %v998_v29 }
  0xb2   :  { %3893 = vmatprep.subr.bf16.mxu0 %v11141_v10  ;;  %3936 = vmatprep.subr.bf16.mxu1 %v11269_v36  ;;  %v858_v10 = vld [vmem:[#allocation7 + $0x2c0] sm:$0xff] }
  0xb3   :  { %v990_v36 = vld [vmem:[#allocation7 + $0x6e0] sm:$0xff] }
  0xb4   :  { %v11324_v53 = vcombine.low %v986_v35, %v990_v36 }
  0xb5   :  { %3894 = vmatpush1.bf16.msra.mxu0 %v11140_v37  ;;  %3937 = vmatpush1.bf16.msra.mxu1 %v11268_v40  ;;  %v11204_v37 = vcombine.low %v866_v26, %v870_v27  ;;  %v11332_v40 = vcombine.low %v994_v28, %v998_v29 }
  0xb6   :  { %3895 = vmatprep.subr.bf16.mxu0 %v11133_v0  ;;  %3938 = vmatprep.subr.bf16.mxu1 %v11261_v43  ;;  %v11197_v0 = vcombine.high %v858_v10, %v862_v34  ;;  %v11325_v43 = vcombine.high %v986_v35, %v990_v36 }
  0xb9   :  { %3896 = vmatpush1.bf16.msra.mxu0 %v11132_v44  ;;  %3939 = vmatpush1.bf16.msra.mxu1 %v11260_v47  ;;  %v13312_v44 = vld [vmem:[#allocation7 + $0x9c0] sm:$0xff] }
  0xba   :  { %3897 = vmatprep.subr.bf16.mxu0 %v11125_v48  ;;  %3940 = vmatprep.subr.bf16.mxu1 %v11253_v51  ;;  %v13318_v47 = vld [vmem:[#allocation7 + $0xde0] sm:$0xff]  ;;  %v11196_v48 = vcombine.low %v858_v10, %v862_v34  ;;  %v11420_v51 = vcombine.low %v13312_v44, %v13314_v45 }
  0xbb   :  { %v11549_v11 = vcombine.high %v13316_v46, %v13318_v47 }
  0xbd   :  { %3898 = vmatpush1.bf16.msra.mxu0 %v11124_v52  ;;  %3941 = vmatpush1.bf16.msra.mxu1 %v11252_v55  ;;  %v11548_v52 = vcombine.low %v13316_v46, %v13318_v47  ;;  %v11317_v55 = vcombine.high %v978_v41, %v982_v42  ;;  %v1054_v46 = vld [vmem:[#allocation7 + $0x8e0] sm:$0xff] }
  0xbe   :  { %3899 = vmatprep.subr.bf16.mxu0 %v11117_v56  ;;  %3942 = vmatprep.subr.bf16.mxu1 %v11245_v59  ;;  %v970_v56 = vld [vmem:[#allocation7 + $0x640] sm:$0xff] }
  0xbf   :  { %v834_v59 = vld [vmem:[#allocation7 + $0x200] sm:$0xff] }
  0xc0   :  { %v1178_v47 = vld [vmem:[#allocation7 + $0xcc0] sm:$0xff] }
  0xc1   :  { %3900 = vmatpush1.bf16.msra.mxu0 %v11116_v60  ;;  %3943 = vmatpush1.bf16.msra.mxu1 %v11244_v63  ;;  %v838_v60 = vld [vmem:[#allocation7 + $0x220] sm:$0xff]  ;;  %v11309_v63 = vcombine.high %v970_v56, %v974_v57 }
  0xc2   :  { %3901 = vmatprep.subr.bf16.mxu0 %v11109_v1  ;;  %3944 = vmatprep.subr.bf16.mxu1 %v11237_v4  ;;  %v962_v1 = vld [vmem:[#allocation7 + $0x600] sm:$0xff]  ;;  %v11308_v4 = vcombine.low %v970_v56, %v974_v57  ;;  %v11172_v7 = vcombine.low %v834_v59, %v838_v60 }
  0xc3   :  { %v11301_v6 = vcombine.high %v962_v1, %v966_v2 }
  0xc5   :  { %3902 = vmatpush1.bf16.msra.mxu0 %v11108_v5  ;;  %3945 = vmatpush1.bf16.msra.mxu1 %v11236_v8  ;;  %v11173_v5 = vcombine.high %v834_v59, %v838_v60  ;;  %v11300_v8 = vcombine.low %v962_v1, %v966_v2  ;;  %v1070_v1 = vld [vmem:[#allocation7 + $0x960] sm:$0xff] }
  0xc6   :  { %3903 = vmatprep.subr.bf16.mxu0 %v11229_v9  ;;  %3946 = vmatprep.subr.bf16.mxu1 %v11357_v13  ;;  %v11421_v9 = vcombine.high %v13312_v44, %v13314_v45  ;;  %v13328_v13 = vshrl.u32 %v208_v12, 7  ;;  %v1194_v2 = vld [vmem:[#allocation7 + $0xd40] sm:$0xff] }
  0xc7   :  { %v1190_v12 = vld [vmem:[#allocation7 + $0xd20] sm:$0xff] }
  0xc8   :  { %v13336_v18 = vsub.s32 0, %v13328_v13  ;;  %v13339_v19 = vsub.s32 3, %v13328_v13  ;;  %v13342_v20 = vsub.s32 2, %v13328_v13 }
  0xc9   :  { %3904 = vmatpush2.bf16.msra.mxu0 %v11228_v14  ;;  %3947 = vmatpush2.bf16.msra.mxu1 %v11356_v15  ;;  %v204_v14 = vld [vmem:[#allocation14] ss:$8 sm:$0xf] }
  0xca   :  { %3905 = vmatprep.subr.bf16.mxu0 %v11221_v16  ;;  %3948 = vmatprep.subr.bf16.mxu1 %v11349_v17  ;;  %v205_v15 = vld [vmem:[#allocation14] ss:$8 sm:$0xf0]  ;;  %v13331_v16 = vsub.s32 1, %v13328_v13 }
  0xcb   :  { %v13333_v17 = vor.u32 %v205_v15, %v204_v14  ;;  %v1050_v15 = vld [vmem:[#allocation7 + $0x8c0] sm:$0xff] }
  0xcd   :  { %3906 = vmatpush2.bf16.msra.mxu0 %v11220_v22  ;;  %3949 = vmatpush2.bf16.msra.mxu1 %v11348_v23  ;;  %v215_v23 = vrot.slane %v13333_v17, %v13331_v16  ;;  %v223_v26 = vrot.slane %v13333_v17, %v13339_v19  ;;  %v219_v27 = vrot.slane %v13333_v17, %v13342_v20 }
  0xce   :  { %3907 = vmatprep.subr.bf16.mxu0 %v11213_v24  ;;  %3950 = vmatprep.subr.bf16.mxu1 %v11341_v25  ;;  %v211_v24 = vrot.slane %v13333_v17, %v13336_v18 }
  0xd1   :  { %3908 = vmatpush2.bf16.msra.mxu0 %v11212_v30  ;;  %3951 = vmatpush2.bf16.msra.mxu1 %v11340_v31 }
  0xd2   :  { %3909 = vmatprep.subr.bf16.mxu0 %v11205_v32  ;;  %3952 = vmatprep.subr.bf16.mxu1 %v11333_v33 }
  0xd5   :  { %3910 = vmatpush2.bf16.msra.mxu0 %v11204_v37  ;;  %3953 = vmatpush2.bf16.msra.mxu1 %v11332_v40 }
  0xd6   :  { %3911 = vmatprep.subr.bf16.mxu0 %v11197_v0  ;;  %3954 = vmatprep.subr.bf16.mxu1 %v11325_v43  ;;  %v1074_v43 = vld [vmem:[#allocation7 + $0x980] sm:$0xff] }
  0xd9   :  { %3912 = vmatpush2.bf16.msra.mxu0 %v11196_v48  ;;  %3955 = vmatpush2.bf16.msra.mxu1 %v11324_v53  ;;  %v1078_v48 = vld [vmem:[#allocation7 + $0x9a0] sm:$0xff] }
  0xda   :  { %3913 = vmatprep.subr.bf16.mxu0 %v11189_v54  ;;  %3956 = vmatprep.subr.bf16.mxu1 %v11317_v55  ;;  %v1202_v54 = vld [vmem:[#allocation7 + $0xd80] sm:$0xff]  ;;  %v11413_v60 = vcombine.high %v1074_v43, %v1078_v48 }
  0xdb   :  { %v1206_v55 = vld [vmem:[#allocation7 + $0xda0] sm:$0xff] }
  0xdd   :  { %3914 = vmatpush2.bf16.msra.mxu0 %v11188_v58  ;;  %3957 = vmatpush2.bf16.msra.mxu1 %v11316_v61 }
  0xde   :  { %3915 = vmatprep.subr.bf16.mxu0 %v11181_v62  ;;  %3958 = vmatprep.subr.bf16.mxu1 %v11309_v63  ;;  %v11541_v62 = vcombine.high %v1202_v54, %v1206_v55  ;;  %v1066_v63 = vld [vmem:[#allocation7 + $0x940] sm:$0xff] }
  0xdf   :  { %v11404_v14 = vcombine.low %v1066_v63, %v1070_v1 }
  0xe1   :  { %3916 = vmatpush2.bf16.msra.mxu0 %v11180_v3  ;;  %3959 = vmatpush2.bf16.msra.mxu1 %v11308_v4  ;;  %v1198_v3 = vld [vmem:[#allocation7 + $0xd60] sm:$0xff]  ;;  %v11412_v4 = vcombine.low %v1074_v43, %v1078_v48 }
  0xe2   :  { %3917 = vmatprep.subr.bf16.mxu0 %v11173_v5  ;;  %3960 = vmatprep.subr.bf16.mxu1 %v11301_v6  ;;  %v11540_v5 = vcombine.low %v1202_v54, %v1206_v55  ;;  %v11405_v6 = vcombine.high %v1066_v63, %v1070_v1  ;;  %v11532_v44 = vcombine.low %v1194_v2, %v1198_v3  ;;  %v1026_v48 = vld [vmem:[#allocation7 + $0x800] sm:$0xff] }
  0xe3   :  { %v1158_v54 = vld [vmem:[#allocation7 + $0xc20] sm:$0xff] }
  0xe5   :  { %3918 = vmatpush2.bf16.msra.mxu0 %v11172_v7  ;;  %3961 = vmatpush2.bf16.msra.mxu1 %v11300_v8  ;;  %v11533_v7 = vcombine.high %v1194_v2, %v1198_v3  ;;  %v1058_v8 = vld [vmem:[#allocation7 + $0x900] sm:$0xff] }
  0xe6   :  { %3973 = vmatprep.subr.bf16.mxu0 %v11421_v9  ;;  %4016 = vmatprep.subr.bf16.mxu1 %v11549_v11  ;;  %v1062_v9 = vld [vmem:[#allocation7 + $0x920] sm:$0xff] }
  0xe7   :  { %v1186_v11 = vld [vmem:[#allocation7 + $0xd00] sm:$0xff]  ;;  %v11397_v45 = vcombine.high %v1058_v8, %v1062_v9 }
 0x148   :  { %v608_v21 = vpop.f32.mrf.mxu0  ;;  %v651_v22 = vpop.f32.mrf.mxu1 }
 0x149   :  { %v609_v33 = vadd.f32 %v608_v21, %v211_v24  ;;  %v652_v36 = vadd.f32 %v651_v22, %v219_v27  ;;  %v11396_v21 = vcombine.low %v1058_v8, %v1062_v9  ;;  %v11524_v22 = vcombine.low %v1186_v11, %v1190_v12  ;;  %v1274_v8 = vld [vmem:[#allocation7 + $0xfc0] sm:$0xff] }
 0x14a   :  { %v610_v25 = vpop.f32.mrf.mxu0  ;;  %v653_v28 = vpop.f32.mrf.mxu1  ;;  %v1278_v9 = vld [vmem:[#allocation7 + $0xfe0] sm:$0xff] }
 0x14b   :  { %v611_v30 = vadd.f32 %v610_v25, %v215_v23  ;;  %v654_v10 = vadd.f32 %v653_v28, %v223_v26  ;;  %v746_v49 = vmax.f32 %v609_v33, 0.0  ;;  %v748_v56 = vmax.f32 %v652_v36, 0.0  ;;  %v1042_v25 = vld [vmem:[#allocation7 + $0x880] sm:$0xff] }
 0x14c   :  { %v612_v29 = vpop.f32.mrf.mxu0  ;;  %v655_v32 = vpop.f32.mrf.mxu1  ;;  %v1174_v28 = vld [vmem:[#allocation7 + $0xca0] sm:$0xff]  ;;  %v13374_v33 = vsub.s32 7, %v13328_v13 }
 0x14d   :  { %v613_v31 = vadd.f32 %v612_v29, %v211_v24  ;;  %v656_v34 = vadd.f32 %v655_v32, %v219_v27  ;;  %v747_v0 = vmax.f32 %v611_v30, 0.0  ;;  %v749_v50 = vmax.f32 %v654_v10, 0.0  ;;  %v1170_v27 = vld [vmem:[#allocation7 + $0xc80] sm:$0xff] }
 0x14e   :  { %v614_v35 = vpop.f32.mrf.mxu0  ;;  %v657_v38 = vpop.f32.mrf.mxu1  ;;  %v11388_v29 = vcombine.low %v1050_v15, %v1054_v46  ;;  %v13371_v30 = vsub.s32 5, %v13328_v13  ;;  %v11509_v10 = vcombine.high %v1170_v27, %v1174_v28  ;;  %v1162_v36 = vld [vmem:[#allocation7 + $0xc40] sm:$0xff] }
 0x14f   :  { %v615_v37 = vadd.f32 %v614_v35, %v215_v23  ;;  %v754_v39 = vmax.f32 %v613_v31, 0.0  ;;  %v658_v40 = vadd.f32 %v657_v38, %v223_v26  ;;  %v756_v41 = vmax.f32 %v656_v34, 0.0  ;;  %v1046_v26 = vld [vmem:[#allocation7 + $0x8a0] sm:$0xff] }
 0x150   :  { %v11389_v23 = vcombine.high %v1050_v15, %v1054_v46  ;;  %v11381_v32 = vcombine.high %v1042_v25, %v1046_v26  ;;  %v1034_v34 = vld [vmem:[#allocation7 + $0x840] sm:$0xff]  ;;  %v11380_v38 = vcombine.low %v1042_v25, %v1046_v26 }
 0x151   :  { %v755_v42 = vmax.f32 %v615_v37, 0.0  ;;  %v757_v53 = vmax.f32 %v658_v40, 0.0  ;;  %v13354_v58 = vpack.c.bf16 %v754_v39, %v746_v49  ;;  %v13358_v61 = vpack.c.bf16 %v756_v41, %v748_v56  ;;  %v1038_v35 = vld [vmem:[#allocation7 + $0x860] sm:$0xff] }
 0x152   :  { %v1166_v37 = vld [vmem:[#allocation7 + $0xc60] sm:$0xff]  ;;  %v231_v39 = vrot.slane %v13333_v17, %v13371_v30  ;;  %v11508_v40 = vcombine.low %v1170_v27, %v1174_v28  ;;  %v11372_v56 = vcombine.low %v1034_v34, %v1038_v35 }
 0x153   :  { %v13352_v57 = vpack.c.bf16 %v755_v42, %v747_v0  ;;  %v13356_v59 = vpack.c.bf16 %v757_v53, %v749_v50  ;;  %v11373_v0 = vcombine.high %v1034_v34, %v1038_v35  ;;  %v239_v42 = vrot.slane %v13333_v17, %v13374_v33  ;;  %v1030_v49 = vld [vmem:[#allocation7 + $0x820] sm:$0xff] }
 0x154   :  { %v11501_v43 = vcombine.high %v1162_v36, %v1166_v37  ;;  %v1154_v53 = vld [vmem:[#allocation7 + $0xc00] sm:$0xff]  ;;  %v11500_v63 = vcombine.low %v1162_v36, %v1166_v37  ;;  %v11365_v1 = vcombine.high %v1026_v48, %v1030_v49 }
 0x155   :  { %3919 = vmatprep.mubr.bf16.mxu0 %v13352_v57  ;;  %3962 = vmatprep.mubr.bf16.mxu1 %v13356_v59  ;;  %v1270_v25 = vld [vmem:[#allocation7 + $0xfa0] sm:$0xff] }
 0x156   :  { %3920 = vmatmul.mubr.bf16.vlgmr.msra.gmra.mxu0 %v13354_v58  ;;  %3963 = vmatmul.mubr.bf16.vlgmr.msra.gmra.mxu1 %v13358_v61  ;;  %v1130_v34 = vld [vmem:[#allocation7 + $0xb40] sm:$0xff] }
 0x157   :  { %3974 = vmatpush1.bf16.msra.mxu0 %v11420_v51  ;;  %4017 = vmatpush1.bf16.msra.mxu1 %v11548_v52  ;;  %v11525_v51 = vcombine.high %v1186_v11, %v1190_v12  ;;  %v1182_v52 = vld [vmem:[#allocation7 + $0xce0] sm:$0xff]  ;;  %v11364_v12 = vcombine.low %v1026_v48, %v1030_v49 }
 0x158   :  { %3975 = vmatprep.subr.bf16.mxu0 %v11413_v60  ;;  %4018 = vmatprep.subr.bf16.mxu1 %v11541_v62  ;;  %v11517_v24 = vcombine.high %v1178_v47, %v1182_v52  ;;  %v11516_v31 = vcombine.low %v1178_v47, %v1182_v52  ;;  %v11613_v52 = vcombine.high %v1274_v8, %v1278_v9  ;;  %v1134_v35 = vld [vmem:[#allocation7 + $0xb60] sm:$0xff] }
 0x159   :  { %v1258_v36 = vld [vmem:[#allocation7 + $0xf40] sm:$0xff] }
 0x15a   :  { %v1262_v37 = vld [vmem:[#allocation7 + $0xf60] sm:$0xff] }
 0x15b   :  { %3976 = vmatpush1.bf16.msra.mxu0 %v11412_v4  ;;  %4019 = vmatpush1.bf16.msra.mxu1 %v11540_v5  ;;  %v11493_v4 = vcombine.high %v1154_v53, %v1158_v54  ;;  %v1146_v5 = vld [vmem:[#allocation7 + $0xbc0] sm:$0xff] }
 0x15c   :  { %3977 = vmatprep.subr.bf16.mxu0 %v11405_v6  ;;  %4020 = vmatprep.subr.bf16.mxu1 %v11533_v7  ;;  %v1150_v6 = vld [vmem:[#allocation7 + $0xbe0] sm:$0xff] }
 0x15d   :  { %v11485_v15 = vcombine.high %v1146_v5, %v1150_v6  ;;  %v11484_v27 = vcombine.low %v1146_v5, %v1150_v6  ;;  %v1250_v48 = vld [vmem:[#allocation7 + $0xf00] sm:$0xff] }
 0x15e   :  { %v1254_v49 = vld [vmem:[#allocation7 + $0xf20] sm:$0xff] }
 0x15f   :  { %3978 = vmatpush1.bf16.msra.mxu0 %v11404_v14  ;;  %4021 = vmatpush1.bf16.msra.mxu1 %v11532_v44 }
 0x160   :  { %3979 = vmatprep.subr.bf16.mxu0 %v11397_v45  ;;  %4022 = vmatprep.subr.bf16.mxu1 %v11525_v51  ;;  %v11492_v51 = vcombine.low %v1154_v53, %v1158_v54  ;;  %v11468_v53 = vcombine.low %v1130_v34, %v1134_v35  ;;  %v11596_v54 = vcombine.low %v1258_v36, %v1262_v37 }
 0x163   :  { %3980 = vmatpush1.bf16.msra.mxu0 %v11396_v21  ;;  %4023 = vmatpush1.bf16.msra.mxu1 %v11524_v22  ;;  %v1138_v21 = vld [vmem:[#allocation7 + $0xb80] sm:$0xff] }
 0x164   :  { %3981 = vmatprep.subr.bf16.mxu0 %v11389_v23  ;;  %4024 = vmatprep.subr.bf16.mxu1 %v11517_v24  ;;  %v1142_v22 = vld [vmem:[#allocation7 + $0xba0] sm:$0xff] }
 0x165   :  { %v1266_v24 = vld [vmem:[#allocation7 + $0xf80] sm:$0xff] }
 0x167   :  { %3982 = vmatpush1.bf16.msra.mxu0 %v11388_v29  ;;  %4025 = vmatpush1.bf16.msra.mxu1 %v11516_v31  ;;  %v11612_v29 = vcombine.low %v1274_v8, %v1278_v9  ;;  %v11477_v31 = vcombine.high %v1138_v21, %v1142_v22  ;;  %v1106_v8 = vld [vmem:[#allocation7 + $0xa80] sm:$0xff] }
 0x168   :  { %3983 = vmatprep.subr.bf16.mxu0 %v11381_v32  ;;  %v13378_v41 = vpop.f32.mrf.mxu0  ;;  %4026 = vmatprep.subr.bf16.mxu1 %v11509_v10  ;;  %v13382_v50 = vpop.f32.mrf.mxu1  ;;  %v11605_v10 = vcombine.high %v1266_v24, %v1270_v25  ;;  %v1110_v9 = vld [vmem:[#allocation7 + $0xaa0] sm:$0xff] }
 0x16a   :  { %v696_v55 = vpop.f32.mrf.mxu0  ;;  %v739_v62 = vpop.f32.mrf.mxu1 }
 0x16b   :  { %3984 = vmatpush1.bf16.msra.mxu0 %v11380_v38  ;;  %v697_v60 = vadd.f32 %v696_v55, %v231_v39  ;;  %4027 = vmatpush1.bf16.msra.mxu1 %v11508_v40  ;;  %v740_v3 = vadd.f32 %v739_v62, %v239_v42  ;;  %v11476_v38 = vcombine.low %v1138_v21, %v1142_v22  ;;  %v1118_v62 = vld [vmem:[#allocation7 + $0xae0] sm:$0xff] }
 0x16c   :  { %3985 = vmatprep.subr.bf16.mxu0 %v11373_v0  ;;  %v13384_v2 = vpop.f32.mrf.mxu0  ;;  %4028 = vmatprep.subr.bf16.mxu1 %v11501_v43  ;;  %v13386_v7 = vpop.f32.mrf.mxu1  ;;  %v11469_v40 = vcombine.high %v1130_v34, %v1134_v35  ;;  %v11597_v0 = vcombine.high %v1258_v36, %v1262_v37  ;;  %v1126_v43 = vld [vmem:[#allocation7 + $0xb20] sm:$0xff] }
 0x16d   :  { %v751_v14 = vmax.f32 %v697_v60, 0.0  ;;  %v753_v46 = vmax.f32 %v740_v3, 0.0  ;;  %v1114_v60 = vld [vmem:[#allocation7 + $0xac0] sm:$0xff] }
 0x16e   :  { %v700_v11 = vpop.f32.mrf.mxu0  ;;  %v743_v45 = vpop.f32.mrf.mxu1  ;;  %v11453_v5 = vcombine.high %v1114_v60, %v1118_v62  ;;  %v1226_v21 = vld [vmem:[#allocation7 + $0xe40] sm:$0xff] }
 0x16f   :  { %3986 = vmatpush1.bf16.msra.mxu0 %v11372_v56  ;;  %v701_v44 = vadd.f32 %v700_v11, %v231_v39  ;;  %4029 = vmatpush1.bf16.msra.mxu1 %v11500_v63  ;;  %v744_v47 = vadd.f32 %v743_v45, %v239_v42  ;;  %v11604_v39 = vcombine.low %v1266_v24, %v1270_v25  ;;  %v1122_v42 = vld [vmem:[#allocation7 + $0xb00] sm:$0xff] }
 0x170   :  { %3987 = vmatprep.subr.bf16.mxu0 %v11365_v1  ;;  %4030 = vmatprep.subr.bf16.mxu1 %v11493_v4  ;;  %v11461_v55 = vcombine.high %v1122_v42, %v1126_v43  ;;  %v11589_v56 = vcombine.high %v1250_v48, %v1254_v49  ;;  %v1242_v63 = vld [vmem:[#allocation7 + $0xec0] sm:$0xff]  ;;  %v11460_v3 = vcombine.low %v1122_v42, %v1126_v43  ;;  %v827_v42 = vld [vmem:[#allocation7 + $0x1c8] sm:$0xff] }
 0x171   :  { %v759_v23 = vmax.f32 %v701_v44, 0.0  ;;  %v761_v26 = vmax.f32 %v744_v47, 0.0  ;;  %v1246_v1 = vld [vmem:[#allocation7 + $0xee0] sm:$0xff]  ;;  %v11588_v4 = vcombine.low %v1250_v48, %v1254_v49  ;;  %v13395_v44 = vsub.s32 4, %v13328_v13  ;;  %v831_v43 = vld [vmem:[#allocation7 + $0x1e8] sm:$0xff] }
 0x172   :  { %v11581_v6 = vcombine.high %v1242_v63, %v1246_v1  ;;  %v1234_v11 = vld [vmem:[#allocation7 + $0xe80] sm:$0xff]  ;;  %v11580_v45 = vcombine.low %v1242_v63, %v1246_v1  ;;  %v955_v48 = vld [vmem:[#allocation7 + $0x5c8] sm:$0xff]  ;;  %v11166_v63 = vcombine.low %v827_v42, %v831_v43 }
 0x173   :  { %3988 = vmatpush1.bf16.msra.mxu0 %v11364_v12  ;;  %v13388_v28 = vpack.c.bf16 %v759_v23, %v751_v14  ;;  %4031 = vmatpush1.bf16.msra.mxu1 %v11492_v51  ;;  %v13390_v32 = vpack.c.bf16 %v761_v26, %v753_v46  ;;  %v1238_v12 = vld [vmem:[#allocation7 + $0xea0] sm:$0xff]  ;;  %v11452_v14 = vcombine.low %v1114_v60, %v1118_v62  ;;  %v959_v49 = vld [vmem:[#allocation7 + $0x5e8] sm:$0xff] }
 0x174   :  { %3989 = vmatprep.subr.bf16.mxu0 %v11485_v15  ;;  %4032 = vmatprep.subr.bf16.mxu1 %v11613_v52  ;;  %v11445_v51 = vcombine.high %v1106_v8, %v1110_v9  ;;  %v13398_v15 = vsub.s32 6, %v13328_v13  ;;  %v11573_v46 = vcombine.high %v1234_v11, %v1238_v12  ;;  %v1098_v47 = vld [vmem:[#allocation7 + $0xa40] sm:$0xff]  ;;  %v11444_v23 = vcombine.low %v1106_v8, %v1110_v9  ;;  %v819_v62 = vld [vmem:[#allocation7 + $0x188] sm:$0xff] }
 0x175   :  { %4005 = vmatprep.mubr.bf16.mxu0 %v13388_v28  ;;  %4048 = vmatprep.mubr.bf16.mxu1 %v13390_v32  ;;  %v1102_v52 = vld [vmem:[#allocation7 + $0xa60] sm:$0xff]  ;;  %v227_v24 = vrot.slane %v13333_v17, %v13395_v44  ;;  %v11572_v25 = vcombine.low %v1234_v11, %v1238_v12  ;;  %v947_v1 = vld [vmem:[#allocation7 + $0x588] sm:$0xff] }
 0x176   :  { %v1230_v22 = vld [vmem:[#allocation7 + $0xe60] sm:$0xff]  ;;  %v11437_v26 = vcombine.high %v1098_v47, %v1102_v52  ;;  %v11436_v35 = vcombine.low %v1098_v47, %v1102_v52  ;;  %v811_v9 = vld [vmem:[#allocation7 + $0x148] sm:$0xff] }
 0x177   :  { %3990 = vmatpush2.bf16.msra.mxu0 %v11484_v27  ;;  %4033 = vmatpush2.bf16.msra.mxu1 %v11612_v29  ;;  %v235_v27 = vrot.slane %v13333_v17, %v13398_v15  ;;  %v11565_v13 = vcombine.high %v1226_v21, %v1230_v22  ;;  %v1090_v29 = vld [vmem:[#allocation7 + $0xa00] sm:$0xff]  ;;  %v11564_v36 = vcombine.low %v1226_v21, %v1230_v22  ;;  %v815_v11 = vld [vmem:[#allocation7 + $0x168] sm:$0xff] }
 0x178   :  { %3991 = vmatprep.subr.bf16.mxu0 %v11477_v31  ;;  %4034 = vmatprep.subr.bf16.mxu1 %v11605_v10  ;;  %v1094_v31 = vld [vmem:[#allocation7 + $0xa20] sm:$0xff]  ;;  %v695_v37 = vadd.f32 %v13378_v41, %v227_v24  ;;  %v11151_v47 = vcombine.high %v811_v9, %v815_v11  ;;  %v803_v21 = vld [vmem:[#allocation7 + $0x108] sm:$0xff] }
 0x179   :  { %v1218_v10 = vld [vmem:[#allocation7 + $0xe00] sm:$0xff]  ;;  %v742_v17 = vadd.f32 %v13386_v7, %v235_v27  ;;  %v823_v7 = vld [vmem:[#allocation7 + $0x1a8] sm:$0xff] }
 0x17a   :  { %v1222_v34 = vld [vmem:[#allocation7 + $0xe20] sm:$0xff]  ;;  %v11159_v8 = vcombine.high %v819_v62, %v823_v7  ;;  %v807_v22 = vld [vmem:[#allocation7 + $0x128] sm:$0xff] }
 0x17b   :  { %3992 = vmatpush2.bf16.msra.mxu0 %v11476_v38  ;;  %4035 = vmatpush2.bf16.msra.mxu1 %v11604_v39  ;;  %v699_v38 = vadd.f32 %v13384_v2, %v227_v24  ;;  %v11429_v39 = vcombine.high %v1090_v29, %v1094_v31  ;;  %v11556_v41 = vcombine.low %v1218_v10, %v1222_v34  ;;  %v760_v60 = vmax.f32 %v742_v17, 0.0  ;;  %v935_v24 = vld [vmem:[#allocation7 + $0x528] sm:$0xff] }
 0x17c   :  { %3993 = vmatprep.subr.bf16.mxu0 %v11469_v40  ;;  %4036 = vmatprep.subr.bf16.mxu1 %v11597_v0  ;;  %v738_v40 = vadd.f32 %v13382_v50, %v235_v27  ;;  %v11557_v0 = vcombine.high %v1218_v10, %v1222_v34  ;;  %v11167_v2 = vcombine.high %v827_v42, %v831_v43  ;;  %v923_v10 = vld [vmem:[#allocation7 + $0x4c8] sm:$0xff] }
 0x17d   :  { %v11295_v50 = vcombine.high %v955_v48, %v959_v49  ;;  %v11143_v27 = vcombine.high %v803_v21, %v807_v22  ;;  %v927_v34 = vld [vmem:[#allocation7 + $0x4e8] sm:$0xff] }
 0x17e   :  { %v915_v17 = vld [vmem:[#allocation7 + $0x488] sm:$0xff]  ;;  %v11262_v43 = vcombine.low %v923_v10, %v927_v34 }
 0x17f   :  { %3994 = vmatpush2.bf16.msra.mxu0 %v11468_v53  ;;  %4037 = vmatpush2.bf16.msra.mxu1 %v11596_v54  ;;  %v11428_v53 = vcombine.low %v1090_v29, %v1094_v31  ;;  %v750_v54 = vmax.f32 %v695_v37, 0.0  ;;  %v795_v29 = vld [vmem:[#allocation7 + $0xc8] sm:$0xff] }
 0x180   :  { %3995 = vmatprep.subr.bf16.mxu0 %v11461_v55  ;;  %4038 = vmatprep.subr.bf16.mxu1 %v11589_v56  ;;  %v758_v55 = vmax.f32 %v699_v38, 0.0  ;;  %v752_v56 = vmax.f32 %v738_v40, 0.0  ;;  %v799_v31 = vld [vmem:[#allocation7 + $0xe8] sm:$0xff]  ;;  %v11263_v38 = vcombine.high %v923_v10, %v927_v34 }
 0x181   :  { %v11135_v37 = vcombine.high %v795_v29, %v799_v31  ;;  %v791_v40 = vld [vmem:[#allocation7 + $0xa8] sm:$0xff]  ;;  %v11134_v42 = vcombine.low %v795_v29, %v799_v31 }
 0x182   :  { %v875_v29 = vld [vmem:[#allocation7 + $0x348] sm:$0xff] }
 0x183   :  { %3996 = vmatpush2.bf16.msra.mxu0 %v11460_v3  ;;  %4039 = vmatpush2.bf16.msra.mxu1 %v11588_v4  ;;  %v951_v3 = vld [vmem:[#allocation7 + $0x5a8] sm:$0xff]  ;;  %v13408_v4 = vpack.c.bf16 %v758_v55, %v750_v54 }
 0x184   :  { %3997 = vmatprep.subr.bf16.mxu0 %v11453_v5  ;;  %4040 = vmatprep.subr.bf16.mxu1 %v11581_v6  ;;  %v11294_v5 = vcombine.low %v955_v48, %v959_v49  ;;  %v13410_v6 = vpack.c.bf16 %v760_v60, %v752_v56  ;;  %v11287_v12 = vcombine.high %v947_v1, %v951_v3  ;;  %v783_v54 = vld [vmem:[#allocation7 + $0x68] sm:$0xff] }
 0x185   :  { %v907_v55 = vld [vmem:[#allocation7 + $0x448] sm:$0xff] }
 0x186   :  { %v879_v31 = vld [vmem:[#allocation7 + $0x368] sm:$0xff] }
 0x187   :  { %3998 = vmatpush2.bf16.msra.mxu0 %v11452_v14  ;;  %4041 = vmatpush2.bf16.msra.mxu1 %v11580_v45  ;;  %v939_v14 = vld [vmem:[#allocation7 + $0x548] sm:$0xff] }
 0x188   :  { %3999 = vmatprep.subr.bf16.mxu0 %v11445_v51  ;;  %4042 = vmatprep.subr.bf16.mxu1 %v11573_v46  ;;  %v943_v45 = vld [vmem:[#allocation7 + $0x568] sm:$0xff]  ;;  %v11158_v51 = vcombine.low %v819_v62, %v823_v7  ;;  %v11286_v46 = vcombine.low %v947_v1, %v951_v3 }
 0x189   :  { %v11279_v52 = vcombine.high %v939_v14, %v943_v45  ;;  %v771_v62 = vld [vmem:[#allocation7 + $0x8] sm:$0xff] }
 0x18a   :  { %v775_v7 = vld [vmem:[#allocation7 + $0x28] sm:$0xff] }
 0x18b   :  { %4000 = vmatpush2.bf16.msra.mxu0 %v11444_v23  ;;  %4043 = vmatpush2.bf16.msra.mxu1 %v11572_v25  ;;  %v931_v23 = vld [vmem:[#allocation7 + $0x508] sm:$0xff]  ;;  %v11150_v25 = vcombine.low %v811_v9, %v815_v11 }
 0x18c   :  { %4001 = vmatprep.subr.bf16.mxu0 %v11437_v26  ;;  %4044 = vmatprep.subr.bf16.mxu1 %v11565_v13  ;;  %v11278_v26 = vcombine.low %v939_v14, %v943_v45  ;;  %v11271_v13 = vcombine.high %v931_v23, %v935_v24  ;;  %v903_v1 = vld [vmem:[#allocation7 + $0x428] sm:$0xff] }
 0x18d   :  { %v891_v11 = vld [vmem:[#allocation7 + $0x3c8] sm:$0xff] }
 0x18e   :  { %v1019_v14 = vld [vmem:[#allocation7 + $0x7c8] sm:$0xff] }
 0x18f   :  { %4002 = vmatpush2.bf16.msra.mxu0 %v11436_v35  ;;  %4045 = vmatpush2.bf16.msra.mxu1 %v11564_v36  ;;  %v11142_v35 = vcombine.low %v803_v21, %v807_v22  ;;  %v11270_v36 = vcombine.low %v931_v23, %v935_v24  ;;  %v1023_v45 = vld [vmem:[#allocation7 + $0x7e8] sm:$0xff] }
 0x190   :  { %4003 = vmatprep.subr.bf16.mxu0 %v11429_v39  ;;  %4046 = vmatprep.subr.bf16.mxu1 %v11557_v0  ;;  %v787_v39 = vld [vmem:[#allocation7 + $0x88] sm:$0xff] }
 0x191   :  { %v919_v0 = vld [vmem:[#allocation7 + $0x4a8] sm:$0xff]  ;;  %v11127_v48 = vcombine.high %v787_v39, %v791_v40 }
 0x192   :  { %v11255_v49 = vcombine.high %v915_v17, %v919_v0  ;;  %v11254_v56 = vcombine.low %v915_v17, %v919_v0  ;;  %v883_v21 = vld [vmem:[#allocation7 + $0x388] sm:$0xff] }
 0x193   :  { %4004 = vmatpush2.bf16.msra.mxu0 %v11428_v53  ;;  %4047 = vmatpush2.bf16.msra.mxu1 %v11556_v41  ;;  %v779_v53 = vld [vmem:[#allocation7 + $0x48] sm:$0xff] }
 0x194   :  { %4059 = vmatprep.subr.bf16.mxu0 %v11167_v2  ;;  %4102 = vmatprep.subr.bf16.mxu1 %v11295_v50  ;;  %v911_v41 = vld [vmem:[#allocation7 + $0x468] sm:$0xff]  ;;  %v11126_v2 = vcombine.low %v787_v39, %v791_v40  ;;  %v11119_v60 = vcombine.high %v779_v53, %v783_v54  ;;  %v11118_v3 = vcombine.low %v779_v53, %v783_v54 }
 0x195   :  { %v11247_v50 = vcombine.high %v907_v55, %v911_v41  ;;  %v887_v22 = vld [vmem:[#allocation7 + $0x3a8] sm:$0xff] }
 0x196   :  { %4006 = vmatmul.mubr.bf16.vlgmr.msra.gmra.mxu0 %v13408_v4  ;;  %4049 = vmatmul.mubr.bf16.vlgmr.msra.gmra.mxu1 %v13410_v6  ;;  %v1011_v23 = vld [vmem:[#allocation7 + $0x788] sm:$0xff] }
 0x197   :  { %4060 = vmatpush1.bf16.msra.mxu0 %v11166_v63  ;;  %4091 = vmatprep.mubr.bf16.mxu0 %v13352_v57  ;;  %v899_v63 = vld [vmem:[#allocation7 + $0x408] sm:$0xff] }
 0x198   :  { %4103 = vmatpush1.bf16.msra.mxu1 %v11294_v5  ;;  %4134 = vmatprep.mubr.bf16.mxu1 %v13356_v59  ;;  %v11246_v5 = vcombine.low %v907_v55, %v911_v41  ;;  %v11239_v9 = vcombine.high %v899_v63, %v903_v1  ;;  %v1015_v24 = vld [vmem:[#allocation7 + $0x7a8] sm:$0xff] }
 0x199   :  { %4061 = vmatprep.subr.bf16.mxu0 %v11159_v8  ;;  %4104 = vmatprep.subr.bf16.mxu1 %v11287_v12  ;;  %v11111_v8 = vcombine.high %v771_v62, %v775_v7  ;;  %v895_v12 = vld [vmem:[#allocation7 + $0x3e8] sm:$0xff] }
 0x19a   :  { %v1003_v10 = vld [vmem:[#allocation7 + $0x748] sm:$0xff] }
 0x19b   :  { %4062 = vmatpush1.bf16.msra.mxu0 %v11158_v51  ;;  %v11110_v51 = vcombine.low %v771_v62, %v775_v7  ;;  %v1007_v34 = vld [vmem:[#allocation7 + $0x768] sm:$0xff] }
 0x19c   :  { %4105 = vmatpush1.bf16.msra.mxu1 %v11286_v46  ;;  %4063 = vmatprep.subr.bf16.mxu0 %v11151_v47  ;;  %v11238_v46 = vcombine.low %v899_v63, %v903_v1  ;;  %v11231_v47 = vcombine.high %v891_v11, %v895_v12  ;;  %v867_v39 = vld [vmem:[#allocation7 + $0x308] sm:$0xff] }
 0x19d   :  { %4106 = vmatprep.subr.bf16.mxu1 %v11279_v52  ;;  %v11359_v52 = vcombine.high %v1019_v14, %v1023_v45  ;;  %v871_v40 = vld [vmem:[#allocation7 + $0x328] sm:$0xff] }
 0x19e   :  { %v995_v17 = vld [vmem:[#allocation7 + $0x708] sm:$0xff] }
 0x19f   :  { %4064 = vmatpush1.bf16.msra.mxu0 %v11150_v25  ;;  %v11230_v25 = vcombine.low %v891_v11, %v895_v12  ;;  %v999_v0 = vld [vmem:[#allocation7 + $0x728] sm:$0xff] }
 0x1a0   :  { %4107 = vmatpush1.bf16.msra.mxu1 %v11278_v26  ;;  %4065 = vmatprep.subr.bf16.mxu0 %v11143_v27  ;;  %v11358_v26 = vcombine.low %v1019_v14, %v1023_v45  ;;  %v11223_v27 = vcombine.high %v883_v21, %v887_v22  ;;  %v859_v53 = vld [vmem:[#allocation7 + $0x2c8] sm:$0xff] }
 0x1a1   :  { %4108 = vmatprep.subr.bf16.mxu1 %v11271_v13  ;;  %v11351_v13 = vcombine.high %v1011_v23, %v1015_v24  ;;  %v863_v54 = vld [vmem:[#allocation7 + $0x2e8] sm:$0xff] }
 0x1a2   :  { %v987_v55 = vld [vmem:[#allocation7 + $0x6c8] sm:$0xff] }
 0x1a3   :  { %4066 = vmatpush1.bf16.msra.mxu0 %v11142_v35  ;;  %v11222_v35 = vcombine.low %v883_v21, %v887_v22  ;;  %v991_v41 = vld [vmem:[#allocation7 + $0x6e8] sm:$0xff] }
 0x1a4   :  { %4109 = vmatpush1.bf16.msra.mxu1 %v11270_v36  ;;  %4067 = vmatprep.subr.bf16.mxu0 %v11135_v37  ;;  %v11350_v36 = vcombine.low %v1011_v23, %v1015_v24  ;;  %v11215_v37 = vcombine.high %v875_v29, %v879_v31  ;;  %v851_v62 = vld [vmem:[#allocation7 + $0x288] sm:$0xff] }
 0x1a5   :  { %4110 = vmatprep.subr.bf16.mxu1 %v11263_v38  ;;  %v11343_v38 = vcombine.high %v1003_v10, %v1007_v34  ;;  %v855_v7 = vld [vmem:[#allocation7 + $0x2a8] sm:$0xff] }
 0x1a6   :  { %v979_v63 = vld [vmem:[#allocation7 + $0x688] sm:$0xff] }
 0x1a7   :  { %4068 = vmatpush1.bf16.msra.mxu0 %v11134_v42  ;;  %v11214_v42 = vcombine.low %v875_v29, %v879_v31  ;;  %v983_v1 = vld [vmem:[#allocation7 + $0x6a8] sm:$0xff] }
 0x1a8   :  { %4111 = vmatpush1.bf16.msra.mxu1 %v11262_v43  ;;  %4069 = vmatprep.subr.bf16.mxu0 %v11127_v48  ;;  %v11342_v43 = vcombine.low %v1003_v10, %v1007_v34  ;;  %v11207_v48 = vcombine.high %v867_v39, %v871_v40  ;;  %v843_v11 = vld [vmem:[#allocation7 + $0x248] sm:$0xff] }
 0x1a9   :  { %4112 = vmatprep.subr.bf16.mxu1 %v11255_v49  ;;  %v11335_v49 = vcombine.high %v995_v17, %v999_v0  ;;  %v847_v12 = vld [vmem:[#allocation7 + $0x268] sm:$0xff] }
 0x1aa   :  { %v971_v14 = vld [vmem:[#allocation7 + $0x648] sm:$0xff] }
 0x1ab   :  { %4070 = vmatpush1.bf16.msra.mxu0 %v11126_v2  ;;  %v11206_v2 = vcombine.low %v867_v39, %v871_v40  ;;  %v975_v45 = vld [vmem:[#allocation7 + $0x668] sm:$0xff] }
 0x1ac   :  { %4113 = vmatpush1.bf16.msra.mxu1 %v11254_v56  ;;  %4071 = vmatprep.subr.bf16.mxu0 %v11119_v60  ;;  %v11334_v56 = vcombine.low %v995_v17, %v999_v0  ;;  %v11199_v60 = vcombine.high %v859_v53, %v863_v54  ;;  %v835_v21 = vld [vmem:[#allocation7 + $0x208] sm:$0xff] }
 0x1ad   :  { %4114 = vmatprep.subr.bf16.mxu1 %v11247_v50  ;;  %v11327_v50 = vcombine.high %v987_v55, %v991_v41  ;;  %v839_v22 = vld [vmem:[#allocation7 + $0x228] sm:$0xff] }
 0x1ae   :  { %v963_v23 = vld [vmem:[#allocation7 + $0x608] sm:$0xff] }
 0x1af   :  { %4072 = vmatpush1.bf16.msra.mxu0 %v11118_v3  ;;  %v11198_v3 = vcombine.low %v859_v53, %v863_v54  ;;  %v967_v24 = vld [vmem:[#allocation7 + $0x628] sm:$0xff] }
 0x1b0   :  { %4115 = vmatpush1.bf16.msra.mxu1 %v11246_v5  ;;  %4073 = vmatprep.subr.bf16.mxu0 %v11111_v8  ;;  %v11326_v5 = vcombine.low %v987_v55, %v991_v41  ;;  %v11191_v8 = vcombine.high %v851_v62, %v855_v7  ;;  %v1083_v29 = vld [vmem:[#allocation7 + $0x9c8] sm:$0xff] }
 0x1b1   :  { %4116 = vmatprep.subr.bf16.mxu1 %v11239_v9  ;;  %v11319_v9 = vcombine.high %v979_v63, %v983_v1  ;;  %v1087_v31 = vld [vmem:[#allocation7 + $0x9e8] sm:$0xff] }
 0x1b2   :  { %v1211_v10 = vld [vmem:[#allocation7 + $0xdc8] sm:$0xff]  ;;  %v11422_v17 = vcombine.low %v1083_v29, %v1087_v31 }
 0x1b3   :  { %4074 = vmatpush1.bf16.msra.mxu0 %v11110_v51  ;;  %v11190_v51 = vcombine.low %v851_v62, %v855_v7  ;;  %v1215_v34 = vld [vmem:[#allocation7 + $0xde8] sm:$0xff] }
 0x1b4   :  { %4117 = vmatpush1.bf16.msra.mxu1 %v11238_v46  ;;  %4075 = vmatprep.subr.bf16.mxu0 %v11231_v47  ;;  %v11318_v46 = vcombine.low %v979_v63, %v983_v1  ;;  %v11183_v47 = vcombine.high %v843_v11, %v847_v12  ;;  %v1075_v39 = vld [vmem:[#allocation7 + $0x988] sm:$0xff] }
 0x1b5   :  { %4118 = vmatprep.subr.bf16.mxu1 %v11359_v52  ;;  %v11311_v52 = vcombine.high %v971_v14, %v975_v45  ;;  %v1079_v40 = vld [vmem:[#allocation7 + $0x9a8] sm:$0xff] }
 0x1b6   :  { %v1203_v0 = vld [vmem:[#allocation7 + $0xd88] sm:$0xff] }
 0x1b7   :  { %4076 = vmatpush2.bf16.msra.mxu0 %v11230_v25  ;;  %v11182_v25 = vcombine.low %v843_v11, %v847_v12  ;;  %v1071_v53 = vld [vmem:[#allocation7 + $0x968] sm:$0xff] }
 0x1b8   :  { %4119 = vmatpush2.bf16.msra.mxu1 %v11358_v26  ;;  %4077 = vmatprep.subr.bf16.mxu0 %v11223_v27  ;;  %v11310_v26 = vcombine.low %v971_v14, %v975_v45  ;;  %v11175_v27 = vcombine.high %v835_v21, %v839_v22  ;;  %v1195_v55 = vld [vmem:[#allocation7 + $0xd48] sm:$0xff] }
 0x1b9   :  { %4120 = vmatprep.subr.bf16.mxu1 %v11351_v13  ;;  %v11303_v13 = vcombine.high %v963_v23, %v967_v24  ;;  %v1199_v41 = vld [vmem:[#allocation7 + $0xd68] sm:$0xff] }
 0x1ba   :  { %v1059_v62 = vld [vmem:[#allocation7 + $0x908] sm:$0xff] }
 0x1bb   :  { %4078 = vmatpush2.bf16.msra.mxu0 %v11222_v35  ;;  %v11174_v35 = vcombine.low %v835_v21, %v839_v22  ;;  %v1063_v7 = vld [vmem:[#allocation7 + $0x928] sm:$0xff] }
 0x1bc   :  { %4121 = vmatpush2.bf16.msra.mxu1 %v11350_v36  ;;  %4079 = vmatprep.subr.bf16.mxu0 %v11215_v37  ;;  %v11302_v36 = vcombine.low %v963_v23, %v967_v24  ;;  %v11423_v37 = vcombine.high %v1083_v29, %v1087_v31  ;;  %v1187_v63 = vld [vmem:[#allocation7 + $0xd08] sm:$0xff] }
 0x1bd   :  { %4122 = vmatprep.subr.bf16.mxu1 %v11343_v38  ;;  %v11551_v38 = vcombine.high %v1211_v10, %v1215_v34  ;;  %v1191_v1 = vld [vmem:[#allocation7 + $0xd28] sm:$0xff] }
 0x1be   :  { %v1051_v11 = vld [vmem:[#allocation7 + $0x8c8] sm:$0xff] }
 0x1bf   :  { %4080 = vmatpush2.bf16.msra.mxu0 %v11214_v42  ;;  %v1207_v42 = vld [vmem:[#allocation7 + $0xda8] sm:$0xff] }
 0x1c0   :  { %4123 = vmatpush2.bf16.msra.mxu1 %v11342_v43  ;;  %4081 = vmatprep.subr.bf16.mxu0 %v11207_v48  ;;  %v11550_v43 = vcombine.low %v1211_v10, %v1215_v34  ;;  %v11415_v48 = vcombine.high %v1075_v39, %v1079_v40  ;;  %v11543_v54 = vcombine.high %v1203_v0, %v1207_v42  ;;  %v1055_v12 = vld [vmem:[#allocation7 + $0x8e8] sm:$0xff] }
 0x1c1   :  { %4124 = vmatprep.subr.bf16.mxu1 %v11335_v49  ;;  %v1067_v49 = vld [vmem:[#allocation7 + $0x948] sm:$0xff] }
 0x1c2   :  { %v1179_v14 = vld [vmem:[#allocation7 + $0xcc8] sm:$0xff] }
 0x1c3   :  { %4082 = vmatpush2.bf16.msra.mxu0 %v11206_v2  ;;  %v11414_v2 = vcombine.low %v1075_v39, %v1079_v40  ;;  %v1183_v45 = vld [vmem:[#allocation7 + $0xce8] sm:$0xff] }
 0x1c4   :  { %4125 = vmatpush2.bf16.msra.mxu1 %v11334_v56  ;;  %4083 = vmatprep.subr.bf16.mxu0 %v11199_v60  ;;  %v11542_v56 = vcombine.low %v1203_v0, %v1207_v42  ;;  %v11407_v60 = vcombine.high %v1067_v49, %v1071_v53  ;;  %v1043_v21 = vld [vmem:[#allocation7 + $0x888] sm:$0xff] }
 0x1c5   :  { %4126 = vmatprep.subr.bf16.mxu1 %v11327_v50  ;;  %v11535_v50 = vcombine.high %v1195_v55, %v1199_v41  ;;  %v1047_v22 = vld [vmem:[#allocation7 + $0x8a8] sm:$0xff] }
 0x1c6   :  { %v1171_v23 = vld [vmem:[#allocation7 + $0xc88] sm:$0xff] }
 0x1c7   :  { %4084 = vmatpush2.bf16.msra.mxu0 %v11198_v3  ;;  %v11406_v3 = vcombine.low %v1067_v49, %v1071_v53  ;;  %v1175_v24 = vld [vmem:[#allocation7 + $0xca8] sm:$0xff] }
 0x1c8   :  { %4127 = vmatpush2.bf16.msra.mxu1 %v11326_v5  ;;  %4085 = vmatprep.subr.bf16.mxu0 %v11191_v8  ;;  %v11534_v5 = vcombine.low %v1195_v55, %v1199_v41  ;;  %v11399_v8 = vcombine.high %v1059_v62, %v1063_v7  ;;  %v1035_v29 = vld [vmem:[#allocation7 + $0x848] sm:$0xff] }
 0x1c9   :  { %4128 = vmatprep.subr.bf16.mxu1 %v11319_v9  ;;  %v11527_v9 = vcombine.high %v1187_v63, %v1191_v1  ;;  %v1039_v31 = vld [vmem:[#allocation7 + $0x868] sm:$0xff] }
 0x1ca   :  { %v1163_v10 = vld [vmem:[#allocation7 + $0xc48] sm:$0xff]  ;;  %v11374_v42 = vcombine.low %v1035_v29, %v1039_v31 }
 0x1cb   :  { %4086 = vmatpush2.bf16.msra.mxu0 %v11190_v51  ;;  %v11398_v51 = vcombine.low %v1059_v62, %v1063_v7  ;;  %v1167_v34 = vld [vmem:[#allocation7 + $0xc68] sm:$0xff] }
 0x1cc   :  { %4129 = vmatpush2.bf16.msra.mxu1 %v11318_v46  ;;  %4087 = vmatprep.subr.bf16.mxu0 %v11183_v47  ;;  %v11526_v46 = vcombine.low %v1187_v63, %v1191_v1  ;;  %v11391_v47 = vcombine.high %v1051_v11, %v1055_v12  ;;  %v1027_v39 = vld [vmem:[#allocation7 + $0x808] sm:$0xff] }
 0x1cd   :  { %4130 = vmatprep.subr.bf16.mxu1 %v11311_v52  ;;  %v11519_v52 = vcombine.high %v1179_v14, %v1183_v45  ;;  %v1031_v40 = vld [vmem:[#allocation7 + $0x828] sm:$0xff] }
 0x1ce   :  { %v1159_v0 = vld [vmem:[#allocation7 + $0xc28] sm:$0xff] }
 0x1cf   :  { %4088 = vmatpush2.bf16.msra.mxu0 %v11182_v25  ;;  %v11390_v25 = vcombine.low %v1051_v11, %v1055_v12  ;;  %v1147_v53 = vld [vmem:[#allocation7 + $0xbc8] sm:$0xff] }
 0x1d0   :  { %4131 = vmatpush2.bf16.msra.mxu1 %v11310_v26  ;;  %4089 = vmatprep.subr.bf16.mxu0 %v11175_v27  ;;  %v11518_v26 = vcombine.low %v1179_v14, %v1183_v45  ;;  %v11383_v27 = vcombine.high %v1043_v21, %v1047_v22  ;;  %v1275_v55 = vld [vmem:[#allocation7 + $0xfc8] sm:$0xff] }
 0x1d1   :  { %4132 = vmatprep.subr.bf16.mxu1 %v11303_v13  ;;  %v11511_v13 = vcombine.high %v1171_v23, %v1175_v24  ;;  %v1279_v41 = vld [vmem:[#allocation7 + $0xfe8] sm:$0xff] }
 0x1d2   :  { %v1139_v62 = vld [vmem:[#allocation7 + $0xb88] sm:$0xff] }
 0x1d3   :  { %4090 = vmatpush2.bf16.msra.mxu0 %v11174_v35  ;;  %v11382_v35 = vcombine.low %v1043_v21, %v1047_v22  ;;  %v1143_v7 = vld [vmem:[#allocation7 + $0xba8] sm:$0xff] }
 0x1d4   :  { %4133 = vmatpush2.bf16.msra.mxu1 %v11302_v36  ;;  %4145 = vmatprep.subr.bf16.mxu0 %v11423_v37  ;;  %v11510_v36 = vcombine.low %v1171_v23, %v1175_v24  ;;  %v11375_v37 = vcombine.high %v1035_v29, %v1039_v31  ;;  %v1267_v63 = vld [vmem:[#allocation7 + $0xf88] sm:$0xff] }
 0x1d5   :  { %4188 = vmatprep.subr.bf16.mxu1 %v11551_v38  ;;  %v11503_v38 = vcombine.high %v1163_v10, %v1167_v34  ;;  %v1271_v1 = vld [vmem:[#allocation7 + $0xfa8] sm:$0xff] }
 0x1d6   :  { %4092 = vmatmul.mubr.bf16.vlgmr.msra.gmra.mxu0 %v13354_v58  ;;  %v1131_v11 = vld [vmem:[#allocation7 + $0xb48] sm:$0xff] }
 0x1d7   :  { %4135 = vmatmul.mubr.bf16.vlgmr.msra.gmra.mxu1 %v13358_v61  ;;  %4146 = vmatpush1.bf16.msra.mxu0 %v11422_v17  ;;  %v1155_v17 = vld [vmem:[#allocation7 + $0xc08] sm:$0xff] }
 0x1d8   :  { %4177 = vmatprep.mubr.bf16.mxu0 %v13388_v28  ;;  %4189 = vmatpush1.bf16.msra.mxu1 %v11550_v43  ;;  %v11502_v43 = vcombine.low %v1163_v10, %v1167_v34  ;;  %v11495_v49 = vcombine.high %v1155_v17, %v1159_v0  ;;  %v1135_v12 = vld [vmem:[#allocation7 + $0xb68] sm:$0xff] }
 0x1d9   :  { %4220 = vmatprep.mubr.bf16.mxu1 %v13390_v32  ;;  %4147 = vmatprep.subr.bf16.mxu0 %v11415_v48  ;;  %v11367_v48 = vcombine.high %v1027_v39, %v1031_v40  ;;  %v1259_v14 = vld [vmem:[#allocation7 + $0xf48] sm:$0xff] }
 0x1da   :  { %4190 = vmatprep.subr.bf16.mxu1 %v11543_v54  ;;  %v1151_v54 = vld [vmem:[#allocation7 + $0xbe8] sm:$0xff] }
 0x1db   :  { %4148 = vmatpush1.bf16.msra.mxu0 %v11414_v2  ;;  %v11366_v2 = vcombine.low %v1027_v39, %v1031_v40  ;;  %v1263_v45 = vld [vmem:[#allocation7 + $0xf68] sm:$0xff] }
 0x1dc   :  { %4191 = vmatpush1.bf16.msra.mxu1 %v11542_v56  ;;  %4149 = vmatprep.subr.bf16.mxu0 %v11407_v60  ;;  %v11494_v56 = vcombine.low %v1155_v17, %v1159_v0  ;;  %v11487_v60 = vcombine.high %v1147_v53, %v1151_v54  ;;  %v1123_v21 = vld [vmem:[#allocation7 + $0xb08] sm:$0xff] }
 0x1dd   :  { %4192 = vmatprep.subr.bf16.mxu1 %v11535_v50  ;;  %v11615_v50 = vcombine.high %v1275_v55, %v1279_v41  ;;  %v1127_v22 = vld [vmem:[#allocation7 + $0xb28] sm:$0xff] }
 0x1de   :  { %v1251_v23 = vld [vmem:[#allocation7 + $0xf08] sm:$0xff] }
 0x1df   :  { %4150 = vmatpush1.bf16.msra.mxu0 %v11406_v3  ;;  %v11486_v3 = vcombine.low %v1147_v53, %v1151_v54  ;;  %v1255_v24 = vld [vmem:[#allocation7 + $0xf28] sm:$0xff] }
 0x1e0   :  { %4193 = vmatpush1.bf16.msra.mxu1 %v11534_v5  ;;  %4151 = vmatprep.subr.bf16.mxu0 %v11399_v8  ;;  %v11614_v5 = vcombine.low %v1275_v55, %v1279_v41  ;;  %v11479_v8 = vcombine.high %v1139_v62, %v1143_v7  ;;  %v1115_v29 = vld [vmem:[#allocation7 + $0xac8] sm:$0xff] }
 0x1e1   :  { %4194 = vmatprep.subr.bf16.mxu1 %v11527_v9  ;;  %v11607_v9 = vcombine.high %v1267_v63, %v1271_v1  ;;  %v1119_v31 = vld [vmem:[#allocation7 + $0xae8] sm:$0xff] }
 0x1e2   :  { %v1243_v10 = vld [vmem:[#allocation7 + $0xec8] sm:$0xff] }
 0x1e3   :  { %4152 = vmatpush1.bf16.msra.mxu0 %v11398_v51  ;;  %v11478_v51 = vcombine.low %v1139_v62, %v1143_v7  ;;  %v1247_v34 = vld [vmem:[#allocation7 + $0xee8] sm:$0xff] }
 0x1e4   :  { %4195 = vmatpush1.bf16.msra.mxu1 %v11526_v46  ;;  %4153 = vmatprep.subr.bf16.mxu0 %v11391_v47  ;;  %v11606_v46 = vcombine.low %v1267_v63, %v1271_v1  ;;  %v11471_v47 = vcombine.high %v1131_v11, %v1135_v12  ;;  %v1107_v39 = vld [vmem:[#allocation7 + $0xa88] sm:$0xff] }
 0x1e5   :  { %4196 = vmatprep.subr.bf16.mxu1 %v11519_v52  ;;  %v11599_v52 = vcombine.high %v1259_v14, %v1263_v45  ;;  %v1111_v40 = vld [vmem:[#allocation7 + $0xaa8] sm:$0xff] }
 0x1e6   :  { %v1235_v17 = vld [vmem:[#allocation7 + $0xe88] sm:$0xff] }
 0x1e7   :  { %4154 = vmatpush1.bf16.msra.mxu0 %v11390_v25  ;;  %v11470_v25 = vcombine.low %v1131_v11, %v1135_v12  ;;  %v1239_v0 = vld [vmem:[#allocation7 + $0xea8] sm:$0xff] }
 0x1e8   :  { %4197 = vmatpush1.bf16.msra.mxu1 %v11518_v26  ;;  %4155 = vmatprep.subr.bf16.mxu0 %v11383_v27  ;;  %v11598_v26 = vcombine.low %v1259_v14, %v1263_v45  ;;  %v11463_v27 = vcombine.high %v1123_v21, %v1127_v22  ;;  %v1099_v53 = vld [vmem:[#allocation7 + $0xa48] sm:$0xff]  ;;  %v828_v14 = vld [vmem:[#allocation7 + $0x1d0] sm:$0xff] }
 0x1e9   :  { %4198 = vmatprep.subr.bf16.mxu1 %v11511_v13  ;;  %v11591_v13 = vcombine.high %v1251_v23, %v1255_v24  ;;  %v1103_v54 = vld [vmem:[#allocation7 + $0xa68] sm:$0xff]  ;;  %v832_v45 = vld [vmem:[#allocation7 + $0x1f0] sm:$0xff] }
 0x1ea   :  { %v1227_v55 = vld [vmem:[#allocation7 + $0xe48] sm:$0xff] }
 0x1eb   :  { %4156 = vmatpush1.bf16.msra.mxu0 %v11382_v35  ;;  %v11462_v35 = vcombine.low %v1123_v21, %v1127_v22  ;;  %v1231_v41 = vld [vmem:[#allocation7 + $0xe68] sm:$0xff]  ;;  %v11169_v22 = vcombine.high %v828_v14, %v832_v45 }
 0x1ec   :  { %4199 = vmatpush1.bf16.msra.mxu1 %v11510_v36  ;;  %4157 = vmatprep.subr.bf16.mxu0 %v11375_v37  ;;  %v11590_v36 = vcombine.low %v1251_v23, %v1255_v24  ;;  %v11455_v37 = vcombine.high %v1115_v29, %v1119_v31  ;;  %v1091_v62 = vld [vmem:[#allocation7 + $0xa08] sm:$0xff]  ;;  %v820_v24 = vld [vmem:[#allocation7 + $0x190] sm:$0xff] }
 0x1ed   :  { %4200 = vmatprep.subr.bf16.mxu1 %v11503_v38  ;;  %v11583_v38 = vcombine.high %v1243_v10, %v1247_v34  ;;  %v1095_v7 = vld [vmem:[#allocation7 + $0xa28] sm:$0xff] }
 0x1ee   :  { %v1219_v63 = vld [vmem:[#allocation7 + $0xe08] sm:$0xff] }
 0x1ef   :  { %4158 = vmatpush1.bf16.msra.mxu0 %v11374_v42  ;;  %v11454_v42 = vcombine.low %v1115_v29, %v1119_v31  ;;  %v1223_v1 = vld [vmem:[#allocation7 + $0xe28] sm:$0xff]  ;;  %v952_v29 = vld [vmem:[#allocation7 + $0x5b0] sm:$0xff] }
 0x1f0   :  { %4201 = vmatpush1.bf16.msra.mxu1 %v11502_v43  ;;  %4159 = vmatprep.subr.bf16.mxu0 %v11367_v48  ;;  %v11582_v43 = vcombine.low %v1243_v10, %v1247_v34  ;;  %v11447_v48 = vcombine.high %v1107_v39, %v1111_v40  ;;  %v1284_v11 = vld [vmem:[#allocation14 + $0x1] ss:$8 sm:$0xf0]  ;;  %v11559_v12 = vcombine.high %v1219_v63, %v1223_v1 }
 0x1f1   :  { %4202 = vmatprep.subr.bf16.mxu1 %v11495_v49  ;;  %v11575_v49 = vcombine.high %v1235_v17, %v1239_v0  ;;  %v11558_v21 = vcombine.low %v1219_v63, %v1223_v1  ;;  %v812_v34 = vld [vmem:[#allocation7 + $0x150] sm:$0xff] }
 0x1f3   :  { %4160 = vmatpush1.bf16.msra.mxu0 %v11366_v2  ;;  %v11446_v2 = vcombine.low %v1107_v39, %v1111_v40  ;;  %v944_v39 = vld [vmem:[#allocation7 + $0x570] sm:$0xff] }
 0x1f4   :  { %4203 = vmatpush1.bf16.msra.mxu1 %v11494_v56  ;;  %4161 = vmatprep.subr.bf16.mxu0 %v11487_v60  ;;  %v11574_v56 = vcombine.low %v1235_v17, %v1239_v0  ;;  %v11439_v60 = vcombine.high %v1099_v53, %v1103_v54 }
 0x1f5   :  { %4204 = vmatprep.subr.bf16.mxu1 %v11615_v50  ;;  %v11567_v50 = vcombine.high %v1227_v55, %v1231_v41 }
 0x1f7   :  { %4162 = vmatpush2.bf16.msra.mxu0 %v11486_v3  ;;  %v11438_v3 = vcombine.low %v1099_v53, %v1103_v54 }
 0x1f8   :  { %4205 = vmatpush2.bf16.msra.mxu1 %v11614_v5  ;;  %4163 = vmatprep.subr.bf16.mxu0 %v11479_v8  ;;  %v11566_v5 = vcombine.low %v1227_v55, %v1231_v41  ;;  %v11431_v8 = vcombine.high %v1091_v62, %v1095_v7  ;;  %v804_v55 = vld [vmem:[#allocation7 + $0x110] sm:$0xff] }
 0x1f9   :  { %4206 = vmatprep.subr.bf16.mxu1 %v11607_v9  ;;  %v1283_v9 = vld [vmem:[#allocation14 + $0x1] ss:$8 sm:$0xf] }
 0x1fa   :  { %v808_v41 = vld [vmem:[#allocation7 + $0x130] sm:$0xff] }
 0x1fb   :  { %4164 = vmatpush2.bf16.msra.mxu0 %v11478_v51  ;;  %v956_v51 = vld [vmem:[#allocation7 + $0x5d0] sm:$0xff]  ;;  %v11145_v1 = vcombine.high %v804_v55, %v808_v41 }
 0x1fc   :  { %4207 = vmatpush2.bf16.msra.mxu1 %v11606_v46  ;;  %4165 = vmatprep.subr.bf16.mxu0 %v11471_v47  ;;  %v960_v46 = vld [vmem:[#allocation7 + $0x5f0] sm:$0xff]  ;;  %v11430_v47 = vcombine.low %v1091_v62, %v1095_v7 }
 0x1fd   :  { %4208 = vmatprep.subr.bf16.mxu1 %v11599_v52  ;;  %v13420_v52 = vor.u32 %v1284_v11, %v1283_v9  ;;  %v11297_v23 = vcombine.high %v956_v51, %v960_v46  ;;  %v11296_v31 = vcombine.low %v956_v51, %v960_v46  ;;  %v800_v9 = vld [vmem:[#allocation7 + $0xf0] sm:$0xff] }
 0x1fe   :  { %v924_v11 = vld [vmem:[#allocation7 + $0x4d0] sm:$0xff] }
 0x1ff   :  { %4166 = vmatpush2.bf16.msra.mxu0 %v11470_v25  ;;  %v824_v25 = vld [vmem:[#allocation7 + $0x1b0] sm:$0xff] }
 0x200   :  { %4209 = vmatpush2.bf16.msra.mxu1 %v11598_v26  ;;  %4167 = vmatprep.subr.bf16.mxu0 %v11463_v27  ;;  %v11168_v26 = vcombine.low %v828_v14, %v832_v45  ;;  %v1290_v27 = vrot.slane %v13420_v52, %v13336_v18  ;;  %v11161_v10 = vcombine.high %v820_v24, %v824_v25 }
 0x201   :  { %4210 = vmatprep.subr.bf16.mxu1 %v11591_v13  ;;  %v948_v13 = vld [vmem:[#allocation7 + $0x590] sm:$0xff]  ;;  %v11160_v0 = vcombine.low %v820_v24, %v824_v25  ;;  %v11144_v14 = vcombine.low %v804_v55, %v808_v41 }
 0x202   :  { %v892_v55 = vld [vmem:[#allocation7 + $0x3d0] sm:$0xff] }
 0x203   :  { %4168 = vmatpush2.bf16.msra.mxu0 %v11462_v35  ;;  %v816_v35 = vld [vmem:[#allocation7 + $0x170] sm:$0xff] }
 0x204   :  { %4211 = vmatpush2.bf16.msra.mxu1 %v11590_v36  ;;  %4169 = vmatprep.subr.bf16.mxu0 %v11455_v37  ;;  %v11289_v37 = vcombine.high %v948_v13, %v952_v29  ;;  %v11152_v62 = vcombine.low %v812_v34, %v816_v35  ;;  %v896_v41 = vld [vmem:[#allocation7 + $0x3f0] sm:$0xff] }
 0x205   :  { %4212 = vmatprep.subr.bf16.mxu1 %v11583_v38  ;;  %v940_v38 = vld [vmem:[#allocation7 + $0x550] sm:$0xff] }
 0x206   :  { %v11281_v54 = vcombine.high %v940_v38, %v944_v39  ;;  %v11280_v63 = vcombine.low %v940_v38, %v944_v39  ;;  %v772_v38 = vld [vmem:[#allocation7 + $0x10] sm:$0xff] }
 0x207   :  { %4170 = vmatpush2.bf16.msra.mxu0 %v11454_v42  ;;  %v776_v39 = vld [vmem:[#allocation7 + $0x30] sm:$0xff] }
 0x208   :  { %4213 = vmatpush2.bf16.msra.mxu1 %v11582_v43  ;;  %4171 = vmatprep.subr.bf16.mxu0 %v11447_v48  ;;  %v11288_v43 = vcombine.low %v948_v13, %v952_v29  ;;  %v11153_v48 = vcombine.high %v812_v34, %v816_v35  ;;  %v780_v13 = vld [vmem:[#allocation7 + $0x50] sm:$0xff] }
 0x209   :  { %4214 = vmatprep.subr.bf16.mxu1 %v11575_v49  ;;  %v784_v29 = vld [vmem:[#allocation7 + $0x70] sm:$0xff] }
 0x20b   :  { %4172 = vmatpush2.bf16.msra.mxu0 %v11446_v2 }
 0x20c   :  { %4215 = vmatpush2.bf16.msra.mxu1 %v11574_v56  ;;  %4173 = vmatprep.subr.bf16.mxu0 %v11439_v60  ;;  %v932_v56 = vld [vmem:[#allocation7 + $0x510] sm:$0xff] }
 0x20d   :  { %4216 = vmatprep.subr.bf16.mxu1 %v11567_v50  ;;  %v936_v60 = vld [vmem:[#allocation7 + $0x530] sm:$0xff] }
 0x20e   :  { %v11272_v45 = vcombine.low %v932_v56, %v936_v60 }
 0x20f   :  { %4174 = vmatpush2.bf16.msra.mxu0 %v11438_v3 }
 0x210   :  { %4217 = vmatpush2.bf16.msra.mxu1 %v11566_v5  ;;  %4175 = vmatprep.subr.bf16.mxu0 %v11431_v8  ;;  %v11273_v5 = vcombine.high %v932_v56, %v936_v60  ;;  %v796_v8 = vld [vmem:[#allocation7 + $0xd0] sm:$0xff]  ;;  %v11112_v60 = vcombine.low %v772_v38, %v776_v39 }
 0x211   :  { %4218 = vmatprep.subr.bf16.mxu1 %v11559_v12  ;;  %v928_v12 = vld [vmem:[#allocation7 + $0x4f0] sm:$0xff]  ;;  %v11137_v51 = vcombine.high %v796_v8, %v800_v9  ;;  %v11136_v24 = vcombine.low %v796_v8, %v800_v9  ;;  %v11232_v9 = vcombine.low %v892_v55, %v896_v41 }
 0x212   :  { %v11265_v46 = vcombine.high %v924_v11, %v928_v12  ;;  %v11264_v25 = vcombine.low %v924_v11, %v928_v12  ;;  %v1024_v56 = vld [vmem:[#allocation7 + $0x7f0] sm:$0xff] }
 0x213   :  { %4176 = vmatpush2.bf16.msra.mxu0 %v11430_v47  ;;  %v788_v47 = vld [vmem:[#allocation7 + $0x90] sm:$0xff] }
 0x214   :  { %4219 = vmatpush2.bf16.msra.mxu1 %v11558_v21  ;;  %4231 = vmatprep.subr.bf16.mxu0 %v11169_v22  ;;  %v792_v21 = vld [vmem:[#allocation7 + $0xb0] sm:$0xff] }
 0x215   :  { %4274 = vmatprep.subr.bf16.mxu1 %v11297_v23  ;;  %v916_v22 = vld [vmem:[#allocation7 + $0x490] sm:$0xff]  ;;  %v11128_v34 = vcombine.low %v788_v47, %v792_v21 }
 0x216   :  { %4178 = vmatmul.mubr.bf16.vlgmr.msra.gmra.mxu0 %v13408_v4  ;;  %v3921_v36 = vpop.f32.mrf.mxu0  ;;  %v3964_v17 = vpop.f32.mrf.mxu1  ;;  %v920_v23 = vld [vmem:[#allocation7 + $0x4b0] sm:$0xff] }
 0x217   :  { %4221 = vmatmul.mubr.bf16.vlgmr.msra.gmra.mxu1 %v13410_v6  ;;  %v3922_v40 = vadd.f32 %v3921_v36, %v1290_v27  ;;  %4232 = vmatpush1.bf16.msra.mxu0 %v11168_v26  ;;  %v11129_v26 = vcombine.high %v788_v47, %v792_v21  ;;  %v11256_v35 = vcombine.low %v916_v22, %v920_v23  ;;  %v1016_v8 = vld [vmem:[#allocation7 + $0x7b0] sm:$0xff] }
 0x218   :  { %4263 = vmatprep.mubr.bf16.mxu0 %v13352_v57  ;;  %4275 = vmatpush1.bf16.msra.mxu1 %v11296_v31  ;;  %v13427_v42 = vpop.f32.mrf.mxu0  ;;  %v13432_v53 = vpop.f32.mrf.mxu1  ;;  %v908_v31 = vld [vmem:[#allocation7 + $0x450] sm:$0xff]  ;;  %v11121_v36 = vcombine.high %v780_v13, %v784_v29 }
 0x219   :  { %v13429_v49 = vadd.f32 %v3964_v17, %v3922_v40  ;;  %4306 = vmatprep.mubr.bf16.mxu1 %v13356_v59  ;;  %4233 = vmatprep.subr.bf16.mxu0 %v11161_v10  ;;  %v912_v10 = vld [vmem:[#allocation7 + $0x470] sm:$0xff] }
 0x21a   :  { %4276 = vmatprep.subr.bf16.mxu1 %v11289_v37  ;;  %v3925_v2 = vpop.f32.mrf.mxu0  ;;  %v3968_v7 = vpop.f32.mrf.mxu1  ;;  %v11249_v37 = vcombine.high %v908_v31, %v912_v10  ;;  %v900_v40 = vld [vmem:[#allocation7 + $0x410] sm:$0xff] }
 0x21b   :  { %v3926_v50 = vadd.f32 %v3925_v2, %v1290_v27  ;;  %4234 = vmatpush1.bf16.msra.mxu0 %v11160_v0  ;;  %v11257_v27 = vcombine.high %v916_v22, %v920_v23  ;;  %v904_v17 = vld [vmem:[#allocation7 + $0x430] sm:$0xff]  ;;  %v11120_v0 = vcombine.low %v780_v13, %v784_v29 }
 0x21c   :  { %4277 = vmatpush1.bf16.msra.mxu1 %v11288_v43  ;;  %4235 = vmatprep.subr.bf16.mxu0 %v11153_v48  ;;  %v11248_v43 = vcombine.low %v908_v31, %v912_v10  ;;  %v11113_v48 = vcombine.high %v772_v38, %v776_v39  ;;  %v1020_v2 = vld [vmem:[#allocation7 + $0x7d0] sm:$0xff] }
 0x21d   :  { %v13434_v3 = vadd.f32 %v3968_v7, %v3926_v50  ;;  %4278 = vmatprep.subr.bf16.mxu1 %v11281_v54  ;;  %v11241_v54 = vcombine.high %v900_v40, %v904_v17  ;;  %v11240_v50 = vcombine.low %v900_v40, %v904_v17  ;;  %v11361_v7 = vcombine.high %v1020_v2, %v1024_v56  ;;  %v1008_v47 = vld [vmem:[#allocation7 + $0x770] sm:$0xff] }
 0x21e   :  { %v11360_v11 = vcombine.low %v1020_v2, %v1024_v56  ;;  %v1000_v13 = vld [vmem:[#allocation7 + $0x730] sm:$0xff] }
 0x21f   :  { %4236 = vmatpush1.bf16.msra.mxu0 %v11152_v62  ;;  %v11233_v62 = vcombine.high %v892_v55, %v896_v41  ;;  %v992_v38 = vld [vmem:[#allocation7 + $0x6f0] sm:$0xff] }
 0x220   :  { %4279 = vmatpush1.bf16.msra.mxu1 %v11280_v63  ;;  %4237 = vmatprep.subr.bf16.mxu0 %v11145_v1  ;;  %v884_v63 = vld [vmem:[#allocation7 + $0x390] sm:$0xff] }
 0x221   :  { %4280 = vmatprep.subr.bf16.mxu1 %v11273_v5  ;;  %v888_v1 = vld [vmem:[#allocation7 + $0x3b0] sm:$0xff] }
 0x222   :  { %v1012_v5 = vld [vmem:[#allocation7 + $0x790] sm:$0xff]  ;;  %v11225_v12 = vcombine.high %v884_v63, %v888_v1  ;;  %v11224_v21 = vcombine.low %v884_v63, %v888_v1 }
 0x223   :  { %4238 = vmatpush1.bf16.msra.mxu0 %v11144_v14  ;;  %v11353_v14 = vcombine.high %v1012_v5, %v1016_v8  ;;  %v11352_v22 = vcombine.low %v1012_v5, %v1016_v8  ;;  %v984_v55 = vld [vmem:[#allocation7 + $0x6b0] sm:$0xff] }
 0x224   :  { %4281 = vmatpush1.bf16.msra.mxu1 %v11272_v45  ;;  %4239 = vmatprep.subr.bf16.mxu0 %v11137_v51  ;;  %v876_v45 = vld [vmem:[#allocation7 + $0x350] sm:$0xff] }
 0x225   :  { %4282 = vmatprep.subr.bf16.mxu1 %v11265_v46  ;;  %v880_v51 = vld [vmem:[#allocation7 + $0x370] sm:$0xff] }
 0x226   :  { %v1004_v46 = vld [vmem:[#allocation7 + $0x750] sm:$0xff]  ;;  %v11217_v23 = vcombine.high %v876_v45, %v880_v51  ;;  %v11216_v29 = vcombine.low %v876_v45, %v880_v51 }
 0x227   :  { %4240 = vmatpush1.bf16.msra.mxu0 %v11136_v24  ;;  %v11345_v24 = vcombine.high %v1004_v46, %v1008_v47  ;;  %v11344_v31 = vcombine.low %v1004_v46, %v1008_v47  ;;  %v976_v63 = vld [vmem:[#allocation7 + $0x670] sm:$0xff] }
 0x228   :  { %4283 = vmatpush1.bf16.msra.mxu1 %v11264_v25  ;;  %4241 = vmatprep.subr.bf16.mxu0 %v11129_v26  ;;  %v868_v25 = vld [vmem:[#allocation7 + $0x310] sm:$0xff] }
 0x229   :  { %4284 = vmatprep.subr.bf16.mxu1 %v11257_v27  ;;  %v872_v26 = vld [vmem:[#allocation7 + $0x330] sm:$0xff] }
 0x22a   :  { %v996_v27 = vld [vmem:[#allocation7 + $0x710] sm:$0xff]  ;;  %v11209_v10 = vcombine.high %v868_v25, %v872_v26  ;;  %v11208_v39 = vcombine.low %v868_v25, %v872_v26 }
 0x22b   :  { %4242 = vmatpush1.bf16.msra.mxu0 %v11128_v34  ;;  %v11337_v34 = vcombine.high %v996_v27, %v1000_v13  ;;  %v11336_v40 = vcombine.low %v996_v27, %v1000_v13  ;;  %v968_v45 = vld [vmem:[#allocation7 + $0x630] sm:$0xff] }
 0x22c   :  { %4285 = vmatpush1.bf16.msra.mxu1 %v11256_v35  ;;  %4243 = vmatprep.subr.bf16.mxu0 %v11121_v36  ;;  %v860_v35 = vld [vmem:[#allocation7 + $0x2d0] sm:$0xff] }
 0x22d   :  { %4286 = vmatprep.subr.bf16.mxu1 %v11249_v37  ;;  %v864_v36 = vld [vmem:[#allocation7 + $0x2f0] sm:$0xff] }
 0x22e   :  { %v988_v37 = vld [vmem:[#allocation7 + $0x6d0] sm:$0xff]  ;;  %v11201_v17 = vcombine.high %v860_v35, %v864_v36  ;;  %v11200_v41 = vcombine.low %v860_v35, %v864_v36 }
 0x22f   :  { %4244 = vmatpush1.bf16.msra.mxu0 %v11120_v0  ;;  %v11329_v0 = vcombine.high %v988_v37, %v992_v38  ;;  %v11328_v2 = vcombine.low %v988_v37, %v992_v38  ;;  %v1216_v25 = vld [vmem:[#allocation7 + $0xdf0] sm:$0xff]  ;;  %v13436_v37 = vpop.f32.mrf.mxu0 }
 0x230   :  { %4287 = vmatpush1.bf16.msra.mxu1 %v11248_v43  ;;  %4245 = vmatprep.subr.bf16.mxu0 %v11113_v48  ;;  %v852_v43 = vld [vmem:[#allocation7 + $0x290] sm:$0xff] }
 0x231   :  { %4288 = vmatprep.subr.bf16.mxu1 %v11241_v54  ;;  %v856_v48 = vld [vmem:[#allocation7 + $0x2b0] sm:$0xff] }
 0x232   :  { %v980_v54 = vld [vmem:[#allocation7 + $0x690] sm:$0xff]  ;;  %v11193_v56 = vcombine.high %v852_v43, %v856_v48  ;;  %v11192_v1 = vcombine.low %v852_v43, %v856_v48 }
 0x233   :  { %4246 = vmatpush1.bf16.msra.mxu0 %v11112_v60  ;;  %v11321_v60 = vcombine.high %v980_v54, %v984_v55  ;;  %v11320_v5 = vcombine.low %v980_v54, %v984_v55  ;;  %v1204_v35 = vld [vmem:[#allocation7 + $0xd90] sm:$0xff] }
 0x234   :  { %4289 = vmatpush1.bf16.msra.mxu1 %v11240_v50  ;;  %4247 = vmatprep.subr.bf16.mxu0 %v11233_v62  ;;  %v844_v50 = vld [vmem:[#allocation7 + $0x250] sm:$0xff] }
 0x235   :  { %4290 = vmatprep.subr.bf16.mxu1 %v11361_v7  ;;  %v848_v62 = vld [vmem:[#allocation7 + $0x270] sm:$0xff] }
 0x236   :  { %v972_v7 = vld [vmem:[#allocation7 + $0x650] sm:$0xff]  ;;  %v11185_v8 = vcombine.high %v844_v50, %v848_v62  ;;  %v11184_v51 = vcombine.low %v844_v50, %v848_v62 }
 0x237   :  { %4248 = vmatpush2.bf16.msra.mxu0 %v11232_v9  ;;  %v11313_v9 = vcombine.high %v972_v7, %v976_v63  ;;  %v11312_v46 = vcombine.low %v972_v7, %v976_v63  ;;  %v1208_v36 = vld [vmem:[#allocation7 + $0xdb0] sm:$0xff] }
 0x238   :  { %4291 = vmatpush2.bf16.msra.mxu1 %v11360_v11  ;;  %4249 = vmatprep.subr.bf16.mxu0 %v11225_v12  ;;  %v836_v11 = vld [vmem:[#allocation7 + $0x210] sm:$0xff]  ;;  %v11545_v48 = vcombine.high %v1204_v35, %v1208_v36  ;;  %v11544_v50 = vcombine.low %v1204_v35, %v1208_v36 }
 0x239   :  { %4292 = vmatprep.subr.bf16.mxu1 %v11353_v14  ;;  %v840_v12 = vld [vmem:[#allocation7 + $0x230] sm:$0xff] }
 0x23a   :  { %v964_v14 = vld [vmem:[#allocation7 + $0x610] sm:$0xff]  ;;  %v11177_v47 = vcombine.high %v836_v11, %v840_v12  ;;  %v11176_v26 = vcombine.low %v836_v11, %v840_v12 }
 0x23b   :  { %4250 = vmatpush2.bf16.msra.mxu0 %v11224_v21  ;;  %v11305_v21 = vcombine.high %v964_v14, %v968_v45  ;;  %v11304_v27 = vcombine.low %v964_v14, %v968_v45  ;;  %v1196_v54 = vld [vmem:[#allocation7 + $0xd50] sm:$0xff] }
 0x23c   :  { %4293 = vmatpush2.bf16.msra.mxu1 %v11352_v22  ;;  %4251 = vmatprep.subr.bf16.mxu0 %v11217_v23  ;;  %v1084_v22 = vld [vmem:[#allocation7 + $0x9d0] sm:$0xff] }
 0x23d   :  { %4294 = vmatprep.subr.bf16.mxu1 %v11345_v24  ;;  %v1088_v23 = vld [vmem:[#allocation7 + $0x9f0] sm:$0xff] }
 0x23e   :  { %v1212_v24 = vld [vmem:[#allocation7 + $0xdd0] sm:$0xff]  ;;  %v11425_v13 = vcombine.high %v1084_v22, %v1088_v23 }
 0x23f   :  { %4252 = vmatpush2.bf16.msra.mxu0 %v11216_v29  ;;  %v11553_v29 = vcombine.high %v1212_v24, %v1216_v25  ;;  %v11552_v38 = vcombine.low %v1212_v24, %v1216_v25  ;;  %v1200_v55 = vld [vmem:[#allocation7 + $0xd70] sm:$0xff] }
 0x240   :  { %4295 = vmatpush2.bf16.msra.mxu1 %v11344_v31  ;;  %4253 = vmatprep.subr.bf16.mxu0 %v11209_v10  ;;  %v1076_v31 = vld [vmem:[#allocation7 + $0x990] sm:$0xff] }
 0x241   :  { %4296 = vmatprep.subr.bf16.mxu1 %v11337_v34  ;;  %v1080_v10 = vld [vmem:[#allocation7 + $0x9b0] sm:$0xff]  ;;  %v11424_v34 = vcombine.low %v1084_v22, %v1088_v23 }
 0x242   :  { %v1192_v11 = vld [vmem:[#allocation7 + $0xd30] sm:$0xff] }
 0x243   :  { %4254 = vmatpush2.bf16.msra.mxu0 %v11208_v39  ;;  %v13438_v39 = vpop.f32.mrf.mxu1  ;;  %v1052_v22 = vld [vmem:[#allocation7 + $0x8d0] sm:$0xff] }
 0x244   :  { %4297 = vmatpush2.bf16.msra.mxu1 %v11336_v40  ;;  %4255 = vmatprep.subr.bf16.mxu0 %v11201_v17  ;;  %v11417_v40 = vcombine.high %v1076_v31, %v1080_v10  ;;  %v1068_v17 = vld [vmem:[#allocation7 + $0x950] sm:$0xff] }
 0x245   :  { %4298 = vmatprep.subr.bf16.mxu1 %v11329_v0  ;;  %v1072_v0 = vld [vmem:[#allocation7 + $0x970] sm:$0xff] }
 0x246   :  { %v11409_v62 = vcombine.high %v1068_v17, %v1072_v0  ;;  %v11408_v14 = vcombine.low %v1068_v17, %v1072_v0  ;;  %v1056_v23 = vld [vmem:[#allocation7 + $0x8f0] sm:$0xff] }
 0x247   :  { %4256 = vmatpush2.bf16.msra.mxu0 %v11200_v41  ;;  %v1180_v24 = vld [vmem:[#allocation7 + $0xcd0] sm:$0xff] }
 0x248   :  { %4299 = vmatpush2.bf16.msra.mxu1 %v11328_v2  ;;  %4257 = vmatprep.subr.bf16.mxu0 %v11193_v56  ;;  %v11416_v56 = vcombine.low %v1076_v31, %v1080_v10  ;;  %v1184_v25 = vld [vmem:[#allocation7 + $0xcf0] sm:$0xff] }
 0x249   :  { %4300 = vmatprep.subr.bf16.mxu1 %v11321_v60  ;;  %v11521_v10 = vcombine.high %v1180_v24, %v1184_v25  ;;  %v1048_v35 = vld [vmem:[#allocation7 + $0x8b0] sm:$0xff]  ;;  %v11520_v17 = vcombine.low %v1180_v24, %v1184_v25 }
 0x24a   :  { %v1172_v36 = vld [vmem:[#allocation7 + $0xc90] sm:$0xff] }
 0x24b   :  { %4258 = vmatpush2.bf16.msra.mxu0 %v11192_v1  ;;  %v11537_v1 = vcombine.high %v1196_v54, %v1200_v55  ;;  %v1140_v24 = vld [vmem:[#allocation7 + $0xb90] sm:$0xff] }
 0x24c   :  { %4301 = vmatpush2.bf16.msra.mxu1 %v11320_v5  ;;  %4259 = vmatprep.subr.bf16.mxu0 %v11185_v8  ;;  %v1064_v5 = vld [vmem:[#allocation7 + $0x930] sm:$0xff] }
 0x24d   :  { %4302 = vmatprep.subr.bf16.mxu1 %v11313_v9  ;;  %v1188_v9 = vld [vmem:[#allocation7 + $0xd10] sm:$0xff] }
 0x24e   :  { %v1144_v25 = vld [vmem:[#allocation7 + $0xbb0] sm:$0xff] }
 0x24f   :  { %4260 = vmatpush2.bf16.msra.mxu0 %v11184_v51  ;;  %v11536_v51 = vcombine.low %v1196_v54, %v1200_v55  ;;  %v1040_v54 = vld [vmem:[#allocation7 + $0x870] sm:$0xff] }
 0x250   :  { %4303 = vmatpush2.bf16.msra.mxu1 %v11312_v46  ;;  %4261 = vmatprep.subr.bf16.mxu0 %v11177_v47  ;;  %v1164_v55 = vld [vmem:[#allocation7 + $0xc50] sm:$0xff] }
 0x251   :  { %4304 = vmatprep.subr.bf16.mxu1 %v11305_v21  ;;  %v11529_v21 = vcombine.high %v1188_v9, %v1192_v11 }
 0x253   :  { %4262 = vmatpush2.bf16.msra.mxu0 %v11176_v26 }
 0x254   :  { %4305 = vmatpush2.bf16.msra.mxu1 %v11304_v27  ;;  %4317 = vmatprep.subr.bf16.mxu0 %v11425_v13 }
 0x255   :  { %4360 = vmatprep.subr.bf16.mxu1 %v11553_v29  ;;  %v11393_v29 = vcombine.high %v1052_v22, %v1056_v23 }
 0x256   :  { %v4007_v43 = vpop.f32.mrf.mxu0  ;;  %4264 = vmatmul.mubr.bf16.vlgmr.msra.gmra.mxu0 %v13354_v58  ;;  %v4050_v2 = vpop.f32.mrf.mxu1 }
 0x257   :  { %v4008_v41 = vadd.f32 %v4007_v43, %v13429_v49  ;;  %4307 = vmatmul.mubr.bf16.vlgmr.msra.gmra.mxu1 %v13358_v61  ;;  %4318 = vmatpush1.bf16.msra.mxu0 %v11424_v34  ;;  %v1060_v49 = vld [vmem:[#allocation7 + $0x910] sm:$0xff] }
 0x258   :  { %4349 = vmatprep.mubr.bf16.mxu0 %v13388_v28  ;;  %4361 = vmatpush1.bf16.msra.mxu1 %v11552_v38  ;;  %v13444_v60 = vpop.f32.mrf.mxu0  ;;  %v13447_v63 = vpop.f32.mrf.mxu1  ;;  %v11401_v46 = vcombine.high %v1060_v49, %v1064_v5  ;;  %v11400_v13 = vcombine.low %v1060_v49, %v1064_v5  ;;  %v1044_v34 = vld [vmem:[#allocation7 + $0x890] sm:$0xff] }
 0x259   :  { %v4051_v7 = vadd.f32 %v4050_v2, %v4008_v41  ;;  %4392 = vmatprep.mubr.bf16.mxu1 %v13390_v32  ;;  %4319 = vmatprep.subr.bf16.mxu0 %v11417_v40  ;;  %v1176_v38 = vld [vmem:[#allocation7 + $0xcb0] sm:$0xff]  ;;  %v11392_v40 = vcombine.low %v1052_v22, %v1056_v23  ;;  %v11385_v0 = vcombine.high %v1044_v34, %v1048_v35 }
 0x25a   :  { %v4011_v8 = vpop.f32.mrf.mxu0  ;;  %4362 = vmatprep.subr.bf16.mxu1 %v11545_v48  ;;  %v4054_v45 = vpop.f32.mrf.mxu1  ;;  %v11513_v43 = vcombine.high %v1172_v36, %v1176_v38  ;;  %v1036_v48 = vld [vmem:[#allocation7 + $0x850] sm:$0xff]  ;;  %v11384_v2 = vcombine.low %v1044_v34, %v1048_v35 }
 0x25b   :  { %v4012_v12 = vadd.f32 %v4011_v8, %v13434_v3  ;;  %4320 = vmatpush1.bf16.msra.mxu0 %v11416_v56  ;;  %v4575_v26 = vmax.f32 %v4051_v7, 0.0  ;;  %v11528_v3 = vcombine.low %v1188_v9, %v1192_v11  ;;  %v1168_v41 = vld [vmem:[#allocation7 + $0xc70] sm:$0xff]  ;;  %v11512_v56 = vcombine.low %v1172_v36, %v1176_v38 }
 0x25c   :  { %4363 = vmatpush1.bf16.msra.mxu1 %v11544_v50  ;;  %4321 = vmatprep.subr.bf16.mxu0 %v11409_v62  ;;  %v11377_v50 = vcombine.high %v1036_v48, %v1040_v54  ;;  %v11505_v62 = vcombine.high %v1164_v55, %v1168_v41  ;;  %v1028_v7 = vld [vmem:[#allocation7 + $0x810] sm:$0xff]  ;;  %v11376_v8 = vcombine.low %v1036_v48, %v1040_v54 }
 0x25d   :  { %v4055_v47 = vadd.f32 %v4054_v45, %v4012_v12  ;;  %4364 = vmatprep.subr.bf16.mxu1 %v11537_v1  ;;  %v1032_v1 = vld [vmem:[#allocation7 + $0x830] sm:$0xff]  ;;  %v11504_v9 = vcombine.low %v1164_v55, %v1168_v41 }
 0x25e   :  { %v1156_v49 = vld [vmem:[#allocation7 + $0xc10] sm:$0xff]  ;;  %v11369_v11 = vcombine.high %v1028_v7, %v1032_v1 }
 0x25f   :  { %v4583_v27 = vmax.f32 %v4055_v47, 0.0  ;;  %4322 = vmatpush1.bf16.msra.mxu0 %v11408_v14  ;;  %v1160_v5 = vld [vmem:[#allocation7 + $0xc30] sm:$0xff]  ;;  %v11368_v47 = vcombine.low %v1028_v7, %v1032_v1 }
 0x260   :  { %4365 = vmatpush1.bf16.msra.mxu1 %v11536_v51  ;;  %4323 = vmatprep.subr.bf16.mxu0 %v11401_v46  ;;  %v11497_v12 = vcombine.high %v1156_v49, %v1160_v5  ;;  %v1148_v14 = vld [vmem:[#allocation7 + $0xbd0] sm:$0xff] }
 0x261   :  { %v13450_v31 = vpack.c.bf16 %v4583_v27, %v4575_v26  ;;  %4366 = vmatprep.subr.bf16.mxu1 %v11529_v21  ;;  %v1152_v45 = vld [vmem:[#allocation7 + $0xbf0] sm:$0xff]  ;;  %v11496_v21 = vcombine.low %v1156_v49, %v1160_v5 }
 0x262   :  { %v1276_v51 = vld [vmem:[#allocation7 + $0xfd0] sm:$0xff]  ;;  %v11489_v22 = vcombine.high %v1148_v14, %v1152_v45 }
 0x263   :  { %4324 = vmatpush1.bf16.msra.mxu0 %v11400_v13  ;;  %v1280_v46 = vld [vmem:[#allocation7 + $0xff0] sm:$0xff]  ;;  %v11488_v13 = vcombine.low %v1148_v14, %v1152_v45 }
 0x264   :  { %4367 = vmatpush1.bf16.msra.mxu1 %v11528_v3  ;;  %4325 = vmatprep.subr.bf16.mxu0 %v11393_v29  ;;  %v11617_v23 = vcombine.high %v1276_v51, %v1280_v46  ;;  %v1268_v26 = vld [vmem:[#allocation7 + $0xf90] sm:$0xff]  ;;  %v11616_v3 = vcombine.low %v1276_v51, %v1280_v46  ;;  %v11481_v29 = vcombine.high %v1140_v24, %v1144_v25 }
 0x265   :  { %4368 = vmatprep.subr.bf16.mxu1 %v11521_v10  ;;  %v1272_v27 = vld [vmem:[#allocation7 + $0xfb0] sm:$0xff] }
 0x266   :  { %v11609_v10 = vcombine.high %v1268_v26, %v1272_v27  ;;  %v1132_v34 = vld [vmem:[#allocation7 + $0xb50] sm:$0xff] }
 0x267   :  { %4326 = vmatpush1.bf16.msra.mxu0 %v11392_v40  ;;  %v1136_v35 = vld [vmem:[#allocation7 + $0xb70] sm:$0xff]  ;;  %v11480_v40 = vcombine.low %v1140_v24, %v1144_v25 }
 0x268   :  { %4369 = vmatpush1.bf16.msra.mxu1 %v11520_v17  ;;  %4327 = vmatprep.subr.bf16.mxu0 %v11385_v0  ;;  %v1260_v36 = vld [vmem:[#allocation7 + $0xf50] sm:$0xff]  ;;  %v11608_v17 = vcombine.low %v1268_v26, %v1272_v27  ;;  %v11473_v0 = vcombine.high %v1132_v34, %v1136_v35 }
 0x269   :  { %4370 = vmatprep.subr.bf16.mxu1 %v11513_v43  ;;  %v1264_v38 = vld [vmem:[#allocation7 + $0xf70] sm:$0xff] }
 0x26a   :  { %v11601_v43 = vcombine.high %v1260_v36, %v1264_v38  ;;  %v1124_v48 = vld [vmem:[#allocation7 + $0xb10] sm:$0xff] }
 0x26b   :  { %4328 = vmatpush1.bf16.msra.mxu0 %v11384_v2  ;;  %v1128_v54 = vld [vmem:[#allocation7 + $0xb30] sm:$0xff]  ;;  %v11472_v2 = vcombine.low %v1132_v34, %v1136_v35 }
 0x26c   :  { %4371 = vmatpush1.bf16.msra.mxu1 %v11512_v56  ;;  %4329 = vmatprep.subr.bf16.mxu0 %v11377_v50  ;;  %v1252_v55 = vld [vmem:[#allocation7 + $0xf10] sm:$0xff]  ;;  %v11600_v56 = vcombine.low %v1260_v36, %v1264_v38  ;;  %v11465_v50 = vcombine.high %v1124_v48, %v1128_v54 }
 0x26d   :  { %4372 = vmatprep.subr.bf16.mxu1 %v11505_v62  ;;  %v1256_v41 = vld [vmem:[#allocation7 + $0xf30] sm:$0xff] }
 0x26e   :  { %v11593_v62 = vcombine.high %v1252_v55, %v1256_v41  ;;  %v1116_v7 = vld [vmem:[#allocation7 + $0xad0] sm:$0xff] }
 0x26f   :  { %4330 = vmatpush1.bf16.msra.mxu0 %v11376_v8  ;;  %v1120_v1 = vld [vmem:[#allocation7 + $0xaf0] sm:$0xff]  ;;  %v11464_v8 = vcombine.low %v1124_v48, %v1128_v54  ;;  %v829_v48 = vld [vmem:[#allocation7 + $0x1d8] sm:$0xff] }
 0x270   :  { %4373 = vmatpush1.bf16.msra.mxu1 %v11504_v9  ;;  %4331 = vmatprep.subr.bf16.mxu0 %v11369_v11  ;;  %v1244_v49 = vld [vmem:[#allocation7 + $0xed0] sm:$0xff]  ;;  %v11592_v9 = vcombine.low %v1252_v55, %v1256_v41  ;;  %v11457_v11 = vcombine.high %v1116_v7, %v1120_v1  ;;  %v833_v54 = vld [vmem:[#allocation7 + $0x1f8] sm:$0xff] }
 0x271   :  { %4374 = vmatprep.subr.bf16.mxu1 %v11497_v12  ;;  %v1248_v5 = vld [vmem:[#allocation7 + $0xef0] sm:$0xff]  ;;  %v957_v55 = vld [vmem:[#allocation7 + $0x5d8] sm:$0xff] }
 0x272   :  { %v11585_v12 = vcombine.high %v1244_v49, %v1248_v5  ;;  %v1108_v14 = vld [vmem:[#allocation7 + $0xa90] sm:$0xff]  ;;  %v961_v41 = vld [vmem:[#allocation7 + $0x5f8] sm:$0xff] }
 0x273   :  { %4332 = vmatpush1.bf16.msra.mxu0 %v11368_v47  ;;  %v1112_v45 = vld [vmem:[#allocation7 + $0xab0] sm:$0xff]  ;;  %v11456_v47 = vcombine.low %v1116_v7, %v1120_v1  ;;  %v821_v7 = vld [vmem:[#allocation7 + $0x198] sm:$0xff] }
 0x274   :  { %4375 = vmatpush1.bf16.msra.mxu1 %v11496_v21  ;;  %4333 = vmatprep.subr.bf16.mxu0 %v11489_v22  ;;  %v1236_v51 = vld [vmem:[#allocation7 + $0xe90] sm:$0xff]  ;;  %v11584_v21 = vcombine.low %v1244_v49, %v1248_v5  ;;  %v11449_v22 = vcombine.high %v1108_v14, %v1112_v45  ;;  %v825_v1 = vld [vmem:[#allocation7 + $0x1b8] sm:$0xff]  ;;  %v1298_v49 = vrot.slane %v13420_v52, %v13342_v20 }
 0x275   :  { %4376 = vmatprep.subr.bf16.mxu1 %v11617_v23  ;;  %v1240_v46 = vld [vmem:[#allocation7 + $0xeb0] sm:$0xff]  ;;  %v11170_v5 = vcombine.low %v829_v48, %v833_v54 }
 0x276   :  { %v11577_v23 = vcombine.high %v1236_v51, %v1240_v46  ;;  %v1100_v24 = vld [vmem:[#allocation7 + $0xa50] sm:$0xff] }
 0x277   :  { %4334 = vmatpush2.bf16.msra.mxu0 %v11488_v13  ;;  %v1104_v25 = vld [vmem:[#allocation7 + $0xa70] sm:$0xff]  ;;  %v11448_v13 = vcombine.low %v1108_v14, %v1112_v45  ;;  %v13456_v14 = vpop.f32.mrf.mxu1  ;;  %v11163_v45 = vcombine.high %v821_v7, %v825_v1 }
 0x278   :  { %4377 = vmatpush2.bf16.msra.mxu1 %v11616_v3  ;;  %4335 = vmatprep.subr.bf16.mxu0 %v11481_v29  ;;  %v1228_v26 = vld [vmem:[#allocation7 + $0xe50] sm:$0xff]  ;;  %v11576_v3 = vcombine.low %v1236_v51, %v1240_v46  ;;  %v11441_v29 = vcombine.high %v1100_v24, %v1104_v25  ;;  %v813_v51 = vld [vmem:[#allocation7 + $0x158] sm:$0xff] }
 0x279   :  { %4378 = vmatprep.subr.bf16.mxu1 %v11609_v10  ;;  %v1232_v27 = vld [vmem:[#allocation7 + $0xe70] sm:$0xff]  ;;  %v817_v46 = vld [vmem:[#allocation7 + $0x178] sm:$0xff] }
 0x27a   :  { %v11569_v10 = vcombine.high %v1228_v26, %v1232_v27  ;;  %v1092_v34 = vld [vmem:[#allocation7 + $0xa10] sm:$0xff] }
 0x27b   :  { %4336 = vmatpush2.bf16.msra.mxu0 %v11480_v40  ;;  %v1096_v35 = vld [vmem:[#allocation7 + $0xa30] sm:$0xff]  ;;  %v11440_v40 = vcombine.low %v1100_v24, %v1104_v25 }
 0x27c   :  { %4379 = vmatpush2.bf16.msra.mxu1 %v11608_v17  ;;  %4337 = vmatprep.subr.bf16.mxu0 %v11473_v0  ;;  %v1220_v36 = vld [vmem:[#allocation7 + $0xe10] sm:$0xff]  ;;  %v11568_v17 = vcombine.low %v1228_v26, %v1232_v27  ;;  %v11433_v0 = vcombine.high %v1092_v34, %v1096_v35  ;;  %v11162_v26 = vcombine.low %v821_v7, %v825_v1  ;;  %v929_v7 = vld [vmem:[#allocation7 + $0x4f8] sm:$0xff] }
 0x27d   :  { %4380 = vmatprep.subr.bf16.mxu1 %v11601_v43  ;;  %v1224_v38 = vld [vmem:[#allocation7 + $0xe30] sm:$0xff] }
 0x27e   :  { %v11561_v43 = vcombine.high %v1220_v36, %v1224_v38 }
 0x27f   :  { %4338 = vmatpush2.bf16.msra.mxu0 %v11472_v2  ;;  %v11432_v2 = vcombine.low %v1092_v34, %v1096_v35  ;;  %v805_v35 = vld [vmem:[#allocation7 + $0x118] sm:$0xff] }
 0x280   :  { %4381 = vmatpush2.bf16.msra.mxu1 %v11600_v56  ;;  %4339 = vmatprep.subr.bf16.mxu0 %v11465_v50  ;;  %v11560_v56 = vcombine.low %v1220_v36, %v1224_v38  ;;  %v11171_v50 = vcombine.high %v829_v48, %v833_v54  ;;  %v809_v36 = vld [vmem:[#allocation7 + $0x138] sm:$0xff] }
 0x281   :  { %4382 = vmatprep.subr.bf16.mxu1 %v11593_v62  ;;  %v11299_v62 = vcombine.high %v957_v55, %v961_v41  ;;  %v11146_v1 = vcombine.low %v805_v35, %v809_v36 }
 0x283   :  { %4340 = vmatpush2.bf16.msra.mxu0 %v11464_v8  ;;  %v949_v8 = vld [vmem:[#allocation7 + $0x598] sm:$0xff] }
 0x284   :  { %4383 = vmatpush2.bf16.msra.mxu1 %v11592_v9  ;;  %4341 = vmatprep.subr.bf16.mxu0 %v11457_v11  ;;  %v953_v9 = vld [vmem:[#allocation7 + $0x5b8] sm:$0xff]  ;;  %v13454_v11 = vpop.f32.mrf.mxu0 }
 0x285   :  { %4384 = vmatprep.subr.bf16.mxu1 %v11585_v12  ;;  %v11298_v12 = vcombine.low %v957_v55, %v961_v41  ;;  %v11147_v55 = vcombine.high %v805_v35, %v809_v36  ;;  %v773_v36 = vld [vmem:[#allocation7 + $0x18] sm:$0xff] }
 0x287   :  { %4342 = vmatpush2.bf16.msra.mxu0 %v11456_v47 }
 0x288   :  { %4385 = vmatpush2.bf16.msra.mxu1 %v11584_v21  ;;  %4343 = vmatprep.subr.bf16.mxu0 %v11449_v22  ;;  %v11291_v21 = vcombine.high %v949_v8, %v953_v9  ;;  %v941_v22 = vld [vmem:[#allocation7 + $0x558] sm:$0xff] }
 0x289   :  { %4386 = vmatprep.subr.bf16.mxu1 %v11577_v23  ;;  %v945_v23 = vld [vmem:[#allocation7 + $0x578] sm:$0xff] }
 0x28a   :  { %v11283_v34 = vcombine.high %v941_v22, %v945_v23  ;;  %v11282_v54 = vcombine.low %v941_v22, %v945_v23  ;;  %v781_v23 = vld [vmem:[#allocation7 + $0x58] sm:$0xff] }
 0x28b   :  { %4344 = vmatpush2.bf16.msra.mxu0 %v11448_v13  ;;  %v11290_v13 = vcombine.low %v949_v8, %v953_v9  ;;  %v789_v9 = vld [vmem:[#allocation7 + $0x98] sm:$0xff] }
 0x28c   :  { %4387 = vmatpush2.bf16.msra.mxu1 %v11576_v3  ;;  %4345 = vmatprep.subr.bf16.mxu0 %v11441_v29  ;;  %v11155_v3 = vcombine.high %v813_v51, %v817_v46 }
 0x28d   :  { %4388 = vmatprep.subr.bf16.mxu1 %v11569_v10 }
 0x28f   :  { %4346 = vmatpush2.bf16.msra.mxu0 %v11440_v40  ;;  %v933_v40 = vld [vmem:[#allocation7 + $0x518] sm:$0xff] }
 0x290   :  { %4389 = vmatpush2.bf16.msra.mxu1 %v11568_v17  ;;  %4347 = vmatprep.subr.bf16.mxu0 %v11433_v0  ;;  %v937_v17 = vld [vmem:[#allocation7 + $0x538] sm:$0xff] }
 0x291   :  { %4390 = vmatprep.subr.bf16.mxu1 %v11561_v43  ;;  %v11154_v43 = vcombine.low %v813_v51, %v817_v46  ;;  %v921_v51 = vld [vmem:[#allocation7 + $0x4b8] sm:$0xff] }
 0x293   :  { %4348 = vmatpush2.bf16.msra.mxu0 %v11432_v2  ;;  %v11275_v2 = vcombine.high %v933_v40, %v937_v17 }
 0x294   :  { %4391 = vmatpush2.bf16.msra.mxu1 %v11560_v56  ;;  %4403 = vmatprep.subr.bf16.mxu0 %v11171_v50  ;;  %v797_v56 = vld [vmem:[#allocation7 + $0xd8] sm:$0xff] }
 0x295   :  { %4446 = vmatprep.subr.bf16.mxu1 %v11299_v62  ;;  %v801_v50 = vld [vmem:[#allocation7 + $0xf8] sm:$0xff] }
 0x296   :  { %v4093_v47 = vpop.f32.mrf.mxu0  ;;  %4350 = vmatmul.mubr.bf16.vlgmr.msra.gmra.mxu0 %v13408_v4  ;;  %v925_v62 = vld [vmem:[#allocation7 + $0x4d8] sm:$0xff]  ;;  %v11138_v46 = vcombine.low %v797_v56, %v801_v50 }
 0x297   :  { %v4094_v24 = vadd.f32 %v4093_v47, %v1298_v49  ;;  %v4136_v25 = vpop.f32.mrf.mxu1  ;;  %4393 = vmatmul.mubr.bf16.vlgmr.msra.gmra.mxu1 %v13410_v6  ;;  %4404 = vmatpush1.bf16.msra.mxu0 %v11170_v5  ;;  %v11139_v5 = vcombine.high %v797_v56, %v801_v50  ;;  %v11267_v8 = vcombine.high %v925_v62, %v929_v7  ;;  %v1021_v56 = vld [vmem:[#allocation7 + $0x7d8] sm:$0xff] }
 0x298   :  { %4435 = vmatprep.mubr.bf16.mxu0 %v13352_v57  ;;  %4447 = vmatpush1.bf16.msra.mxu1 %v11298_v12  ;;  %v13461_v27 = vpop.f32.mrf.mxu0  ;;  %v793_v12 = vld [vmem:[#allocation7 + $0xb8] sm:$0xff]  ;;  %v11266_v47 = vcombine.low %v925_v62, %v929_v7 }
 0x299   :  { %v13463_v29 = vadd.f32 %v4136_v25, %v4094_v24  ;;  %4478 = vmatprep.mubr.bf16.mxu1 %v13356_v59  ;;  %v13466_v10 = vpop.f32.mrf.mxu1  ;;  %4405 = vmatprep.subr.bf16.mxu0 %v11163_v45  ;;  %v917_v45 = vld [vmem:[#allocation7 + $0x498] sm:$0xff] }
 0x29a   :  { %v4097_v38 = vpop.f32.mrf.mxu0  ;;  %4448 = vmatprep.subr.bf16.mxu1 %v11291_v21  ;;  %v11131_v21 = vcombine.high %v789_v9, %v793_v12  ;;  %v11259_v22 = vcombine.high %v917_v45, %v921_v51  ;;  %v785_v24 = vld [vmem:[#allocation7 + $0x78] sm:$0xff] }
 0x29b   :  { %v4098_v0 = vadd.f32 %v4097_v38, %v1298_v49  ;;  %4406 = vmatpush1.bf16.msra.mxu0 %v11162_v26  ;;  %v4140_v48 = vpop.f32.mrf.mxu1  ;;  %v11274_v49 = vcombine.low %v933_v40, %v937_v17  ;;  %v909_v25 = vld [vmem:[#allocation7 + $0x458] sm:$0xff] }
 0x29c   :  { %4449 = vmatpush1.bf16.msra.mxu1 %v11290_v13  ;;  %4407 = vmatprep.subr.bf16.mxu0 %v11155_v3  ;;  %v913_v26 = vld [vmem:[#allocation7 + $0x478] sm:$0xff]  ;;  %v11130_v13 = vcombine.low %v789_v9, %v793_v12  ;;  %v11258_v3 = vcombine.low %v917_v45, %v921_v51 }
 0x29d   :  { %v13468_v41 = vadd.f32 %v4140_v48, %v4098_v0  ;;  %4450 = vmatprep.subr.bf16.mxu1 %v11283_v34  ;;  %v11123_v34 = vcombine.high %v781_v23, %v785_v24  ;;  %v11251_v35 = vcombine.high %v909_v25, %v913_v26  ;;  %v777_v38 = vld [vmem:[#allocation7 + $0x38] sm:$0xff]  ;;  %v11122_v0 = vcombine.low %v781_v23, %v785_v24 }
 0x29e   :  { %v901_v40 = vld [vmem:[#allocation7 + $0x418] sm:$0xff]  ;;  %v11115_v48 = vcombine.high %v773_v36, %v777_v38  ;;  %v11114_v62 = vcombine.low %v773_v36, %v777_v38 }
 0x29f   :  { %4408 = vmatpush1.bf16.msra.mxu0 %v11154_v43  ;;  %v905_v17 = vld [vmem:[#allocation7 + $0x438] sm:$0xff]  ;;  %v11250_v43 = vcombine.low %v909_v25, %v913_v26 }
 0x2a0   :  { %4451 = vmatpush1.bf16.msra.mxu1 %v11282_v54  ;;  %4409 = vmatprep.subr.bf16.mxu0 %v11147_v55  ;;  %v11243_v54 = vcombine.high %v901_v40, %v905_v17  ;;  %v893_v55 = vld [vmem:[#allocation7 + $0x3d8] sm:$0xff]  ;;  %v11242_v7 = vcombine.low %v901_v40, %v905_v17 }
 0x2a1   :  { %4452 = vmatprep.subr.bf16.mxu1 %v11275_v2  ;;  %v897_v2 = vld [vmem:[#allocation7 + $0x3f8] sm:$0xff] }
 0x2a2   :  { %v1025_v50 = vld [vmem:[#allocation7 + $0x7f8] sm:$0xff]  ;;  %v11234_v45 = vcombine.low %v893_v55, %v897_v2 }
 0x2a3   :  { %4410 = vmatpush1.bf16.msra.mxu0 %v11146_v1  ;;  %v11235_v1 = vcombine.high %v893_v55, %v897_v2  ;;  %v1013_v9 = vld [vmem:[#allocation7 + $0x798] sm:$0xff]  ;;  %v11362_v51 = vcombine.low %v1021_v56, %v1025_v50 }
 0x2a4   :  { %4453 = vmatpush1.bf16.msra.mxu1 %v11274_v49  ;;  %4411 = vmatprep.subr.bf16.mxu0 %v11139_v5  ;;  %v11363_v49 = vcombine.high %v1021_v56, %v1025_v50  ;;  %v885_v5 = vld [vmem:[#allocation7 + $0x398] sm:$0xff] }
 0x2a5   :  { %4454 = vmatprep.subr.bf16.mxu1 %v11267_v8  ;;  %v889_v8 = vld [vmem:[#allocation7 + $0x3b8] sm:$0xff] }
 0x2a6   :  { %v1017_v12 = vld [vmem:[#allocation7 + $0x7b8] sm:$0xff]  ;;  %v11226_v25 = vcombine.low %v885_v5, %v889_v8 }
 0x2a7   :  { %4412 = vmatpush1.bf16.msra.mxu0 %v11138_v46  ;;  %v11227_v46 = vcombine.high %v885_v5, %v889_v8  ;;  %v1005_v23 = vld [vmem:[#allocation7 + $0x758] sm:$0xff]  ;;  %v11354_v26 = vcombine.low %v1013_v9, %v1017_v12 }
 0x2a8   :  { %4455 = vmatpush1.bf16.msra.mxu1 %v11266_v47  ;;  %4413 = vmatprep.subr.bf16.mxu0 %v11131_v21  ;;  %v11355_v47 = vcombine.high %v1013_v9, %v1017_v12  ;;  %v877_v21 = vld [vmem:[#allocation7 + $0x358] sm:$0xff] }
 0x2a9   :  { %4456 = vmatprep.subr.bf16.mxu1 %v11259_v22  ;;  %v881_v22 = vld [vmem:[#allocation7 + $0x378] sm:$0xff] }
 0x2aa   :  { %v1009_v24 = vld [vmem:[#allocation7 + $0x778] sm:$0xff]  ;;  %v11218_v40 = vcombine.low %v877_v21, %v881_v22 }
 0x2ab   :  { %4414 = vmatpush1.bf16.msra.mxu0 %v11130_v13  ;;  %v11219_v13 = vcombine.high %v877_v21, %v881_v22  ;;  %v997_v36 = vld [vmem:[#allocation7 + $0x718] sm:$0xff]  ;;  %v11346_v17 = vcombine.low %v1005_v23, %v1009_v24 }
 0x2ac   :  { %4457 = vmatpush1.bf16.msra.mxu1 %v11258_v3  ;;  %4415 = vmatprep.subr.bf16.mxu0 %v11123_v34  ;;  %v11347_v3 = vcombine.high %v1005_v23, %v1009_v24  ;;  %v869_v34 = vld [vmem:[#allocation7 + $0x318] sm:$0xff] }
 0x2ad   :  { %4458 = vmatprep.subr.bf16.mxu1 %v11251_v35  ;;  %v873_v35 = vld [vmem:[#allocation7 + $0x338] sm:$0xff] }
 0x2ae   :  { %v1001_v38 = vld [vmem:[#allocation7 + $0x738] sm:$0xff]  ;;  %v11210_v56 = vcombine.low %v869_v34, %v873_v35 }
 0x2af   :  { %4416 = vmatpush1.bf16.msra.mxu0 %v11122_v0  ;;  %v11211_v0 = vcombine.high %v869_v34, %v873_v35  ;;  %v989_v55 = vld [vmem:[#allocation7 + $0x6d8] sm:$0xff]  ;;  %v11338_v50 = vcombine.low %v997_v36, %v1001_v38 }
 0x2b0   :  { %4459 = vmatpush1.bf16.msra.mxu1 %v11250_v43  ;;  %4417 = vmatprep.subr.bf16.mxu0 %v11115_v48  ;;  %v11339_v43 = vcombine.high %v997_v36, %v1001_v38  ;;  %v861_v48 = vld [vmem:[#allocation7 + $0x2d8] sm:$0xff] }
 0x2b1   :  { %4460 = vmatprep.subr.bf16.mxu1 %v11243_v54  ;;  %v865_v54 = vld [vmem:[#allocation7 + $0x2f8] sm:$0xff] }
 0x2b2   :  { %v993_v2 = vld [vmem:[#allocation7 + $0x6f8] sm:$0xff]  ;;  %v11202_v9 = vcombine.low %v861_v48, %v865_v54 }
 0x2b3   :  { %4418 = vmatpush1.bf16.msra.mxu0 %v11114_v62  ;;  %v11203_v62 = vcombine.high %v861_v48, %v865_v54  ;;  %v981_v5 = vld [vmem:[#allocation7 + $0x698] sm:$0xff]  ;;  %v11330_v12 = vcombine.low %v989_v55, %v993_v2 }
 0x2b4   :  { %4461 = vmatpush1.bf16.msra.mxu1 %v11242_v7  ;;  %4419 = vmatprep.subr.bf16.mxu0 %v11235_v1  ;;  %v11331_v7 = vcombine.high %v989_v55, %v993_v2  ;;  %v853_v1 = vld [vmem:[#allocation7 + $0x298] sm:$0xff] }
 0x2b5   :  { %4462 = vmatprep.subr.bf16.mxu1 %v11363_v49  ;;  %v857_v49 = vld [vmem:[#allocation7 + $0x2b8] sm:$0xff] }
 0x2b6   :  { %v985_v8 = vld [vmem:[#allocation7 + $0x6b8] sm:$0xff]  ;;  %v11194_v23 = vcombine.low %v853_v1, %v857_v49 }
 0x2b7   :  { %4420 = vmatpush2.bf16.msra.mxu0 %v11234_v45  ;;  %v11195_v45 = vcombine.high %v853_v1, %v857_v49  ;;  %v973_v21 = vld [vmem:[#allocation7 + $0x658] sm:$0xff]  ;;  %v11322_v24 = vcombine.low %v981_v5, %v985_v8 }
 0x2b8   :  { %4463 = vmatpush2.bf16.msra.mxu1 %v11362_v51  ;;  %4421 = vmatprep.subr.bf16.mxu0 %v11227_v46  ;;  %v11323_v51 = vcombine.high %v981_v5, %v985_v8  ;;  %v845_v46 = vld [vmem:[#allocation7 + $0x258] sm:$0xff]  ;;  %v13470_v8 = vpop.f32.mrf.mxu0 }
 0x2b9   :  { %4464 = vmatprep.subr.bf16.mxu1 %v11355_v47  ;;  %v849_v47 = vld [vmem:[#allocation7 + $0x278] sm:$0xff] }
 0x2ba   :  { %v977_v22 = vld [vmem:[#allocation7 + $0x678] sm:$0xff]  ;;  %v11186_v36 = vcombine.low %v845_v46, %v849_v47 }
 0x2bb   :  { %4422 = vmatpush2.bf16.msra.mxu0 %v11226_v25  ;;  %v11187_v25 = vcombine.high %v845_v46, %v849_v47  ;;  %v965_v34 = vld [vmem:[#allocation7 + $0x618] sm:$0xff]  ;;  %v11314_v38 = vcombine.low %v973_v21, %v977_v22 }
 0x2bc   :  { %4465 = vmatpush2.bf16.msra.mxu1 %v11354_v26  ;;  %4423 = vmatprep.subr.bf16.mxu0 %v11219_v13  ;;  %v11315_v26 = vcombine.high %v973_v21, %v977_v22  ;;  %v837_v13 = vld [vmem:[#allocation7 + $0x218] sm:$0xff] }
 0x2bd   :  { %4466 = vmatprep.subr.bf16.mxu1 %v11347_v3  ;;  %v841_v3 = vld [vmem:[#allocation7 + $0x238] sm:$0xff] }
 0x2be   :  { %v969_v35 = vld [vmem:[#allocation7 + $0x638] sm:$0xff]  ;;  %v11178_v55 = vcombine.low %v837_v13, %v841_v3 }
 0x2bf   :  { %4424 = vmatpush2.bf16.msra.mxu0 %v11218_v40  ;;  %v11179_v40 = vcombine.high %v837_v13, %v841_v3  ;;  %v1213_v48 = vld [vmem:[#allocation7 + $0xdd8] sm:$0xff]  ;;  %v11306_v2 = vcombine.low %v965_v34, %v969_v35 }
 0x2c0   :  { %4467 = vmatpush2.bf16.msra.mxu1 %v11346_v17  ;;  %4425 = vmatprep.subr.bf16.mxu0 %v11211_v0  ;;  %v11307_v17 = vcombine.high %v965_v34, %v969_v35  ;;  %v1085_v0 = vld [vmem:[#allocation7 + $0x9d8] sm:$0xff] }
 0x2c1   :  { %4468 = vmatprep.subr.bf16.mxu1 %v11339_v43  ;;  %v1089_v43 = vld [vmem:[#allocation7 + $0x9f8] sm:$0xff] }
 0x2c2   :  { %v1217_v54 = vld [vmem:[#allocation7 + $0xdf8] sm:$0xff]  ;;  %v11426_v1 = vcombine.low %v1085_v0, %v1089_v43 }
 0x2c3   :  { %4426 = vmatpush2.bf16.msra.mxu0 %v11210_v56  ;;  %v11427_v56 = vcombine.high %v1085_v0, %v1089_v43  ;;  %v1205_v49 = vld [vmem:[#allocation7 + $0xd98] sm:$0xff] }
 0x2c4   :  { %4469 = vmatpush2.bf16.msra.mxu1 %v11338_v50  ;;  %4427 = vmatprep.subr.bf16.mxu0 %v11203_v62  ;;  %v11555_v50 = vcombine.high %v1213_v48, %v1217_v54  ;;  %v1077_v62 = vld [vmem:[#allocation7 + $0x998] sm:$0xff] }
 0x2c5   :  { %4470 = vmatprep.subr.bf16.mxu1 %v11331_v7  ;;  %v1081_v7 = vld [vmem:[#allocation7 + $0x9b8] sm:$0xff] }
 0x2c6   :  { %v1209_v5 = vld [vmem:[#allocation7 + $0xdb8] sm:$0xff] }
 0x2c7   :  { %4428 = vmatpush2.bf16.msra.mxu0 %v11202_v9  ;;  %v11554_v9 = vcombine.low %v1213_v48, %v1217_v54  ;;  %v1073_v46 = vld [vmem:[#allocation7 + $0x978] sm:$0xff]  ;;  %v11547_v21 = vcombine.high %v1205_v49, %v1209_v5  ;;  %v11546_v3 = vcombine.low %v1205_v49, %v1209_v5 }
 0x2c8   :  { %4471 = vmatpush2.bf16.msra.mxu1 %v11330_v12  ;;  %4429 = vmatprep.subr.bf16.mxu0 %v11195_v45  ;;  %v13472_v12 = vpop.f32.mrf.mxu1  ;;  %v11419_v45 = vcombine.high %v1077_v62, %v1081_v7  ;;  %v1197_v22 = vld [vmem:[#allocation7 + $0xd58] sm:$0xff] }
 0x2c9   :  { %4472 = vmatprep.subr.bf16.mxu1 %v11323_v51  ;;  %v1069_v51 = vld [vmem:[#allocation7 + $0x958] sm:$0xff] }
 0x2ca   :  { %v11411_v34 = vcombine.high %v1069_v51, %v1073_v46  ;;  %v1189_v0 = vld [vmem:[#allocation7 + $0xd18] sm:$0xff]  ;;  %v11410_v54 = vcombine.low %v1069_v51, %v1073_v46 }
 0x2cb   :  { %4430 = vmatpush2.bf16.msra.mxu0 %v11194_v23  ;;  %v1201_v23 = vld [vmem:[#allocation7 + $0xd78] sm:$0xff] }
 0x2cc   :  { %4473 = vmatpush2.bf16.msra.mxu1 %v11322_v24  ;;  %4431 = vmatprep.subr.bf16.mxu0 %v11187_v25  ;;  %v1193_v43 = vld [vmem:[#allocation7 + $0xd38] sm:$0xff] }
 0x2cd   :  { %4474 = vmatprep.subr.bf16.mxu1 %v11315_v26  ;;  %v11418_v26 = vcombine.low %v1077_v62, %v1081_v7  ;;  %v11531_v62 = vcombine.high %v1189_v0, %v1193_v43  ;;  %v1053_v7 = vld [vmem:[#allocation7 + $0x8d8] sm:$0xff] }
 0x2ce   :  { %v1181_v49 = vld [vmem:[#allocation7 + $0xcd8] sm:$0xff] }
 0x2cf   :  { %4432 = vmatpush2.bf16.msra.mxu0 %v11186_v36  ;;  %v1185_v5 = vld [vmem:[#allocation7 + $0xcf8] sm:$0xff] }
 0x2d0   :  { %4475 = vmatpush2.bf16.msra.mxu1 %v11314_v38  ;;  %4433 = vmatprep.subr.bf16.mxu0 %v11179_v40  ;;  %v11539_v38 = vcombine.high %v1197_v22, %v1201_v23  ;;  %v1065_v40 = vld [vmem:[#allocation7 + $0x938] sm:$0xff] }
 0x2d1   :  { %4476 = vmatprep.subr.bf16.mxu1 %v11307_v17 }
 0x2d3   :  { %4434 = vmatpush2.bf16.msra.mxu0 %v11178_v55 }
 0x2d4   :  { %4477 = vmatpush2.bf16.msra.mxu1 %v11306_v2  ;;  %4489 = vmatprep.subr.bf16.mxu0 %v11427_v56  ;;  %v11538_v2 = vcombine.low %v1197_v22, %v1201_v23  ;;  %v1045_v22 = vld [vmem:[#allocation7 + $0x898] sm:$0xff] }
 0x2d5   :  { %4532 = vmatprep.subr.bf16.mxu1 %v11555_v50  ;;  %v1049_v23 = vld [vmem:[#allocation7 + $0x8b8] sm:$0xff] }
 0x2d6   :  { %v4179_v47 = vpop.f32.mrf.mxu0  ;;  %4436 = vmatmul.mubr.bf16.vlgmr.msra.gmra.mxu0 %v13354_v58 }
 0x2d7   :  { %v4180_v24 = vadd.f32 %v4179_v47, %v13463_v29  ;;  %v4222_v25 = vpop.f32.mrf.mxu1  ;;  %4479 = vmatmul.mubr.bf16.vlgmr.msra.gmra.mxu1 %v13358_v61  ;;  %4490 = vmatpush1.bf16.msra.mxu0 %v11426_v1  ;;  %v1061_v29 = vld [vmem:[#allocation7 + $0x918] sm:$0xff] }
 0x2d8   :  { %4521 = vmatprep.mubr.bf16.mxu0 %v13388_v28  ;;  %4533 = vmatpush1.bf16.msra.mxu1 %v11554_v9  ;;  %v13478_v13 = vpop.f32.mrf.mxu0  ;;  %v11403_v56 = vcombine.high %v1061_v29, %v1065_v40  ;;  %v1057_v1 = vld [vmem:[#allocation7 + $0x8f8] sm:$0xff]  ;;  %v11402_v47 = vcombine.low %v1061_v29, %v1065_v40 }
 0x2d9   :  { %v4223_v35 = vadd.f32 %v4222_v25, %v4180_v24  ;;  %4564 = vmatprep.mubr.bf16.mxu1 %v13390_v32  ;;  %v13481_v36 = vpop.f32.mrf.mxu1  ;;  %4491 = vmatprep.subr.bf16.mxu0 %v11419_v45  ;;  %v11395_v51 = vcombine.high %v1053_v7, %v1057_v1  ;;  %v1173_v24 = vld [vmem:[#allocation7 + $0xc98] sm:$0xff] }
 0x2da   :  { %v4183_v17 = vpop.f32.mrf.mxu0  ;;  %4534 = vmatprep.subr.bf16.mxu1 %v11547_v21  ;;  %v11523_v21 = vcombine.high %v1181_v49, %v1185_v5  ;;  %v1177_v25 = vld [vmem:[#allocation7 + $0xcb8] sm:$0xff] }
 0x2db   :  { %v4184_v48 = vadd.f32 %v4183_v17, %v13468_v41  ;;  %4492 = vmatpush1.bf16.msra.mxu0 %v11418_v26  ;;  %v4226_v55 = vpop.f32.mrf.mxu1  ;;  %v4577_v9 = vmax.f32 %v4223_v35, 0.0  ;;  %v11530_v41 = vcombine.low %v1189_v0, %v1193_v43  ;;  %v11394_v26 = vcombine.low %v1053_v7, %v1057_v1  ;;  %v1041_v29 = vld [vmem:[#allocation7 + $0x878] sm:$0xff] }
 0x2dc   :  { %4535 = vmatpush1.bf16.msra.mxu1 %v11546_v3  ;;  %4493 = vmatprep.subr.bf16.mxu0 %v11411_v34  ;;  %v11522_v3 = vcombine.low %v1181_v49, %v1185_v5  ;;  %v11387_v34 = vcombine.high %v1045_v22, %v1049_v23  ;;  %v11515_v35 = vcombine.high %v1173_v24, %v1177_v25  ;;  %v1165_v40 = vld [vmem:[#allocation7 + $0xc58] sm:$0xff] }
 0x2dd   :  { %v4227_v50 = vadd.f32 %v4226_v55, %v4184_v48  ;;  %4536 = vmatprep.subr.bf16.mxu1 %v11539_v38  ;;  %v1037_v38 = vld [vmem:[#allocation7 + $0x858] sm:$0xff]  ;;  %v11386_v0 = vcombine.low %v1045_v22, %v1049_v23  ;;  %v11514_v43 = vcombine.low %v1173_v24, %v1177_v25 }
 0x2de   :  { %v1169_v17 = vld [vmem:[#allocation7 + $0xc78] sm:$0xff]  ;;  %v11379_v48 = vcombine.high %v1037_v38, %v1041_v29 }
 0x2df   :  { %v4585_v45 = vmax.f32 %v4227_v50, 0.0  ;;  %4494 = vmatpush1.bf16.msra.mxu0 %v11410_v54  ;;  %v11507_v54 = vcombine.high %v1165_v40, %v1169_v17  ;;  %v1029_v55 = vld [vmem:[#allocation7 + $0x818] sm:$0xff]  ;;  %v11506_v7 = vcombine.low %v1165_v40, %v1169_v17 }
 0x2e0   :  { %4537 = vmatpush1.bf16.msra.mxu1 %v11538_v2  ;;  %4495 = vmatprep.subr.bf16.mxu0 %v11403_v56  ;;  %v1033_v2 = vld [vmem:[#allocation7 + $0x838] sm:$0xff] }
 0x2e1   :  { %v13484_v46 = vpack.c.bf16 %v4585_v45, %v4577_v9  ;;  %4538 = vmatprep.subr.bf16.mxu1 %v11531_v62  ;;  %v1157_v56 = vld [vmem:[#allocation7 + $0xc18] sm:$0xff]  ;;  %v11378_v62 = vcombine.low %v1037_v38, %v1041_v29  ;;  %v11371_v1 = vcombine.high %v1029_v55, %v1033_v2 }
 0x2e2   :  { %v1161_v50 = vld [vmem:[#allocation7 + $0xc38] sm:$0xff] }
 0x2e3   :  { %4496 = vmatpush1.bf16.msra.mxu0 %v11402_v47  ;;  %v11499_v49 = vcombine.high %v1157_v56, %v1161_v50  ;;  %v1149_v5 = vld [vmem:[#allocation7 + $0xbd8] sm:$0xff] }
 0x2e4   :  { %4539 = vmatpush1.bf16.msra.mxu1 %v11530_v41  ;;  %4497 = vmatprep.subr.bf16.mxu0 %v11395_v51  ;;  %v1153_v9 = vld [vmem:[#allocation7 + $0xbf8] sm:$0xff]  ;;  %v11370_v41 = vcombine.low %v1029_v55, %v1033_v2  ;;  %v11498_v51 = vcombine.low %v1157_v56, %v1161_v50 }
 0x2e5   :  { %4540 = vmatprep.subr.bf16.mxu1 %v11523_v21  ;;  %v1277_v45 = vld [vmem:[#allocation7 + $0xfd8] sm:$0xff]  ;;  %v11491_v21 = vcombine.high %v1149_v5, %v1153_v9 }
 0x2e6   :  { %v1281_v47 = vld [vmem:[#allocation7 + $0xff8] sm:$0xff] }
 0x2e7   :  { %4498 = vmatpush1.bf16.msra.mxu0 %v11394_v26  ;;  %v11619_v22 = vcombine.high %v1277_v45, %v1281_v47  ;;  %v1141_v23 = vld [vmem:[#allocation7 + $0xb98] sm:$0xff] }
 0x2e8   :  { %4541 = vmatpush1.bf16.msra.mxu1 %v11522_v3  ;;  %4499 = vmatprep.subr.bf16.mxu0 %v11387_v34  ;;  %v1145_v24 = vld [vmem:[#allocation7 + $0xbb8] sm:$0xff]  ;;  %v11490_v3 = vcombine.low %v1149_v5, %v1153_v9  ;;  %v11618_v34 = vcombine.low %v1277_v45, %v1281_v47  ;;  %v1294_v47 = vrot.slane %v13420_v52, %v13331_v16 }
 0x2e9   :  { %4542 = vmatprep.subr.bf16.mxu1 %v11515_v35  ;;  %v1269_v25 = vld [vmem:[#allocation7 + $0xf98] sm:$0xff]  ;;  %v11483_v35 = vcombine.high %v1141_v23, %v1145_v24 }
 0x2ea   :  { %v1273_v26 = vld [vmem:[#allocation7 + $0xfb8] sm:$0xff] }
 0x2eb   :  { %4500 = vmatpush1.bf16.msra.mxu0 %v11386_v0  ;;  %v11611_v38 = vcombine.high %v1269_v25, %v1273_v26  ;;  %v1133_v29 = vld [vmem:[#allocation7 + $0xb58] sm:$0xff] }
 0x2ec   :  { %4543 = vmatpush1.bf16.msra.mxu1 %v11514_v43  ;;  %4501 = vmatprep.subr.bf16.mxu0 %v11379_v48  ;;  %v1137_v40 = vld [vmem:[#allocation7 + $0xb78] sm:$0xff]  ;;  %v11482_v43 = vcombine.low %v1141_v23, %v1145_v24  ;;  %v11610_v48 = vcombine.low %v1269_v25, %v1273_v26  ;;  %v3928_v23 = vadd.f32 %v13436_v37, %v1294_v47 }
 0x2ed   :  { %4544 = vmatprep.subr.bf16.mxu1 %v11507_v54  ;;  %v1261_v17 = vld [vmem:[#allocation7 + $0xf58] sm:$0xff]  ;;  %v11475_v54 = vcombine.high %v1133_v29, %v1137_v40 }
 0x2ee   :  { %v1265_v0 = vld [vmem:[#allocation7 + $0xf78] sm:$0xff]  ;;  %v3971_v37 = vadd.f32 %v13438_v39, %v3928_v23 }
 0x2ef   :  { %4502 = vmatpush1.bf16.msra.mxu0 %v11378_v62  ;;  %v11603_v55 = vcombine.high %v1261_v17, %v1265_v0  ;;  %v1125_v2 = vld [vmem:[#allocation7 + $0xb18] sm:$0xff] }
 0x2f0   :  { %4545 = vmatpush1.bf16.msra.mxu1 %v11506_v7  ;;  %4503 = vmatprep.subr.bf16.mxu0 %v11371_v1  ;;  %v1129_v56 = vld [vmem:[#allocation7 + $0xb38] sm:$0xff]  ;;  %v11474_v7 = vcombine.low %v1133_v29, %v1137_v40  ;;  %v11602_v1 = vcombine.low %v1261_v17, %v1265_v0 }
 0x2f1   :  { %4546 = vmatprep.subr.bf16.mxu1 %v11499_v49  ;;  %v1253_v50 = vld [vmem:[#allocation7 + $0xf18] sm:$0xff]  ;;  %v11467_v49 = vcombine.high %v1125_v2, %v1129_v56 }
 0x2f2   :  { %v1257_v62 = vld [vmem:[#allocation7 + $0xf38] sm:$0xff] }
 0x2f3   :  { %4504 = vmatpush1.bf16.msra.mxu0 %v11370_v41  ;;  %v11595_v5 = vcombine.high %v1253_v50, %v1257_v62  ;;  %v1117_v9 = vld [vmem:[#allocation7 + $0xad8] sm:$0xff]  ;;  %v11594_v24 = vcombine.low %v1253_v50, %v1257_v62  ;;  %v4014_v50 = vadd.f32 %v13454_v11, %v3971_v37 }
 0x2f4   :  { %4547 = vmatpush1.bf16.msra.mxu1 %v11498_v51  ;;  %4505 = vmatprep.subr.bf16.mxu0 %v11491_v21  ;;  %v1121_v45 = vld [vmem:[#allocation7 + $0xaf8] sm:$0xff]  ;;  %v1302_v21 = vrot.slane %v13420_v52, %v13339_v19 }
 0x2f5   :  { %4548 = vmatprep.subr.bf16.mxu1 %v11619_v22  ;;  %v1245_v41 = vld [vmem:[#allocation7 + $0xed8] sm:$0xff]  ;;  %v11466_v22 = vcombine.low %v1125_v2, %v1129_v56  ;;  %v11459_v25 = vcombine.high %v1117_v9, %v1121_v45  ;;  %v11458_v0 = vcombine.low %v1117_v9, %v1121_v45  ;;  %v4057_v11 = vadd.f32 %v13456_v14, %v4014_v50  ;;  %v4791_v14 = vld [vmem:[#allocation8 + $0x5c0] sm:$0xff] }
 0x2f6   :  { %v1249_v51 = vld [vmem:[#allocation7 + $0xef8] sm:$0xff]  ;;  %v4100_v26 = vadd.f32 %v13470_v8, %v1302_v21  ;;  %v4096_v17 = vadd.f32 %v13461_v27, %v1302_v21  ;;  %v4647_v50 = vld [vmem:[#allocation8 + $0x140] sm:$0xff] }
 0x2f7   :  { %4506 = vmatpush2.bf16.msra.mxu0 %v11490_v3  ;;  %v11587_v3 = vcombine.high %v1245_v41, %v1249_v51  ;;  %v1237_v29 = vld [vmem:[#allocation7 + $0xe98] sm:$0xff] }
 0x2f8   :  { %4549 = vmatpush2.bf16.msra.mxu1 %v11618_v34  ;;  %4507 = vmatprep.subr.bf16.mxu0 %v11483_v35  ;;  %v1109_v34 = vld [vmem:[#allocation7 + $0xa98] sm:$0xff]  ;;  %v4143_v8 = vadd.f32 %v13472_v12, %v4100_v26  ;;  %v4663_v26 = vld [vmem:[#allocation8 + $0x1c0] sm:$0xff] }
 0x2f9   :  { %4550 = vmatprep.subr.bf16.mxu1 %v11611_v38  ;;  %v1113_v35 = vld [vmem:[#allocation7 + $0xab8] sm:$0xff]  ;;  %v3924_v38 = vadd.f32 %v13427_v42, %v1294_v47 }
 0x2fa   :  { %v1241_v40 = vld [vmem:[#allocation7 + $0xeb8] sm:$0xff] }
 0x2fb   :  { %4508 = vmatpush2.bf16.msra.mxu0 %v11482_v43  ;;  %v4185_v43 = vpop.f32.mrf.mxu0  ;;  %v1101_v2 = vld [vmem:[#allocation7 + $0xa58] sm:$0xff]  ;;  %v3967_v42 = vadd.f32 %v13432_v53, %v3924_v38  ;;  %v11578_v12 = vcombine.low %v1237_v29, %v1241_v40 }
 0x2fc   :  { %4551 = vmatpush2.bf16.msra.mxu1 %v11610_v48  ;;  %4509 = vmatprep.subr.bf16.mxu0 %v11475_v54  ;;  %v11586_v48 = vcombine.low %v1245_v41, %v1249_v51  ;;  %v11451_v54 = vcombine.high %v1109_v34, %v1113_v35  ;;  %v1105_v56 = vld [vmem:[#allocation7 + $0xa78] sm:$0xff]  ;;  %v4186_v39 = vadd.f32 %v4185_v43, %v4143_v8  ;;  %v4228_v41 = vpop.f32.mrf.mxu1 }
 0x2fd   :  { %4552 = vmatprep.subr.bf16.mxu1 %v11603_v55  ;;  %v11579_v55 = vcombine.high %v1237_v29, %v1241_v40  ;;  %v1229_v27 = vld [vmem:[#allocation7 + $0xe58] sm:$0xff] }
 0x2fe   :  { %v1233_v62 = vld [vmem:[#allocation7 + $0xe78] sm:$0xff]  ;;  %v4229_v21 = vadd.f32 %v4228_v41, %v4186_v39  ;;  %v4775_v39 = vld [vmem:[#allocation8 + $0x540] sm:$0xff] }
 0x2ff   :  { %4510 = vmatpush2.bf16.msra.mxu0 %v11474_v7  ;;  %v4139_v7 = vadd.f32 %v13466_v10, %v4096_v17  ;;  %v11571_v45 = vcombine.high %v1229_v27, %v1233_v62  ;;  %v1093_v53 = vld [vmem:[#allocation7 + $0xa18] sm:$0xff]  ;;  %v11570_v23 = vcombine.low %v1229_v27, %v1233_v62  ;;  %v4651_v27 = vld [vmem:[#allocation8 + $0x160] sm:$0xff] }
 0x300   :  { %4553 = vmatpush2.bf16.msra.mxu1 %v11602_v1  ;;  %4511 = vmatprep.subr.bf16.mxu0 %v11467_v49  ;;  %v11450_v1 = vcombine.low %v1109_v34, %v1113_v35  ;;  %v4010_v49 = vadd.f32 %v13444_v60, %v3967_v42  ;;  %v1097_v47 = vld [vmem:[#allocation7 + $0xa38] sm:$0xff]  ;;  %v4584_v34 = vmax.f32 %v4057_v11, 0.0  ;;  %v4795_v35 = vld [vmem:[#allocation8 + $0x5e0] sm:$0xff]  ;;  %v4586_v38 = vmax.f32 %v4229_v21, 0.0 }
 0x301   :  { %4554 = vmatprep.subr.bf16.mxu1 %v11595_v5  ;;  %v11443_v5 = vcombine.high %v1101_v2, %v1105_v56  ;;  %v4182_v9 = vadd.f32 %v13478_v13, %v4139_v7  ;;  %v1221_v51 = vld [vmem:[#allocation7 + $0xe18] sm:$0xff]  ;;  %v11434_v29 = vcombine.low %v1093_v53, %v1097_v47  ;;  %v11805_v37 = vcombine.high %v4791_v14, %v4795_v35  ;;  %v4771_v11 = vld [vmem:[#allocation8 + $0x520] sm:$0xff] }
 0x302   :  { %v1225_v10 = vld [vmem:[#allocation7 + $0xe38] sm:$0xff]  ;;  %v4053_v60 = vadd.f32 %v13447_v63, %v4010_v49  ;;  %v4631_v21 = vld [vmem:[#allocation8 + $0xc0] sm:$0xff] }
 0x303   :  { %4512 = vmatpush2.bf16.msra.mxu0 %v11466_v22  ;;  %v11442_v22 = vcombine.low %v1101_v2, %v1105_v56  ;;  %v4225_v13 = vadd.f32 %v13481_v36, %v4182_v9  ;;  %v11562_v63 = vcombine.low %v1221_v51, %v1225_v10  ;;  %v4655_v36 = vld [vmem:[#allocation8 + $0x180] sm:$0xff]  ;;  %v11804_v56 = vcombine.low %v4791_v14, %v4795_v35 }
 0x304   :  { %4555 = vmatpush2.bf16.msra.mxu1 %v11594_v24  ;;  %4513 = vmatprep.subr.bf16.mxu0 %v11459_v25  ;;  %v11435_v24 = vcombine.high %v1093_v53, %v1097_v47  ;;  %v11563_v25 = vcombine.high %v1221_v51, %v1225_v10  ;;  %v4576_v40 = vmax.f32 %v4053_v60, 0.0  ;;  %v4787_v2 = vld [vmem:[#allocation8 + $0x5a0] sm:$0xff]  ;;  %v11661_v9 = vcombine.high %v4647_v50, %v4651_v27 }
 0x305   :  { %4556 = vmatprep.subr.bf16.mxu1 %v11587_v3  ;;  %v4667_v3 = vld [vmem:[#allocation8 + $0x1e0] sm:$0xff] }
 0x306   :  { %v11677_v17 = vcombine.high %v4663_v26, %v4667_v3  ;;  %v13504_v43 = vpack.c.bf16 %v4584_v34, %v4576_v40  ;;  %v11676_v8 = vcombine.low %v4663_v26, %v4667_v3  ;;  %v4643_v53 = vld [vmem:[#allocation8 + $0x120] sm:$0xff] }
 0x307   :  { %4514 = vmatpush2.bf16.msra.mxu0 %v11458_v0  ;;  %v4578_v0 = vmax.f32 %v4225_v13, 0.0  ;;  %v4767_v47 = vld [vmem:[#allocation8 + $0x500] sm:$0xff] }
 0x308   :  { %4557 = vmatpush2.bf16.msra.mxu1 %v11586_v48  ;;  %4515 = vmatprep.subr.bf16.mxu0 %v11451_v54  ;;  %v4659_v48 = vld [vmem:[#allocation8 + $0x1a0] sm:$0xff]  ;;  %v13510_v62 = vadd.bf16 %v13504_v43, %v13352_v57  ;;  %v11781_v10 = vcombine.high %v4767_v47, %v4771_v11  ;;  %v11780_v13 = vcombine.low %v4767_v47, %v4771_v11 }
 0x309   :  { %4558 = vmatprep.subr.bf16.mxu1 %v11579_v55  ;;  %v13506_v54 = vpack.c.bf16 %v4586_v38, %v4578_v0  ;;  %v4783_v55 = vld [vmem:[#allocation8 + $0x580] sm:$0xff]  ;;  %v11669_v42 = vcombine.high %v4655_v36, %v4659_v48 }
 0x30a   :  { %v11797_v7 = vcombine.high %v4783_v55, %v4787_v2  ;;  %v4759_v60 = vld [vmem:[#allocation8 + $0x4c0] sm:$0xff] }
 0x30b   :  { %4516 = vmatpush2.bf16.msra.mxu0 %v11450_v1  ;;  %v4779_v1 = vld [vmem:[#allocation8 + $0x560] sm:$0xff]  ;;  %v13515_v49 = vadd.bf16 %v13506_v54, %v13356_v59  ;;  %v11660_v59 = vcombine.low %v4647_v50, %v4651_v27 }
 0x30c   :  { %4559 = vmatpush2.bf16.msra.mxu1 %v11578_v12  ;;  %4517 = vmatprep.subr.bf16.mxu0 %v11443_v5  ;;  %v11668_v12 = vcombine.low %v4655_v36, %v4659_v48  ;;  %v11796_v5 = vcombine.low %v4783_v55, %v4787_v2  ;;  %v11789_v57 = vcombine.high %v4775_v39, %v4779_v1  ;;  %v4623_v3 = vld [vmem:[#allocation8 + $0x80] sm:$0xff] }
 0x30d   :  { %4560 = vmatprep.subr.bf16.mxu1 %v11571_v45  ;;  %v4639_v45 = vld [vmem:[#allocation8 + $0x100] sm:$0xff]  ;;  %v11788_v41 = vcombine.low %v4775_v39, %v4779_v1 }
 0x30e   :  { %v11653_v51 = vcombine.high %v4639_v45, %v4643_v53  ;;  %v4627_v34 = vld [vmem:[#allocation8 + $0xa0] sm:$0xff] }
 0x30f   :  { %4518 = vmatpush2.bf16.msra.mxu0 %v11442_v22  ;;  %v4635_v22 = vld [vmem:[#allocation8 + $0xe0] sm:$0xff]  ;;  %v11637_v40 = vcombine.high %v4623_v3, %v4627_v34  ;;  %v11636_v48 = vcombine.low %v4623_v3, %v4627_v34 }
 0x310   :  { %4561 = vmatpush2.bf16.msra.mxu1 %v11570_v23  ;;  %4519 = vmatprep.subr.bf16.mxu0 %v11435_v24  ;;  %v4763_v23 = vld [vmem:[#allocation8 + $0x4e0] sm:$0xff]  ;;  %v11652_v24 = vcombine.low %v4639_v45, %v4643_v53  ;;  %v11644_v38 = vcombine.low %v4631_v21, %v4635_v22 }
 0x311   :  { %4562 = vmatprep.subr.bf16.mxu1 %v11563_v25  ;;  %v11645_v25 = vcombine.high %v4631_v21, %v4635_v22  ;;  %v11773_v26 = vcombine.high %v4759_v60, %v4763_v23  ;;  %v4751_v14 = vld [vmem:[#allocation8 + $0x480] sm:$0xff] }
 0x312   :  { %v4755_v35 = vld [vmem:[#allocation8 + $0x4a0] sm:$0xff] }
 0x313   :  { %4520 = vmatpush2.bf16.msra.mxu0 %v11434_v29  ;;  %v11772_v29 = vcombine.low %v4759_v60, %v4763_v23  ;;  %v4619_v0 = vld [vmem:[#allocation8 + $0x60] sm:$0xff] }
 0x314   :  { %4563 = vmatpush2.bf16.msra.mxu1 %v11562_v63  ;;  %7724 = vmatprep.subr.bf16.mxu0 %v11677_v17  ;;  %v11765_v63 = vcombine.high %v4751_v14, %v4755_v35  ;;  %v4615_v17 = vld [vmem:[#allocation8 + $0x40] sm:$0xff] }
 0x315   :  { %7767 = vmatprep.subr.bf16.mxu1 %v11805_v37  ;;  %v4743_v37 = vld [vmem:[#allocation8 + $0x440] sm:$0xff]  ;;  %v11629_v55 = vcombine.high %v4615_v17, %v4619_v0 }
 0x316   :  { %4522 = vmatmul.mubr.bf16.vlgmr.msra.gmra.mxu0 %v13408_v4  ;;  %v4747_v36 = vld [vmem:[#allocation8 + $0x460] sm:$0xff] }
 0x317   :  { %4565 = vmatmul.mubr.bf16.vlgmr.msra.gmra.mxu1 %v13410_v6  ;;  %7725 = vmatpush1.bf16.msra.mxu0 %v11676_v8  ;;  %v11764_v8 = vcombine.low %v4751_v14, %v4755_v35  ;;  %v11757_v2 = vcombine.high %v4743_v37, %v4747_v36  ;;  %v4735_v50 = vld [vmem:[#allocation8 + $0x400] sm:$0xff]  ;;  %v11756_v39 = vcombine.low %v4743_v37, %v4747_v36 }
 0x318   :  { %7756 = vmatprep.mubr.bf16.mxu0 %v13510_v62  ;;  %7768 = vmatpush1.bf16.msra.mxu1 %v11804_v56  ;;  %v4607_v56 = vld [vmem:[#allocation8] sm:$0xff] }
 0x319   :  { %7799 = vmatprep.mubr.bf16.mxu1 %v13515_v49  ;;  %7726 = vmatprep.subr.bf16.mxu0 %v11669_v42  ;;  %v4611_v42 = vld [vmem:[#allocation8 + $0x20] sm:$0xff] }
 0x31a   :  { %7769 = vmatprep.subr.bf16.mxu1 %v11797_v7  ;;  %v4739_v27 = vld [vmem:[#allocation8 + $0x420] sm:$0xff]  ;;  %v11628_v7 = vcombine.low %v4615_v17, %v4619_v0  ;;  %v11621_v1 = vcombine.high %v4607_v56, %v4611_v42  ;;  %v11620_v53 = vcombine.low %v4607_v56, %v4611_v42 }
 0x31b   :  { %7727 = vmatpush1.bf16.msra.mxu0 %v11668_v12  ;;  %v11749_v12 = vcombine.high %v4735_v50, %v4739_v27  ;;  %v4859_v45 = vld [vmem:[#allocation8 + $0x7e0] sm:$0xff]  ;;  %v11748_v47 = vcombine.low %v4735_v50, %v4739_v27 }
 0x31c   :  { %7770 = vmatpush1.bf16.msra.mxu1 %v11796_v5  ;;  %7728 = vmatprep.subr.bf16.mxu0 %v11661_v9  ;;  %v4727_v5 = vld [vmem:[#allocation8 + $0x3c0] sm:$0xff] }
 0x31d   :  { %7771 = vmatprep.subr.bf16.mxu1 %v11789_v57  ;;  %v4731_v9 = vld [vmem:[#allocation8 + $0x3e0] sm:$0xff] }
 0x31e   :  { %v4855_v57 = vld [vmem:[#allocation8 + $0x7c0] sm:$0xff]  ;;  %v11741_v11 = vcombine.high %v4727_v5, %v4731_v9  ;;  %v11740_v22 = vcombine.low %v4727_v5, %v4731_v9 }
 0x31f   :  { %7729 = vmatpush1.bf16.msra.mxu0 %v11660_v59  ;;  %v11869_v59 = vcombine.high %v4855_v57, %v4859_v45  ;;  %v4851_v21 = vld [vmem:[#allocation8 + $0x7a0] sm:$0xff]  ;;  %v11868_v60 = vcombine.low %v4855_v57, %v4859_v45 }
 0x320   :  { %7772 = vmatpush1.bf16.msra.mxu1 %v11788_v41  ;;  %7730 = vmatprep.subr.bf16.mxu0 %v11653_v51  ;;  %v4719_v41 = vld [vmem:[#allocation8 + $0x380] sm:$0xff] }
 0x321   :  { %7773 = vmatprep.subr.bf16.mxu1 %v11781_v10  ;;  %v4723_v51 = vld [vmem:[#allocation8 + $0x3a0] sm:$0xff] }
 0x322   :  { %v4847_v10 = vld [vmem:[#allocation8 + $0x780] sm:$0xff]  ;;  %v11733_v23 = vcombine.high %v4719_v41, %v4723_v51  ;;  %v11732_v34 = vcombine.low %v4719_v41, %v4723_v51 }
 0x323   :  { %7731 = vmatpush1.bf16.msra.mxu0 %v11652_v24  ;;  %v11861_v24 = vcombine.high %v4847_v10, %v4851_v21  ;;  %v4843_v3 = vld [vmem:[#allocation8 + $0x760] sm:$0xff]  ;;  %v11860_v14 = vcombine.low %v4847_v10, %v4851_v21  ;;  %v13520_v10 = vpop.f32.mrf.mxu0 }
 0x324   :  { %7774 = vmatpush1.bf16.msra.mxu1 %v11780_v13  ;;  %7732 = vmatprep.subr.bf16.mxu0 %v11645_v25  ;;  %v4711_v13 = vld [vmem:[#allocation8 + $0x340] sm:$0xff] }
 0x325   :  { %7775 = vmatprep.subr.bf16.mxu1 %v11773_v26  ;;  %v4715_v25 = vld [vmem:[#allocation8 + $0x360] sm:$0xff] }
 0x326   :  { %v4839_v26 = vld [vmem:[#allocation8 + $0x740] sm:$0xff]  ;;  %v11725_v35 = vcombine.high %v4711_v13, %v4715_v25  ;;  %v11724_v0 = vcombine.low %v4711_v13, %v4715_v25 }
 0x327   :  { %7733 = vmatpush1.bf16.msra.mxu0 %v11644_v38  ;;  %v11853_v38 = vcombine.high %v4839_v26, %v4843_v3  ;;  %v4835_v17 = vld [vmem:[#allocation8 + $0x720] sm:$0xff]  ;;  %v11852_v37 = vcombine.low %v4839_v26, %v4843_v3 }
 0x328   :  { %7776 = vmatpush1.bf16.msra.mxu1 %v11772_v29  ;;  %7734 = vmatprep.subr.bf16.mxu0 %v11637_v40  ;;  %v4703_v29 = vld [vmem:[#allocation8 + $0x300] sm:$0xff] }
 0x329   :  { %7777 = vmatprep.subr.bf16.mxu1 %v11765_v63  ;;  %v4707_v40 = vld [vmem:[#allocation8 + $0x320] sm:$0xff] }
 0x32a   :  { %v4831_v63 = vld [vmem:[#allocation8 + $0x700] sm:$0xff]  ;;  %v11717_v36 = vcombine.high %v4703_v29, %v4707_v40  ;;  %v11716_v42 = vcombine.low %v4703_v29, %v4707_v40 }
 0x32b   :  { %7735 = vmatpush1.bf16.msra.mxu0 %v11636_v48  ;;  %v11845_v48 = vcombine.high %v4831_v63, %v4835_v17  ;;  %v4827_v56 = vld [vmem:[#allocation8 + $0x6e0] sm:$0xff]  ;;  %v11844_v50 = vcombine.low %v4831_v63, %v4835_v17 }
 0x32c   :  { %7778 = vmatpush1.bf16.msra.mxu1 %v11764_v8  ;;  %7736 = vmatprep.subr.bf16.mxu0 %v11629_v55  ;;  %v4695_v8 = vld [vmem:[#allocation8 + $0x2c0] sm:$0xff] }
 0x32d   :  { %7779 = vmatprep.subr.bf16.mxu1 %v11757_v2  ;;  %v4699_v55 = vld [vmem:[#allocation8 + $0x2e0] sm:$0xff] }
 0x32e   :  { %v4823_v2 = vld [vmem:[#allocation8 + $0x6c0] sm:$0xff]  ;;  %v11709_v27 = vcombine.high %v4695_v8, %v4699_v55  ;;  %v11708_v9 = vcombine.low %v4695_v8, %v4699_v55 }
 0x32f   :  { %7737 = vmatpush1.bf16.msra.mxu0 %v11628_v7  ;;  %v11837_v7 = vcombine.high %v4823_v2, %v4827_v56  ;;  %v4819_v5 = vld [vmem:[#allocation8 + $0x6a0] sm:$0xff]  ;;  %v11836_v57 = vcombine.low %v4823_v2, %v4827_v56 }
 0x330   :  { %7780 = vmatpush1.bf16.msra.mxu1 %v11756_v39  ;;  %7738 = vmatprep.subr.bf16.mxu0 %v11621_v1  ;;  %v4687_v39 = vld [vmem:[#allocation8 + $0x280] sm:$0xff] }
 0x331   :  { %7781 = vmatprep.subr.bf16.mxu1 %v11749_v12  ;;  %v4691_v1 = vld [vmem:[#allocation8 + $0x2a0] sm:$0xff] }
 0x332   :  { %v4815_v12 = vld [vmem:[#allocation8 + $0x680] sm:$0xff]  ;;  %v11701_v45 = vcombine.high %v4687_v39, %v4691_v1  ;;  %v11700_v51 = vcombine.low %v4687_v39, %v4691_v1 }
 0x333   :  { %7739 = vmatpush1.bf16.msra.mxu0 %v11620_v53  ;;  %v11829_v53 = vcombine.high %v4815_v12, %v4819_v5  ;;  %v4811_v41 = vld [vmem:[#allocation8 + $0x660] sm:$0xff]  ;;  %v11828_v21 = vcombine.low %v4815_v12, %v4819_v5  ;;  %v13532_v12 = vadd.bf16 %v13450_v31, %v13354_v58 }
 0x334   :  { %7782 = vmatpush1.bf16.msra.mxu1 %v11748_v47  ;;  %7740 = vmatprep.subr.bf16.mxu0 %v11741_v11  ;;  %v4679_v47 = vld [vmem:[#allocation8 + $0x240] sm:$0xff] }
 0x335   :  { %7783 = vmatprep.subr.bf16.mxu1 %v11869_v59  ;;  %v4683_v11 = vld [vmem:[#allocation8 + $0x260] sm:$0xff] }
 0x336   :  { %v4807_v59 = vld [vmem:[#allocation8 + $0x640] sm:$0xff]  ;;  %v11692_v3 = vcombine.low %v4679_v47, %v4683_v11 }
 0x337   :  { %7741 = vmatpush2.bf16.msra.mxu0 %v11740_v22  ;;  %v11693_v22 = vcombine.high %v4679_v47, %v4683_v11  ;;  %v4675_v13 = vld [vmem:[#allocation8 + $0x220] sm:$0xff] }
 0x338   :  { %7784 = vmatpush2.bf16.msra.mxu1 %v11868_v60  ;;  %7742 = vmatprep.subr.bf16.mxu0 %v11733_v23  ;;  %v13522_v60 = vpop.f32.mrf.mxu1  ;;  %v11821_v23 = vcombine.high %v4807_v59, %v4811_v41  ;;  %v4799_v25 = vld [vmem:[#allocation8 + $0x600] sm:$0xff] }
 0x339   :  { %7785 = vmatprep.subr.bf16.mxu1 %v11861_v24  ;;  %v4671_v24 = vld [vmem:[#allocation8 + $0x200] sm:$0xff] }
 0x33a   :  { %v4803_v26 = vld [vmem:[#allocation8 + $0x620] sm:$0xff] }
 0x33b   :  { %7743 = vmatpush2.bf16.msra.mxu0 %v11732_v34  ;;  %v4267_v34 = vpop.f32.mrf.mxu0  ;;  %v11813_v29 = vcombine.high %v4799_v25, %v4803_v26  ;;  %v4919_v40 = vld [vmem:[#allocation8 + $0x9c0] sm:$0xff]  ;;  %v11812_v8 = vcombine.low %v4799_v25, %v4803_v26 }
 0x33c   :  { %7786 = vmatpush2.bf16.msra.mxu1 %v11860_v14  ;;  %7744 = vmatprep.subr.bf16.mxu0 %v11725_v35  ;;  %v11820_v14 = vcombine.low %v4807_v59, %v4811_v41  ;;  %v11685_v35 = vcombine.high %v4671_v24, %v4675_v13  ;;  %v4923_v63 = vld [vmem:[#allocation8 + $0x9e0] sm:$0xff] }
 0x33d   :  { %7787 = vmatprep.subr.bf16.mxu1 %v11853_v38  ;;  %v4310_v38 = vpop.f32.mrf.mxu1  ;;  %v5047_v17 = vld [vmem:[#allocation8 + $0xdc0] sm:$0xff]  ;;  %v11933_v55 = vcombine.high %v4919_v40, %v4923_v63  ;;  %v11932_v1 = vcombine.low %v4919_v40, %v4923_v63 }
 0x33e   :  { %v4911_v56 = vld [vmem:[#allocation8 + $0x980] sm:$0xff] }
 0x33f   :  { %7745 = vmatpush2.bf16.msra.mxu0 %v11724_v0  ;;  %v5051_v0 = vld [vmem:[#allocation8 + $0xde0] sm:$0xff]  ;;  %v13528_v2 = vpop.f32.mrf.mxu1 }
 0x340   :  { %7788 = vmatpush2.bf16.msra.mxu1 %v11852_v37  ;;  %7746 = vmatprep.subr.bf16.mxu0 %v11717_v36  ;;  %v1310_v37 = vrot.slane %v13420_v52, %v13371_v30  ;;  %v11684_v36 = vcombine.low %v4671_v24, %v4675_v13  ;;  %v4903_v47 = vld [vmem:[#allocation8 + $0x940] sm:$0xff] }
 0x341   :  { %7789 = vmatprep.subr.bf16.mxu1 %v11845_v48  ;;  %v13526_v48 = vpop.f32.mrf.mxu0  ;;  %v4907_v11 = vld [vmem:[#allocation8 + $0x960] sm:$0xff] }
 0x342   :  { %v4268_v39 = vadd.f32 %v4267_v34, %v1310_v37  ;;  %v5031_v58 = vld [vmem:[#allocation8 + $0xd40] sm:$0xff]  ;;  %v11917_v13 = vcombine.high %v4903_v47, %v4907_v11 }
 0x343   :  { %7747 = vmatpush2.bf16.msra.mxu0 %v11716_v42  ;;  %v4915_v42 = vld [vmem:[#allocation8 + $0x9a0] sm:$0xff]  ;;  %v4271_v5 = vpop.f32.mrf.mxu0 }
 0x344   :  { %7790 = vmatpush2.bf16.msra.mxu1 %v11844_v50  ;;  %7748 = vmatprep.subr.bf16.mxu0 %v11709_v27  ;;  %v12061_v50 = vcombine.high %v5047_v17, %v5051_v0  ;;  %v5039_v27 = vld [vmem:[#allocation8 + $0xd80] sm:$0xff] }
 0x345   :  { %7791 = vmatprep.subr.bf16.mxu1 %v11837_v7  ;;  %v5043_v7 = vld [vmem:[#allocation8 + $0xda0] sm:$0xff] }
 0x346   :  { %v12053_v59 = vcombine.high %v5039_v27, %v5043_v7  ;;  %v12052_v25 = vcombine.low %v5039_v27, %v5043_v7  ;;  %v4895_v34 = vld [vmem:[#allocation8 + $0x900] sm:$0xff] }
 0x347   :  { %7749 = vmatpush2.bf16.msra.mxu0 %v11708_v9  ;;  %v11925_v9 = vcombine.high %v4911_v56, %v4915_v42  ;;  %v5027_v40 = vld [vmem:[#allocation8 + $0xd20] sm:$0xff] }
 0x348   :  { %7792 = vmatpush2.bf16.msra.mxu1 %v11836_v57  ;;  %7750 = vmatprep.subr.bf16.mxu0 %v11701_v45  ;;  %v12060_v57 = vcombine.low %v5047_v17, %v5051_v0  ;;  %v13536_v45 = vadd.bf16 %v13484_v46, %v13358_v61  ;;  %v11924_v61 = vcombine.low %v4911_v56, %v4915_v42  ;;  %v4887_v42 = vld [vmem:[#allocation8 + $0x8c0] sm:$0xff] }
 0x349   :  { %7793 = vmatprep.subr.bf16.mxu1 %v11829_v53  ;;  %v4314_v53 = vpop.f32.mrf.mxu1  ;;  %v11916_v0 = vcombine.low %v4903_v47, %v4907_v11 }
 0x34b   :  { %7751 = vmatpush2.bf16.msra.mxu0 %v11700_v51  ;;  %v5035_v51 = vld [vmem:[#allocation8 + $0xd60] sm:$0xff] }
 0x34c   :  { %7794 = vmatpush2.bf16.msra.mxu1 %v11828_v21  ;;  %7752 = vmatprep.subr.bf16.mxu0 %v11693_v22  ;;  %v4311_v21 = vadd.f32 %v4310_v38, %v4268_v39  ;;  %v4272_v22 = vadd.f32 %v4271_v5, %v1310_v37  ;;  %v5023_v38 = vld [vmem:[#allocation8 + $0xd00] sm:$0xff] }
 0x34d   :  { %7795 = vmatprep.subr.bf16.mxu1 %v11821_v23  ;;  %v12037_v27 = vcombine.high %v5023_v38, %v5027_v40  ;;  %v5015_v39 = vld [vmem:[#allocation8 + $0xcc0] sm:$0xff] }
 0x34e   :  { %v4315_v63 = vadd.f32 %v4314_v53, %v4272_v22  ;;  %v12036_v53 = vcombine.low %v5023_v38, %v5027_v40  ;;  %v5011_v22 = vld [vmem:[#allocation8 + $0xca0] sm:$0xff]  ;;  %v13554_v40 = vld [vmem:[#allocation8 + $0x5c8] sm:$0xff] }
 0x34f   :  { %7753 = vmatpush2.bf16.msra.mxu0 %v11692_v3  ;;  %v5003_v38 = vld [vmem:[#allocation8 + $0xc60] sm:$0xff] }
 0x350   :  { %7796 = vmatpush2.bf16.msra.mxu1 %v11820_v14  ;;  %7754 = vmatprep.subr.bf16.mxu0 %v11685_v35  ;;  %v4899_v14 = vld [vmem:[#allocation8 + $0x920] sm:$0xff]  ;;  %v12045_v35 = vcombine.high %v5031_v58, %v5035_v51 }
 0x351   :  { %7797 = vmatprep.subr.bf16.mxu1 %v11813_v29 }
 0x353   :  { %7755 = vmatpush2.bf16.msra.mxu0 %v11684_v36  ;;  %v11909_v36 = vcombine.high %v4895_v34, %v4899_v14 }
 0x354   :  { %7798 = vmatpush2.bf16.msra.mxu1 %v11812_v8  ;;  %7810 = vmatprep.subr.bf16.mxu0 %v11933_v55  ;;  %v12044_v8 = vcombine.low %v5031_v58, %v5035_v51  ;;  %v4883_v58 = vld [vmem:[#allocation8 + $0x8a0] sm:$0xff] }
 0x355   :  { %7853 = vmatprep.subr.bf16.mxu1 %v12061_v50  ;;  %v4891_v50 = vld [vmem:[#allocation8 + $0x8e0] sm:$0xff] }
 0x356   :  { %v13538_v41 = vpop.f32.mrf.mxu0  ;;  %7757 = vmatmul.mubr.bf16.vlgmr.msra.gmra.mxu0 %v13532_v12 }
 0x357   :  { %v13541_v23 = vpop.f32.mrf.mxu1  ;;  %7800 = vmatmul.mubr.bf16.vlgmr.msra.gmra.mxu1 %v13536_v45  ;;  %7811 = vmatpush1.bf16.msra.mxu0 %v11932_v1  ;;  %v5019_v1 = vld [vmem:[#allocation8 + $0xce0] sm:$0xff] }
 0x358   :  { %v4353_v24 = vpop.f32.mrf.mxu0  ;;  %7812 = vmatprep.subr.bf16.mxu0 %v11925_v9  ;;  %7854 = vmatpush1.bf16.msra.mxu1 %v12060_v57  ;;  %v11908_v9 = vcombine.low %v4895_v34, %v4899_v14  ;;  %v11901_v57 = vcombine.high %v4887_v42, %v4891_v50  ;;  %v12029_v51 = vcombine.high %v5015_v39, %v5019_v1  ;;  %v4875_v34 = vld [vmem:[#allocation8 + $0x860] sm:$0xff] }
 0x359   :  { %v4354_v26 = vadd.f32 %v4353_v24, %v4311_v21  ;;  %v4396_v3 = vpop.f32.mrf.mxu1  ;;  %7855 = vmatprep.subr.bf16.mxu1 %v12053_v59  ;;  %v4879_v59 = vld [vmem:[#allocation8 + $0x880] sm:$0xff]  ;;  %v11900_v24 = vcombine.low %v4887_v42, %v4891_v50 }
 0x35a   :  { %v13544_v29 = vpop.f32.mrf.mxu0  ;;  %v5007_v21 = vld [vmem:[#allocation8 + $0xc80] sm:$0xff] }
 0x35b   :  { %v13546_v17 = vpop.f32.mrf.mxu1  ;;  %7813 = vmatpush1.bf16.msra.mxu0 %v11924_v61  ;;  %v4397_v55 = vadd.f32 %v4396_v3, %v4354_v26  ;;  %v4871_v3 = vld [vmem:[#allocation8 + $0x840] sm:$0xff]  ;;  %v12021_v14 = vcombine.high %v5007_v21, %v5011_v22 }
 0x35c   :  { %v4357_v37 = vpop.f32.mrf.mxu0  ;;  %7814 = vmatprep.subr.bf16.mxu0 %v11917_v13  ;;  %7856 = vmatpush1.bf16.msra.mxu1 %v12052_v25  ;;  %v11893_v13 = vcombine.high %v4879_v59, %v4883_v58  ;;  %v12028_v25 = vcombine.low %v5015_v39, %v5019_v1  ;;  %v4991_v42 = vld [vmem:[#allocation8 + $0xc00] sm:$0xff] }
 0x35d   :  { %v4358_v56 = vadd.f32 %v4357_v37, %v4315_v63  ;;  %7857 = vmatprep.subr.bf16.mxu1 %v12045_v35  ;;  %v4400_v7 = vpop.f32.mrf.mxu1  ;;  %v4580_v47 = vmax.f32 %v4397_v55, 0.0  ;;  %v4999_v35 = vld [vmem:[#allocation8 + $0xc40] sm:$0xff]  ;;  %v13556_v63 = vld [vmem:[#allocation8 + $0x5e8] sm:$0xff] }
 0x35e   :  { %v11806_v37 = vcombine.low %v13554_v40, %v13556_v63  ;;  %v4867_v55 = vld [vmem:[#allocation8 + $0x820] sm:$0xff]  ;;  %v12012_v39 = vcombine.low %v4999_v35, %v5003_v38 }
 0x35f   :  { %v4401_v5 = vadd.f32 %v4400_v7, %v4358_v56  ;;  %7815 = vmatpush1.bf16.msra.mxu0 %v11916_v0  ;;  %v11892_v0 = vcombine.low %v4879_v59, %v4883_v58  ;;  %v12013_v56 = vcombine.high %v4999_v35, %v5003_v38  ;;  %v4995_v50 = vld [vmem:[#allocation8 + $0xc20] sm:$0xff] }
 0x360   :  { %7816 = vmatprep.subr.bf16.mxu0 %v11909_v36  ;;  %7858 = vmatpush1.bf16.msra.mxu1 %v12044_v8  ;;  %v12020_v36 = vcombine.low %v5007_v21, %v5011_v22  ;;  %v4863_v8 = vld [vmem:[#allocation8 + $0x800] sm:$0xff]  ;;  %v12004_v59 = vcombine.low %v4991_v42, %v4995_v50 }
 0x361   :  { %v4588_v11 = vmax.f32 %v4401_v5, 0.0  ;;  %7859 = vmatprep.subr.bf16.mxu1 %v12037_v27  ;;  %v11884_v27 = vcombine.low %v4871_v3, %v4875_v34  ;;  %v11877_v7 = vcombine.high %v4863_v8, %v4867_v55  ;;  %v4983_v1 = vld [vmem:[#allocation8 + $0xbc0] sm:$0xff] }
 0x362   :  { %v4987_v5 = vld [vmem:[#allocation8 + $0xbe0] sm:$0xff] }
 0x363   :  { %v13548_v61 = vpack.c.bf16 %v4588_v11, %v4580_v47  ;;  %7817 = vmatpush1.bf16.msra.mxu0 %v11908_v9  ;;  %v12005_v9 = vcombine.high %v4991_v42, %v4995_v50  ;;  %v11876_v47 = vcombine.low %v4863_v8, %v4867_v55  ;;  %v11997_v11 = vcombine.high %v4983_v1, %v4987_v5  ;;  %v4975_v58 = vld [vmem:[#allocation8 + $0xb80] sm:$0xff] }
 0x364   :  { %7818 = vmatprep.subr.bf16.mxu0 %v11901_v57  ;;  %7860 = vmatpush1.bf16.msra.mxu1 %v12036_v53  ;;  %v5111_v57 = vld [vmem:[#allocation8 + $0xfc0] sm:$0xff] }
 0x365   :  { %v13552_v26 = vadd.bf16 %v13548_v61, %v13388_v28  ;;  %7861 = vmatprep.subr.bf16.mxu1 %v12029_v51  ;;  %v11885_v28 = vcombine.high %v4871_v3, %v4875_v34  ;;  %v5115_v53 = vld [vmem:[#allocation8 + $0xfe0] sm:$0xff] }
 0x366   :  { %v4979_v51 = vld [vmem:[#allocation8 + $0xba0] sm:$0xff]  ;;  %v12125_v21 = vcombine.high %v5111_v57, %v5115_v53  ;;  %v12124_v3 = vcombine.low %v5111_v57, %v5115_v53 }
 0x367   :  { %7819 = vmatpush1.bf16.msra.mxu0 %v11900_v24  ;;  %7842 = vmatprep.mubr.bf16.mxu0 %v13552_v26  ;;  %v5103_v22 = vld [vmem:[#allocation8 + $0xf80] sm:$0xff] }
 0x368   :  { %7820 = vmatprep.subr.bf16.mxu0 %v11893_v13  ;;  %7862 = vmatpush1.bf16.msra.mxu1 %v12028_v25  ;;  %v5107_v24 = vld [vmem:[#allocation8 + $0xfa0] sm:$0xff]  ;;  %v11996_v13 = vcombine.low %v4983_v1, %v4987_v5  ;;  %v11989_v25 = vcombine.high %v4975_v58, %v4979_v51 }
 0x369   :  { %7863 = vmatprep.subr.bf16.mxu1 %v12021_v14  ;;  %v4967_v34 = vld [vmem:[#allocation8 + $0xb40] sm:$0xff]  ;;  %v12117_v35 = vcombine.high %v5103_v22, %v5107_v24  ;;  %v12116_v8 = vcombine.low %v5103_v22, %v5107_v24 }
 0x36a   :  { %v4971_v14 = vld [vmem:[#allocation8 + $0xb60] sm:$0xff] }
 0x36b   :  { %7821 = vmatpush1.bf16.msra.mxu0 %v11892_v0  ;;  %v5095_v38 = vld [vmem:[#allocation8 + $0xf40] sm:$0xff] }
 0x36c   :  { %7822 = vmatprep.subr.bf16.mxu0 %v11885_v28  ;;  %7864 = vmatpush1.bf16.msra.mxu1 %v12020_v36  ;;  %v5099_v0 = vld [vmem:[#allocation8 + $0xf60] sm:$0xff]  ;;  %v11988_v28 = vcombine.low %v4975_v58, %v4979_v51  ;;  %v11981_v36 = vcombine.high %v4967_v34, %v4971_v14 }
 0x36d   :  { %7865 = vmatprep.subr.bf16.mxu1 %v12013_v56  ;;  %v4959_v55 = vld [vmem:[#allocation8 + $0xb00] sm:$0xff]  ;;  %v12109_v42 = vcombine.high %v5095_v38, %v5099_v0  ;;  %v12108_v5 = vcombine.low %v5095_v38, %v5099_v0 }
 0x36e   :  { %v4963_v56 = vld [vmem:[#allocation8 + $0xb20] sm:$0xff] }
 0x36f   :  { %7823 = vmatpush1.bf16.msra.mxu0 %v11884_v27  ;;  %v5087_v50 = vld [vmem:[#allocation8 + $0xf00] sm:$0xff]  ;;  %v11973_v1 = vcombine.high %v4959_v55, %v4963_v56  ;;  %v11972_v58 = vcombine.low %v4959_v55, %v4963_v56 }
 0x370   :  { %7824 = vmatprep.subr.bf16.mxu0 %v11877_v7  ;;  %7866 = vmatpush1.bf16.msra.mxu1 %v12012_v39  ;;  %v5091_v27 = vld [vmem:[#allocation8 + $0xf20] sm:$0xff]  ;;  %v11980_v7 = vcombine.low %v4967_v34, %v4971_v14  ;;  %v1306_v39 = vrot.slane %v13420_v52, %v13395_v44 }
 0x371   :  { %7867 = vmatprep.subr.bf16.mxu1 %v12005_v9  ;;  %v4951_v9 = vld [vmem:[#allocation8 + $0xac0] sm:$0xff]  ;;  %v12101_v53 = vcombine.high %v5087_v50, %v5091_v27 }
 0x372   :  { %v4955_v57 = vld [vmem:[#allocation8 + $0xae0] sm:$0xff]  ;;  %v4266_v51 = vadd.f32 %v13520_v10, %v1306_v39 }
 0x373   :  { %7825 = vmatpush1.bf16.msra.mxu0 %v11876_v47  ;;  %v4270_v47 = vadd.f32 %v13526_v48, %v1306_v39  ;;  %v4943_v22 = vld [vmem:[#allocation8 + $0xa80] sm:$0xff]  ;;  %v11964_v48 = vcombine.low %v4951_v9, %v4955_v57 }
 0x374   :  { %7826 = vmatprep.subr.bf16.mxu0 %v11997_v11  ;;  %7868 = vmatpush1.bf16.msra.mxu1 %v12004_v59  ;;  %v5079_v11 = vld [vmem:[#allocation8 + $0xec0] sm:$0xff]  ;;  %v4309_v38 = vadd.f32 %v13522_v60, %v4266_v51 }
 0x375   :  { %7869 = vmatprep.subr.bf16.mxu1 %v12125_v21  ;;  %v5083_v59 = vld [vmem:[#allocation8 + $0xee0] sm:$0xff]  ;;  %v11965_v21 = vcombine.high %v4951_v9, %v4955_v57 }
 0x376   :  { %v4947_v24 = vld [vmem:[#allocation8 + $0xaa0] sm:$0xff]  ;;  %v12092_v10 = vcombine.low %v5079_v11, %v5083_v59  ;;  %v4352_v55 = vadd.f32 %v13538_v41, %v4309_v38 }
 0x377   :  { %7827 = vmatpush2.bf16.msra.mxu0 %v11996_v13  ;;  %v12100_v13 = vcombine.low %v5087_v50, %v5091_v27  ;;  %v5071_v34 = vld [vmem:[#allocation8 + $0xe80] sm:$0xff] }
 0x378   :  { %7828 = vmatprep.subr.bf16.mxu0 %v11989_v25  ;;  %7870 = vmatpush2.bf16.msra.mxu1 %v12124_v3  ;;  %v12093_v25 = vcombine.high %v5079_v11, %v5083_v59  ;;  %v4313_v3 = vadd.f32 %v13528_v2, %v4270_v47  ;;  %v5075_v14 = vld [vmem:[#allocation8 + $0xea0] sm:$0xff]  ;;  %v4668_v11 = vld [vmem:[#allocation8 + $0x1e8] sm:$0xff] }
 0x379   :  { %7871 = vmatprep.subr.bf16.mxu1 %v12117_v35  ;;  %v11957_v35 = vcombine.high %v4943_v22, %v4947_v24  ;;  %v5063_v56 = vld [vmem:[#allocation8 + $0xe40] sm:$0xff]  ;;  %v12084_v60 = vcombine.low %v5071_v34, %v5075_v14 }
 0x37a   :  { %v4356_v0 = vadd.f32 %v13544_v29, %v4313_v3  ;;  %v5067_v2 = vld [vmem:[#allocation8 + $0xe60] sm:$0xff] }
 0x37b   :  { %7829 = vmatpush2.bf16.msra.mxu0 %v11988_v28  ;;  %v4935_v28 = vld [vmem:[#allocation8 + $0xa40] sm:$0xff]  ;;  %v12077_v39 = vcombine.high %v5063_v56, %v5067_v2  ;;  %v12076_v47 = vcombine.low %v5063_v56, %v5067_v2 }
 0x37c   :  { %7830 = vmatprep.subr.bf16.mxu0 %v11981_v36  ;;  %7872 = vmatpush2.bf16.msra.mxu1 %v12116_v8  ;;  %v4939_v36 = vld [vmem:[#allocation8 + $0xa60] sm:$0xff]  ;;  %v12085_v8 = vcombine.high %v5071_v34, %v5075_v14  ;;  %v4399_v50 = vadd.f32 %v13546_v17, %v4356_v0  ;;  %v4664_v17 = vld [vmem:[#allocation8 + $0x1c8] sm:$0xff] }
 0x37d   :  { %7873 = vmatprep.subr.bf16.mxu1 %v12109_v42  ;;  %v11956_v42 = vcombine.low %v4943_v22, %v4947_v24  ;;  %v11949_v27 = vcombine.high %v4935_v28, %v4939_v36  ;;  %v4927_v29 = vld [vmem:[#allocation8 + $0xa00] sm:$0xff]  ;;  %v11948_v41 = vcombine.low %v4935_v28, %v4939_v36  ;;  %v4656_v24 = vld [vmem:[#allocation8 + $0x188] sm:$0xff]  ;;  %v11678_v3 = vcombine.low %v4664_v17, %v4668_v11 }
 0x37e   :  { %v5059_v9 = vld [vmem:[#allocation8 + $0xe20] sm:$0xff]  ;;  %v4587_v57 = vmax.f32 %v4399_v50, 0.0  ;;  %v4644_v28 = vld [vmem:[#allocation8 + $0x128] sm:$0xff] }
 0x37f   :  { %7831 = vmatpush2.bf16.msra.mxu0 %v11980_v7  ;;  %v4931_v7 = vld [vmem:[#allocation8 + $0xa20] sm:$0xff]  ;;  %v4628_v50 = vld [vmem:[#allocation8 + $0xa8] sm:$0xff] }
 0x380   :  { %7832 = vmatprep.subr.bf16.mxu0 %v11973_v1  ;;  %7874 = vmatpush2.bf16.msra.mxu1 %v12108_v5  ;;  %v4395_v1 = vadd.f32 %v13541_v23, %v4352_v55  ;;  %v5055_v5 = vld [vmem:[#allocation8 + $0xe00] sm:$0xff]  ;;  %v11940_v51 = vcombine.low %v4927_v29, %v4931_v7  ;;  %v11679_v23 = vcombine.high %v4664_v17, %v4668_v11  ;;  %v4636_v55 = vld [vmem:[#allocation8 + $0xe8] sm:$0xff] }
 0x381   :  { %7875 = vmatprep.subr.bf16.mxu1 %v12101_v53  ;;  %v11941_v53 = vcombine.high %v4927_v29, %v4931_v7  ;;  %v12069_v59 = vcombine.high %v5055_v5, %v5059_v9  ;;  %v12068_v22 = vcombine.low %v5055_v5, %v5059_v9  ;;  %v4616_v29 = vld [vmem:[#allocation8 + $0x48] sm:$0xff] }
 0x382   :  { %v4620_v7 = vld [vmem:[#allocation8 + $0x68] sm:$0xff] }
 0x383   :  { %7833 = vmatpush2.bf16.msra.mxu0 %v11972_v58  ;;  %v4579_v58 = vmax.f32 %v4395_v1, 0.0  ;;  %v11631_v1 = vcombine.high %v4616_v29, %v4620_v7  ;;  %v4608_v5 = vld [vmem:[#allocation8 + $0x8] sm:$0xff] }
 0x384   :  { %7834 = vmatprep.subr.bf16.mxu0 %v11965_v21  ;;  %7876 = vmatpush2.bf16.msra.mxu1 %v12100_v13  ;;  %v4660_v13 = vld [vmem:[#allocation8 + $0x1a8] sm:$0xff] }
 0x385   :  { %7877 = vmatprep.subr.bf16.mxu1 %v12093_v25  ;;  %v13571_v21 = vpack.c.bf16 %v4587_v57, %v4579_v58  ;;  %v11807_v25 = vcombine.high %v13554_v40, %v13556_v63  ;;  %v11671_v14 = vcombine.high %v4656_v24, %v4660_v13  ;;  %v11670_v38 = vcombine.low %v4656_v24, %v4660_v13  ;;  %v4612_v9 = vld [vmem:[#allocation8 + $0x28] sm:$0xff] }
 0x386   :  { %v11623_v57 = vcombine.high %v4608_v5, %v4612_v9  ;;  %v11622_v17 = vcombine.low %v4608_v5, %v4612_v9  ;;  %v4724_v58 = vld [vmem:[#allocation8 + $0x3a8] sm:$0xff] }
 0x387   :  { %7835 = vmatpush2.bf16.msra.mxu0 %v11964_v48  ;;  %v13577_v34 = vadd.bf16 %v13571_v21, %v13408_v4  ;;  %v4648_v48 = vld [vmem:[#allocation8 + $0x148] sm:$0xff] }
 0x388   :  { %7836 = vmatprep.subr.bf16.mxu0 %v11957_v35  ;;  %7878 = vmatpush2.bf16.msra.mxu1 %v12092_v10  ;;  %v4652_v35 = vld [vmem:[#allocation8 + $0x168] sm:$0xff] }
 0x389   :  { %7879 = vmatprep.subr.bf16.mxu1 %v12085_v8  ;;  %v11663_v0 = vcombine.high %v4648_v48, %v4652_v35  ;;  %v4640_v10 = vld [vmem:[#allocation8 + $0x108] sm:$0xff]  ;;  %v11662_v36 = vcombine.low %v4648_v48, %v4652_v35 }
 0x38a   :  { %v11655_v4 = vcombine.high %v4640_v10, %v4644_v28  ;;  %v4632_v8 = vld [vmem:[#allocation8 + $0xc8] sm:$0xff]  ;;  %v11654_v56 = vcombine.low %v4640_v10, %v4644_v28 }
 0x38b   :  { %7837 = vmatpush2.bf16.msra.mxu0 %v11956_v42  ;;  %v11647_v2 = vcombine.high %v4632_v8, %v4636_v55  ;;  %v4624_v42 = vld [vmem:[#allocation8 + $0x88] sm:$0xff] }
 0x38c   :  { %7838 = vmatprep.subr.bf16.mxu0 %v11949_v27  ;;  %7880 = vmatpush2.bf16.msra.mxu1 %v12084_v60  ;;  %v11646_v27 = vcombine.low %v4632_v8, %v4636_v55  ;;  %v11639_v60 = vcombine.high %v4624_v42, %v4628_v50  ;;  %v4716_v24 = vld [vmem:[#allocation8 + $0x368] sm:$0xff] }
 0x38d   :  { %7881 = vmatprep.subr.bf16.mxu1 %v12077_v39  ;;  %v11638_v39 = vcombine.low %v4624_v42, %v4628_v50 }
 0x38f   :  { %7839 = vmatpush2.bf16.msra.mxu0 %v11948_v41  ;;  %v11630_v41 = vcombine.low %v4616_v29, %v4620_v7  ;;  %v4672_v29 = vld [vmem:[#allocation8 + $0x208] sm:$0xff] }
 0x390   :  { %7840 = vmatprep.subr.bf16.mxu0 %v11941_v53  ;;  %7882 = vmatpush2.bf16.msra.mxu1 %v12076_v47  ;;  %v4728_v53 = vld [vmem:[#allocation8 + $0x3c8] sm:$0xff] }
 0x391   :  { %7883 = vmatprep.subr.bf16.mxu1 %v12069_v59  ;;  %v4732_v47 = vld [vmem:[#allocation8 + $0x3e8] sm:$0xff] }
 0x392   :  { %v11743_v11 = vcombine.high %v4728_v53, %v4732_v47  ;;  %v4720_v59 = vld [vmem:[#allocation8 + $0x388] sm:$0xff] }
 0x393   :  { %7841 = vmatpush2.bf16.msra.mxu0 %v11940_v51  ;;  %v11742_v51 = vcombine.low %v4728_v53, %v4732_v47  ;;  %v11734_v13 = vcombine.low %v4720_v59, %v4724_v58  ;;  %v4676_v7 = vld [vmem:[#allocation8 + $0x228] sm:$0xff]  ;;  %v1314_v53 = vrot.slane %v13420_v52, %v13398_v15  ;;  %v1318_v47 = vrot.slane %v13420_v52, %v13374_v33 }
 0x394   :  { %7896 = vmatprep.subr.bf16.mxu0 %v11679_v23  ;;  %7884 = vmatpush2.bf16.msra.mxu1 %v12068_v22  ;;  %v11735_v23 = vcombine.high %v4720_v59, %v4724_v58  ;;  %v4712_v22 = vld [vmem:[#allocation8 + $0x348] sm:$0xff]  ;;  %v11687_v5 = vcombine.high %v4672_v29, %v4676_v7 }
 0x395   :  { %7939 = vmatprep.subr.bf16.mxu1 %v11807_v25  ;;  %v11727_v25 = vcombine.high %v4712_v22, %v4716_v24  ;;  %v11726_v48 = vcombine.low %v4712_v22, %v4716_v24 }
 0x396   :  { %7843 = vmatmul.mubr.bf16.vlgmr.msra.gmra.mxu0 %v13577_v34  ;;  %v4437_v50 = vpop.f32.mrf.mxu0 }
 0x397   :  { %7897 = vmatpush1.bf16.msra.mxu0 %v11678_v3  ;;  %7928 = vmatprep.mubr.bf16.mxu0 %v13510_v62  ;;  %v4704_v3 = vld [vmem:[#allocation8 + $0x308] sm:$0xff]  ;;  %v4438_v22 = vadd.f32 %v4437_v50, %v1314_v53 }
 0x398   :  { %7898 = vmatprep.subr.bf16.mxu0 %v11671_v14  ;;  %v4708_v14 = vld [vmem:[#allocation8 + $0x328] sm:$0xff] }
 0x399   :  { %v11719_v35 = vcombine.high %v4704_v3, %v4708_v14  ;;  %v11718_v10 = vcombine.low %v4704_v3, %v4708_v14 }
 0x39b   :  { %7899 = vmatpush1.bf16.msra.mxu0 %v11670_v38  ;;  %v4696_v38 = vld [vmem:[#allocation8 + $0x2c8] sm:$0xff] }
 0x39c   :  { %7900 = vmatprep.subr.bf16.mxu0 %v11663_v0  ;;  %v4700_v0 = vld [vmem:[#allocation8 + $0x2e8] sm:$0xff] }
 0x39d   :  { %v11711_v28 = vcombine.high %v4696_v38, %v4700_v0  ;;  %v11710_v8 = vcombine.low %v4696_v38, %v4700_v0  ;;  %v4908_v38 = vld [vmem:[#allocation8 + $0x968] sm:$0xff] }
 0x39f   :  { %7901 = vmatpush1.bf16.msra.mxu0 %v11662_v36  ;;  %v4688_v36 = vld [vmem:[#allocation8 + $0x288] sm:$0xff] }
 0x3a0   :  { %7902 = vmatprep.subr.bf16.mxu0 %v11655_v4  ;;  %v4692_v4 = vld [vmem:[#allocation8 + $0x2a8] sm:$0xff] }
 0x3a1   :  { %v11703_v55 = vcombine.high %v4688_v36, %v4692_v4  ;;  %v11702_v42 = vcombine.low %v4688_v36, %v4692_v4 }
 0x3a3   :  { %7903 = vmatpush1.bf16.msra.mxu0 %v11654_v56  ;;  %v4680_v56 = vld [vmem:[#allocation8 + $0x248] sm:$0xff] }
 0x3a4   :  { %7904 = vmatprep.subr.bf16.mxu0 %v11647_v2  ;;  %v4684_v2 = vld [vmem:[#allocation8 + $0x268] sm:$0xff] }
 0x3a7   :  { %7905 = vmatpush1.bf16.msra.mxu0 %v11646_v27  ;;  %v11695_v27 = vcombine.high %v4680_v56, %v4684_v2 }
 0x3a8   :  { %7906 = vmatprep.subr.bf16.mxu0 %v11639_v60  ;;  %v4480_v60 = vpop.f32.mrf.mxu1 }
 0x3a9   :  { %v4481_v52 = vadd.f32 %v4480_v60, %v4438_v22 }
 0x3aa   :  { %v4482_v9 = vpop.f32.mrf.mxu1 }
 0x3ab   :  { %7907 = vmatpush1.bf16.msra.mxu0 %v11638_v39  ;;  %v11694_v39 = vcombine.low %v4680_v56, %v4684_v2 }
 0x3ac   :  { %7908 = vmatprep.subr.bf16.mxu0 %v11631_v1  ;;  %v4439_v1 = vpop.f32.mrf.mxu0  ;;  %v4484_v58 = vpop.f32.mrf.mxu1 }
 0x3ad   :  { %v4440_v24 = vadd.f32 %v4439_v1, %v1318_v47 }
 0x3af   :  { %7909 = vmatpush1.bf16.msra.mxu0 %v11630_v41  ;;  %v4920_v41 = vld [vmem:[#allocation8 + $0x9c8] sm:$0xff] }
 0x3b0   :  { %7910 = vmatprep.subr.bf16.mxu0 %v11623_v57  ;;  %v4924_v57 = vld [vmem:[#allocation8 + $0x9e8] sm:$0xff] }
 0x3b1   :  { %v11935_v59 = vcombine.high %v4920_v41, %v4924_v57 }
 0x3b3   :  { %7911 = vmatpush1.bf16.msra.mxu0 %v11622_v17  ;;  %v11686_v17 = vcombine.low %v4672_v29, %v4676_v7  ;;  %v4900_v29 = vld [vmem:[#allocation8 + $0x928] sm:$0xff] }
 0x3b4   :  { %7912 = vmatprep.subr.bf16.mxu0 %v11743_v11  ;;  %v4441_v11 = vpop.f32.mrf.mxu0 }
 0x3b5   :  { %v4442_v14 = vadd.f32 %v4441_v11, %v1314_v53  ;;  %v4888_v11 = vld [vmem:[#allocation8 + $0x8c8] sm:$0xff] }
 0x3b7   :  { %7913 = vmatpush2.bf16.msra.mxu0 %v11742_v51  ;;  %v4912_v51 = vld [vmem:[#allocation8 + $0x988] sm:$0xff]  ;;  %v4485_v2 = vadd.f32 %v4484_v58, %v4442_v14 }
 0x3b8   :  { %7914 = vmatprep.subr.bf16.mxu0 %v11735_v23  ;;  %v4916_v23 = vld [vmem:[#allocation8 + $0x9a8] sm:$0xff] }
 0x3b9   :  { %v11927_v3 = vcombine.high %v4912_v51, %v4916_v23  ;;  %v11926_v4 = vcombine.low %v4912_v51, %v4916_v23  ;;  %v4880_v14 = vld [vmem:[#allocation8 + $0x888] sm:$0xff] }
 0x3bb   :  { %7915 = vmatpush2.bf16.msra.mxu0 %v11734_v13  ;;  %v11934_v13 = vcombine.low %v4920_v41, %v4924_v57 }
 0x3bc   :  { %7916 = vmatprep.subr.bf16.mxu0 %v11727_v25  ;;  %v4443_v25 = vpop.f32.mrf.mxu0 }
 0x3bf   :  { %7917 = vmatpush2.bf16.msra.mxu0 %v11726_v48  ;;  %v4486_v48 = vpop.f32.mrf.mxu1 }
 0x3c0   :  { %7918 = vmatprep.subr.bf16.mxu0 %v11719_v35  ;;  %v4904_v35 = vld [vmem:[#allocation8 + $0x948] sm:$0xff] }
 0x3c1   :  { %v11919_v56 = vcombine.high %v4904_v35, %v4908_v38 }
 0x3c3   :  { %7919 = vmatpush2.bf16.msra.mxu0 %v11718_v10  ;;  %v4483_v10 = vadd.f32 %v4482_v9, %v4440_v24 }
 0x3c4   :  { %7920 = vmatprep.subr.bf16.mxu0 %v11711_v28  ;;  %v4444_v28 = vadd.f32 %v4443_v25, %v1318_v47 }
 0x3c6   :  { %v4487_v7 = vadd.f32 %v4486_v48, %v4444_v28  ;;  %v4884_v48 = vld [vmem:[#allocation8 + $0x8a8] sm:$0xff] }
 0x3c7   :  { %7921 = vmatpush2.bf16.msra.mxu0 %v11710_v8  ;;  %v11895_v28 = vcombine.high %v4880_v14, %v4884_v48 }
 0x3c8   :  { %7922 = vmatprep.subr.bf16.mxu0 %v11703_v55 }
 0x3cb   :  { %7923 = vmatpush2.bf16.msra.mxu0 %v11702_v42 }
 0x3cc   :  { %7924 = vmatprep.subr.bf16.mxu0 %v11695_v27  ;;  %v4896_v27 = vld [vmem:[#allocation8 + $0x908] sm:$0xff] }
 0x3cd   :  { %v11911_v57 = vcombine.high %v4896_v27, %v4900_v29  ;;  %v11910_v22 = vcombine.low %v4896_v27, %v4900_v29  ;;  %v4868_v29 = vld [vmem:[#allocation8 + $0x828] sm:$0xff] }
 0x3cf   :  { %7925 = vmatpush2.bf16.msra.mxu0 %v11694_v39 }
 0x3d0   :  { %7926 = vmatprep.subr.bf16.mxu0 %v11687_v5  ;;  %v11918_v5 = vcombine.low %v4904_v35, %v4908_v38 }
 0x3d3   :  { %7927 = vmatpush2.bf16.msra.mxu0 %v11686_v17 }
 0x3d4   :  { %7982 = vmatprep.subr.bf16.mxu0 %v11935_v59  ;;  %v4892_v59 = vld [vmem:[#allocation8 + $0x8e8] sm:$0xff] }
 0x3d6   :  { %v4523_v0 = vpop.f32.mrf.mxu0  ;;  %7929 = vmatmul.mubr.bf16.vlgmr.msra.gmra.mxu0 %v13532_v12 }
 0x3d7   :  { %v4566_v36 = vpop.f32.mrf.mxu1  ;;  %7983 = vmatpush1.bf16.msra.mxu0 %v11934_v13  ;;  %8014 = vmatprep.mubr.bf16.mxu0 %v13552_v26  ;;  %v4524_v8 = vadd.f32 %v4523_v0, %v4481_v52  ;;  %v11903_v13 = vcombine.high %v4888_v11, %v4892_v59  ;;  %v11902_v52 = vcombine.low %v4888_v11, %v4892_v59  ;;  %v4784_v0 = vld [vmem:[#allocation8 + $0x588] sm:$0xff] }
 0x3d8   :  { %v4525_v55 = vpop.f32.mrf.mxu0  ;;  %7984 = vmatprep.subr.bf16.mxu0 %v11927_v3  ;;  %v4976_v11 = vld [vmem:[#allocation8 + $0xb88] sm:$0xff] }
 0x3d9   :  { %v4526_v42 = vadd.f32 %v4525_v55, %v4483_v10  ;;  %v4568_v50 = vpop.f32.mrf.mxu1  ;;  %v4567_v9 = vadd.f32 %v4566_v36, %v4524_v8  ;;  %v4788_v10 = vld [vmem:[#allocation8 + $0x5a8] sm:$0xff] }
 0x3da   :  { %v4527_v60 = vpop.f32.mrf.mxu0  ;;  %v4876_v8 = vld [vmem:[#allocation8 + $0x868] sm:$0xff] }
 0x3db   :  { %v4528_v39 = vadd.f32 %v4527_v60, %v4485_v2  ;;  %v4570_v1 = vpop.f32.mrf.mxu1  ;;  %7985 = vmatpush1.bf16.msra.mxu0 %v11926_v4  ;;  %v4569_v53 = vadd.f32 %v4568_v50, %v4526_v42  ;;  %v4581_v24 = vmax.f32 %v4567_v9, 0.0  ;;  %v4872_v4 = vld [vmem:[#allocation8 + $0x848] sm:$0xff]  ;;  %v11894_v2 = vcombine.low %v4880_v14, %v4884_v48 }
 0x3dc   :  { %v4529_v41 = vpop.f32.mrf.mxu0  ;;  %7986 = vmatprep.subr.bf16.mxu0 %v11919_v56  ;;  %v11799_v56 = vcombine.high %v4784_v0, %v4788_v10  ;;  %v4776_v42 = vld [vmem:[#allocation8 + $0x548] sm:$0xff]  ;;  %v11887_v27 = vcombine.high %v4872_v4, %v4876_v8 }
 0x3dd   :  { %v4571_v47 = vadd.f32 %v4570_v1, %v4528_v39  ;;  %v4530_v17 = vadd.f32 %v4529_v41, %v4487_v7  ;;  %v4572_v58 = vpop.f32.mrf.mxu1  ;;  %v4582_v25 = vmax.f32 %v4569_v53, 0.0  ;;  %v4780_v50 = vld [vmem:[#allocation8 + $0x568] sm:$0xff]  ;;  %v11886_v7 = vcombine.low %v4872_v4, %v4876_v8 }
 0x3de   :  { %v11791_v60 = vcombine.high %v4776_v42, %v4780_v50  ;;  %v4768_v39 = vld [vmem:[#allocation8 + $0x508] sm:$0xff]  ;;  %v11790_v9 = vcombine.low %v4776_v42, %v4780_v50 }
 0x3df   :  { %v4589_v51 = vmax.f32 %v4571_v47, 0.0  ;;  %v4573_v23 = vadd.f32 %v4572_v58, %v4530_v17  ;;  %7987 = vmatpush1.bf16.msra.mxu0 %v11918_v5  ;;  %v4772_v1 = vld [vmem:[#allocation8 + $0x528] sm:$0xff] }
 0x3e0   :  { %7988 = vmatprep.subr.bf16.mxu0 %v11911_v57  ;;  %v4984_v41 = vld [vmem:[#allocation8 + $0xbc8] sm:$0xff]  ;;  %v11783_v40 = vcombine.high %v4768_v39, %v4772_v1  ;;  %v11782_v17 = vcombine.low %v4768_v39, %v4772_v1 }
 0x3e1   :  { %v4590_v3 = vmax.f32 %v4573_v23, 0.0  ;;  %v13587_v35 = vpack.c.bf16 %v4589_v51, %v4581_v24  ;;  %v4988_v57 = vld [vmem:[#allocation8 + $0xbe8] sm:$0xff] }
 0x3e2   :  { %v4764_v53 = vld [vmem:[#allocation8 + $0x4e8] sm:$0xff]  ;;  %v11999_v47 = vcombine.high %v4984_v41, %v4988_v57  ;;  %v11998_v51 = vcombine.low %v4984_v41, %v4988_v57 }
 0x3e3   :  { %v13589_v38 = vpack.c.bf16 %v4590_v3, %v4582_v25  ;;  %7989 = vmatpush1.bf16.msra.mxu0 %v11910_v22  ;;  %v13597_v55 = vadd.bf16 %v13587_v35, %v13410_v6  ;;  %v4864_v6 = vld [vmem:[#allocation8 + $0x808] sm:$0xff] }
 0x3e4   :  { %7990 = vmatprep.subr.bf16.mxu0 %v11903_v13  ;;  %v11879_v5 = vcombine.high %v4864_v6, %v4868_v29  ;;  %v11878_v63 = vcombine.low %v4864_v6, %v4868_v29  ;;  %v4980_v59 = vld [vmem:[#allocation8 + $0xba8] sm:$0xff] }
 0x3e5   :  { %v13593_v36 = vadd.bf16 %v13589_v38, %v13390_v32  ;;  %v11798_v32 = vcombine.low %v4784_v0, %v4788_v10  ;;  %v4752_v23 = vld [vmem:[#allocation8 + $0x488] sm:$0xff]  ;;  %v11991_v24 = vcombine.high %v4976_v11, %v4980_v59  ;;  %v11990_v48 = vcombine.low %v4976_v11, %v4980_v59 }
 0x3e6   :  { %v4756_v22 = vld [vmem:[#allocation8 + $0x4a8] sm:$0xff] }
 0x3e7   :  { %7885 = vmatprep.mubr.bf16.mxu1 %v13593_v36  ;;  %7991 = vmatpush1.bf16.msra.mxu0 %v11902_v52  ;;  %v4968_v25 = vld [vmem:[#allocation8 + $0xb48] sm:$0xff]  ;;  %v11767_v14 = vcombine.high %v4752_v23, %v4756_v22 }
 0x3e8   :  { %7886 = vmatmul.mubr.bf16.vlgmr.msra.gmra.mxu1 %v13597_v55  ;;  %7992 = vmatprep.subr.bf16.mxu0 %v11895_v28  ;;  %v4972_v3 = vld [vmem:[#allocation8 + $0xb68] sm:$0xff]  ;;  %v11766_v28 = vcombine.low %v4752_v23, %v4756_v22 }
 0x3e9   :  { %7940 = vmatpush1.bf16.msra.mxu1 %v11806_v37  ;;  %7971 = vmatprep.mubr.bf16.mxu1 %v13515_v49  ;;  %v4760_v37 = vld [vmem:[#allocation8 + $0x4c8] sm:$0xff]  ;;  %v11983_v10 = vcombine.high %v4968_v25, %v4972_v3 }
 0x3ea   :  { %7941 = vmatprep.subr.bf16.mxu1 %v11799_v56  ;;  %v11775_v58 = vcombine.high %v4760_v37, %v4764_v53  ;;  %v11774_v13 = vcombine.low %v4760_v37, %v4764_v53  ;;  %v4744_v52 = vld [vmem:[#allocation8 + $0x448] sm:$0xff] }
 0x3eb   :  { %7993 = vmatpush1.bf16.msra.mxu0 %v11894_v2  ;;  %v4748_v0 = vld [vmem:[#allocation8 + $0x468] sm:$0xff]  ;;  %v11982_v2 = vcombine.low %v4968_v25, %v4972_v3 }
 0x3ec   :  { %7994 = vmatprep.subr.bf16.mxu0 %v11887_v27  ;;  %v4960_v4 = vld [vmem:[#allocation8 + $0xb08] sm:$0xff]  ;;  %v11759_v56 = vcombine.high %v4744_v52, %v4748_v0 }
 0x3ed   :  { %7942 = vmatpush1.bf16.msra.mxu1 %v11798_v32  ;;  %v4964_v8 = vld [vmem:[#allocation8 + $0xb28] sm:$0xff]  ;;  %v11758_v32 = vcombine.low %v4744_v52, %v4748_v0 }
 0x3ee   :  { %7943 = vmatprep.subr.bf16.mxu1 %v11791_v60  ;;  %v4736_v42 = vld [vmem:[#allocation8 + $0x408] sm:$0xff]  ;;  %v11975_v27 = vcombine.high %v4960_v4, %v4964_v8 }
 0x3ef   :  { %7995 = vmatpush1.bf16.msra.mxu0 %v11886_v7  ;;  %v4740_v50 = vld [vmem:[#allocation8 + $0x428] sm:$0xff]  ;;  %v11974_v7 = vcombine.low %v4960_v4, %v4964_v8 }
 0x3f0   :  { %7996 = vmatprep.subr.bf16.mxu0 %v11879_v5  ;;  %v4952_v6 = vld [vmem:[#allocation8 + $0xac8] sm:$0xff]  ;;  %v11751_v60 = vcombine.high %v4736_v42, %v4740_v50 }
 0x3f1   :  { %7944 = vmatpush1.bf16.msra.mxu1 %v11790_v9  ;;  %v4956_v29 = vld [vmem:[#allocation8 + $0xae8] sm:$0xff]  ;;  %v11750_v9 = vcombine.low %v4736_v42, %v4740_v50 }
 0x3f2   :  { %7945 = vmatprep.subr.bf16.mxu1 %v11783_v40  ;;  %v4856_v39 = vld [vmem:[#allocation8 + $0x7c8] sm:$0xff]  ;;  %v11967_v5 = vcombine.high %v4952_v6, %v4956_v29 }
 0x3f3   :  { %7997 = vmatpush1.bf16.msra.mxu0 %v11878_v63  ;;  %v4860_v1 = vld [vmem:[#allocation8 + $0x7e8] sm:$0xff]  ;;  %v11966_v63 = vcombine.low %v4952_v6, %v4956_v29 }
 0x3f4   :  { %7998 = vmatprep.subr.bf16.mxu0 %v11999_v47  ;;  %v4944_v41 = vld [vmem:[#allocation8 + $0xa88] sm:$0xff]  ;;  %v11871_v40 = vcombine.high %v4856_v39, %v4860_v1 }
 0x3f5   :  { %7946 = vmatpush1.bf16.msra.mxu1 %v11782_v17  ;;  %v4948_v57 = vld [vmem:[#allocation8 + $0xaa8] sm:$0xff]  ;;  %v11870_v17 = vcombine.low %v4856_v39, %v4860_v1  ;;  %v4661_v39 = vld [vmem:[#allocation8 + $0x1b0] sm:$0xff] }
 0x3f6   :  { %7947 = vmatprep.subr.bf16.mxu1 %v11775_v58  ;;  %v4848_v37 = vld [vmem:[#allocation8 + $0x788] sm:$0xff]  ;;  %v11959_v47 = vcombine.high %v4944_v41, %v4948_v57 }
 0x3f7   :  { %7999 = vmatpush2.bf16.msra.mxu0 %v11998_v51  ;;  %v4852_v53 = vld [vmem:[#allocation8 + $0x7a8] sm:$0xff]  ;;  %v11958_v51 = vcombine.low %v4944_v41, %v4948_v57 }
 0x3f8   :  { %8000 = vmatprep.subr.bf16.mxu0 %v11991_v24  ;;  %v4936_v11 = vld [vmem:[#allocation8 + $0xa48] sm:$0xff]  ;;  %v11863_v58 = vcombine.high %v4848_v37, %v4852_v53 }
 0x3f9   :  { %7948 = vmatpush1.bf16.msra.mxu1 %v11774_v13  ;;  %v4940_v59 = vld [vmem:[#allocation8 + $0xa68] sm:$0xff]  ;;  %v11862_v13 = vcombine.low %v4848_v37, %v4852_v53  ;;  %v4649_v37 = vld [vmem:[#allocation8 + $0x150] sm:$0xff] }
 0x3fa   :  { %7949 = vmatprep.subr.bf16.mxu1 %v11767_v14  ;;  %v4840_v23 = vld [vmem:[#allocation8 + $0x748] sm:$0xff]  ;;  %v11951_v24 = vcombine.high %v4936_v11, %v4940_v59  ;;  %v4653_v53 = vld [vmem:[#allocation8 + $0x170] sm:$0xff] }
 0x3fb   :  { %8001 = vmatpush2.bf16.msra.mxu0 %v11990_v48  ;;  %v4844_v22 = vld [vmem:[#allocation8 + $0x768] sm:$0xff]  ;;  %v11950_v48 = vcombine.low %v4936_v11, %v4940_v59 }
 0x3fc   :  { %8002 = vmatprep.subr.bf16.mxu0 %v11983_v10  ;;  %v4928_v25 = vld [vmem:[#allocation8 + $0xa08] sm:$0xff]  ;;  %v11855_v14 = vcombine.high %v4840_v23, %v4844_v22  ;;  %v11854_v8 = vcombine.low %v4840_v23, %v4844_v22 }
 0x3fd   :  { %7950 = vmatpush1.bf16.msra.mxu1 %v11766_v28  ;;  %v4932_v3 = vld [vmem:[#allocation8 + $0xa28] sm:$0xff] }
 0x3fe   :  { %7951 = vmatprep.subr.bf16.mxu1 %v11759_v56  ;;  %v4832_v52 = vld [vmem:[#allocation8 + $0x708] sm:$0xff]  ;;  %v11943_v10 = vcombine.high %v4928_v25, %v4932_v3  ;;  %v4665_v56 = vld [vmem:[#allocation8 + $0x1d0] sm:$0xff]  ;;  %v11942_v50 = vcombine.low %v4928_v25, %v4932_v3 }
 0x3ff   :  { %8003 = vmatpush2.bf16.msra.mxu0 %v11982_v2  ;;  %v4836_v0 = vld [vmem:[#allocation8 + $0x728] sm:$0xff]  ;;  %v4669_v2 = vld [vmem:[#allocation8 + $0x1f0] sm:$0xff] }
 0x400   :  { %8004 = vmatprep.subr.bf16.mxu0 %v11975_v27  ;;  %v5120_v28 = vld [vmem:[#allocation14 + $0x2] ss:$8 sm:$0xf]  ;;  %v11847_v42 = vcombine.high %v4832_v52, %v4836_v0  ;;  %v11681_v29 = vcombine.high %v4665_v56, %v4669_v2 }
 0x401   :  { %7952 = vmatpush1.bf16.msra.mxu1 %v11758_v32  ;;  %v5121_v4 = vld [vmem:[#allocation14 + $0x2] ss:$8 sm:$0xf0] }
 0x402   :  { %7953 = vmatprep.subr.bf16.mxu1 %v11751_v60  ;;  %v13605_v27 = vor.u32 %v5121_v4, %v5120_v28  ;;  %v4824_v32 = vld [vmem:[#allocation8 + $0x6c8] sm:$0xff]  ;;  %v11846_v60 = vcombine.low %v4832_v52, %v4836_v0  ;;  %v11664_v28 = vcombine.low %v4649_v37, %v4653_v53 }
 0x403   :  { %8005 = vmatpush2.bf16.msra.mxu0 %v11974_v7  ;;  %v4828_v6 = vld [vmem:[#allocation8 + $0x6e8] sm:$0xff]  ;;  %v4657_v7 = vld [vmem:[#allocation8 + $0x190] sm:$0xff] }
 0x404   :  { %8006 = vmatprep.subr.bf16.mxu0 %v11967_v5  ;;  %v11839_v1 = vcombine.high %v4824_v32, %v4828_v6  ;;  %v5127_v5 = vrot.slane %v13605_v27, %v13336_v18  ;;  %v4816_v41 = vld [vmem:[#allocation8 + $0x688] sm:$0xff] }
 0x405   :  { %7954 = vmatpush1.bf16.msra.mxu1 %v11750_v9  ;;  %v11680_v9 = vcombine.low %v4665_v56, %v4669_v2  ;;  %v4820_v57 = vld [vmem:[#allocation8 + $0x6a8] sm:$0xff] }
 0x406   :  { %7955 = vmatprep.subr.bf16.mxu1 %v11871_v40  ;;  %v11673_v40 = vcombine.high %v4657_v7, %v4661_v39  ;;  %v4812_v23 = vld [vmem:[#allocation8 + $0x668] sm:$0xff]  ;;  %v11830_v3 = vcombine.low %v4816_v41, %v4820_v57 }
 0x407   :  { %8007 = vmatpush2.bf16.msra.mxu0 %v11966_v63  ;;  %v11838_v63 = vcombine.low %v4824_v32, %v4828_v6  ;;  %v4800_v4 = vld [vmem:[#allocation8 + $0x608] sm:$0xff]  ;;  %v4633_v32 = vld [vmem:[#allocation8 + $0xd0] sm:$0xff] }
 0x408   :  { %8008 = vmatprep.subr.bf16.mxu0 %v11959_v47  ;;  %v4637_v6 = vld [vmem:[#allocation8 + $0xf0] sm:$0xff] }
 0x409   :  { %7956 = vmatpush2.bf16.msra.mxu1 %v11870_v17  ;;  %v11831_v17 = vcombine.high %v4816_v41, %v4820_v57  ;;  %v4629_v41 = vld [vmem:[#allocation8 + $0xb0] sm:$0xff] }
 0x40a   :  { %7957 = vmatprep.subr.bf16.mxu1 %v11863_v58  ;;  %v11672_v58 = vcombine.low %v4657_v7, %v4661_v39  ;;  %v5048_v7 = vld [vmem:[#allocation8 + $0xdc8] sm:$0xff] }
 0x40b   :  { %8009 = vmatpush2.bf16.msra.mxu0 %v11958_v51  ;;  %v4808_v51 = vld [vmem:[#allocation8 + $0x648] sm:$0xff] }
 0x40c   :  { %8010 = vmatprep.subr.bf16.mxu0 %v11951_v24  ;;  %v11665_v24 = vcombine.high %v4649_v37, %v4653_v53  ;;  %v11823_v0 = vcombine.high %v4808_v51, %v4812_v23  ;;  %v5052_v39 = vld [vmem:[#allocation8 + $0xde8] sm:$0xff] }
 0x40d   :  { %7958 = vmatpush2.bf16.msra.mxu1 %v11862_v13  ;;  %v12063_v57 = vcombine.high %v5048_v7, %v5052_v39  ;;  %v5044_v37 = vld [vmem:[#allocation8 + $0xda8] sm:$0xff] }
 0x40e   :  { %7959 = vmatprep.subr.bf16.mxu1 %v11855_v14  ;;  %v4641_v14 = vld [vmem:[#allocation8 + $0x110] sm:$0xff] }
 0x40f   :  { %8011 = vmatpush2.bf16.msra.mxu0 %v11950_v48  ;;  %v4645_v48 = vld [vmem:[#allocation8 + $0x130] sm:$0xff] }
 0x410   :  { %8012 = vmatprep.subr.bf16.mxu0 %v11943_v10  ;;  %v11657_v2 = vcombine.high %v4641_v14, %v4645_v48 }
 0x411   :  { %7960 = vmatpush2.bf16.msra.mxu1 %v11854_v8  ;;  %v4804_v8 = vld [vmem:[#allocation8 + $0x628] sm:$0xff] }
 0x412   :  { %7961 = vmatprep.subr.bf16.mxu1 %v11847_v42 }
 0x413   :  { %8013 = vmatpush2.bf16.msra.mxu0 %v11942_v50  ;;  %v11822_v50 = vcombine.low %v4808_v51, %v4812_v23  ;;  %v5032_v51 = vld [vmem:[#allocation8 + $0xd48] sm:$0xff] }
 0x414   :  { %8068 = vmatprep.subr.bf16.mxu0 %v11681_v29  ;;  %v11815_v29 = vcombine.high %v4800_v4, %v4804_v8  ;;  %v5036_v23 = vld [vmem:[#allocation8 + $0xd68] sm:$0xff] }
 0x415   :  { %7962 = vmatpush2.bf16.msra.mxu1 %v11846_v60  ;;  %v11656_v60 = vcombine.low %v4641_v14, %v4645_v48  ;;  %v4609_v14 = vld [vmem:[#allocation8 + $0x10] sm:$0xff] }
 0x416   :  { %v7758_v47 = vpop.f32.mrf.mxu0  ;;  %8015 = vmatmul.mubr.bf16.vlgmr.msra.gmra.mxu0 %v13577_v34  ;;  %7963 = vmatprep.subr.bf16.mxu1 %v11839_v1  ;;  %v11649_v1 = vcombine.high %v4633_v32, %v4637_v6  ;;  %v4613_v48 = vld [vmem:[#allocation8 + $0x30] sm:$0xff] }
 0x417   :  { %v7759_v11 = vadd.f32 %v7758_v47, %v5127_v5  ;;  %v7801_v59 = vpop.f32.mrf.mxu1  ;;  %8069 = vmatpush1.bf16.msra.mxu0 %v11680_v9  ;;  %8100 = vmatprep.mubr.bf16.mxu0 %v13510_v62  ;;  %v4625_v9 = vld [vmem:[#allocation8 + $0x90] sm:$0xff]  ;;  %v12062_v47 = vcombine.low %v5048_v7, %v5052_v39 }
 0x418   :  { %v13611_v22 = vpop.f32.mrf.mxu0  ;;  %8070 = vmatprep.subr.bf16.mxu0 %v11673_v40  ;;  %v11648_v40 = vcombine.low %v4633_v32, %v4637_v6  ;;  %v11641_v53 = vcombine.high %v4625_v9, %v4629_v41  ;;  %v11624_v32 = vcombine.low %v4609_v14, %v4613_v48  ;;  %v5016_v6 = vld [vmem:[#allocation8 + $0xcc8] sm:$0xff]  ;;  %v4721_v39 = vld [vmem:[#allocation8 + $0x390] sm:$0xff] }
 0x419   :  { %v13613_v13 = vadd.f32 %v7801_v59, %v7759_v11  ;;  %v13615_v25 = vpop.f32.mrf.mxu1  ;;  %7964 = vmatpush2.bf16.msra.mxu1 %v11838_v63  ;;  %v5040_v63 = vld [vmem:[#allocation8 + $0xd88] sm:$0xff]  ;;  %v4621_v11 = vld [vmem:[#allocation8 + $0x70] sm:$0xff] }
 0x41a   :  { %v7762_v52 = vpop.f32.mrf.mxu0  ;;  %7965 = vmatprep.subr.bf16.mxu1 %v11831_v17  ;;  %v4617_v17 = vld [vmem:[#allocation8 + $0x50] sm:$0xff]  ;;  %v12055_v59 = vcombine.high %v5040_v63, %v5044_v37 }
 0x41b   :  { %v7763_v10 = vadd.f32 %v7762_v52, %v5127_v5  ;;  %8071 = vmatpush1.bf16.msra.mxu0 %v11672_v58  ;;  %v7805_v56 = vpop.f32.mrf.mxu1  ;;  %v11814_v5 = vcombine.low %v4800_v4, %v4804_v8  ;;  %v11640_v58 = vcombine.low %v4625_v9, %v4629_v41  ;;  %v12047_v52 = vcombine.high %v5032_v51, %v5036_v23  ;;  %v5008_v41 = vld [vmem:[#allocation8 + $0xc88] sm:$0xff] }
 0x41c   :  { %8072 = vmatprep.subr.bf16.mxu0 %v11665_v24  ;;  %v11633_v24 = vcombine.high %v4617_v17, %v4621_v11  ;;  %v11625_v4 = vcombine.high %v4609_v14, %v4613_v48  ;;  %v12046_v8 = vcombine.low %v5032_v51, %v5036_v23  ;;  %v4705_v23 = vld [vmem:[#allocation8 + $0x310] sm:$0xff]  ;;  %v4992_v48 = vld [vmem:[#allocation8 + $0xc08] sm:$0xff] }
 0x41d   :  { %v13617_v42 = vadd.f32 %v7805_v56, %v7763_v10  ;;  %7966 = vmatpush2.bf16.msra.mxu1 %v11830_v3  ;;  %v12054_v3 = vcombine.low %v5040_v63, %v5044_v37  ;;  %v5024_v10 = vld [vmem:[#allocation8 + $0xd08] sm:$0xff]  ;;  %v4729_v56 = vld [vmem:[#allocation8 + $0x3d0] sm:$0xff] }
 0x41e   :  { %7967 = vmatprep.subr.bf16.mxu1 %v11823_v0  ;;  %v11632_v0 = vcombine.low %v4617_v17, %v4621_v11  ;;  %v4713_v37 = vld [vmem:[#allocation8 + $0x350] sm:$0xff]  ;;  %v5000_v11 = vld [vmem:[#allocation8 + $0xc48] sm:$0xff] }
 0x41f   :  { %8073 = vmatpush1.bf16.msra.mxu0 %v11664_v28  ;;  %v5028_v28 = vld [vmem:[#allocation8 + $0xd28] sm:$0xff] }
 0x420   :  { %8074 = vmatprep.subr.bf16.mxu0 %v11657_v2  ;;  %v4733_v2 = vld [vmem:[#allocation8 + $0x3f0] sm:$0xff]  ;;  %v12038_v7 = vcombine.low %v5024_v10, %v5028_v28 }
 0x421   :  { %7968 = vmatpush2.bf16.msra.mxu1 %v11822_v50  ;;  %v12039_v50 = vcombine.high %v5024_v10, %v5028_v28  ;;  %v11744_v9 = vcombine.low %v4729_v56, %v4733_v2  ;;  %v4697_v28 = vld [vmem:[#allocation8 + $0x2d0] sm:$0xff] }
 0x422   :  { %7969 = vmatprep.subr.bf16.mxu1 %v11815_v29  ;;  %v5020_v29 = vld [vmem:[#allocation8 + $0xce8] sm:$0xff] }
 0x423   :  { %8075 = vmatpush1.bf16.msra.mxu0 %v11656_v60  ;;  %v11745_v60 = vcombine.high %v4729_v56, %v4733_v2  ;;  %v12030_v63 = vcombine.low %v5016_v6, %v5020_v29  ;;  %v5112_v2 = vld [vmem:[#allocation8 + $0xfc8] sm:$0xff] }
 0x424   :  { %8076 = vmatprep.subr.bf16.mxu0 %v11649_v1  ;;  %v4725_v1 = vld [vmem:[#allocation8 + $0x3b0] sm:$0xff] }
 0x425   :  { %7970 = vmatpush2.bf16.msra.mxu1 %v11814_v5  ;;  %v12031_v5 = vcombine.high %v5016_v6, %v5020_v29  ;;  %v11736_v17 = vcombine.low %v4721_v39, %v4725_v1  ;;  %v4689_v29 = vld [vmem:[#allocation8 + $0x290] sm:$0xff] }
 0x426   :  { %8025 = vmatprep.subr.bf16.mxu1 %v12063_v57  ;;  %v5012_v57 = vld [vmem:[#allocation8 + $0xca8] sm:$0xff] }
 0x427   :  { %8077 = vmatpush1.bf16.msra.mxu0 %v11648_v40  ;;  %v11737_v40 = vcombine.high %v4721_v39, %v4725_v1  ;;  %v12022_v51 = vcombine.low %v5008_v41, %v5012_v57  ;;  %v5104_v1 = vld [vmem:[#allocation8 + $0xf88] sm:$0xff] }
 0x428   :  { %7972 = vmatmul.mubr.bf16.vlgmr.msra.gmra.mxu1 %v13536_v45  ;;  %8078 = vmatprep.subr.bf16.mxu0 %v11641_v53  ;;  %v4717_v53 = vld [vmem:[#allocation8 + $0x370] sm:$0xff] }
 0x429   :  { %8026 = vmatpush1.bf16.msra.mxu1 %v12062_v47  ;;  %8057 = vmatprep.mubr.bf16.mxu1 %v13593_v36  ;;  %v12023_v47 = vcombine.high %v5008_v41, %v5012_v57  ;;  %v11728_v14 = vcombine.low %v4713_v37, %v4717_v53  ;;  %v4681_v57 = vld [vmem:[#allocation8 + $0x250] sm:$0xff] }
 0x42a   :  { %8027 = vmatprep.subr.bf16.mxu1 %v12055_v59  ;;  %v5004_v59 = vld [vmem:[#allocation8 + $0xc68] sm:$0xff] }
 0x42b   :  { %8079 = vmatpush1.bf16.msra.mxu0 %v11640_v58  ;;  %v11729_v58 = vcombine.high %v4713_v37, %v4717_v53  ;;  %v12014_v10 = vcombine.low %v5000_v11, %v5004_v59  ;;  %v5096_v53 = vld [vmem:[#allocation8 + $0xf48] sm:$0xff] }
 0x42c   :  { %8080 = vmatprep.subr.bf16.mxu0 %v11633_v24  ;;  %v4709_v24 = vld [vmem:[#allocation8 + $0x330] sm:$0xff] }
 0x42d   :  { %8028 = vmatpush1.bf16.msra.mxu1 %v12054_v3  ;;  %v12015_v3 = vcombine.high %v5000_v11, %v5004_v59  ;;  %v11720_v56 = vcombine.low %v4705_v23, %v4709_v24  ;;  %v4673_v59 = vld [vmem:[#allocation8 + $0x210] sm:$0xff] }
 0x42e   :  { %8029 = vmatprep.subr.bf16.mxu1 %v12047_v52  ;;  %v4996_v52 = vld [vmem:[#allocation8 + $0xc28] sm:$0xff] }
 0x42f   :  { %8081 = vmatpush1.bf16.msra.mxu0 %v11632_v0  ;;  %v11721_v0 = vcombine.high %v4705_v23, %v4709_v24  ;;  %v12006_v6 = vcombine.low %v4992_v48, %v4996_v52  ;;  %v5088_v24 = vld [vmem:[#allocation8 + $0xf08] sm:$0xff] }
 0x430   :  { %8082 = vmatprep.subr.bf16.mxu0 %v11625_v4  ;;  %v4701_v4 = vld [vmem:[#allocation8 + $0x2f0] sm:$0xff] }
 0x431   :  { %8030 = vmatpush1.bf16.msra.mxu1 %v12046_v8  ;;  %v12007_v8 = vcombine.high %v4992_v48, %v4996_v52  ;;  %v11712_v39 = vcombine.low %v4697_v28, %v4701_v4  ;;  %v4921_v52 = vld [vmem:[#allocation8 + $0x9d0] sm:$0xff] }
 0x432   :  { %8031 = vmatprep.subr.bf16.mxu1 %v12039_v50  ;;  %v5116_v50 = vld [vmem:[#allocation8 + $0xfe8] sm:$0xff] }
 0x433   :  { %8083 = vmatpush1.bf16.msra.mxu0 %v11624_v32  ;;  %v11713_v32 = vcombine.high %v4697_v28, %v4701_v4  ;;  %v12126_v41 = vcombine.low %v5112_v2, %v5116_v50  ;;  %v5080_v4 = vld [vmem:[#allocation8 + $0xec8] sm:$0xff] }
 0x434   :  { %8084 = vmatprep.subr.bf16.mxu0 %v11745_v60  ;;  %v4693_v60 = vld [vmem:[#allocation8 + $0x2b0] sm:$0xff] }
 0x435   :  { %8032 = vmatpush1.bf16.msra.mxu1 %v12038_v7  ;;  %v12127_v7 = vcombine.high %v5112_v2, %v5116_v50  ;;  %v11704_v37 = vcombine.low %v4689_v29, %v4693_v60  ;;  %v4913_v50 = vld [vmem:[#allocation8 + $0x990] sm:$0xff] }
 0x436   :  { %8033 = vmatprep.subr.bf16.mxu1 %v12031_v5  ;;  %v5108_v5 = vld [vmem:[#allocation8 + $0xfa8] sm:$0xff] }
 0x437   :  { %8085 = vmatpush2.bf16.msra.mxu0 %v11744_v9  ;;  %v11705_v9 = vcombine.high %v4689_v29, %v4693_v60  ;;  %v12118_v11 = vcombine.low %v5104_v1, %v5108_v5  ;;  %v5072_v60 = vld [vmem:[#allocation8 + $0xe88] sm:$0xff] }
 0x438   :  { %8086 = vmatprep.subr.bf16.mxu0 %v11737_v40  ;;  %v4685_v40 = vld [vmem:[#allocation8 + $0x270] sm:$0xff] }
 0x439   :  { %8034 = vmatpush1.bf16.msra.mxu1 %v12030_v63  ;;  %v12119_v63 = vcombine.high %v5104_v1, %v5108_v5  ;;  %v11696_v23 = vcombine.low %v4681_v57, %v4685_v40 }
 0x43a   :  { %8035 = vmatprep.subr.bf16.mxu1 %v12023_v47  ;;  %v5100_v47 = vld [vmem:[#allocation8 + $0xf68] sm:$0xff] }
 0x43b   :  { %8087 = vmatpush2.bf16.msra.mxu0 %v11736_v17  ;;  %v11697_v17 = vcombine.high %v4681_v57, %v4685_v40  ;;  %v12110_v48 = vcombine.low %v5096_v53, %v5100_v47 }
 0x43c   :  { %8088 = vmatprep.subr.bf16.mxu0 %v11729_v58  ;;  %v4677_v58 = vld [vmem:[#allocation8 + $0x230] sm:$0xff] }
 0x43d   :  { %8036 = vmatpush1.bf16.msra.mxu1 %v12022_v51  ;;  %v12111_v51 = vcombine.high %v5096_v53, %v5100_v47  ;;  %v11688_v28 = vcombine.low %v4673_v59, %v4677_v58  ;;  %v5064_v53 = vld [vmem:[#allocation8 + $0xe48] sm:$0xff] }
 0x43e   :  { %8037 = vmatprep.subr.bf16.mxu1 %v12015_v3  ;;  %v5092_v3 = vld [vmem:[#allocation8 + $0xf28] sm:$0xff] }
 0x43f   :  { %8089 = vmatpush2.bf16.msra.mxu0 %v11728_v14  ;;  %v11689_v14 = vcombine.high %v4673_v59, %v4677_v58  ;;  %v12102_v2 = vcombine.low %v5088_v24, %v5092_v3  ;;  %v5068_v47 = vld [vmem:[#allocation8 + $0xe68] sm:$0xff]  ;;  %v4897_v58 = vld [vmem:[#allocation8 + $0x910] sm:$0xff] }
 0x440   :  { %8090 = vmatprep.subr.bf16.mxu0 %v11721_v0  ;;  %v4925_v0 = vld [vmem:[#allocation8 + $0x9f0] sm:$0xff] }
 0x441   :  { %8038 = vmatpush1.bf16.msra.mxu1 %v12014_v10  ;;  %v12103_v10 = vcombine.high %v5088_v24, %v5092_v3  ;;  %v11936_v29 = vcombine.low %v4921_v52, %v4925_v0  ;;  %v12079_v24 = vcombine.high %v5064_v53, %v5068_v47 }
 0x442   :  { %8039 = vmatprep.subr.bf16.mxu1 %v12007_v8  ;;  %v5084_v8 = vld [vmem:[#allocation8 + $0xee8] sm:$0xff] }
 0x443   :  { %8091 = vmatpush2.bf16.msra.mxu0 %v11720_v56  ;;  %v11937_v56 = vcombine.high %v4921_v52, %v4925_v0  ;;  %v12094_v5 = vcombine.low %v5080_v4, %v5084_v8  ;;  %v12078_v0 = vcombine.low %v5064_v53, %v5068_v47  ;;  %v4777_v53 = vld [vmem:[#allocation8 + $0x550] sm:$0xff] }
 0x444   :  { %8092 = vmatprep.subr.bf16.mxu0 %v11713_v32  ;;  %v4917_v32 = vld [vmem:[#allocation8 + $0x9b0] sm:$0xff] }
 0x445   :  { %8040 = vmatpush1.bf16.msra.mxu1 %v12006_v6  ;;  %v12095_v6 = vcombine.high %v5080_v4, %v5084_v8  ;;  %v11929_v1 = vcombine.high %v4913_v50, %v4917_v32  ;;  %v4781_v47 = vld [vmem:[#allocation8 + $0x570] sm:$0xff] }
 0x446   :  { %8041 = vmatprep.subr.bf16.mxu1 %v12127_v7  ;;  %v5076_v7 = vld [vmem:[#allocation8 + $0xea8] sm:$0xff] }
 0x447   :  { %8093 = vmatpush2.bf16.msra.mxu0 %v11712_v39  ;;  %v13621_v39 = vpop.f32.mrf.mxu0  ;;  %v12087_v40 = vcombine.high %v5072_v60, %v5076_v7  ;;  %v12086_v59 = vcombine.low %v5072_v60, %v5076_v7  ;;  %v4785_v7 = vld [vmem:[#allocation8 + $0x590] sm:$0xff] }
 0x448   :  { %8094 = vmatprep.subr.bf16.mxu0 %v11705_v9  ;;  %v4905_v9 = vld [vmem:[#allocation8 + $0x950] sm:$0xff] }
 0x449   :  { %8042 = vmatpush2.bf16.msra.mxu1 %v12126_v41  ;;  %v4909_v41 = vld [vmem:[#allocation8 + $0x970] sm:$0xff] }
 0x44a   :  { %8043 = vmatprep.subr.bf16.mxu1 %v12119_v63  ;;  %v11920_v3 = vcombine.low %v4905_v9, %v4909_v41 }
 0x44b   :  { %8095 = vmatpush2.bf16.msra.mxu0 %v11704_v37  ;;  %v11928_v37 = vcombine.low %v4913_v50, %v4917_v32  ;;  %v4881_v32 = vld [vmem:[#allocation8 + $0x890] sm:$0xff] }
 0x44c   :  { %8096 = vmatprep.subr.bf16.mxu0 %v11697_v17 }
 0x44d   :  { %8044 = vmatpush2.bf16.msra.mxu1 %v12118_v11  ;;  %v11921_v11 = vcombine.high %v4905_v9, %v4909_v41  ;;  %v4873_v41 = vld [vmem:[#allocation8 + $0x850] sm:$0xff] }
 0x44e   :  { %8045 = vmatprep.subr.bf16.mxu1 %v12111_v51  ;;  %v4901_v51 = vld [vmem:[#allocation8 + $0x930] sm:$0xff] }
 0x44f   :  { %8097 = vmatpush2.bf16.msra.mxu0 %v11696_v23  ;;  %v11913_v52 = vcombine.high %v4897_v58, %v4901_v51  ;;  %v11912_v8 = vcombine.low %v4897_v58, %v4901_v51  ;;  %v4865_v58 = vld [vmem:[#allocation8 + $0x810] sm:$0xff] }
 0x450   :  { %8098 = vmatprep.subr.bf16.mxu0 %v11689_v14  ;;  %v5056_v14 = vld [vmem:[#allocation8 + $0xe08] sm:$0xff]  ;;  %v4869_v51 = vld [vmem:[#allocation8 + $0x830] sm:$0xff] }
 0x451   :  { %8046 = vmatpush2.bf16.msra.mxu1 %v12110_v48  ;;  %v5060_v48 = vld [vmem:[#allocation8 + $0xe28] sm:$0xff] }
 0x452   :  { %8047 = vmatprep.subr.bf16.mxu1 %v12103_v10  ;;  %v4889_v10 = vld [vmem:[#allocation8 + $0x8d0] sm:$0xff]  ;;  %v12071_v4 = vcombine.high %v5056_v14, %v5060_v48 }
 0x453   :  { %8099 = vmatpush2.bf16.msra.mxu0 %v11688_v28  ;;  %v4893_v28 = vld [vmem:[#allocation8 + $0x8f0] sm:$0xff] }
 0x454   :  { %8154 = vmatprep.subr.bf16.mxu0 %v11937_v56  ;;  %v4793_v56 = vld [vmem:[#allocation8 + $0x5d0] sm:$0xff]  ;;  %v11905_v50 = vcombine.high %v4889_v10, %v4893_v28  ;;  %v11904_v60 = vcombine.low %v4889_v10, %v4893_v28 }
 0x455   :  { %8048 = vmatpush2.bf16.msra.mxu1 %v12102_v2  ;;  %v4797_v2 = vld [vmem:[#allocation8 + $0x5f0] sm:$0xff] }
 0x456   :  { %v7844_v57 = vpop.f32.mrf.mxu0  ;;  %8101 = vmatmul.mubr.bf16.vlgmr.msra.gmra.mxu0 %v13532_v12  ;;  %8049 = vmatprep.subr.bf16.mxu1 %v12095_v6  ;;  %v4885_v6 = vld [vmem:[#allocation8 + $0x8b0] sm:$0xff]  ;;  %v11808_v9 = vcombine.low %v4793_v56, %v4797_v2 }
 0x457   :  { %v13625_v63 = vadd.f32 %v7844_v57, %v13613_v13  ;;  %8155 = vmatpush1.bf16.msra.mxu0 %v11936_v29  ;;  %8186 = vmatprep.mubr.bf16.mxu0 %v13552_v26  ;;  %v11809_v29 = vcombine.high %v4793_v56, %v4797_v2  ;;  %v4877_v57 = vld [vmem:[#allocation8 + $0x870] sm:$0xff] }
 0x458   :  { %v13628_v17 = vpop.f32.mrf.mxu0  ;;  %8156 = vmatprep.subr.bf16.mxu0 %v11929_v1  ;;  %v4789_v1 = vld [vmem:[#allocation8 + $0x5b0] sm:$0xff] }
 0x459   :  { %8050 = vmatpush2.bf16.msra.mxu1 %v12094_v5  ;;  %v11897_v5 = vcombine.high %v4881_v32, %v4885_v6  ;;  %v4989_v10 = vld [vmem:[#allocation8 + $0xbf0] sm:$0xff] }
 0x45a   :  { %v7848_v23 = vpop.f32.mrf.mxu0  ;;  %8051 = vmatprep.subr.bf16.mxu1 %v12087_v40  ;;  %v11801_v40 = vcombine.high %v4785_v7, %v4789_v1  ;;  %v4765_v56 = vld [vmem:[#allocation8 + $0x4f0] sm:$0xff] }
 0x45b   :  { %v13631_v13 = vadd.f32 %v7848_v23, %v13617_v42  ;;  %8157 = vmatpush1.bf16.msra.mxu0 %v11928_v37  ;;  %v12070_v42 = vcombine.low %v5056_v14, %v5060_v48  ;;  %v11896_v37 = vcombine.low %v4881_v32, %v4885_v6  ;;  %v11793_v23 = vcombine.high %v4777_v53, %v4781_v47  ;;  %v4773_v14 = vld [vmem:[#allocation8 + $0x530] sm:$0xff] }
 0x45c   :  { %8158 = vmatprep.subr.bf16.mxu0 %v11921_v11  ;;  %v11889_v11 = vcombine.high %v4873_v41, %v4877_v57  ;;  %v11881_v48 = vcombine.high %v4865_v58, %v4869_v51  ;;  %v4981_v32 = vld [vmem:[#allocation8 + $0xbb0] sm:$0xff] }
 0x45d   :  { %8052 = vmatpush2.bf16.msra.mxu1 %v12086_v59  ;;  %v11800_v59 = vcombine.low %v4785_v7, %v4789_v1  ;;  %v4757_v7 = vld [vmem:[#allocation8 + $0x4b0] sm:$0xff] }
 0x45e   :  { %8053 = vmatprep.subr.bf16.mxu1 %v12079_v24  ;;  %v11888_v24 = vcombine.low %v4873_v41, %v4877_v57  ;;  %v4973_v41 = vld [vmem:[#allocation8 + $0xb70] sm:$0xff] }
 0x45f   :  { %8159 = vmatpush1.bf16.msra.mxu0 %v11920_v3  ;;  %v4769_v3 = vld [vmem:[#allocation8 + $0x510] sm:$0xff] }
 0x460   :  { %8160 = vmatprep.subr.bf16.mxu0 %v11913_v52  ;;  %v11792_v52 = vcombine.low %v4777_v53, %v4781_v47  ;;  %v11785_v28 = vcombine.high %v4769_v3, %v4773_v14  ;;  %v4749_v53 = vld [vmem:[#allocation8 + $0x470] sm:$0xff] }
 0x461   :  { %8054 = vmatpush2.bf16.msra.mxu1 %v12078_v0  ;;  %v4985_v0 = vld [vmem:[#allocation8 + $0xbd0] sm:$0xff] }
 0x462   :  { %8055 = vmatprep.subr.bf16.mxu1 %v12071_v4  ;;  %v11880_v4 = vcombine.low %v4865_v58, %v4869_v51  ;;  %v12001_v2 = vcombine.high %v4985_v0, %v4989_v10  ;;  %v4965_v58 = vld [vmem:[#allocation8 + $0xb30] sm:$0xff] }
 0x463   :  { %8161 = vmatpush1.bf16.msra.mxu0 %v11912_v8  ;;  %v4761_v8 = vld [vmem:[#allocation8 + $0x4d0] sm:$0xff] }
 0x464   :  { %8162 = vmatprep.subr.bf16.mxu0 %v11905_v50  ;;  %v11784_v50 = vcombine.low %v4769_v3, %v4773_v14  ;;  %v11777_v6 = vcombine.high %v4761_v8, %v4765_v56  ;;  %v4741_v3 = vld [vmem:[#allocation8 + $0x430] sm:$0xff] }
 0x465   :  { %8056 = vmatpush2.bf16.msra.mxu1 %v12070_v42  ;;  %v4977_v42 = vld [vmem:[#allocation8 + $0xb90] sm:$0xff] }
 0x466   :  { %8111 = vmatprep.subr.bf16.mxu1 %v11809_v29  ;;  %v12000_v29 = vcombine.low %v4985_v0, %v4989_v10  ;;  %v11993_v1 = vcombine.high %v4977_v42, %v4981_v32  ;;  %v4957_v0 = vld [vmem:[#allocation8 + $0xaf0] sm:$0xff] }
 0x467   :  { %8163 = vmatpush1.bf16.msra.mxu0 %v11904_v60  ;;  %v4753_v60 = vld [vmem:[#allocation8 + $0x490] sm:$0xff] }
 0x468   :  { %8058 = vmatmul.mubr.bf16.vlgmr.msra.gmra.mxu1 %v13597_v55  ;;  %8164 = vmatprep.subr.bf16.mxu0 %v11897_v5  ;;  %v11776_v5 = vcombine.low %v4761_v8, %v4765_v56  ;;  %v11769_v57 = vcombine.high %v4753_v60, %v4757_v7  ;;  %v4861_v8 = vld [vmem:[#allocation8 + $0x7f0] sm:$0xff] }
 0x469   :  { %8112 = vmatpush1.bf16.msra.mxu1 %v11808_v9  ;;  %8143 = vmatprep.mubr.bf16.mxu1 %v13515_v49  ;;  %v4969_v9 = vld [vmem:[#allocation8 + $0xb50] sm:$0xff] }
 0x46a   :  { %8113 = vmatprep.subr.bf16.mxu1 %v11801_v40  ;;  %v11992_v40 = vcombine.low %v4977_v42, %v4981_v32  ;;  %v11985_v47 = vcombine.high %v4969_v9, %v4973_v41  ;;  %v4949_v42 = vld [vmem:[#allocation8 + $0xab0] sm:$0xff] }
 0x46b   :  { %8165 = vmatpush1.bf16.msra.mxu0 %v11896_v37  ;;  %v4745_v37 = vld [vmem:[#allocation8 + $0x450] sm:$0xff] }
 0x46c   :  { %8166 = vmatprep.subr.bf16.mxu0 %v11889_v11  ;;  %v11768_v11 = vcombine.low %v4753_v60, %v4757_v7  ;;  %v11761_v51 = vcombine.high %v4745_v37, %v4749_v53  ;;  %v4853_v60 = vld [vmem:[#allocation8 + $0x7b0] sm:$0xff] }
 0x46d   :  { %8114 = vmatpush1.bf16.msra.mxu1 %v11800_v59  ;;  %v4961_v59 = vld [vmem:[#allocation8 + $0xb10] sm:$0xff] }
 0x46e   :  { %8115 = vmatprep.subr.bf16.mxu1 %v11793_v23  ;;  %v11984_v23 = vcombine.low %v4969_v9, %v4973_v41  ;;  %v11977_v14 = vcombine.high %v4961_v59, %v4965_v58  ;;  %v4941_v9 = vld [vmem:[#allocation8 + $0xa70] sm:$0xff] }
 0x46f   :  { %8167 = vmatpush1.bf16.msra.mxu0 %v11888_v24  ;;  %v4737_v24 = vld [vmem:[#allocation8 + $0x410] sm:$0xff] }
 0x470   :  { %8168 = vmatprep.subr.bf16.mxu0 %v11881_v48  ;;  %v11760_v48 = vcombine.low %v4745_v37, %v4749_v53  ;;  %v11753_v10 = vcombine.high %v4737_v24, %v4741_v3  ;;  %v4845_v37 = vld [vmem:[#allocation8 + $0x770] sm:$0xff] }
 0x471   :  { %8116 = vmatpush1.bf16.msra.mxu1 %v11792_v52  ;;  %v4953_v52 = vld [vmem:[#allocation8 + $0xad0] sm:$0xff] }
 0x472   :  { %8117 = vmatprep.subr.bf16.mxu1 %v11785_v28  ;;  %v11976_v28 = vcombine.low %v4961_v59, %v4965_v58  ;;  %v11969_v56 = vcombine.high %v4953_v52, %v4957_v0  ;;  %v4933_v59 = vld [vmem:[#allocation8 + $0xa30] sm:$0xff] }
 0x473   :  { %8169 = vmatpush1.bf16.msra.mxu0 %v11880_v4  ;;  %v4857_v4 = vld [vmem:[#allocation8 + $0x7d0] sm:$0xff] }
 0x474   :  { %8170 = vmatprep.subr.bf16.mxu0 %v12001_v2  ;;  %v11752_v2 = vcombine.low %v4737_v24, %v4741_v3  ;;  %v11873_v32 = vcombine.high %v4857_v4, %v4861_v8  ;;  %v4837_v24 = vld [vmem:[#allocation8 + $0x730] sm:$0xff] }
 0x475   :  { %8118 = vmatpush1.bf16.msra.mxu1 %v11784_v50  ;;  %v4945_v50 = vld [vmem:[#allocation8 + $0xa90] sm:$0xff] }
 0x476   :  { %8119 = vmatprep.subr.bf16.mxu1 %v11777_v6  ;;  %v11968_v6 = vcombine.low %v4953_v52, %v4957_v0  ;;  %v11961_v7 = vcombine.high %v4945_v50, %v4949_v42  ;;  %v4670_v52 = vld [vmem:[#allocation8 + $0x1f8] sm:$0xff] }
 0x477   :  { %8171 = vmatpush2.bf16.msra.mxu0 %v12000_v29  ;;  %v4849_v29 = vld [vmem:[#allocation8 + $0x790] sm:$0xff] }
 0x478   :  { %8172 = vmatprep.subr.bf16.mxu0 %v11993_v1  ;;  %v11872_v1 = vcombine.low %v4857_v4, %v4861_v8  ;;  %v11865_v41 = vcombine.high %v4849_v29, %v4853_v60  ;;  %v4829_v4 = vld [vmem:[#allocation8 + $0x6f0] sm:$0xff] }
 0x479   :  { %8120 = vmatpush1.bf16.msra.mxu1 %v11776_v5  ;;  %v4937_v5 = vld [vmem:[#allocation8 + $0xa50] sm:$0xff] }
 0x47a   :  { %8121 = vmatprep.subr.bf16.mxu1 %v11769_v57  ;;  %v11960_v57 = vcombine.low %v4945_v50, %v4949_v42  ;;  %v11953_v53 = vcombine.high %v4937_v5, %v4941_v9  ;;  %v4662_v50 = vld [vmem:[#allocation8 + $0x1b8] sm:$0xff] }
 0x47b   :  { %8173 = vmatpush2.bf16.msra.mxu0 %v11992_v40  ;;  %v4841_v40 = vld [vmem:[#allocation8 + $0x750] sm:$0xff] }
 0x47c   :  { %8174 = vmatprep.subr.bf16.mxu0 %v11985_v47  ;;  %v11864_v47 = vcombine.low %v4849_v29, %v4853_v60  ;;  %v11857_v58 = vcombine.high %v4841_v40, %v4845_v37  ;;  %v4821_v29 = vld [vmem:[#allocation8 + $0x6b0] sm:$0xff] }
 0x47d   :  { %8122 = vmatpush1.bf16.msra.mxu1 %v11768_v11  ;;  %v4929_v11 = vld [vmem:[#allocation8 + $0xa10] sm:$0xff] }
 0x47e   :  { %8123 = vmatprep.subr.bf16.mxu1 %v11761_v51  ;;  %v11952_v51 = vcombine.low %v4937_v5, %v4941_v9  ;;  %v11945_v3 = vcombine.high %v4929_v11, %v4933_v59  ;;  %v4654_v5 = vld [vmem:[#allocation8 + $0x178] sm:$0xff] }
 0x47f   :  { %8175 = vmatpush2.bf16.msra.mxu0 %v11984_v23  ;;  %v4833_v23 = vld [vmem:[#allocation8 + $0x710] sm:$0xff] }
 0x480   :  { %8176 = vmatprep.subr.bf16.mxu0 %v11977_v14  ;;  %v11856_v14 = vcombine.low %v4841_v40, %v4845_v37  ;;  %v11849_v0 = vcombine.high %v4833_v23, %v4837_v24  ;;  %v4813_v40 = vld [vmem:[#allocation8 + $0x670] sm:$0xff] }
 0x481   :  { %8124 = vmatpush1.bf16.msra.mxu1 %v11760_v48  ;;  %v4666_v48 = vld [vmem:[#allocation8 + $0x1d8] sm:$0xff] }
 0x482   :  { %8125 = vmatprep.subr.bf16.mxu1 %v11753_v10  ;;  %v11944_v10 = vcombine.low %v4929_v11, %v4933_v59  ;;  %v11683_v8 = vcombine.high %v4666_v48, %v4670_v52  ;;  %v4646_v11 = vld [vmem:[#allocation8 + $0x138] sm:$0xff] }
 0x483   :  { %8177 = vmatpush2.bf16.msra.mxu0 %v11976_v28  ;;  %v4825_v28 = vld [vmem:[#allocation8 + $0x6d0] sm:$0xff] }
 0x484   :  { %8178 = vmatprep.subr.bf16.mxu0 %v11969_v56  ;;  %v11848_v56 = vcombine.low %v4833_v23, %v4837_v24  ;;  %v11841_v42 = vcombine.high %v4825_v28, %v4829_v4  ;;  %v4805_v23 = vld [vmem:[#allocation8 + $0x630] sm:$0xff] }
 0x485   :  { %8126 = vmatpush1.bf16.msra.mxu1 %v11752_v2  ;;  %v4658_v2 = vld [vmem:[#allocation8 + $0x198] sm:$0xff] }
 0x486   :  { %8127 = vmatprep.subr.bf16.mxu1 %v11873_v32  ;;  %v11682_v32 = vcombine.low %v4666_v48, %v4670_v52  ;;  %v11675_v60 = vcombine.high %v4658_v2, %v4662_v50 }
 0x487   :  { %8179 = vmatpush2.bf16.msra.mxu0 %v11968_v6  ;;  %v4817_v6 = vld [vmem:[#allocation8 + $0x690] sm:$0xff] }
 0x488   :  { %8180 = vmatprep.subr.bf16.mxu0 %v11961_v7  ;;  %v11840_v7 = vcombine.low %v4825_v28, %v4829_v4  ;;  %v11833_v9 = vcombine.high %v4817_v6, %v4821_v29 }
 0x489   :  { %8128 = vmatpush2.bf16.msra.mxu1 %v11872_v1  ;;  %v4650_v1 = vld [vmem:[#allocation8 + $0x158] sm:$0xff] }
 0x48a   :  { %8129 = vmatprep.subr.bf16.mxu1 %v11865_v41  ;;  %v11674_v41 = vcombine.low %v4658_v2, %v4662_v50  ;;  %v11667_v37 = vcombine.high %v4650_v1, %v4654_v5 }
 0x48b   :  { %8181 = vmatpush2.bf16.msra.mxu0 %v11960_v57  ;;  %v4809_v57 = vld [vmem:[#allocation8 + $0x650] sm:$0xff] }
 0x48c   :  { %8182 = vmatprep.subr.bf16.mxu0 %v11953_v53  ;;  %v11832_v53 = vcombine.low %v4817_v6, %v4821_v29  ;;  %v11825_v59 = vcombine.high %v4809_v57, %v4813_v40 }
 0x48d   :  { %8130 = vmatpush2.bf16.msra.mxu1 %v11864_v47  ;;  %v4642_v47 = vld [vmem:[#allocation8 + $0x118] sm:$0xff] }
 0x48e   :  { %8131 = vmatprep.subr.bf16.mxu1 %v11857_v58  ;;  %v11666_v58 = vcombine.low %v4650_v1, %v4654_v5  ;;  %v11659_v24 = vcombine.high %v4642_v47, %v4646_v11  ;;  %v11658_v52 = vcombine.low %v4642_v47, %v4646_v11  ;;  %v13637_v1 = vpop.f32.mrf.mxu1  ;;  %v4610_v11 = vld [vmem:[#allocation8 + $0x18] sm:$0xff] }
 0x48f   :  { %8183 = vmatpush2.bf16.msra.mxu0 %v11952_v51  ;;  %v4801_v51 = vld [vmem:[#allocation8 + $0x610] sm:$0xff] }
 0x490   :  { %8184 = vmatprep.subr.bf16.mxu0 %v11945_v3  ;;  %v11824_v3 = vcombine.low %v4809_v57, %v4813_v40  ;;  %v11817_v48 = vcombine.high %v4801_v51, %v4805_v23  ;;  %v11816_v4 = vcombine.low %v4801_v51, %v4805_v23  ;;  %v5037_v57 = vld [vmem:[#allocation8 + $0xd70] sm:$0xff] }
 0x491   :  { %8132 = vmatpush2.bf16.msra.mxu1 %v11856_v14  ;;  %v4638_v14 = vld [vmem:[#allocation8 + $0xf8] sm:$0xff] }
 0x492   :  { %8133 = vmatprep.subr.bf16.mxu1 %v11849_v0  ;;  %v5049_v0 = vld [vmem:[#allocation8 + $0xdd0] sm:$0xff] }
 0x493   :  { %8185 = vmatpush2.bf16.msra.mxu0 %v11944_v10  ;;  %v5053_v10 = vld [vmem:[#allocation8 + $0xdf0] sm:$0xff] }
 0x494   :  { %8240 = vmatprep.subr.bf16.mxu0 %v11683_v8  ;;  %v4626_v8 = vld [vmem:[#allocation8 + $0x98] sm:$0xff]  ;;  %v12065_v2 = vcombine.high %v5049_v0, %v5053_v10  ;;  %v12064_v29 = vcombine.low %v5049_v0, %v5053_v10 }
 0x495   :  { %8134 = vmatpush2.bf16.msra.mxu1 %v11848_v56  ;;  %v4630_v56 = vld [vmem:[#allocation8 + $0xb8] sm:$0xff] }
 0x496   :  { %8187 = vmatmul.mubr.bf16.vlgmr.msra.gmra.mxu0 %v13577_v34  ;;  %8135 = vmatprep.subr.bf16.mxu1 %v11841_v42  ;;  %v5041_v42 = vld [vmem:[#allocation8 + $0xd90] sm:$0xff]  ;;  %v11643_v6 = vcombine.high %v4626_v8, %v4630_v56  ;;  %v4734_v0 = vld [vmem:[#allocation8 + $0x3f8] sm:$0xff] }
 0x497   :  { %8241 = vmatpush1.bf16.msra.mxu0 %v11682_v32  ;;  %8272 = vmatprep.mubr.bf16.mxu0 %v13510_v62  ;;  %v4634_v62 = vld [vmem:[#allocation8 + $0xd8] sm:$0xff]  ;;  %v5045_v32 = vld [vmem:[#allocation8 + $0xdb0] sm:$0xff] }
 0x498   :  { %8242 = vmatprep.subr.bf16.mxu0 %v11675_v60  ;;  %v11651_v28 = vcombine.high %v4634_v62, %v4638_v14  ;;  %v11650_v50 = vcombine.low %v4634_v62, %v4638_v14  ;;  %v4618_v60 = vld [vmem:[#allocation8 + $0x58] sm:$0xff]  ;;  %v12057_v5 = vcombine.high %v5041_v42, %v5045_v32  ;;  %v12056_v47 = vcombine.low %v5041_v42, %v5045_v32 }
 0x499   :  { %8136 = vmatpush2.bf16.msra.mxu1 %v11840_v7  ;;  %v4622_v7 = vld [vmem:[#allocation8 + $0x78] sm:$0xff] }
 0x49a   :  { %8137 = vmatprep.subr.bf16.mxu1 %v11833_v9  ;;  %v11642_v9 = vcombine.low %v4626_v8, %v4630_v56  ;;  %v11634_v23 = vcombine.low %v4618_v60, %v4622_v7  ;;  %v5017_v56 = vld [vmem:[#allocation8 + $0xcd0] sm:$0xff] }
 0x49b   :  { %8243 = vmatpush1.bf16.msra.mxu0 %v11674_v41  ;;  %v5033_v41 = vld [vmem:[#allocation8 + $0xd50] sm:$0xff] }
 0x49c   :  { %8244 = vmatprep.subr.bf16.mxu0 %v11667_v37  ;;  %v11635_v37 = vcombine.high %v4618_v60, %v4622_v7  ;;  %v12049_v51 = vcombine.high %v5033_v41, %v5037_v57  ;;  %v5009_v7 = vld [vmem:[#allocation8 + $0xc90] sm:$0xff] }
 0x49d   :  { %8138 = vmatpush2.bf16.msra.mxu1 %v11832_v53 }
 0x49e   :  { %8139 = vmatprep.subr.bf16.mxu1 %v11825_v59  ;;  %v4614_v59 = vld [vmem:[#allocation8 + $0x38] sm:$0xff] }
 0x49f   :  { %8245 = vmatpush1.bf16.msra.mxu0 %v11666_v58  ;;  %v11627_v14 = vcombine.high %v4610_v11, %v4614_v59  ;;  %v11626_v8 = vcombine.low %v4610_v11, %v4614_v59  ;;  %v5005_v11 = vld [vmem:[#allocation8 + $0xc70] sm:$0xff] }
 0x4a0   :  { %8246 = vmatprep.subr.bf16.mxu0 %v11659_v24  ;;  %v5025_v24 = vld [vmem:[#allocation8 + $0xd10] sm:$0xff] }
 0x4a1   :  { %8140 = vmatpush2.bf16.msra.mxu1 %v11824_v3  ;;  %v5029_v3 = vld [vmem:[#allocation8 + $0xd30] sm:$0xff] }
 0x4a2   :  { %8141 = vmatprep.subr.bf16.mxu1 %v11817_v48  ;;  %v12041_v10 = vcombine.high %v5025_v24, %v5029_v3  ;;  %v12040_v32 = vcombine.low %v5025_v24, %v5029_v3  ;;  %v4710_v24 = vld [vmem:[#allocation8 + $0x338] sm:$0xff] }
 0x4a3   :  { %8247 = vmatpush1.bf16.msra.mxu0 %v11658_v52  ;;  %v4730_v52 = vld [vmem:[#allocation8 + $0x3d8] sm:$0xff] }
 0x4a4   :  { %8248 = vmatprep.subr.bf16.mxu0 %v11651_v28  ;;  %v11746_v60 = vcombine.low %v4730_v52, %v4734_v0 }
 0x4a5   :  { %8142 = vmatpush2.bf16.msra.mxu1 %v11816_v4 }
 0x4a6   :  { %8197 = vmatprep.subr.bf16.mxu1 %v12065_v2  ;;  %v5021_v2 = vld [vmem:[#allocation8 + $0xcf0] sm:$0xff] }
 0x4a7   :  { %8249 = vmatpush1.bf16.msra.mxu0 %v11650_v50  ;;  %v11747_v50 = vcombine.high %v4730_v52, %v4734_v0  ;;  %v4698_v0 = vld [vmem:[#allocation8 + $0x2d8] sm:$0xff] }
 0x4a8   :  { %8144 = vmatmul.mubr.bf16.vlgmr.msra.gmra.mxu1 %v13536_v45  ;;  %v7887_v40 = vpop.f32.mrf.mxu1  ;;  %8250 = vmatprep.subr.bf16.mxu0 %v11643_v6  ;;  %v4722_v6 = vld [vmem:[#allocation8 + $0x398] sm:$0xff] }
 0x4a9   :  { %v7888_v53 = vadd.f32 %v7887_v40, %v13625_v63  ;;  %8198 = vmatpush1.bf16.msra.mxu1 %v12064_v29  ;;  %8229 = vmatprep.mubr.bf16.mxu1 %v13593_v36  ;;  %v12048_v63 = vcombine.low %v5033_v41, %v5037_v57  ;;  %v12033_v29 = vcombine.high %v5017_v56, %v5021_v2  ;;  %v4714_v57 = vld [vmem:[#allocation8 + $0x358] sm:$0xff] }
 0x4aa   :  { %v13642_v58 = vpop.f32.mrf.mxu1  ;;  %8199 = vmatprep.subr.bf16.mxu1 %v12057_v5  ;;  %v5013_v5 = vld [vmem:[#allocation8 + $0xcb0] sm:$0xff]  ;;  %v12032_v41 = vcombine.low %v5017_v56, %v5021_v2  ;;  %v4718_v40 = vld [vmem:[#allocation8 + $0x378] sm:$0xff] }
 0x4ab   :  { %8251 = vmatpush1.bf16.msra.mxu0 %v11642_v9  ;;  %v8412_v28 = vmax.f32 %v7888_v53, 0.0  ;;  %v11731_v59 = vcombine.high %v4714_v57, %v4718_v40  ;;  %v5117_v56 = vld [vmem:[#allocation8 + $0xff0] sm:$0xff] }
 0x4ac   :  { %v7891_v62 = vpop.f32.mrf.mxu1  ;;  %8252 = vmatprep.subr.bf16.mxu0 %v11635_v37  ;;  %v12025_v37 = vcombine.high %v5009_v7, %v5013_v5 }
 0x4ad   :  { %v7892_v48 = vadd.f32 %v7891_v62, %v13631_v13  ;;  %8200 = vmatpush1.bf16.msra.mxu1 %v12056_v47  ;;  %v4726_v13 = vld [vmem:[#allocation8 + $0x3b8] sm:$0xff]  ;;  %v5001_v47 = vld [vmem:[#allocation8 + $0xc50] sm:$0xff]  ;;  %v11730_v62 = vcombine.low %v4714_v57, %v4718_v40 }
 0x4ae   :  { %8201 = vmatprep.subr.bf16.mxu1 %v12049_v51  ;;  %v11739_v9 = vcombine.high %v4722_v6, %v4726_v13  ;;  %v11738_v53 = vcombine.low %v4722_v6, %v4726_v13  ;;  %v12024_v51 = vcombine.low %v5009_v7, %v5013_v5  ;;  %v12017_v3 = vcombine.high %v5001_v47, %v5005_v11  ;;  %v4694_v6 = vld [vmem:[#allocation8 + $0x2b8] sm:$0xff]  ;;  %v5109_v7 = vld [vmem:[#allocation8 + $0xfb0] sm:$0xff] }
 0x4af   :  { %v8420_v4 = vmax.f32 %v7892_v48, 0.0  ;;  %8253 = vmatpush1.bf16.msra.mxu0 %v11634_v23  ;;  %v4706_v23 = vld [vmem:[#allocation8 + $0x318] sm:$0xff]  ;;  %v4997_v48 = vld [vmem:[#allocation8 + $0xc30] sm:$0xff]  ;;  %v12016_v52 = vcombine.low %v5001_v47, %v5005_v11 }
 0x4b0   :  { %8254 = vmatprep.subr.bf16.mxu0 %v11627_v14  ;;  %v4993_v14 = vld [vmem:[#allocation8 + $0xc10] sm:$0xff]  ;;  %v4686_v57 = vld [vmem:[#allocation8 + $0x278] sm:$0xff] }
 0x4b1   :  { %v13645_v42 = vpack.c.bf16 %v8420_v4, %v8412_v28  ;;  %8202 = vmatpush1.bf16.msra.mxu1 %v12048_v63  ;;  %v11723_v63 = vcombine.high %v4706_v23, %v4710_v24  ;;  %v12009_v28 = vcombine.high %v4993_v14, %v4997_v48  ;;  %v11722_v4 = vcombine.low %v4706_v23, %v4710_v24  ;;  %v5101_v47 = vld [vmem:[#allocation8 + $0xf70] sm:$0xff]  ;;  %v4678_v23 = vld [vmem:[#allocation8 + $0x238] sm:$0xff] }
 0x4b2   :  { %8203 = vmatprep.subr.bf16.mxu1 %v12041_v10  ;;  %v4702_v10 = vld [vmem:[#allocation8 + $0x2f8] sm:$0xff] }
 0x4b3   :  { %8255 = vmatpush1.bf16.msra.mxu0 %v11626_v8  ;;  %v5113_v8 = vld [vmem:[#allocation8 + $0xfd0] sm:$0xff]  ;;  %v11715_v2 = vcombine.high %v4698_v0, %v4702_v10 }
 0x4b4   :  { %8256 = vmatprep.subr.bf16.mxu0 %v11747_v50  ;;  %v12008_v50 = vcombine.low %v4993_v14, %v4997_v48  ;;  %v12129_v13 = vcombine.high %v5113_v8, %v5117_v56  ;;  %v5093_v14 = vld [vmem:[#allocation8 + $0xf30] sm:$0xff] }
 0x4b5   :  { %8204 = vmatpush1.bf16.msra.mxu1 %v12040_v32  ;;  %v4690_v32 = vld [vmem:[#allocation8 + $0x298] sm:$0xff] }
 0x4b6   :  { %8205 = vmatprep.subr.bf16.mxu1 %v12033_v29  ;;  %v11714_v29 = vcombine.low %v4698_v0, %v4702_v10  ;;  %v11707_v5 = vcombine.high %v4690_v32, %v4694_v6  ;;  %v4926_v0 = vld [vmem:[#allocation8 + $0x9f8] sm:$0xff] }
 0x4b7   :  { %8257 = vmatpush2.bf16.msra.mxu0 %v11746_v60  ;;  %v5105_v60 = vld [vmem:[#allocation8 + $0xf90] sm:$0xff] }
 0x4b8   :  { %8258 = vmatprep.subr.bf16.mxu0 %v11739_v9  ;;  %v12128_v9 = vcombine.low %v5113_v8, %v5117_v56  ;;  %v12121_v40 = vcombine.high %v5105_v60, %v5109_v7  ;;  %v5085_v8 = vld [vmem:[#allocation8 + $0xef0] sm:$0xff] }
 0x4b9   :  { %8206 = vmatpush1.bf16.msra.mxu1 %v12032_v41  ;;  %v4682_v41 = vld [vmem:[#allocation8 + $0x258] sm:$0xff] }
 0x4ba   :  { %8207 = vmatprep.subr.bf16.mxu1 %v12025_v37  ;;  %v11706_v37 = vcombine.low %v4690_v32, %v4694_v6  ;;  %v11699_v11 = vcombine.high %v4682_v41, %v4686_v57  ;;  %v4918_v32 = vld [vmem:[#allocation8 + $0x9b8] sm:$0xff] }
 0x4bb   :  { %8259 = vmatpush2.bf16.msra.mxu0 %v11738_v53  ;;  %v5097_v53 = vld [vmem:[#allocation8 + $0xf50] sm:$0xff] }
 0x4bc   :  { %8260 = vmatprep.subr.bf16.mxu0 %v11731_v59  ;;  %v12120_v59 = vcombine.low %v5105_v60, %v5109_v7  ;;  %v12113_v24 = vcombine.high %v5097_v53, %v5101_v47  ;;  %v5077_v60 = vld [vmem:[#allocation8 + $0xeb0] sm:$0xff] }
 0x4bd   :  { %8208 = vmatpush1.bf16.msra.mxu1 %v12024_v51  ;;  %v4674_v51 = vld [vmem:[#allocation8 + $0x218] sm:$0xff] }
 0x4be   :  { %8209 = vmatprep.subr.bf16.mxu1 %v12017_v3  ;;  %v11698_v3 = vcombine.low %v4682_v41, %v4686_v57  ;;  %v11691_v48 = vcombine.high %v4674_v51, %v4678_v23  ;;  %v4910_v41 = vld [vmem:[#allocation8 + $0x978] sm:$0xff]  ;;  %v13647_v57 = vpop.f32.mrf.mxu0 }
 0x4bf   :  { %8261 = vmatpush2.bf16.msra.mxu0 %v11730_v62  ;;  %v5089_v62 = vld [vmem:[#allocation8 + $0xf10] sm:$0xff] }
 0x4c0   :  { %8262 = vmatprep.subr.bf16.mxu0 %v11723_v63  ;;  %v12112_v63 = vcombine.low %v5097_v53, %v5101_v47  ;;  %v12105_v10 = vcombine.high %v5089_v62, %v5093_v14  ;;  %v5065_v53 = vld [vmem:[#allocation8 + $0xe50] sm:$0xff] }
 0x4c1   :  { %8210 = vmatpush1.bf16.msra.mxu1 %v12016_v52  ;;  %v4922_v52 = vld [vmem:[#allocation8 + $0x9d8] sm:$0xff]  ;;  %v5069_v47 = vld [vmem:[#allocation8 + $0xe70] sm:$0xff] }
 0x4c2   :  { %8211 = vmatprep.subr.bf16.mxu1 %v12009_v28  ;;  %v11690_v28 = vcombine.low %v4674_v51, %v4678_v23  ;;  %v11939_v56 = vcombine.high %v4922_v52, %v4926_v0  ;;  %v4898_v23 = vld [vmem:[#allocation8 + $0x918] sm:$0xff] }
 0x4c3   :  { %8263 = vmatpush2.bf16.msra.mxu0 %v11722_v4  ;;  %v5081_v4 = vld [vmem:[#allocation8 + $0xed0] sm:$0xff] }
 0x4c4   :  { %8264 = vmatprep.subr.bf16.mxu0 %v11715_v2  ;;  %v12104_v2 = vcombine.low %v5089_v62, %v5093_v14  ;;  %v12097_v6 = vcombine.high %v5081_v4, %v5085_v8  ;;  %v5061_v14 = vld [vmem:[#allocation8 + $0xe30] sm:$0xff] }
 0x4c5   :  { %8212 = vmatpush1.bf16.msra.mxu1 %v12008_v50  ;;  %v4914_v50 = vld [vmem:[#allocation8 + $0x998] sm:$0xff] }
 0x4c6   :  { %8213 = vmatprep.subr.bf16.mxu1 %v12129_v13  ;;  %v11938_v13 = vcombine.low %v4922_v52, %v4926_v0  ;;  %v11931_v7 = vcombine.high %v4914_v50, %v4918_v32  ;;  %v4890_v52 = vld [vmem:[#allocation8 + $0x8d8] sm:$0xff] }
 0x4c7   :  { %8265 = vmatpush2.bf16.msra.mxu0 %v11714_v29  ;;  %v5073_v29 = vld [vmem:[#allocation8 + $0xe90] sm:$0xff]  ;;  %v4894_v0 = vld [vmem:[#allocation8 + $0x8f8] sm:$0xff] }
 0x4c8   :  { %8266 = vmatprep.subr.bf16.mxu0 %v11707_v5  ;;  %v12096_v5 = vcombine.low %v5081_v4, %v5085_v8  ;;  %v12088_v51 = vcombine.low %v5073_v29, %v5077_v60  ;;  %v4794_v4 = vld [vmem:[#allocation8 + $0x5d8] sm:$0xff] }
 0x4c9   :  { %8214 = vmatpush2.bf16.msra.mxu1 %v12128_v9  ;;  %v4906_v9 = vld [vmem:[#allocation8 + $0x958] sm:$0xff] }
 0x4ca   :  { %8215 = vmatprep.subr.bf16.mxu1 %v12121_v40  ;;  %v12089_v40 = vcombine.high %v5073_v29, %v5077_v60  ;;  %v11922_v62 = vcombine.low %v4906_v9, %v4910_v41  ;;  %v4798_v8 = vld [vmem:[#allocation8 + $0x5f8] sm:$0xff]  ;;  %v5135_v29 = vrot.slane %v13605_v27, %v13342_v20  ;;  %v11906_v60 = vcombine.low %v4890_v52, %v4894_v0 }
 0x4cb   :  { %8267 = vmatpush2.bf16.msra.mxu0 %v11706_v37  ;;  %v11930_v37 = vcombine.low %v4914_v50, %v4918_v32  ;;  %v4882_v32 = vld [vmem:[#allocation8 + $0x898] sm:$0xff] }
 0x4cc   :  { %8268 = vmatprep.subr.bf16.mxu0 %v11699_v11  ;;  %v7930_v11 = vpop.f32.mrf.mxu0 }
 0x4cd   :  { %8216 = vmatpush2.bf16.msra.mxu1 %v12120_v59  ;;  %v11923_v59 = vcombine.high %v4906_v9, %v4910_v41 }
 0x4ce   :  { %8217 = vmatprep.subr.bf16.mxu1 %v12113_v24  ;;  %v4902_v24 = vld [vmem:[#allocation8 + $0x938] sm:$0xff] }
 0x4cf   :  { %8269 = vmatpush2.bf16.msra.mxu0 %v11698_v3  ;;  %v12081_v3 = vcombine.high %v5065_v53, %v5069_v47 }
 0x4d0   :  { %8270 = vmatprep.subr.bf16.mxu0 %v11691_v48  ;;  %v13651_v48 = vpop.f32.mrf.mxu0 }
 0x4d1   :  { %8218 = vmatpush2.bf16.msra.mxu1 %v12112_v63  ;;  %v12080_v63 = vcombine.low %v5065_v53, %v5069_v47  ;;  %v4878_v53 = vld [vmem:[#allocation8 + $0x878] sm:$0xff]  ;;  %v13657_v47 = vpop.f32.mrf.mxu1 }
 0x4d2   :  { %8219 = vmatprep.subr.bf16.mxu1 %v12105_v10 }
 0x4d3   :  { %8271 = vmatpush2.bf16.msra.mxu0 %v11690_v28  ;;  %v11914_v28 = vcombine.low %v4898_v23, %v4902_v24 }
 0x4d4   :  { %8326 = vmatprep.subr.bf16.mxu0 %v11939_v56  ;;  %v7934_v56 = vpop.f32.mrf.mxu0 }
 0x4d5   :  { %8220 = vmatpush2.bf16.msra.mxu1 %v12104_v2  ;;  %v11907_v2 = vcombine.high %v4890_v52, %v4894_v0  ;;  %v4866_v52 = vld [vmem:[#allocation8 + $0x818] sm:$0xff] }
 0x4d6   :  { %8273 = vmatmul.mubr.bf16.vlgmr.msra.gmra.mxu0 %v13532_v12  ;;  %8221 = vmatprep.subr.bf16.mxu1 %v12097_v6  ;;  %v5057_v12 = vld [vmem:[#allocation8 + $0xe10] sm:$0xff]  ;;  %v4886_v6 = vld [vmem:[#allocation8 + $0x8b8] sm:$0xff]  ;;  %v13655_v9 = vpop.f32.mrf.mxu0 }
 0x4d7   :  { %8327 = vmatpush1.bf16.msra.mxu0 %v11938_v13  ;;  %8358 = vmatprep.mubr.bf16.mxu0 %v13552_v26  ;;  %v11915_v26 = vcombine.high %v4898_v23, %v4902_v24  ;;  %v12073_v10 = vcombine.high %v5057_v12, %v5061_v14  ;;  %v12072_v50 = vcombine.low %v5057_v12, %v5061_v14  ;;  %v4870_v0 = vld [vmem:[#allocation8 + $0x838] sm:$0xff] }
 0x4d8   :  { %8328 = vmatprep.subr.bf16.mxu0 %v11931_v7  ;;  %v11811_v13 = vcombine.high %v4794_v4, %v4798_v8  ;;  %v4786_v7 = vld [vmem:[#allocation8 + $0x598] sm:$0xff]  ;;  %v11899_v41 = vcombine.high %v4882_v32, %v4886_v6  ;;  %v7931_v23 = vadd.f32 %v7930_v11, %v5135_v29  ;;  %v11898_v24 = vcombine.low %v4882_v32, %v4886_v6 }
 0x4d9   :  { %8222 = vmatpush2.bf16.msra.mxu1 %v12096_v5  ;;  %v4790_v5 = vld [vmem:[#allocation8 + $0x5b8] sm:$0xff] }
 0x4da   :  { %8223 = vmatprep.subr.bf16.mxu1 %v12089_v40  ;;  %v11810_v40 = vcombine.low %v4794_v4, %v4798_v8  ;;  %v7935_v4 = vadd.f32 %v7934_v56, %v5135_v29  ;;  %v4762_v56 = vld [vmem:[#allocation8 + $0x4d8] sm:$0xff] }
 0x4db   :  { %8329 = vmatpush1.bf16.msra.mxu0 %v11930_v37  ;;  %v4874_v37 = vld [vmem:[#allocation8 + $0x858] sm:$0xff] }
 0x4dc   :  { %8330 = vmatprep.subr.bf16.mxu0 %v11923_v59  ;;  %v8016_v59 = vpop.f32.mrf.mxu0  ;;  %v11891_v14 = vcombine.high %v4874_v37, %v4878_v53  ;;  %v11890_v8 = vcombine.low %v4874_v37, %v4878_v53  ;;  %v4766_v29 = vld [vmem:[#allocation8 + $0x4f8] sm:$0xff] }
 0x4dd   :  { %8224 = vmatpush2.bf16.msra.mxu1 %v12088_v51  ;;  %v11803_v51 = vcombine.high %v4786_v7, %v4790_v5 }
 0x4de   :  { %8225 = vmatprep.subr.bf16.mxu1 %v12081_v3  ;;  %v4778_v3 = vld [vmem:[#allocation8 + $0x558] sm:$0xff] }
 0x4df   :  { %8331 = vmatpush1.bf16.msra.mxu0 %v11922_v62  ;;  %v4782_v62 = vld [vmem:[#allocation8 + $0x578] sm:$0xff] }
 0x4e0   :  { %8332 = vmatprep.subr.bf16.mxu0 %v11915_v26  ;;  %v11795_v11 = vcombine.high %v4778_v3, %v4782_v62 }
 0x4e1   :  { %8226 = vmatpush2.bf16.msra.mxu1 %v12080_v63  ;;  %v11802_v63 = vcombine.low %v4786_v7, %v4790_v5  ;;  %v4986_v7 = vld [vmem:[#allocation8 + $0xbd8] sm:$0xff] }
 0x4e2   :  { %8227 = vmatprep.subr.bf16.mxu1 %v12073_v10  ;;  %v13661_v10 = vpop.f32.mrf.mxu0  ;;  %v4990_v5 = vld [vmem:[#allocation8 + $0xbf8] sm:$0xff] }
 0x4e3   :  { %8333 = vmatpush1.bf16.msra.mxu0 %v11914_v28  ;;  %v12003_v53 = vcombine.high %v4986_v7, %v4990_v5 }
 0x4e4   :  { %8334 = vmatprep.subr.bf16.mxu0 %v11907_v2  ;;  %v4770_v2 = vld [vmem:[#allocation8 + $0x518] sm:$0xff] }
 0x4e5   :  { %8228 = vmatpush2.bf16.msra.mxu1 %v12072_v50  ;;  %v4774_v50 = vld [vmem:[#allocation8 + $0x538] sm:$0xff] }
 0x4e6   :  { %8283 = vmatprep.subr.bf16.mxu1 %v11811_v13  ;;  %v11883_v13 = vcombine.high %v4866_v52, %v4870_v0 }
 0x4e7   :  { %8335 = vmatpush1.bf16.msra.mxu0 %v11906_v60  ;;  %v11794_v60 = vcombine.low %v4778_v3, %v4782_v62  ;;  %v12002_v3 = vcombine.low %v4986_v7, %v4990_v5  ;;  %v4754_v62 = vld [vmem:[#allocation8 + $0x498] sm:$0xff] }
 0x4e8   :  { %v7973_v12 = vpop.f32.mrf.mxu1  ;;  %8230 = vmatmul.mubr.bf16.vlgmr.msra.gmra.mxu1 %v13597_v55  ;;  %8336 = vmatprep.subr.bf16.mxu0 %v11899_v41  ;;  %v8020_v41 = vpop.f32.mrf.mxu0  ;;  %v4738_v5 = vld [vmem:[#allocation8 + $0x418] sm:$0xff] }
 0x4e9   :  { %v7974_v26 = vadd.f32 %v7973_v12, %v7931_v23  ;;  %8284 = vmatpush1.bf16.msra.mxu1 %v11810_v40  ;;  %8315 = vmatprep.mubr.bf16.mxu1 %v13515_v49  ;;  %v11787_v40 = vcombine.high %v4770_v2, %v4774_v50  ;;  %v4978_v23 = vld [vmem:[#allocation8 + $0xb98] sm:$0xff]  ;;  %v11779_v12 = vcombine.high %v4762_v56, %v4766_v29 }
 0x4ea   :  { %v13663_v28 = vpop.f32.mrf.mxu1  ;;  %8285 = vmatprep.subr.bf16.mxu1 %v11803_v51  ;;  %v11882_v51 = vcombine.low %v4866_v52, %v4870_v0  ;;  %v4970_v52 = vld [vmem:[#allocation8 + $0xb58] sm:$0xff] }
 0x4eb   :  { %8337 = vmatpush1.bf16.msra.mxu0 %v11898_v24  ;;  %v13665_v32 = vadd.f32 %v8016_v59, %v7974_v26  ;;  %v11786_v59 = vcombine.low %v4770_v2, %v4774_v50  ;;  %v4982_v24 = vld [vmem:[#allocation8 + $0xbb8] sm:$0xff] }
 0x4ec   :  { %v7977_v6 = vpop.f32.mrf.mxu1  ;;  %8338 = vmatprep.subr.bf16.mxu0 %v11891_v14  ;;  %v4758_v14 = vld [vmem:[#allocation8 + $0x4b8] sm:$0xff]  ;;  %v11995_v26 = vcombine.high %v4978_v23, %v4982_v24 }
 0x4ed   :  { %v7978_v49 = vadd.f32 %v7977_v6, %v7935_v4  ;;  %8286 = vmatpush1.bf16.msra.mxu1 %v11802_v63  ;;  %v11778_v63 = vcombine.low %v4762_v56, %v4766_v29  ;;  %v4974_v0 = vld [vmem:[#allocation8 + $0xb78] sm:$0xff]  ;;  %v11994_v4 = vcombine.low %v4978_v23, %v4982_v24  ;;  %v11770_v6 = vcombine.low %v4754_v62, %v4758_v14 }
 0x4ee   :  { %8287 = vmatprep.subr.bf16.mxu1 %v11795_v11  ;;  %v11771_v11 = vcombine.high %v4754_v62, %v4758_v14  ;;  %v4750_v2 = vld [vmem:[#allocation8 + $0x478] sm:$0xff]  ;;  %v11987_v50 = vcombine.high %v4970_v52, %v4974_v0  ;;  %v11986_v7 = vcombine.low %v4970_v52, %v4974_v0 }
 0x4ef   :  { %8339 = vmatpush1.bf16.msra.mxu0 %v11890_v8  ;;  %v13667_v37 = vadd.f32 %v8020_v41, %v7978_v49  ;;  %v4746_v8 = vld [vmem:[#allocation8 + $0x458] sm:$0xff] }
 0x4f0   :  { %8340 = vmatprep.subr.bf16.mxu0 %v11883_v13  ;;  %v4962_v13 = vld [vmem:[#allocation8 + $0xb18] sm:$0xff] }
 0x4f1   :  { %8288 = vmatpush1.bf16.msra.mxu1 %v11794_v60  ;;  %v4966_v49 = vld [vmem:[#allocation8 + $0xb38] sm:$0xff]  ;;  %v11763_v60 = vcombine.high %v4746_v8, %v4750_v2 }
 0x4f2   :  { %8289 = vmatprep.subr.bf16.mxu1 %v11787_v40  ;;  %v4742_v41 = vld [vmem:[#allocation8 + $0x438] sm:$0xff]  ;;  %v11979_v40 = vcombine.high %v4962_v13, %v4966_v49  ;;  %v11978_v23 = vcombine.low %v4962_v13, %v4966_v49 }
 0x4f3   :  { %8341 = vmatpush1.bf16.msra.mxu0 %v11882_v51  ;;  %v11762_v51 = vcombine.low %v4746_v8, %v4750_v2  ;;  %v4954_v56 = vld [vmem:[#allocation8 + $0xad8] sm:$0xff]  ;;  %v11754_v14 = vcombine.low %v4738_v5, %v4742_v41 }
 0x4f4   :  { %8342 = vmatprep.subr.bf16.mxu0 %v12003_v53  ;;  %v4958_v29 = vld [vmem:[#allocation8 + $0xaf8] sm:$0xff]  ;;  %v11755_v53 = vcombine.high %v4738_v5, %v4742_v41 }
 0x4f5   :  { %8290 = vmatpush1.bf16.msra.mxu1 %v11786_v59  ;;  %v5131_v59 = vrot.slane %v13605_v27, %v13331_v16  ;;  %v4858_v24 = vld [vmem:[#allocation8 + $0x7d8] sm:$0xff] }
 0x4f6   :  { %8291 = vmatprep.subr.bf16.mxu1 %v11779_v12  ;;  %v4862_v12 = vld [vmem:[#allocation8 + $0x7f8] sm:$0xff] }
 0x4f7   :  { %8343 = vmatpush2.bf16.msra.mxu0 %v12002_v3  ;;  %v11971_v3 = vcombine.high %v4954_v56, %v4958_v29  ;;  %v7765_v62 = vadd.f32 %v13621_v39, %v5131_v59  ;;  %v11875_v52 = vcombine.high %v4858_v24, %v4862_v12  ;;  %v7761_v0 = vadd.f32 %v13611_v22, %v5131_v59  ;;  %v4854_v8 = vld [vmem:[#allocation8 + $0x7b8] sm:$0xff] }
 0x4f8   :  { %8344 = vmatprep.subr.bf16.mxu0 %v11995_v26  ;;  %v4946_v26 = vld [vmem:[#allocation8 + $0xa98] sm:$0xff] }
 0x4f9   :  { %8292 = vmatpush1.bf16.msra.mxu1 %v11778_v63  ;;  %v4950_v63 = vld [vmem:[#allocation8 + $0xab8] sm:$0xff] }
 0x4fa   :  { %8293 = vmatprep.subr.bf16.mxu1 %v11771_v11  ;;  %v11970_v11 = vcombine.low %v4954_v56, %v4958_v29  ;;  %v11963_v2 = vcombine.high %v4946_v26, %v4950_v63  ;;  %v4938_v13 = vld [vmem:[#allocation8 + $0xa58] sm:$0xff]  ;;  %v11962_v22 = vcombine.low %v4946_v26, %v4950_v63 }
 0x4fb   :  { %8345 = vmatpush2.bf16.msra.mxu0 %v11994_v4  ;;  %v4850_v4 = vld [vmem:[#allocation8 + $0x798] sm:$0xff] }
 0x4fc   :  { %8346 = vmatprep.subr.bf16.mxu0 %v11987_v50  ;;  %v7808_v50 = vadd.f32 %v13637_v1, %v7765_v62  ;;  %v4942_v39 = vld [vmem:[#allocation8 + $0xa78] sm:$0xff]  ;;  %v11867_v49 = vcombine.high %v4850_v4, %v4854_v8  ;;  %v11866_v56 = vcombine.low %v4850_v4, %v4854_v8  ;;  %v12509_v4 = vld [vmem:[#allocation10 + $0xe0] ss:$16 sps:$4 sm:$0xff]  }
 0x4fd   :  { %8294 = vmatpush1.bf16.msra.mxu1 %v11770_v6  ;;  %v11874_v6 = vcombine.low %v4858_v24, %v4862_v12  ;;  %v4842_v5 = vld [vmem:[#allocation8 + $0x758] sm:$0xff] }
 0x4fe   :  { %8295 = vmatprep.subr.bf16.mxu1 %v11763_v60  ;;  %v7804_v60 = vadd.f32 %v13615_v25, %v7761_v0  ;;  %v4846_v41 = vld [vmem:[#allocation8 + $0x778] sm:$0xff] }
 0x4ff   :  { %8347 = vmatpush2.bf16.msra.mxu0 %v11986_v7  ;;  %v7851_v7 = vadd.f32 %v13647_v57, %v7808_v50  ;;  %v4930_v29 = vld [vmem:[#allocation8 + $0xa18] sm:$0xff]  ;;  %v11859_v59 = vcombine.high %v4842_v5, %v4846_v41  ;;  %v11954_v57 = vcombine.low %v4938_v13, %v4942_v39  ;;  %v11858_v62 = vcombine.low %v4842_v5, %v4846_v41  ;;  %v12514_v50 = vld [vmem:[#allocation10 + $0xc4] ss:$16 sps:$4 sm:$0xff]  }
 0x500   :  { %8348 = vmatprep.subr.bf16.mxu0 %v11979_v40  ;;  %v11955_v40 = vcombine.high %v4938_v13, %v4942_v39  ;;  %v4838_v24 = vld [vmem:[#allocation8 + $0x738] sm:$0xff] }
 0x501   :  { %8296 = vmatpush1.bf16.msra.mxu1 %v11762_v51  ;;  %v7847_v51 = vadd.f32 %v13628_v17, %v7804_v60  ;;  %v7894_v1 = vadd.f32 %v13657_v47, %v7851_v7  ;;  %v4826_v26 = vld [vmem:[#allocation8 + $0x6d8] sm:$0xff] }
 0x502   :  { %8297 = vmatprep.subr.bf16.mxu1 %v11755_v53  ;;  %v4934_v53 = vld [vmem:[#allocation8 + $0xa38] sm:$0xff] }
 0x503   :  { %8349 = vmatpush2.bf16.msra.mxu0 %v11978_v23  ;;  %v7890_v25 = vadd.f32 %v13642_v58, %v7847_v51  ;;  %v4834_v23 = vld [vmem:[#allocation8 + $0x718] sm:$0xff]  ;;  %v11947_v12 = vcombine.high %v4930_v29, %v4934_v53 }
 0x504   :  { %8350 = vmatprep.subr.bf16.mxu0 %v11971_v3  ;;  %v8421_v3 = vmax.f32 %v7894_v1, 0.0  ;;  %v11851_v17 = vcombine.high %v4834_v23, %v4838_v24  ;;  %v4830_v63 = vld [vmem:[#allocation8 + $0x6f8] sm:$0xff]  ;;  %v11850_v58 = vcombine.low %v4834_v23, %v4838_v24  ;;  %v12521_v24 = vld [vmem:[#allocation10 + $0x60] ss:$16 sps:$4 sm:$0xff]  }
 0x505   :  { %8298 = vmatpush1.bf16.msra.mxu1 %v11754_v14  ;;  %v8413_v47 = vmax.f32 %v7890_v25, 0.0  ;;  %v11946_v14 = vcombine.low %v4930_v29, %v4934_v53  ;;  %v4818_v8 = vld [vmem:[#allocation8 + $0x698] sm:$0xff]  ;;  %v12518_v29 = vld [vmem:[#allocation10 + $0x80] ss:$16 sps:$4 sm:$0xff]   ;;  %v12523_v25 = vld [vmem:[#allocation10 + $0x64] ss:$16 sps:$4 sm:$0xff]  }
 0x506   :  { %8299 = vmatprep.subr.bf16.mxu1 %v11875_v52  ;;  %v12511_v52 = vld [vmem:[#allocation10 + $0xe4] ss:$16 sps:$4 sm:$0xff]   ;;  %v4810_v60 = vld [vmem:[#allocation8 + $0x658] sm:$0xff] }
 0x507   :  { %8351 = vmatpush2.bf16.msra.mxu0 %v11970_v11  ;;  %v8429_v0 = vpack.c.bf16 %v8421_v3, %v8413_v47  ;;  %v11843_v11 = vcombine.high %v4826_v26, %v4830_v63  ;;  %v4814_v7 = vld [vmem:[#allocation8 + $0x678] sm:$0xff]  ;;  %v13684_v47 = vpop.f32.mrf.mxu1 }
 0x508   :  { %8352 = vmatprep.subr.bf16.mxu0 %v11963_v2  ;;  %v4822_v2 = vld [vmem:[#allocation8 + $0x6b8] sm:$0xff]  ;;  %v11827_v41 = vcombine.high %v4810_v60, %v4814_v7  ;;  %v11826_v1 = vcombine.low %v4810_v60, %v4814_v7  ;;  %v12532_v60 = vld [vmem:[#allocation10 + $0x4] ss:$16 sps:$4 sm:$0xff]  }
 0x509   :  { %8300 = vmatpush2.bf16.msra.mxu1 %v11874_v6  ;;  %v11842_v6 = vcombine.low %v4826_v26, %v4830_v63  ;;  %v13680_v13 = vadd.bf16 %v8429_v0, %v13504_v43  ;;  %v11835_v39 = vcombine.high %v4818_v8, %v4822_v2  ;;  %v11834_v5 = vcombine.low %v4818_v8, %v4822_v2  ;;  %v4802_v43 = vld [vmem:[#allocation8 + $0x618] sm:$0xff]  ;;  %v12524_v26 = vld [vmem:[#allocation10 + $0x40] ss:$16 sps:$4 sm:$0xff]  }
 0x50a   :  { %8301 = vmatprep.subr.bf16.mxu1 %v11867_v49  ;;  %v12512_v49 = vld [vmem:[#allocation10 + $0xc0] ss:$16 sps:$4 sm:$0xff]   ;;  %v4806_v51 = vld [vmem:[#allocation8 + $0x638] sm:$0xff] }
 0x50b   :  { %8353 = vmatpush2.bf16.msra.mxu0 %v11962_v22  ;;  %v12517_v22 = vld [vmem:[#allocation10 + $0xa4] ss:$16 sps:$4 sm:$0xff]   ;;  %v5050_v53 = vld [vmem:[#allocation8 + $0xdd8] sm:$0xff] }
 0x50c   :  { %8354 = vmatprep.subr.bf16.mxu0 %v11955_v40  ;;  %v12515_v40 = vld [vmem:[#allocation10 + $0xa0] ss:$16 sps:$4 sm:$0xff]   ;;  %v5046_v3 = vld [vmem:[#allocation8 + $0xdb8] sm:$0xff] }
 0x50d   :  { %8302 = vmatpush2.bf16.msra.mxu1 %v11866_v56  ;;  %v11819_v56 = vcombine.high %v4802_v43, %v4806_v51  ;;  %v5034_v63 = vld [vmem:[#allocation8 + $0xd58] sm:$0xff] }
 0x50e   :  { %8303 = vmatprep.subr.bf16.mxu1 %v11859_v59  ;;  %v5054_v59 = vld [vmem:[#allocation8 + $0xdf8] sm:$0xff] }
 0x50f   :  { %8355 = vmatpush2.bf16.msra.mxu0 %v11954_v57  ;;  %v11818_v57 = vcombine.low %v4802_v43, %v4806_v51  ;;  %v12067_v23 = vcombine.high %v5050_v53, %v5054_v59  ;;  %v12535_v43 = vld [vmem:[#allocation10 + $0x1e4] ss:$16 sps:$4 sm:$0xff]  }
 0x510   :  { %8356 = vmatprep.subr.bf16.mxu0 %v11947_v12  ;;  %v5042_v12 = vld [vmem:[#allocation8 + $0xd98] sm:$0xff] }
 0x511   :  { %8304 = vmatpush2.bf16.msra.mxu1 %v11858_v62  ;;  %v12526_v62 = vld [vmem:[#allocation10 + $0x44] ss:$16 sps:$4 sm:$0xff]  }
 0x512   :  { %8305 = vmatprep.subr.bf16.mxu1 %v11851_v17  ;;  %v12066_v17 = vcombine.low %v5050_v53, %v5054_v59  ;;  %v12538_v53 = vld [vmem:[#allocation10 + $0x1c4] ss:$16 sps:$4 sm:$0xff]  }
 0x513   :  { %8357 = vmatpush2.bf16.msra.mxu0 %v11946_v14  ;;  %v12059_v14 = vcombine.high %v5042_v12, %v5046_v3 }
 0x514   :  { %10003 = vmatprep.subr.bf16.mxu0 %v12511_v52  ;;  %v5038_v52 = vld [vmem:[#allocation8 + $0xd78] sm:$0xff] }
 0x515   :  { %8306 = vmatpush2.bf16.msra.mxu1 %v11850_v58  ;;  %v12529_v58 = vld [vmem:[#allocation10 + $0x24] ss:$16 sps:$4 sm:$0xff]   ;;  %v12051_v2 = vcombine.high %v5034_v63, %v5038_v52  ;;  %v12050_v7 = vcombine.low %v5034_v63, %v5038_v52 }
 0x516   :  { %8359 = vmatmul.mubr.bf16.vlgmr.msra.gmra.mxu0 %v13577_v34  ;;  %8307 = vmatprep.subr.bf16.mxu1 %v11843_v11  ;;  %v12520_v34 = vld [vmem:[#allocation10 + $0x84] ss:$16 sps:$4 sm:$0xff]  }
 0x517   :  { %10004 = vmatpush1.bf16.msra.mxu0 %v12509_v4  ;;  %10035 = vmatprep.mubr.bf16.mxu0 %v13680_v13  ;;  %v12058_v4 = vcombine.low %v5042_v12, %v5046_v3  ;;  %v12541_v12 = vld [vmem:[#allocation10 + $0x1a4] ss:$16 sps:$4 sm:$0xff]  }
 0x518   :  { %10005 = vmatprep.subr.bf16.mxu0 %v12514_v50  ;;  %v12527_v50 = vld [vmem:[#allocation10 + $0x20] ss:$16 sps:$4 sm:$0xff]   ;;  %v12544_v63 = vld [vmem:[#allocation10 + $0x184] ss:$16 sps:$4 sm:$0xff]  }
 0x519   :  { %8308 = vmatpush2.bf16.msra.mxu1 %v11842_v6  ;;  %v5026_v6 = vld [vmem:[#allocation8 + $0xd18] sm:$0xff] }
 0x51a   :  { %8309 = vmatprep.subr.bf16.mxu1 %v11835_v39  ;;  %v5030_v39 = vld [vmem:[#allocation8 + $0xd38] sm:$0xff] }
 0x51b   :  { %10006 = vmatpush1.bf16.msra.mxu0 %v12512_v49 }
 0x51c   :  { %10007 = vmatprep.subr.bf16.mxu0 %v12517_v22 }
 0x51d   :  { %8310 = vmatpush2.bf16.msra.mxu1 %v11834_v5  ;;  %v12530_v5 = vld [vmem:[#allocation10] ss:$16 sps:$4 sm:$0xff]  }
 0x51e   :  { %8311 = vmatprep.subr.bf16.mxu1 %v11827_v41  ;;  %v5018_v41 = vld [vmem:[#allocation8 + $0xcd8] sm:$0xff] }
 0x51f   :  { %10008 = vmatpush1.bf16.msra.mxu0 %v12515_v40  ;;  %v5022_v40 = vld [vmem:[#allocation8 + $0xcf8] sm:$0xff] }
 0x520   :  { %10009 = vmatprep.subr.bf16.mxu0 %v12520_v34  ;;  %v12042_v34 = vcombine.low %v5026_v6, %v5030_v39  ;;  %v12034_v59 = vcombine.low %v5018_v41, %v5022_v40 }
 0x521   :  { %8312 = vmatpush2.bf16.msra.mxu1 %v11826_v1  ;;  %v12035_v1 = vcombine.high %v5018_v41, %v5022_v40  ;;  %v12553_v41 = vld [vmem:[#allocation10 + $0x124] ss:$16 sps:$4 sm:$0xff]  }
 0x522   :  { %8313 = vmatprep.subr.bf16.mxu1 %v11819_v56  ;;  %v5010_v56 = vld [vmem:[#allocation8 + $0xc98] sm:$0xff] }
 0x523   :  { %10010 = vmatpush1.bf16.msra.mxu0 %v12518_v29  ;;  %v5014_v29 = vld [vmem:[#allocation8 + $0xcb8] sm:$0xff] }
 0x524   :  { %10011 = vmatprep.subr.bf16.mxu0 %v12523_v25  ;;  %v12027_v25 = vcombine.high %v5010_v56, %v5014_v29  ;;  %v12026_v3 = vcombine.low %v5010_v56, %v5014_v29  ;;  %v12556_v56 = vld [vmem:[#allocation10 + $0x104] ss:$16 sps:$4 sm:$0xff]  }
 0x525   :  { %8314 = vmatpush2.bf16.msra.mxu1 %v11818_v57  ;;  %v12536_v57 = vld [vmem:[#allocation10 + $0x1c0] ss:$16 sps:$4 sm:$0xff]  }
 0x526   :  { %8369 = vmatprep.subr.bf16.mxu1 %v12067_v23  ;;  %v5002_v23 = vld [vmem:[#allocation8 + $0xc58] sm:$0xff] }
 0x527   :  { %10012 = vmatpush1.bf16.msra.mxu0 %v12521_v24  ;;  %v5006_v24 = vld [vmem:[#allocation8 + $0xc78] sm:$0xff] }
 0x528   :  { %v8059_v0 = vpop.f32.mrf.mxu1  ;;  %8316 = vmatmul.mubr.bf16.vlgmr.msra.gmra.mxu1 %v13536_v45  ;;  %10013 = vmatprep.subr.bf16.mxu0 %v12526_v62  ;;  %v12019_v62 = vcombine.high %v5002_v23, %v5006_v24  ;;  %v12018_v52 = vcombine.low %v5002_v23, %v5006_v24  ;;  %v12571_v23 = vld [vmem:[#allocation10 + $0x4e4] ss:$16 sps:$4 sm:$0xff]   ;;  %v5139_v24 = vrot.slane %v13605_v27, %v13339_v19 }
 0x529   :  { %v8060_v11 = vadd.f32 %v8059_v0, %v13665_v32  ;;  %8370 = vmatpush1.bf16.msra.mxu1 %v12066_v17  ;;  %8401 = vmatprep.mubr.bf16.mxu1 %v13593_v36  ;;  %v12043_v32 = vcombine.high %v5026_v6, %v5030_v39  ;;  %v12539_v17 = vld [vmem:[#allocation10 + $0x1a0] ss:$16 sps:$4 sm:$0xff]  }
 0x52a   :  { %v13689_v8 = vpop.f32.mrf.mxu1  ;;  %8371 = vmatprep.subr.bf16.mxu1 %v12059_v14  ;;  %v4994_v14 = vld [vmem:[#allocation8 + $0xc18] sm:$0xff]  ;;  %v12545_v39 = vld [vmem:[#allocation10 + $0x160] ss:$16 sps:$4 sm:$0xff]  }
 0x52b   :  { %10014 = vmatpush1.bf16.msra.mxu0 %v12524_v26  ;;  %v8414_v22 = vmax.f32 %v8060_v11, 0.0  ;;  %v4998_v26 = vld [vmem:[#allocation8 + $0xc38] sm:$0xff] }
 0x52c   :  { %v8063_v49 = vpop.f32.mrf.mxu1  ;;  %10015 = vmatprep.subr.bf16.mxu0 %v12529_v58  ;;  %v12011_v0 = vcombine.high %v4994_v14, %v4998_v26  ;;  %v12542_v58 = vld [vmem:[#allocation10 + $0x180] ss:$16 sps:$4 sm:$0xff]   ;;  %v5114_v11 = vld [vmem:[#allocation8 + $0xfd8] sm:$0xff] }
 0x52d   :  { %v8064_v45 = vadd.f32 %v8063_v49, %v13667_v37  ;;  %8372 = vmatpush1.bf16.msra.mxu1 %v12058_v4  ;;  %v12533_v37 = vld [vmem:[#allocation10 + $0x1e0] ss:$16 sps:$4 sm:$0xff]   ;;  %v5118_v4 = vld [vmem:[#allocation8 + $0xff8] sm:$0xff] }
 0x52e   :  { %8373 = vmatprep.subr.bf16.mxu1 %v12051_v2  ;;  %v12547_v2 = vld [vmem:[#allocation10 + $0x164] ss:$16 sps:$4 sm:$0xff]   ;;  %v12131_v6 = vcombine.high %v5114_v11, %v5118_v4  ;;  %v5106_v49 = vld [vmem:[#allocation8 + $0xf98] sm:$0xff] }
 0x52f   :  { %v8422_v36 = vmax.f32 %v8064_v45, 0.0  ;;  %10016 = vmatpush1.bf16.msra.mxu0 %v12527_v50  ;;  %v12010_v50 = vcombine.low %v4994_v14, %v4998_v26  ;;  %v12550_v45 = vld [vmem:[#allocation10 + $0x144] ss:$16 sps:$4 sm:$0xff]   ;;  %v5078_v14 = vld [vmem:[#allocation8 + $0xeb8] sm:$0xff]  ;;  %v12569_v26 = vld [vmem:[#allocation10 + $0x4e0] ss:$16 sps:$4 sm:$0xff]  }
 0x530   :  { %10017 = vmatprep.subr.bf16.mxu0 %v12532_v60  ;;  %v5110_v60 = vld [vmem:[#allocation8 + $0xfb8] sm:$0xff] }
 0x531   :  { %v13692_v51 = vpack.c.bf16 %v8422_v36, %v8414_v22  ;;  %8374 = vmatpush1.bf16.msra.mxu1 %v12050_v7  ;;  %v12130_v7 = vcombine.low %v5114_v11, %v5118_v4  ;;  %v12548_v22 = vld [vmem:[#allocation10 + $0x140] ss:$16 sps:$4 sm:$0xff]   ;;  %v5098_v36 = vld [vmem:[#allocation8 + $0xf58] sm:$0xff]  ;;  %v12122_v40 = vcombine.low %v5106_v49, %v5110_v60 }
 0x532   :  { %8375 = vmatprep.subr.bf16.mxu1 %v12043_v32  ;;  %v12123_v32 = vcombine.high %v5106_v49, %v5110_v60 }
 0x533   :  { %10018 = vmatpush1.bf16.msra.mxu0 %v12530_v5  ;;  %v5102_v5 = vld [vmem:[#allocation8 + $0xf78] sm:$0xff] }
 0x534   :  { %10019 = vmatprep.subr.bf16.mxu0 %v12535_v43  ;;  %v12115_v43 = vcombine.high %v5098_v36, %v5102_v5  ;;  %v12114_v29 = vcombine.low %v5098_v36, %v5102_v5 }
 0x535   :  { %8376 = vmatpush1.bf16.msra.mxu1 %v12042_v34  ;;  %v12551_v34 = vld [vmem:[#allocation10 + $0x120] ss:$16 sps:$4 sm:$0xff]  }
 0x536   :  { %8377 = vmatprep.subr.bf16.mxu1 %v12035_v1  ;;  %v5090_v1 = vld [vmem:[#allocation8 + $0xf18] sm:$0xff] }
 0x537   :  { %10020 = vmatpush2.bf16.msra.mxu0 %v12533_v37  ;;  %v5094_v37 = vld [vmem:[#allocation8 + $0xf38] sm:$0xff] }
 0x538   :  { %10021 = vmatprep.subr.bf16.mxu0 %v12538_v53  ;;  %v12107_v53 = vcombine.high %v5090_v1, %v5094_v37 }
 0x539   :  { %8378 = vmatpush1.bf16.msra.mxu1 %v12034_v59  ;;  %v12554_v59 = vld [vmem:[#allocation10 + $0x100] ss:$16 sps:$4 sm:$0xff]  }
 0x53a   :  { %8379 = vmatprep.subr.bf16.mxu1 %v12027_v25  ;;  %v5082_v25 = vld [vmem:[#allocation8 + $0xed8] sm:$0xff] }
 0x53b   :  { %10022 = vmatpush2.bf16.msra.mxu0 %v12536_v57  ;;  %v5086_v57 = vld [vmem:[#allocation8 + $0xef8] sm:$0xff] }
 0x53c   :  { %10023 = vmatprep.subr.bf16.mxu0 %v12541_v12  ;;  %v12106_v12 = vcombine.low %v5090_v1, %v5094_v37  ;;  %v12098_v11 = vcombine.low %v5082_v25, %v5086_v57  ;;  %v12559_v37 = vld [vmem:[#allocation10 + $0x2e4] ss:$16 sps:$4 sm:$0xff]  }
 0x53d   :  { %8380 = vmatpush1.bf16.msra.mxu1 %v12026_v3  ;;  %v12099_v3 = vcombine.high %v5082_v25, %v5086_v57  ;;  %v12599_v57 = vld [vmem:[#allocation10 + $0x440] ss:$16 sps:$4 sm:$0xff]  }
 0x53e   :  { %8381 = vmatprep.subr.bf16.mxu1 %v12019_v62  ;;  %v7937_v62 = vadd.f32 %v13655_v9, %v5139_v24 }
 0x53f   :  { %10024 = vmatpush2.bf16.msra.mxu0 %v12539_v17  ;;  %v5074_v17 = vld [vmem:[#allocation8 + $0xe98] sm:$0xff] }
 0x540   :  { %10025 = vmatprep.subr.bf16.mxu0 %v12544_v63  ;;  %v13699_v63 = vadd.bf16 %v13645_v42, %v13450_v31  ;;  %v12091_v9 = vcombine.high %v5074_v17, %v5078_v14  ;;  %v8022_v31 = vpop.f32.mrf.mxu0  ;;  %v8065_v42 = vpop.f32.mrf.mxu1 }
 0x541   :  { %8382 = vmatpush1.bf16.msra.mxu1 %v12018_v52  ;;  %v12577_v52 = vld [vmem:[#allocation10 + $0x4c4] ss:$16 sps:$4 sm:$0xff]  }
 0x542   :  { %8383 = vmatprep.subr.bf16.mxu1 %v12011_v0  ;;  %v7933_v0 = vadd.f32 %v13651_v48, %v5139_v24  ;;  %v12090_v48 = vcombine.low %v5074_v17, %v5078_v14  ;;  %v12560_v24 = vld [vmem:[#allocation10 + $0x2c0] ss:$16 sps:$4 sm:$0xff]  }
 0x543   :  { %10026 = vmatpush2.bf16.msra.mxu0 %v12542_v58  ;;  %v7980_v58 = vadd.f32 %v13684_v47, %v7937_v62  ;;  %v12613_v62 = vld [vmem:[#allocation10 + $0x404] ss:$16 sps:$4 sm:$0xff]   ;;  %v12563_v17 = vld [vmem:[#allocation10 + $0x2a0] ss:$16 sps:$4 sm:$0xff]  }
 0x544   :  { %10027 = vmatprep.subr.bf16.mxu0 %v12547_v2  ;;  %v7976_v4 = vadd.f32 %v13663_v28, %v7933_v0  ;;  %v5066_v2 = vld [vmem:[#allocation8 + $0xe58] sm:$0xff]  ;;  %v12581_v28 = vld [vmem:[#allocation10 + $0x4a0] ss:$16 sps:$4 sm:$0xff]  }
 0x545   :  { %8384 = vmatpush1.bf16.msra.mxu1 %v12010_v50  ;;  %v5070_v50 = vld [vmem:[#allocation8 + $0xe78] sm:$0xff]  ;;  %v8023_v49 = vadd.f32 %v8022_v31, %v7980_v58  ;;  %v12611_v14 = vld [vmem:[#allocation10 + $0x400] ss:$16 sps:$4 sm:$0xff]   ;;  %v12625_v58 = vld [vmem:[#allocation10 + $0x5c4] ss:$16 sps:$4 sm:$0xff]  }
 0x546   :  { %8385 = vmatprep.subr.bf16.mxu1 %v12131_v6  ;;  %v12575_v6 = vld [vmem:[#allocation10 + $0x4c0] ss:$16 sps:$4 sm:$0xff]   ;;  %v12083_v47 = vcombine.high %v5066_v2, %v5070_v50  ;;  %v8019_v60 = vadd.f32 %v13661_v10, %v7976_v4  ;;  %v12082_v5 = vcombine.low %v5066_v2, %v5070_v50  ;;  %v12631_v2 = vld [vmem:[#allocation10 + $0x5a4] ss:$16 sps:$4 sm:$0xff]  }
 0x547   :  { %10028 = vmatpush2.bf16.msra.mxu0 %v12545_v39  ;;  %v12583_v39 = vld [vmem:[#allocation10 + $0x4a4] ss:$16 sps:$4 sm:$0xff]   ;;  %v12617_v0 = vld [vmem:[#allocation10 + $0x5e0] ss:$16 sps:$4 sm:$0xff]  }
 0x548   :  { %10029 = vmatprep.subr.bf16.mxu0 %v12550_v45  ;;  %v8066_v45 = vadd.f32 %v8065_v42, %v8023_v49  ;;  %v8062_v36 = vadd.f32 %v13689_v8, %v8019_v60  ;;  %v12557_v8 = vld [vmem:[#allocation10 + $0x2e0] ss:$16 sps:$4 sm:$0xff]   ;;  %v12637_v42 = vld [vmem:[#allocation10 + $0x584] ss:$16 sps:$4 sm:$0xff]  }
 0x549   :  { %8386 = vmatpush2.bf16.msra.mxu1 %v12130_v7  ;;  %v5058_v7 = vld [vmem:[#allocation8 + $0xe18] sm:$0xff]  ;;  %v12623_v4 = vld [vmem:[#allocation10 + $0x5c0] ss:$16 sps:$4 sm:$0xff]   ;;  %v12592_v49 = vld [vmem:[#allocation10 + $0x204] ss:$16 sps:$4 sm:$0xff]  }
 0x54a   :  { %8387 = vmatprep.subr.bf16.mxu1 %v12123_v32  ;;  %v5062_v32 = vld [vmem:[#allocation8 + $0xe38] sm:$0xff]  ;;  %v8415_v1 = vmax.f32 %v8062_v36, 0.0  ;;  %v12578_v50 = vld [vmem:[#allocation10 + $0x240] ss:$16 sps:$4 sm:$0xff]  }
 0x54b   :  { %10030 = vmatpush2.bf16.msra.mxu0 %v12548_v22  ;;  %v12589_v22 = vld [vmem:[#allocation10 + $0x484] ss:$16 sps:$4 sm:$0xff]   ;;  %v12074_v10 = vcombine.low %v5058_v7, %v5062_v32  ;;  %v12629_v31 = vld [vmem:[#allocation10 + $0x5a0] ss:$16 sps:$4 sm:$0xff]  }
 0x54c   :  { %10031 = vmatprep.subr.bf16.mxu0 %v12553_v41  ;;  %v12075_v41 = vcombine.high %v5058_v7, %v5062_v32  ;;  %v12590_v60 = vld [vmem:[#allocation10 + $0x200] ss:$16 sps:$4 sm:$0xff]   ;;  %v12646_v32 = vld [vmem:[#allocation10 + $0x544] ss:$16 sps:$4 sm:$0xff]  }
 0x54d   :  { %8388 = vmatpush2.bf16.msra.mxu1 %v12122_v40  ;;  %v8423_v40 = vmax.f32 %v8066_v45, 0.0  ;;  %v12598_v45 = vld [vmem:[#allocation10 + $0x3e4] ss:$16 sps:$4 sm:$0xff]   ;;  %v12641_v7 = vld [vmem:[#allocation10 + $0x560] ss:$16 sps:$4 sm:$0xff]  }
 0x54e   :  { %8389 = vmatprep.subr.bf16.mxu1 %v12115_v43  ;;  %v12587_v43 = vld [vmem:[#allocation10 + $0x480] ss:$16 sps:$4 sm:$0xff]  }
 0x54f   :  { %10032 = vmatpush2.bf16.msra.mxu0 %v12551_v34  ;;  %v12595_v34 = vld [vmem:[#allocation10 + $0x464] ss:$16 sps:$4 sm:$0xff]   ;;  %v12644_v36 = vld [vmem:[#allocation10 + $0x540] ss:$16 sps:$4 sm:$0xff]  }
 0x550   :  { %10033 = vmatprep.subr.bf16.mxu0 %v12556_v56  ;;  %v8431_v56 = vpack.c.bf16 %v8423_v40, %v8415_v1  ;;  %v12610_v40 = vld [vmem:[#allocation10 + $0x3a4] ss:$16 sps:$4 sm:$0xff]   ;;  %v12608_v1 = vld [vmem:[#allocation10 + $0x3a0] ss:$16 sps:$4 sm:$0xff]  }
 0x551   :  { %8390 = vmatpush2.bf16.msra.mxu1 %v12114_v29  ;;  %v12593_v29 = vld [vmem:[#allocation10 + $0x460] ss:$16 sps:$4 sm:$0xff]  }
 0x552   :  { %8391 = vmatprep.subr.bf16.mxu1 %v12107_v53  ;;  %v12601_v53 = vld [vmem:[#allocation10 + $0x444] ss:$16 sps:$4 sm:$0xff]   ;;  %v13708_v25 = vadd.bf16 %v8431_v56, %v13506_v54  ;;  %v12655_v56 = vld [vmem:[#allocation10 + $0xec] ss:$16 sps:$4 sm:$0xff]  }
 0x553   :  { %10034 = vmatpush2.bf16.msra.mxu0 %v12554_v59  ;;  %v12562_v59 = vld [vmem:[#allocation10 + $0x2c4] ss:$16 sps:$4 sm:$0xff]  }
 0x554   :  { %10089 = vmatprep.subr.bf16.mxu0 %v12571_v23  ;;  %v12607_v23 = vld [vmem:[#allocation10 + $0x424] ss:$16 sps:$4 sm:$0xff]  }
 0x555   :  { %8392 = vmatpush2.bf16.msra.mxu1 %v12106_v12  ;;  %v12565_v12 = vld [vmem:[#allocation10 + $0x2a4] ss:$16 sps:$4 sm:$0xff]  }
 0x556   :  { %10036 = vmatmul.mubr.bf16.vlgmr.msra.gmra.mxu0 %v13699_v63  ;;  %8393 = vmatprep.subr.bf16.mxu1 %v12099_v3  ;;  %v12605_v3 = vld [vmem:[#allocation10 + $0x420] ss:$16 sps:$4 sm:$0xff]   ;;  %v12568_v54 = vld [vmem:[#allocation10 + $0x284] ss:$16 sps:$4 sm:$0xff]  }
 0x557   :  { %10090 = vmatpush1.bf16.msra.mxu0 %v12569_v26  ;;  %v12566_v26 = vld [vmem:[#allocation10 + $0x280] ss:$16 sps:$4 sm:$0xff]  }
 0x558   :  { %10091 = vmatprep.subr.bf16.mxu0 %v12577_v52  ;;  %v12574_v52 = vld [vmem:[#allocation10 + $0x264] ss:$16 sps:$4 sm:$0xff]  }
 0x559   :  { %8394 = vmatpush2.bf16.msra.mxu1 %v12098_v11  ;;  %v12572_v11 = vld [vmem:[#allocation10 + $0x260] ss:$16 sps:$4 sm:$0xff]  }
 0x55a   :  { %8395 = vmatprep.subr.bf16.mxu1 %v12091_v9  ;;  %v12580_v9 = vld [vmem:[#allocation10 + $0x244] ss:$16 sps:$4 sm:$0xff]  }
 0x55b   :  { %10092 = vmatpush1.bf16.msra.mxu0 %v12575_v6  ;;  %v12586_v6 = vld [vmem:[#allocation10 + $0x224] ss:$16 sps:$4 sm:$0xff]  }
 0x55c   :  { %10093 = vmatprep.subr.bf16.mxu0 %v12583_v39  ;;  %v12584_v39 = vld [vmem:[#allocation10 + $0x220] ss:$16 sps:$4 sm:$0xff]  }
 0x55d   :  { %8396 = vmatpush2.bf16.msra.mxu1 %v12090_v48  ;;  %v12635_v48 = vld [vmem:[#allocation10 + $0x580] ss:$16 sps:$4 sm:$0xff]  }
 0x55e   :  { %8397 = vmatprep.subr.bf16.mxu1 %v12083_v47  ;;  %v12643_v47 = vld [vmem:[#allocation10 + $0x564] ss:$16 sps:$4 sm:$0xff]  }
 0x55f   :  { %10094 = vmatpush1.bf16.msra.mxu0 %v12581_v28  ;;  %v12596_v28 = vld [vmem:[#allocation10 + $0x3e0] ss:$16 sps:$4 sm:$0xff]  }
 0x560   :  { %10095 = vmatprep.subr.bf16.mxu0 %v12589_v22  ;;  %v12604_v22 = vld [vmem:[#allocation10 + $0x3c4] ss:$16 sps:$4 sm:$0xff]  }
 0x561   :  { %8398 = vmatpush2.bf16.msra.mxu1 %v12082_v5  ;;  %v12649_v5 = vld [vmem:[#allocation10 + $0x524] ss:$16 sps:$4 sm:$0xff]  }
 0x562   :  { %8399 = vmatprep.subr.bf16.mxu1 %v12075_v41  ;;  %v12602_v41 = vld [vmem:[#allocation10 + $0x3c0] ss:$16 sps:$4 sm:$0xff]  }
 0x563   :  { %10096 = vmatpush1.bf16.msra.mxu0 %v12587_v43  ;;  %v12647_v43 = vld [vmem:[#allocation10 + $0x520] ss:$16 sps:$4 sm:$0xff]  }
 0x564   :  { %10097 = vmatprep.subr.bf16.mxu0 %v12595_v34  ;;  %v12652_v34 = vld [vmem:[#allocation10 + $0x504] ss:$16 sps:$4 sm:$0xff]  }
 0x565   :  { %8400 = vmatpush2.bf16.msra.mxu1 %v12074_v10  ;;  %v12616_v10 = vld [vmem:[#allocation10 + $0x384] ss:$16 sps:$4 sm:$0xff]  }
 0x566   :  { %10046 = vmatprep.subr.bf16.mxu1 %v12559_v37  ;;  %v12650_v37 = vld [vmem:[#allocation10 + $0x500] ss:$16 sps:$4 sm:$0xff]  }
 0x567   :  { %10098 = vmatpush1.bf16.msra.mxu0 %v12593_v29  ;;  %v12614_v29 = vld [vmem:[#allocation10 + $0x380] ss:$16 sps:$4 sm:$0xff]  }
 0x568   :  { %8402 = vmatmul.mubr.bf16.vlgmr.msra.gmra.mxu1 %v13597_v55  ;;  %10099 = vmatprep.subr.bf16.mxu0 %v12601_v53  ;;  %v12619_v55 = vld [vmem:[#allocation10 + $0x5e4] ss:$16 sps:$4 sm:$0xff]   ;;  %v8102_v53 = vpop.f32.mrf.mxu0 }
 0x569   :  { %10047 = vmatpush1.bf16.msra.mxu1 %v12557_v8  ;;  %10078 = vmatprep.mubr.bf16.mxu1 %v13708_v25  ;;  %v12622_v8 = vld [vmem:[#allocation10 + $0x364] ss:$16 sps:$4 sm:$0xff]  }
 0x56a   :  { %10048 = vmatprep.subr.bf16.mxu1 %v12562_v59  ;;  %v12620_v59 = vld [vmem:[#allocation10 + $0x360] ss:$16 sps:$4 sm:$0xff]  }
 0x56b   :  { %10100 = vmatpush1.bf16.msra.mxu0 %v12599_v57  ;;  %v8104_v57 = vpop.f32.mrf.mxu0 }
 0x56c   :  { %10101 = vmatprep.subr.bf16.mxu0 %v12607_v23  ;;  %v12628_v23 = vld [vmem:[#allocation10 + $0x344] ss:$16 sps:$4 sm:$0xff]  }
 0x56d   :  { %10049 = vmatpush1.bf16.msra.mxu1 %v12560_v24  ;;  %v12626_v24 = vld [vmem:[#allocation10 + $0x340] ss:$16 sps:$4 sm:$0xff]  }
 0x56e   :  { %10050 = vmatprep.subr.bf16.mxu1 %v12565_v12  ;;  %v8106_v12 = vpop.f32.mrf.mxu0 }
 0x56f   :  { %10102 = vmatpush1.bf16.msra.mxu0 %v12605_v3  ;;  %v8145_v3 = vpop.f32.mrf.mxu1 }
 0x570   :  { %10103 = vmatprep.subr.bf16.mxu0 %v12613_v62  ;;  %v12634_v62 = vld [vmem:[#allocation10 + $0x324] ss:$16 sps:$4 sm:$0xff]  }
 0x571   :  { %10051 = vmatpush1.bf16.msra.mxu1 %v12563_v17  ;;  %v12632_v17 = vld [vmem:[#allocation10 + $0x320] ss:$16 sps:$4 sm:$0xff]  }
 0x572   :  { %10052 = vmatprep.subr.bf16.mxu1 %v12568_v54  ;;  %v8108_v54 = vpop.f32.mrf.mxu0 }
 0x573   :  { %10104 = vmatpush1.bf16.msra.mxu0 %v12611_v14  ;;  %v8147_v14 = vpop.f32.mrf.mxu1 }
 0x574   :  { %10105 = vmatprep.subr.bf16.mxu0 %v12619_v55  ;;  %v12640_v55 = vld [vmem:[#allocation10 + $0x304] ss:$16 sps:$4 sm:$0xff]  }
 0x575   :  { %10053 = vmatpush1.bf16.msra.mxu1 %v12566_v26  ;;  %v5143_v26 = vrot.slane %v13605_v27, %v13395_v44 }
 0x576   :  { %10054 = vmatprep.subr.bf16.mxu1 %v12574_v52  ;;  %v8188_v52 = vpop.f32.mrf.mxu0 }
 0x577   :  { %10106 = vmatpush2.bf16.msra.mxu0 %v12617_v0  ;;  %v5147_v0 = vrot.slane %v13605_v27, %v13371_v30 }
 0x578   :  { %10107 = vmatprep.subr.bf16.mxu0 %v12625_v58  ;;  %v12638_v58 = vld [vmem:[#allocation10 + $0x300] ss:$16 sps:$4 sm:$0xff]  }
 0x579   :  { %10055 = vmatpush1.bf16.msra.mxu1 %v12572_v11  ;;  %v8149_v11 = vpop.f32.mrf.mxu1  ;;  %v8109_v30 = vadd.f32 %v8108_v54, %v5147_v0 }
 0x57a   :  { %10056 = vmatprep.subr.bf16.mxu1 %v12580_v9  ;;  %v12703_v9 = vld [vmem:[#allocation10 + $0x6e4] ss:$16 sps:$4 sm:$0xff]  }
 0x57b   :  { %10108 = vmatpush2.bf16.msra.mxu0 %v12623_v4  ;;  %v8103_v4 = vadd.f32 %v8102_v53, %v5143_v26 }
 0x57c   :  { %10109 = vmatprep.subr.bf16.mxu0 %v12631_v2  ;;  %v8190_v2 = vpop.f32.mrf.mxu0 }
 0x57d   :  { %10057 = vmatpush1.bf16.msra.mxu1 %v12578_v50  ;;  %v8105_v50 = vadd.f32 %v8104_v57, %v5147_v0  ;;  %v8146_v44 = vadd.f32 %v8145_v3, %v8103_v4  ;;  %v12731_v0 = vld [vmem:[#allocation10 + $0x640] ss:$16 sps:$4 sm:$0xff]   ;;  %v12745_v4 = vld [vmem:[#allocation10 + $0x604] ss:$16 sps:$4 sm:$0xff]  }
 0x57e   :  { %10058 = vmatprep.subr.bf16.mxu1 %v12586_v6  ;;  %v8107_v6 = vadd.f32 %v8106_v12, %v5143_v26  ;;  %v12727_v12 = vld [vmem:[#allocation10 + $0x664] ss:$16 sps:$4 sm:$0xff]  }
 0x57f   :  { %10110 = vmatpush2.bf16.msra.mxu0 %v12629_v31  ;;  %v12701_v31 = vld [vmem:[#allocation10 + $0x6e0] ss:$16 sps:$4 sm:$0xff]   ;;  %v12733_v26 = vld [vmem:[#allocation10 + $0x644] ss:$16 sps:$4 sm:$0xff]  }
 0x580   :  { %10111 = vmatprep.subr.bf16.mxu0 %v12637_v42  ;;  %v13718_v42 = vadd.bf16 %v13692_v51, %v13484_v46 }
 0x581   :  { %10059 = vmatpush1.bf16.msra.mxu1 %v12584_v39  ;;  %v8151_v39 = vpop.f32.mrf.mxu1 }
 0x582   :  { %10060 = vmatprep.subr.bf16.mxu1 %v12592_v49  ;;  %v12709_v49 = vld [vmem:[#allocation10 + $0x6c4] ss:$16 sps:$4 sm:$0xff]  }
 0x583   :  { %10112 = vmatpush2.bf16.msra.mxu0 %v12635_v48  ;;  %v8148_v48 = vadd.f32 %v8147_v14, %v8105_v50  ;;  %v12658_v14 = vld [vmem:[#allocation10 + $0xcc] ss:$16 sps:$4 sm:$0xff]  }
 0x584   :  { %10113 = vmatprep.subr.bf16.mxu0 %v12643_v47  ;;  %v8150_v47 = vadd.f32 %v8149_v11, %v8107_v6  ;;  %v12664_v11 = vld [vmem:[#allocation10 + $0x8c] ss:$16 sps:$4 sm:$0xff]   ;;  %v12751_v6 = vld [vmem:[#allocation10 + $0x7e4] ss:$16 sps:$4 sm:$0xff]  }
 0x585   :  { %10061 = vmatpush1.bf16.msra.mxu1 %v12590_v60  ;;  %v8192_v60 = vpop.f32.mrf.mxu0  ;;  %v8191_v46 = vadd.f32 %v8190_v2, %v8148_v48  ;;  %v12662_v2 = vld [vmem:[#allocation10 + $0x88] ss:$16 sps:$4 sm:$0xff]   ;;  %v12667_v50 = vld [vmem:[#allocation10 + $0x6c] ss:$16 sps:$4 sm:$0xff]  }
 0x586   :  { %10062 = vmatprep.subr.bf16.mxu1 %v12598_v45  ;;  %v8193_v51 = vadd.f32 %v8192_v60, %v8150_v47  ;;  %v12673_v48 = vld [vmem:[#allocation10 + $0x2c] ss:$16 sps:$4 sm:$0xff]   ;;  %v12755_v47 = vld [vmem:[#allocation10 + $0x7c0] ss:$16 sps:$4 sm:$0xff]   ;;  %v12763_v60 = vld [vmem:[#allocation10 + $0x7a4] ss:$16 sps:$4 sm:$0xff]  }
 0x587   :  { %10114 = vmatpush2.bf16.msra.mxu0 %v12641_v7  ;;  %v8152_v7 = vadd.f32 %v8151_v39, %v8109_v30  ;;  %v12749_v39 = vld [vmem:[#allocation10 + $0x7e0] ss:$16 sps:$4 sm:$0xff]   ;;  %v12668_v30 = vld [vmem:[#allocation10 + $0x48] ss:$16 sps:$4 sm:$0xff]  }
 0x588   :  { %10115 = vmatprep.subr.bf16.mxu0 %v12646_v32  ;;  %v12707_v32 = vld [vmem:[#allocation10 + $0x6c0] ss:$16 sps:$4 sm:$0xff]  }
 0x589   :  { %10063 = vmatpush2.bf16.msra.mxu1 %v12596_v28  ;;  %v8189_v28 = vadd.f32 %v8188_v52, %v8146_v44  ;;  %v12656_v52 = vld [vmem:[#allocation10 + $0xc8] ss:$16 sps:$4 sm:$0xff]   ;;  %v12670_v44 = vld [vmem:[#allocation10 + $0x4c] ss:$16 sps:$4 sm:$0xff]  }
 0x58a   :  { %10064 = vmatprep.subr.bf16.mxu1 %v12604_v22 }
 0x58b   :  { %10116 = vmatpush2.bf16.msra.mxu0 %v12644_v36  ;;  %v12715_v36 = vld [vmem:[#allocation10 + $0x6a4] ss:$16 sps:$4 sm:$0xff]  }
 0x58c   :  { %10117 = vmatprep.subr.bf16.mxu0 %v12649_v5  ;;  %v8194_v5 = vpop.f32.mrf.mxu0 }
 0x58d   :  { %10065 = vmatpush2.bf16.msra.mxu1 %v12602_v41 }
 0x58e   :  { %10066 = vmatprep.subr.bf16.mxu1 %v12610_v40 }
 0x58f   :  { %10118 = vmatpush2.bf16.msra.mxu0 %v12647_v43 }
 0x590   :  { %10119 = vmatprep.subr.bf16.mxu0 %v12652_v34 }
 0x591   :  { %10067 = vmatpush2.bf16.msra.mxu1 %v12608_v1  ;;  %v8195_v1 = vadd.f32 %v8194_v5, %v8152_v7  ;;  %v12676_v7 = vld [vmem:[#allocation10 + $0xc] ss:$16 sps:$4 sm:$0xff]   ;;  %v12677_v5 = vld [vmem:[#allocation10 + $0x1e8] ss:$16 sps:$4 sm:$0xff]  }
 0x592   :  { %10068 = vmatprep.subr.bf16.mxu1 %v12616_v10  ;;  %v12713_v10 = vld [vmem:[#allocation10 + $0x6a0] ss:$16 sps:$4 sm:$0xff]  }
 0x593   :  { %10120 = vmatpush2.bf16.msra.mxu0 %v12650_v37 }
 0x594   :  { %10175 = vmatprep.subr.bf16.mxu0 %v12655_v56  ;;  %v12721_v56 = vld [vmem:[#allocation10 + $0x684] ss:$16 sps:$4 sm:$0xff]  }
 0x595   :  { %10069 = vmatpush2.bf16.msra.mxu1 %v12614_v29 }
 0x596   :  { %10070 = vmatprep.subr.bf16.mxu1 %v12622_v8 }
 0x599   :  { %10071 = vmatpush2.bf16.msra.mxu1 %v12620_v59 }
 0x59a   :  { %10072 = vmatprep.subr.bf16.mxu1 %v12628_v23  ;;  %v12719_v23 = vld [vmem:[#allocation10 + $0x680] ss:$16 sps:$4 sm:$0xff]  }
 0x59d   :  { %10073 = vmatpush2.bf16.msra.mxu1 %v12626_v24 }
 0x59e   :  { %10074 = vmatprep.subr.bf16.mxu1 %v12634_v62 }
 0x5a1   :  { %10075 = vmatpush2.bf16.msra.mxu1 %v12632_v17  ;;  %v12653_v17 = vld [vmem:[#allocation10 + $0xe8] ss:$16 sps:$4 sm:$0xff]  }
 0x5a2   :  { %10076 = vmatprep.subr.bf16.mxu1 %v12640_v55  ;;  %v12725_v55 = vld [vmem:[#allocation10 + $0x660] ss:$16 sps:$4 sm:$0xff]  }
 0x5a5   :  { %10077 = vmatpush2.bf16.msra.mxu1 %v12638_v58  ;;  %v12739_v58 = vld [vmem:[#allocation10 + $0x624] ss:$16 sps:$4 sm:$0xff]  }
 0x5a6   :  { %10132 = vmatprep.subr.bf16.mxu1 %v12703_v9  ;;  %v12737_v9 = vld [vmem:[#allocation10 + $0x620] ss:$16 sps:$4 sm:$0xff]  }
 0x5a8   :  { %v8231_v45 = vpop.f32.mrf.mxu1  ;;  %10079 = vmatmul.mubr.bf16.vlgmr.msra.gmra.mxu1 %v13718_v42 }
 0x5a9   :  { %10133 = vmatpush1.bf16.msra.mxu1 %v12701_v31  ;;  %v8232_v41 = vadd.f32 %v8231_v45, %v8189_v28  ;;  %v12665_v31 = vld [vmem:[#allocation10 + $0x68] ss:$16 sps:$4 sm:$0xff]   ;;  %v12769_v28 = vld [vmem:[#allocation10 + $0x784] ss:$16 sps:$4 sm:$0xff]  }
 0x5aa   :  { %v8233_v22 = vpop.f32.mrf.mxu1  ;;  %10134 = vmatprep.subr.bf16.mxu1 %v12709_v49  ;;  %v12757_v49 = vld [vmem:[#allocation10 + $0x7c4] ss:$16 sps:$4 sm:$0xff]   ;;  %v12671_v45 = vld [vmem:[#allocation10 + $0x28] ss:$16 sps:$4 sm:$0xff]  }
 0x5ab   :  { %v8234_v43 = vadd.f32 %v8233_v22, %v8191_v46  ;;  %v8416_v8 = vmax.f32 %v8232_v41, 0.0  ;;  %v12674_v22 = vld [vmem:[#allocation10 + $0x8] ss:$16 sps:$4 sm:$0xff]   ;;  %v12767_v46 = vld [vmem:[#allocation10 + $0x780] ss:$16 sps:$4 sm:$0xff]  }
 0x5ac   :  { %v8235_v40 = vpop.f32.mrf.mxu1  ;;  %v12682_v41 = vld [vmem:[#allocation10 + $0x1cc] ss:$16 sps:$4 sm:$0xff]  }
 0x5ad   :  { %v8236_v34 = vadd.f32 %v8235_v40, %v8193_v51  ;;  %10135 = vmatpush1.bf16.msra.mxu1 %v12707_v32  ;;  %v8417_v59 = vmax.f32 %v8234_v43, 0.0  ;;  %v12761_v32 = vld [vmem:[#allocation10 + $0x7a0] ss:$16 sps:$4 sm:$0xff]   ;;  %v12775_v51 = vld [vmem:[#allocation10 + $0x764] ss:$16 sps:$4 sm:$0xff]  }
 0x5ae   :  { %v8237_v37 = vpop.f32.mrf.mxu1  ;;  %10136 = vmatprep.subr.bf16.mxu1 %v12715_v36  ;;  %v12679_v36 = vld [vmem:[#allocation10 + $0x1ec] ss:$16 sps:$4 sm:$0xff]   ;;  %v12773_v40 = vld [vmem:[#allocation10 + $0x760] ss:$16 sps:$4 sm:$0xff]   ;;  %v12781_v43 = vld [vmem:[#allocation10 + $0x744] ss:$16 sps:$4 sm:$0xff]  }
 0x5af   :  { %v8424_v29 = vmax.f32 %v8236_v34, 0.0  ;;  %v8238_v53 = vadd.f32 %v8237_v37, %v8195_v1  ;;  %v12680_v34 = vld [vmem:[#allocation10 + $0x1c8] ss:$16 sps:$4 sm:$0xff]   ;;  %v12685_v1 = vld [vmem:[#allocation10 + $0x1ac] ss:$16 sps:$4 sm:$0xff]  }
 0x5b0   :  { %v12787_v37 = vld [vmem:[#allocation10 + $0x724] ss:$16 sps:$4 sm:$0xff]  }
 0x5b1   :  { %v8425_v57 = vmax.f32 %v8238_v53, 0.0  ;;  %10137 = vmatpush1.bf16.msra.mxu1 %v12713_v10  ;;  %v8432_v24 = vpack.c.bf16 %v8424_v29, %v8416_v8  ;;  %v12779_v10 = vld [vmem:[#allocation10 + $0x740] ss:$16 sps:$4 sm:$0xff]   ;;  %v12688_v29 = vld [vmem:[#allocation10 + $0x18c] ss:$16 sps:$4 sm:$0xff]  }
 0x5b2   :  { %10138 = vmatprep.subr.bf16.mxu1 %v12721_v56  ;;  %v12683_v56 = vld [vmem:[#allocation10 + $0x1a8] ss:$16 sps:$4 sm:$0xff]   ;;  %v12785_v53 = vld [vmem:[#allocation10 + $0x720] ss:$16 sps:$4 sm:$0xff]   ;;  %v12793_v8 = vld [vmem:[#allocation10 + $0x704] ss:$16 sps:$4 sm:$0xff]  }
 0x5b3   :  { %v8433_v3 = vpack.c.bf16 %v8425_v57, %v8417_v59  ;;  %v13725_v54 = vadd.bf16 %v8432_v24, %v13571_v21  ;;  %v12659_v21 = vld [vmem:[#allocation10 + $0xa8] ss:$16 sps:$4 sm:$0xff]   ;;  %v12691_v57 = vld [vmem:[#allocation10 + $0x16c] ss:$16 sps:$4 sm:$0xff]  }
 0x5b4   :  { %v12686_v59 = vld [vmem:[#allocation10 + $0x188] ss:$16 sps:$4 sm:$0xff]   ;;  %v12799_v24 = vld [vmem:[#allocation10 + $0x2ec] ss:$16 sps:$4 sm:$0xff]  }
 0x5b5   :  { %v13722_v62 = vadd.bf16 %v8433_v3, %v13548_v61  ;;  %10139 = vmatpush1.bf16.msra.mxu1 %v12719_v23  ;;  %v12661_v61 = vld [vmem:[#allocation10 + $0xac] ss:$16 sps:$4 sm:$0xff]   ;;  %v12791_v23 = vld [vmem:[#allocation10 + $0x700] ss:$16 sps:$4 sm:$0xff]  }
 0x5b6   :  { %10140 = vmatprep.subr.bf16.mxu1 %v12727_v12  ;;  %v12689_v12 = vld [vmem:[#allocation10 + $0x168] ss:$16 sps:$4 sm:$0xff]   ;;  %v12694_v3 = vld [vmem:[#allocation10 + $0x14c] ss:$16 sps:$4 sm:$0xff]  }
 0x5b7   :  { %10121 = vmatprep.mubr.bf16.mxu0 %v13722_v62 }
 0x5b8   :  { %10122 = vmatmul.mubr.bf16.vlgmr.msra.gmra.mxu0 %v13725_v54 }
 0x5b9   :  { %10176 = vmatpush1.bf16.msra.mxu0 %v12653_v17  ;;  %10207 = vmatprep.mubr.bf16.mxu0 %v13680_v13  ;;  %v12743_v13 = vld [vmem:[#allocation10 + $0x600] ss:$16 sps:$4 sm:$0xff]   ;;  %v12692_v17 = vld [vmem:[#allocation10 + $0x148] ss:$16 sps:$4 sm:$0xff]  }
 0x5ba   :  { %10177 = vmatprep.subr.bf16.mxu0 %v12658_v14  ;;  %10141 = vmatpush1.bf16.msra.mxu1 %v12725_v55  ;;  %v12697_v14 = vld [vmem:[#allocation10 + $0x12c] ss:$16 sps:$4 sm:$0xff]   ;;  %v12695_v55 = vld [vmem:[#allocation10 + $0x128] ss:$16 sps:$4 sm:$0xff]  }
 0x5bb   :  { %10142 = vmatprep.subr.bf16.mxu1 %v12733_v26  ;;  %v12700_v26 = vld [vmem:[#allocation10 + $0x10c] ss:$16 sps:$4 sm:$0xff]  }
 0x5bd   :  { %10178 = vmatpush1.bf16.msra.mxu0 %v12656_v52  ;;  %v12698_v52 = vld [vmem:[#allocation10 + $0x108] ss:$16 sps:$4 sm:$0xff]  }
 0x5be   :  { %10179 = vmatprep.subr.bf16.mxu0 %v12661_v61  ;;  %10143 = vmatpush1.bf16.msra.mxu1 %v12731_v0  ;;  %v12706_v61 = vld [vmem:[#allocation10 + $0x4ec] ss:$16 sps:$4 sm:$0xff]   ;;  %v12704_v0 = vld [vmem:[#allocation10 + $0x4e8] ss:$16 sps:$4 sm:$0xff]  }
 0x5bf   :  { %10144 = vmatprep.subr.bf16.mxu1 %v12739_v58  ;;  %v12712_v58 = vld [vmem:[#allocation10 + $0x4cc] ss:$16 sps:$4 sm:$0xff]  }
 0x5c1   :  { %10180 = vmatpush1.bf16.msra.mxu0 %v12659_v21  ;;  %v12710_v21 = vld [vmem:[#allocation10 + $0x4c8] ss:$16 sps:$4 sm:$0xff]  }
 0x5c2   :  { %10181 = vmatprep.subr.bf16.mxu0 %v12664_v11  ;;  %10145 = vmatpush1.bf16.msra.mxu1 %v12737_v9  ;;  %v12718_v11 = vld [vmem:[#allocation10 + $0x4ac] ss:$16 sps:$4 sm:$0xff]   ;;  %v12716_v9 = vld [vmem:[#allocation10 + $0x4a8] ss:$16 sps:$4 sm:$0xff]  }
 0x5c3   :  { %10146 = vmatprep.subr.bf16.mxu1 %v12745_v4  ;;  %v12724_v4 = vld [vmem:[#allocation10 + $0x48c] ss:$16 sps:$4 sm:$0xff]  }
 0x5c5   :  { %10182 = vmatpush1.bf16.msra.mxu0 %v12662_v2  ;;  %v12722_v2 = vld [vmem:[#allocation10 + $0x488] ss:$16 sps:$4 sm:$0xff]  }
 0x5c6   :  { %10183 = vmatprep.subr.bf16.mxu0 %v12667_v50  ;;  %10147 = vmatpush1.bf16.msra.mxu1 %v12743_v13  ;;  %v12730_v50 = vld [vmem:[#allocation10 + $0x46c] ss:$16 sps:$4 sm:$0xff]   ;;  %v12728_v13 = vld [vmem:[#allocation10 + $0x468] ss:$16 sps:$4 sm:$0xff]  }
 0x5c7   :  { %10148 = vmatprep.subr.bf16.mxu1 %v12751_v6  ;;  %v12736_v6 = vld [vmem:[#allocation10 + $0x44c] ss:$16 sps:$4 sm:$0xff]  }
 0x5c9   :  { %10184 = vmatpush1.bf16.msra.mxu0 %v12665_v31  ;;  %v12742_v31 = vld [vmem:[#allocation10 + $0x42c] ss:$16 sps:$4 sm:$0xff]  }
 0x5ca   :  { %10185 = vmatprep.subr.bf16.mxu0 %v12670_v44  ;;  %10149 = vmatpush2.bf16.msra.mxu1 %v12749_v39  ;;  %v12748_v44 = vld [vmem:[#allocation10 + $0x40c] ss:$16 sps:$4 sm:$0xff]   ;;  %v12746_v39 = vld [vmem:[#allocation10 + $0x408] ss:$16 sps:$4 sm:$0xff]  }
 0x5cb   :  { %10150 = vmatprep.subr.bf16.mxu1 %v12757_v49  ;;  %v8274_v49 = vpop.f32.mrf.mxu0 }
 0x5cd   :  { %10186 = vmatpush1.bf16.msra.mxu0 %v12668_v30  ;;  %v12754_v30 = vld [vmem:[#allocation10 + $0x5ec] ss:$16 sps:$4 sm:$0xff]  }
 0x5ce   :  { %10187 = vmatprep.subr.bf16.mxu0 %v12673_v48  ;;  %10151 = vmatpush2.bf16.msra.mxu1 %v12755_v47  ;;  %v12752_v48 = vld [vmem:[#allocation10 + $0x5e8] ss:$16 sps:$4 sm:$0xff]   ;;  %v8276_v47 = vpop.f32.mrf.mxu0 }
 0x5cf   :  { %10152 = vmatprep.subr.bf16.mxu1 %v12763_v60  ;;  %v12760_v60 = vld [vmem:[#allocation10 + $0x5cc] ss:$16 sps:$4 sm:$0xff]  }
 0x5d1   :  { %10188 = vmatpush1.bf16.msra.mxu0 %v12671_v45  ;;  %v12758_v45 = vld [vmem:[#allocation10 + $0x5c8] ss:$16 sps:$4 sm:$0xff]  }
 0x5d2   :  { %10189 = vmatprep.subr.bf16.mxu0 %v12676_v7  ;;  %10153 = vmatpush2.bf16.msra.mxu1 %v12761_v32  ;;  %v8278_v7 = vpop.f32.mrf.mxu0 }
 0x5d3   :  { %10154 = vmatprep.subr.bf16.mxu1 %v12769_v28  ;;  %v12766_v28 = vld [vmem:[#allocation10 + $0x5ac] ss:$16 sps:$4 sm:$0xff]  }
 0x5d5   :  { %10190 = vmatpush1.bf16.msra.mxu0 %v12674_v22  ;;  %v12764_v22 = vld [vmem:[#allocation10 + $0x5a8] ss:$16 sps:$4 sm:$0xff]  }
 0x5d6   :  { %10191 = vmatprep.subr.bf16.mxu0 %v12679_v36  ;;  %10155 = vmatpush2.bf16.msra.mxu1 %v12767_v46  ;;  %v8280_v36 = vpop.f32.mrf.mxu0 }
 0x5d7   :  { %10156 = vmatprep.subr.bf16.mxu1 %v12775_v51  ;;  %v12772_v51 = vld [vmem:[#allocation10 + $0x58c] ss:$16 sps:$4 sm:$0xff]  }
 0x5d9   :  { %10192 = vmatpush2.bf16.msra.mxu0 %v12677_v5  ;;  %v5151_v5 = vrot.slane %v13605_v27, %v13398_v15 }
 0x5da   :  { %10193 = vmatprep.subr.bf16.mxu0 %v12682_v41  ;;  %10157 = vmatpush2.bf16.msra.mxu1 %v12773_v40  ;;  %v8360_v41 = vpop.f32.mrf.mxu0  ;;  %v5155_v40 = vrot.slane %v13605_v27, %v13374_v33 }
 0x5db   :  { %10158 = vmatprep.subr.bf16.mxu1 %v12781_v43  ;;  %v12770_v43 = vld [vmem:[#allocation10 + $0x588] ss:$16 sps:$4 sm:$0xff]  }
 0x5dc   :  { %v8281_v15 = vadd.f32 %v8280_v36, %v5155_v40  ;;  %v12806_v36 = vld [vmem:[#allocation10 + $0x288] ss:$16 sps:$4 sm:$0xff]  }
 0x5dd   :  { %10194 = vmatpush2.bf16.msra.mxu0 %v12680_v34 }
 0x5de   :  { %10195 = vmatprep.subr.bf16.mxu0 %v12685_v1  ;;  %10159 = vmatpush2.bf16.msra.mxu1 %v12779_v10  ;;  %v12778_v1 = vld [vmem:[#allocation10 + $0x56c] ss:$16 sps:$4 sm:$0xff]   ;;  %v8275_v10 = vadd.f32 %v8274_v49, %v5151_v5 }
 0x5df   :  { %10160 = vmatprep.subr.bf16.mxu1 %v12787_v37  ;;  %v8362_v37 = vpop.f32.mrf.mxu0 }
 0x5e1   :  { %10196 = vmatpush2.bf16.msra.mxu0 %v12683_v56  ;;  %v8277_v56 = vadd.f32 %v8276_v47, %v5155_v40  ;;  %v12904_v40 = vld [vmem:[#allocation11 + $0x44] ss:$8 sps:$4 sm:$0xff]  }
 0x5e2   :  { %10197 = vmatprep.subr.bf16.mxu0 %v12688_v29  ;;  %10161 = vmatpush2.bf16.msra.mxu1 %v12785_v53  ;;  %v8279_v29 = vadd.f32 %v8278_v7, %v5151_v5  ;;  %v12776_v53 = vld [vmem:[#allocation10 + $0x568] ss:$16 sps:$4 sm:$0xff]   ;;  %v12805_v7 = vld [vmem:[#allocation10 + $0x2ac] ss:$16 sps:$4 sm:$0xff]  }
 0x5e3   :  { %10162 = vmatprep.subr.bf16.mxu1 %v12793_v8  ;;  %v12814_v5 = vld [vmem:[#allocation10 + $0x24c] ss:$16 sps:$4 sm:$0xff]  }
 0x5e5   :  { %10198 = vmatpush2.bf16.msra.mxu0 %v12686_v59 }
 0x5e6   :  { %10199 = vmatprep.subr.bf16.mxu0 %v12691_v57  ;;  %10163 = vmatpush2.bf16.msra.mxu1 %v12791_v23  ;;  %v12784_v57 = vld [vmem:[#allocation10 + $0x54c] ss:$16 sps:$4 sm:$0xff]  }
 0x5e7   :  { %10218 = vmatprep.subr.bf16.mxu1 %v12799_v24 }
 0x5e8   :  { %v8317_v32 = vpop.f32.mrf.mxu1 }
 0x5e9   :  { %10200 = vmatpush2.bf16.msra.mxu0 %v12689_v12  ;;  %v8318_v8 = vadd.f32 %v8317_v32, %v8275_v10  ;;  %v8364_v12 = vpop.f32.mrf.mxu0  ;;  %v12808_v32 = vld [vmem:[#allocation10 + $0x28c] ss:$16 sps:$4 sm:$0xff]  }
 0x5ea   :  { %10201 = vmatprep.subr.bf16.mxu0 %v12694_v3  ;;  %v8319_v46 = vpop.f32.mrf.mxu1  ;;  %v12782_v3 = vld [vmem:[#allocation10 + $0x548] ss:$16 sps:$4 sm:$0xff]   ;;  %v12907_v10 = vld [vmem:[#allocation11 + $0x34] ss:$8 sps:$4 sm:$0xff]  }
 0x5eb   :  { %v8320_v23 = vadd.f32 %v8319_v46, %v8277_v56  ;;  %v12896_v46 = vld [vmem:[#allocation11 + $0x60] ss:$8 sps:$4 sm:$0xff]   ;;  %v12820_v56 = vld [vmem:[#allocation10 + $0x20c] ss:$16 sps:$4 sm:$0xff]  }
 0x5ec   :  { %v8321_v34 = vpop.f32.mrf.mxu1 }
 0x5ed   :  { %10202 = vmatpush2.bf16.msra.mxu0 %v12692_v17  ;;  %v8322_v24 = vadd.f32 %v8321_v34, %v8279_v29  ;;  %v8361_v17 = vadd.f32 %v8360_v41, %v8318_v8  ;;  %v12899_v41 = vld [vmem:[#allocation11 + $0x50] ss:$8 sps:$4 sm:$0xff]   ;;  %v12817_v34 = vld [vmem:[#allocation10 + $0x22c] ss:$16 sps:$4 sm:$0xff]  }
 0x5ee   :  { %10203 = vmatprep.subr.bf16.mxu0 %v12697_v14  ;;  %v8323_v59 = vpop.f32.mrf.mxu1  ;;  %v12905_v29 = vld [vmem:[#allocation11 + $0x30] ss:$8 sps:$4 sm:$0xff]  }
 0x5ef   :  { %v8324_v27 = vadd.f32 %v8323_v59, %v8281_v15  ;;  %v12818_v8 = vld [vmem:[#allocation10 + $0x208] ss:$16 sps:$4 sm:$0xff]   ;;  %v12823_v59 = vld [vmem:[#allocation10 + $0x3ec] ss:$16 sps:$4 sm:$0xff]  }
 0x5f0   :  { %v12913_v15 = vld [vmem:[#allocation11 + $0x14] ss:$8 sps:$4 sm:$0xff]  }
 0x5f1   :  { %10204 = vmatpush2.bf16.msra.mxu0 %v12695_v55  ;;  %v12790_v55 = vld [vmem:[#allocation10 + $0x52c] ss:$16 sps:$4 sm:$0xff]  }
 0x5f2   :  { %10205 = vmatprep.subr.bf16.mxu0 %v12700_v26  ;;  %v8363_v26 = vadd.f32 %v8362_v37, %v8320_v23  ;;  %v12815_v37 = vld [vmem:[#allocation10 + $0x228] ss:$16 sps:$4 sm:$0xff]  }
 0x5f3   :  { %v12821_v23 = vld [vmem:[#allocation10 + $0x3e8] ss:$16 sps:$4 sm:$0xff]  }
 0x5f5   :  { %10206 = vmatpush2.bf16.msra.mxu0 %v12698_v52  ;;  %v8365_v52 = vadd.f32 %v8364_v12, %v8322_v24  ;;  %v12826_v24 = vld [vmem:[#allocation10 + $0x3cc] ss:$16 sps:$4 sm:$0xff]   ;;  %v12911_v12 = vld [vmem:[#allocation11 + $0x10] ss:$8 sps:$4 sm:$0xff]  }
 0x5f6   :  { %10261 = vmatprep.subr.bf16.mxu0 %v12706_v61  ;;  %v8366_v61 = vpop.f32.mrf.mxu0 }
 0x5f8   :  { %10208 = vmatmul.mubr.bf16.vlgmr.msra.gmra.mxu0 %v13699_v63  ;;  %v12734_v63 = vld [vmem:[#allocation10 + $0x448] ss:$16 sps:$4 sm:$0xff]  }
 0x5f9   :  { %10262 = vmatpush1.bf16.msra.mxu0 %v12704_v0  ;;  %10293 = vmatprep.mubr.bf16.mxu0 %v13722_v62  ;;  %v12740_v62 = vld [vmem:[#allocation10 + $0x428] ss:$16 sps:$4 sm:$0xff]  }
 0x5fa   :  { %10263 = vmatprep.subr.bf16.mxu0 %v12712_v58 }
 0x5fd   :  { %10264 = vmatpush1.bf16.msra.mxu0 %v12710_v21 }
 0x5fe   :  { %10265 = vmatprep.subr.bf16.mxu0 %v12718_v11 }
 0x601   :  { %10266 = vmatpush1.bf16.msra.mxu0 %v12716_v9  ;;  %v8367_v9 = vadd.f32 %v8366_v61, %v8324_v27  ;;  %v12824_v27 = vld [vmem:[#allocation10 + $0x3c8] ss:$16 sps:$4 sm:$0xff]   ;;  %v12922_v61 = vld [vmem:[#allocation11 + $0xe4] ss:$8 sps:$4 sm:$0xff]  }
 0x602   :  { %10267 = vmatprep.subr.bf16.mxu0 %v12724_v4  ;;  %v12788_v4 = vld [vmem:[#allocation10 + $0x528] ss:$16 sps:$4 sm:$0xff]  }
 0x605   :  { %10268 = vmatpush1.bf16.msra.mxu0 %v12722_v2 }
 0x606   :  { %10269 = vmatprep.subr.bf16.mxu0 %v12730_v50  ;;  %v12796_v50 = vld [vmem:[#allocation10 + $0x50c] ss:$16 sps:$4 sm:$0xff]  }
 0x609   :  { %10270 = vmatpush1.bf16.msra.mxu0 %v12728_v13 }
 0x60a   :  { %10271 = vmatprep.subr.bf16.mxu0 %v12736_v6 }
 0x60d   :  { %10272 = vmatpush1.bf16.msra.mxu0 %v12734_v63 }
 0x60e   :  { %10273 = vmatprep.subr.bf16.mxu0 %v12742_v31 }
 0x611   :  { %10274 = vmatpush1.bf16.msra.mxu0 %v12740_v62 }
 0x612   :  { %10275 = vmatprep.subr.bf16.mxu0 %v12748_v44  ;;  %v12794_v44 = vld [vmem:[#allocation10 + $0x508] ss:$16 sps:$4 sm:$0xff]  }
 0x615   :  { %10276 = vmatpush1.bf16.msra.mxu0 %v12746_v39 }
 0x616   :  { %10277 = vmatprep.subr.bf16.mxu0 %v12754_v30 }
 0x619   :  { %10278 = vmatpush2.bf16.msra.mxu0 %v12752_v48  ;;  %v12797_v48 = vld [vmem:[#allocation10 + $0x2e8] ss:$16 sps:$4 sm:$0xff]  }
 0x61a   :  { %10279 = vmatprep.subr.bf16.mxu0 %v12760_v60  ;;  %v12802_v60 = vld [vmem:[#allocation10 + $0x2cc] ss:$16 sps:$4 sm:$0xff]  }
 0x61d   :  { %10280 = vmatpush2.bf16.msra.mxu0 %v12758_v45  ;;  %v12800_v45 = vld [vmem:[#allocation10 + $0x2c8] ss:$16 sps:$4 sm:$0xff]  }
 0x61e   :  { %10281 = vmatprep.subr.bf16.mxu0 %v12766_v28  ;;  %v12893_v28 = vld [vmem:[#allocation11 + $0x70] ss:$8 sps:$4 sm:$0xff]  }
 0x621   :  { %10282 = vmatpush2.bf16.msra.mxu0 %v12764_v22  ;;  %v12898_v22 = vld [vmem:[#allocation11 + $0x64] ss:$8 sps:$4 sm:$0xff]  }
 0x622   :  { %10283 = vmatprep.subr.bf16.mxu0 %v12772_v51  ;;  %v12901_v51 = vld [vmem:[#allocation11 + $0x54] ss:$8 sps:$4 sm:$0xff]  }
 0x625   :  { %10284 = vmatpush2.bf16.msra.mxu0 %v12770_v43  ;;  %v12812_v43 = vld [vmem:[#allocation10 + $0x248] ss:$16 sps:$4 sm:$0xff]  }
 0x626   :  { %10285 = vmatprep.subr.bf16.mxu0 %v12778_v1  ;;  %v12902_v1 = vld [vmem:[#allocation11 + $0x40] ss:$8 sps:$4 sm:$0xff]  }
 0x628   :  { %v8403_v33 = vpop.f32.mrf.mxu1 }
 0x629   :  { %10286 = vmatpush2.bf16.msra.mxu0 %v12776_v53  ;;  %v8404_v0 = vadd.f32 %v8403_v33, %v8361_v17  ;;  %v12910_v53 = vld [vmem:[#allocation11 + $0x24] ss:$8 sps:$4 sm:$0xff]   ;;  %v12914_v17 = vld [vmem:[#allocation11] ss:$8 sps:$4 sm:$0xff]  }
 0x62a   :  { %v8405_v14 = vpop.f32.mrf.mxu1  ;;  %10287 = vmatprep.subr.bf16.mxu0 %v12784_v57  ;;  %v12908_v57 = vld [vmem:[#allocation11 + $0x20] ss:$8 sps:$4 sm:$0xff]   ;;  %v12916_v33 = vld [vmem:[#allocation11 + $0x4] ss:$8 sps:$4 sm:$0xff]  }
 0x62b   :  { %v8406_v21 = vadd.f32 %v8405_v14, %v8363_v26  ;;  %v8418_v63 = vmax.f32 %v8404_v0, 0.0  ;;  %v12919_v14 = vld [vmem:[#allocation11 + $0xf4] ss:$8 sps:$4 sm:$0xff]   ;;  %v12830_v0 = vld [vmem:[#allocation10 + $0x388] ss:$16 sps:$4 sm:$0xff]  }
 0x62c   :  { %v8407_v58 = vpop.f32.mrf.mxu1  ;;  %v12832_v26 = vld [vmem:[#allocation10 + $0x38c] ss:$16 sps:$4 sm:$0xff]  }
 0x62d   :  { %v8408_v11 = vadd.f32 %v8407_v58, %v8365_v52  ;;  %10288 = vmatpush2.bf16.msra.mxu0 %v12782_v3  ;;  %v8419_v31 = vmax.f32 %v8406_v21, 0.0  ;;  %v12829_v3 = vld [vmem:[#allocation10 + $0x3ac] ss:$16 sps:$4 sm:$0xff]   ;;  %v12917_v52 = vld [vmem:[#allocation11 + $0xf0] ss:$8 sps:$4 sm:$0xff]  }
 0x62e   :  { %v8409_v2 = vpop.f32.mrf.mxu1  ;;  %10289 = vmatprep.subr.bf16.mxu0 %v12790_v55  ;;  %v12827_v55 = vld [vmem:[#allocation10 + $0x3a8] ss:$16 sps:$4 sm:$0xff]   ;;  %v12835_v58 = vld [vmem:[#allocation10 + $0x36c] ss:$16 sps:$4 sm:$0xff]  }
 0x62f   :  { %v8426_v13 = vmax.f32 %v8408_v11, 0.0  ;;  %v8410_v6 = vadd.f32 %v8409_v2, %v8367_v9  ;;  %v12920_v21 = vld [vmem:[#allocation11 + $0xe0] ss:$8 sps:$4 sm:$0xff]   ;;  %v12925_v11 = vld [vmem:[#allocation11 + $0xd4] ss:$8 sps:$4 sm:$0xff]  }
 0x630   :  { %v12833_v9 = vld [vmem:[#allocation10 + $0x368] ss:$16 sps:$4 sm:$0xff]  }
 0x631   :  { %v8427_v62 = vmax.f32 %v8410_v6, 0.0  ;;  %10290 = vmatpush2.bf16.msra.mxu0 %v12788_v4  ;;  %v8434_v39 = vpack.c.bf16 %v8426_v13, %v8418_v63  ;;  %v12838_v4 = vld [vmem:[#allocation10 + $0x34c] ss:$16 sps:$4 sm:$0xff]   ;;  %v12923_v2 = vld [vmem:[#allocation11 + $0xd0] ss:$8 sps:$4 sm:$0xff]  }
 0x632   :  { %10291 = vmatprep.subr.bf16.mxu0 %v12796_v50  ;;  %v12928_v50 = vld [vmem:[#allocation11 + $0xc4] ss:$8 sps:$4 sm:$0xff]   ;;  %v12836_v13 = vld [vmem:[#allocation10 + $0x348] ss:$16 sps:$4 sm:$0xff]  }
 0x633   :  { %v8435_v49 = vpack.c.bf16 %v8427_v62, %v8419_v31  ;;  %v13740_v47 = vadd.bf16 %v8434_v39, %v13587_v35  ;;  %v12895_v35 = vld [vmem:[#allocation11 + $0x74] ss:$8 sps:$4 sm:$0xff]   ;;  %v12926_v63 = vld [vmem:[#allocation11 + $0xc0] ss:$8 sps:$4 sm:$0xff]   ;;  %v12929_v39 = vld [vmem:[#allocation11 + $0xb0] ss:$8 sps:$4 sm:$0xff]  }
 0x634   :  { %v12841_v6 = vld [vmem:[#allocation10 + $0x32c] ss:$16 sps:$4 sm:$0xff]   ;;  %v12839_v62 = vld [vmem:[#allocation10 + $0x328] ss:$16 sps:$4 sm:$0xff]  }
 0x635   :  { %10292 = vmatpush2.bf16.msra.mxu0 %v12794_v44  ;;  %v13737_v30 = vadd.bf16 %v8435_v49, %v13589_v38  ;;  %v12803_v38 = vld [vmem:[#allocation10 + $0x2a8] ss:$16 sps:$4 sm:$0xff]   ;;  %v12931_v31 = vld [vmem:[#allocation11 + $0xb4] ss:$8 sps:$4 sm:$0xff]  }
 0x636   :  { %10756 = vmatprep.subr.bf16.mxu0 %v12895_v35  ;;  %v12844_v44 = vld [vmem:[#allocation10 + $0x30c] ss:$16 sps:$4 sm:$0xff]   ;;  %v12842_v49 = vld [vmem:[#allocation10 + $0x308] ss:$16 sps:$4 sm:$0xff]  }
 0x637   :  { %10164 = vmatprep.mubr.bf16.mxu1 %v13737_v30  ;;  %v12851_v35 = vld [vmem:[#allocation10 + $0x6a8] ss:$16 sps:$4 sm:$0xff]  }
 0x638   :  { %10294 = vmatmul.mubr.bf16.vlgmr.msra.gmra.mxu0 %v13725_v54  ;;  %10165 = vmatmul.mubr.bf16.vlgmr.msra.gmra.mxu1 %v13740_v47  ;;  %v12811_v54 = vld [vmem:[#allocation10 + $0x26c] ss:$16 sps:$4 sm:$0xff]  }
 0x639   :  { %10219 = vmatpush1.bf16.msra.mxu1 %v12797_v48  ;;  %10250 = vmatprep.mubr.bf16.mxu1 %v13708_v25  ;;  %v12809_v25 = vld [vmem:[#allocation10 + $0x268] ss:$16 sps:$4 sm:$0xff]   ;;  %v12847_v48 = vld [vmem:[#allocation10 + $0x6ec] ss:$16 sps:$4 sm:$0xff]  }
 0x63a   :  { %10220 = vmatprep.subr.bf16.mxu1 %v12802_v60  ;;  %10757 = vmatpush1.bf16.msra.mxu0 %v12893_v28  ;;  %v12845_v60 = vld [vmem:[#allocation10 + $0x6e8] ss:$16 sps:$4 sm:$0xff]  }
 0x63b   :  { %10758 = vmatprep.subr.bf16.mxu0 %v12898_v22  ;;  %v12932_v28 = vld [vmem:[#allocation11 + $0xa0] ss:$8 sps:$4 sm:$0xff]   ;;  %v12937_v22 = vld [vmem:[#allocation11 + $0x94] ss:$8 sps:$4 sm:$0xff]  }
 0x63d   :  { %10221 = vmatpush1.bf16.msra.mxu1 %v12800_v45  ;;  %v12850_v45 = vld [vmem:[#allocation10 + $0x6cc] ss:$16 sps:$4 sm:$0xff]  }
 0x63e   :  { %10222 = vmatprep.subr.bf16.mxu1 %v12805_v7  ;;  %10759 = vmatpush1.bf16.msra.mxu0 %v12896_v46  ;;  %v12848_v7 = vld [vmem:[#allocation10 + $0x6c8] ss:$16 sps:$4 sm:$0xff]   ;;  %v12940_v46 = vld [vmem:[#allocation11 + $0x84] ss:$8 sps:$4 sm:$0xff]  }
 0x63f   :  { %10760 = vmatprep.subr.bf16.mxu0 %v12901_v51  ;;  %v12938_v51 = vld [vmem:[#allocation11 + $0x80] ss:$8 sps:$4 sm:$0xff]  }
 0x641   :  { %10223 = vmatpush1.bf16.msra.mxu1 %v12803_v38  ;;  %v12934_v38 = vld [vmem:[#allocation11 + $0xa4] ss:$8 sps:$4 sm:$0xff]  }
 0x642   :  { %10224 = vmatprep.subr.bf16.mxu1 %v12808_v32  ;;  %10761 = vmatpush1.bf16.msra.mxu0 %v12899_v41  ;;  %v12853_v32 = vld [vmem:[#allocation10 + $0x6ac] ss:$16 sps:$4 sm:$0xff]   ;;  %v12860_v41 = vld [vmem:[#allocation10 + $0x648] ss:$16 sps:$4 sm:$0xff]  }
 0x643   :  { %10762 = vmatprep.subr.bf16.mxu0 %v12904_v40  ;;  %v12865_v40 = vld [vmem:[#allocation10 + $0x62c] ss:$16 sps:$4 sm:$0xff]  }
 0x645   :  { %10225 = vmatpush1.bf16.msra.mxu1 %v12806_v36  ;;  %v12856_v36 = vld [vmem:[#allocation10 + $0x68c] ss:$16 sps:$4 sm:$0xff]  }
 0x646   :  { %10226 = vmatprep.subr.bf16.mxu1 %v12811_v54  ;;  %10763 = vmatpush1.bf16.msra.mxu0 %v12902_v1  ;;  %v12935_v54 = vld [vmem:[#allocation11 + $0x90] ss:$8 sps:$4 sm:$0xff]  }
 0x647   :  { %10764 = vmatprep.subr.bf16.mxu0 %v12907_v10  ;;  %v12866_v1 = vld [vmem:[#allocation10 + $0x608] ss:$16 sps:$4 sm:$0xff]   ;;  %v12871_v10 = vld [vmem:[#allocation10 + $0x7ec] ss:$16 sps:$4 sm:$0xff]  }
 0x649   :  { %10227 = vmatpush1.bf16.msra.mxu1 %v12809_v25  ;;  %v12857_v25 = vld [vmem:[#allocation10 + $0x668] ss:$16 sps:$4 sm:$0xff]  }
 0x64a   :  { %10228 = vmatprep.subr.bf16.mxu1 %v12814_v5  ;;  %10765 = vmatpush1.bf16.msra.mxu0 %v12905_v29  ;;  %v12862_v5 = vld [vmem:[#allocation10 + $0x64c] ss:$16 sps:$4 sm:$0xff]   ;;  %v12872_v29 = vld [vmem:[#allocation10 + $0x7c8] ss:$16 sps:$4 sm:$0xff]  }
 0x64b   :  { %10766 = vmatprep.subr.bf16.mxu0 %v12910_v53  ;;  %v12877_v53 = vld [vmem:[#allocation10 + $0x7ac] ss:$16 sps:$4 sm:$0xff]  }
 0x64d   :  { %10229 = vmatpush1.bf16.msra.mxu1 %v12812_v43  ;;  %v12863_v43 = vld [vmem:[#allocation10 + $0x628] ss:$16 sps:$4 sm:$0xff]  }
 0x64e   :  { %10230 = vmatprep.subr.bf16.mxu1 %v12817_v34  ;;  %10767 = vmatpush1.bf16.msra.mxu0 %v12908_v57  ;;  %v12868_v34 = vld [vmem:[#allocation10 + $0x60c] ss:$16 sps:$4 sm:$0xff]   ;;  %v12878_v57 = vld [vmem:[#allocation10 + $0x788] ss:$16 sps:$4 sm:$0xff]  }
 0x64f   :  { %10768 = vmatprep.subr.bf16.mxu0 %v12913_v15  ;;  %v12883_v15 = vld [vmem:[#allocation10 + $0x76c] ss:$16 sps:$4 sm:$0xff]  }
 0x651   :  { %10231 = vmatpush1.bf16.msra.mxu1 %v12815_v37  ;;  %v12869_v37 = vld [vmem:[#allocation10 + $0x7e8] ss:$16 sps:$4 sm:$0xff]  }
 0x652   :  { %10232 = vmatprep.subr.bf16.mxu1 %v12820_v56  ;;  %10769 = vmatpush1.bf16.msra.mxu0 %v12911_v12  ;;  %v12874_v56 = vld [vmem:[#allocation10 + $0x7cc] ss:$16 sps:$4 sm:$0xff]   ;;  %v12884_v12 = vld [vmem:[#allocation10 + $0x748] ss:$16 sps:$4 sm:$0xff]  }
 0x653   :  { %10770 = vmatprep.subr.bf16.mxu0 %v12916_v33  ;;  %v12889_v33 = vld [vmem:[#allocation10 + $0x72c] ss:$16 sps:$4 sm:$0xff]  }
 0x655   :  { %10233 = vmatpush1.bf16.msra.mxu1 %v12818_v8  ;;  %v12875_v8 = vld [vmem:[#allocation10 + $0x7a8] ss:$16 sps:$4 sm:$0xff]  }
 0x656   :  { %10234 = vmatprep.subr.bf16.mxu1 %v12823_v59  ;;  %10771 = vmatpush1.bf16.msra.mxu0 %v12914_v17  ;;  %v12880_v59 = vld [vmem:[#allocation10 + $0x78c] ss:$16 sps:$4 sm:$0xff]   ;;  %v12890_v17 = vld [vmem:[#allocation10 + $0x708] ss:$16 sps:$4 sm:$0xff]  }
 0x657   :  { %10772 = vmatprep.subr.bf16.mxu0 %v12919_v14  ;;  %v12941_v14 = vld [vmem:[#allocation11 + $0x170] ss:$8 sps:$4 sm:$0xff]  }
 0x659   :  { %10235 = vmatpush2.bf16.msra.mxu1 %v12821_v23  ;;  %v12881_v23 = vld [vmem:[#allocation10 + $0x768] ss:$16 sps:$4 sm:$0xff]  }
 0x65a   :  { %10236 = vmatprep.subr.bf16.mxu1 %v12826_v24  ;;  %10773 = vmatpush2.bf16.msra.mxu0 %v12917_v52  ;;  %v12886_v24 = vld [vmem:[#allocation10 + $0x74c] ss:$16 sps:$4 sm:$0xff]   ;;  %v12944_v52 = vld [vmem:[#allocation11 + $0x160] ss:$8 sps:$4 sm:$0xff]  }
 0x65b   :  { %10774 = vmatprep.subr.bf16.mxu0 %v12922_v61  ;;  %v12949_v61 = vld [vmem:[#allocation11 + $0x154] ss:$8 sps:$4 sm:$0xff]  }
 0x65d   :  { %10237 = vmatpush2.bf16.msra.mxu1 %v12824_v27  ;;  %v12887_v27 = vld [vmem:[#allocation10 + $0x728] ss:$16 sps:$4 sm:$0xff]  }
 0x65e   :  { %10238 = vmatprep.subr.bf16.mxu1 %v12829_v3  ;;  %10775 = vmatpush2.bf16.msra.mxu0 %v12920_v21  ;;  %v12892_v3 = vld [vmem:[#allocation10 + $0x70c] ss:$16 sps:$4 sm:$0xff]   ;;  %v12950_v21 = vld [vmem:[#allocation11 + $0x140] ss:$8 sps:$4 sm:$0xff]  }
 0x65f   :  { %10776 = vmatprep.subr.bf16.mxu0 %v12925_v11  ;;  %v12955_v11 = vld [vmem:[#allocation11 + $0x134] ss:$8 sps:$4 sm:$0xff]  }
 0x661   :  { %10239 = vmatpush2.bf16.msra.mxu1 %v12827_v55  ;;  %v12943_v55 = vld [vmem:[#allocation11 + $0x174] ss:$8 sps:$4 sm:$0xff]  }
 0x662   :  { %10240 = vmatprep.subr.bf16.mxu1 %v12832_v26  ;;  %10777 = vmatpush2.bf16.msra.mxu0 %v12923_v2  ;;  %v12946_v26 = vld [vmem:[#allocation11 + $0x164] ss:$8 sps:$4 sm:$0xff]   ;;  %v12961_v2 = vld [vmem:[#allocation11 + $0x114] ss:$8 sps:$4 sm:$0xff]  }
 0x663   :  { %10778 = vmatprep.subr.bf16.mxu0 %v12928_v50  ;;  %v12959_v50 = vld [vmem:[#allocation11 + $0x110] ss:$8 sps:$4 sm:$0xff]  }
 0x665   :  { %10241 = vmatpush2.bf16.msra.mxu1 %v12830_v0  ;;  %v12947_v0 = vld [vmem:[#allocation11 + $0x150] ss:$8 sps:$4 sm:$0xff]  }
 0x666   :  { %10242 = vmatprep.subr.bf16.mxu1 %v12835_v58  ;;  %10779 = vmatpush2.bf16.msra.mxu0 %v12926_v63  ;;  %v12952_v58 = vld [vmem:[#allocation11 + $0x144] ss:$8 sps:$4 sm:$0xff]   ;;  %v12967_v63 = vld [vmem:[#allocation11 + $0x1f4] ss:$8 sps:$4 sm:$0xff]  }
 0x667   :  { %10780 = vmatprep.subr.bf16.mxu0 %v12931_v31  ;;  %v12965_v31 = vld [vmem:[#allocation11 + $0x1f0] ss:$8 sps:$4 sm:$0xff]  }
 0x669   :  { %10243 = vmatpush2.bf16.msra.mxu1 %v12833_v9  ;;  %v12953_v9 = vld [vmem:[#allocation11 + $0x130] ss:$8 sps:$4 sm:$0xff]  }
 0x66a   :  { %10244 = vmatprep.subr.bf16.mxu1 %v12838_v4  ;;  %10781 = vmatpush2.bf16.msra.mxu0 %v12929_v39  ;;  %v12956_v4 = vld [vmem:[#allocation11 + $0x120] ss:$8 sps:$4 sm:$0xff]  }
 0x66b   :  { %10782 = vmatprep.subr.bf16.mxu0 %v12934_v38  ;;  %v12968_v39 = vld [vmem:[#allocation11 + $0x1e0] ss:$8 sps:$4 sm:$0xff]   ;;  %v10080_v38 = vpop.f32.mrf.mxu1 }
 0x66d   :  { %10245 = vmatpush2.bf16.msra.mxu1 %v12836_v13  ;;  %v12964_v13 = vld [vmem:[#allocation11 + $0x104] ss:$8 sps:$4 sm:$0xff]  }
 0x66e   :  { %10246 = vmatprep.subr.bf16.mxu1 %v12841_v6  ;;  %10783 = vmatpush2.bf16.msra.mxu0 %v12932_v28  ;;  %v12962_v6 = vld [vmem:[#allocation11 + $0x100] ss:$8 sps:$4 sm:$0xff]   ;;  %v12979_v28 = vld [vmem:[#allocation11 + $0x1b4] ss:$8 sps:$4 sm:$0xff]  }
 0x66f   :  { %10784 = vmatprep.subr.bf16.mxu0 %v12937_v22  ;;  %v10082_v22 = vpop.f32.mrf.mxu1 }
 0x671   :  { %10247 = vmatpush2.bf16.msra.mxu1 %v12839_v62  ;;  %v12970_v62 = vld [vmem:[#allocation11 + $0x1e4] ss:$8 sps:$4 sm:$0xff]  }
 0x672   :  { %10248 = vmatprep.subr.bf16.mxu1 %v12844_v44  ;;  %10785 = vmatpush2.bf16.msra.mxu0 %v12935_v54  ;;  %v10037_v44 = vpop.f32.mrf.mxu0  ;;  %v12977_v54 = vld [vmem:[#allocation11 + $0x1b0] ss:$8 sps:$4 sm:$0xff]  }
 0x673   :  { %10786 = vmatprep.subr.bf16.mxu0 %v12940_v46  ;;  %v10084_v46 = vpop.f32.mrf.mxu1 }
 0x675   :  { %10249 = vmatpush2.bf16.msra.mxu1 %v12842_v49  ;;  %v12973_v49 = vld [vmem:[#allocation11 + $0x1d4] ss:$8 sps:$4 sm:$0xff]  }
 0x676   :  { %10304 = vmatprep.subr.bf16.mxu1 %v12847_v48  ;;  %10787 = vmatpush2.bf16.msra.mxu0 %v12938_v51  ;;  %v10039_v48 = vpop.f32.mrf.mxu0 }
 0x678   :  { %10251 = vmatmul.mubr.bf16.vlgmr.msra.gmra.mxu1 %v13718_v42  ;;  %v12854_v42 = vld [vmem:[#allocation10 + $0x688] ss:$16 sps:$4 sm:$0xff]  }
 0x679   :  { %10305 = vmatpush1.bf16.msra.mxu1 %v12845_v60  ;;  %10336 = vmatprep.mubr.bf16.mxu1 %v13737_v30  ;;  %v12859_v30 = vld [vmem:[#allocation10 + $0x66c] ss:$16 sps:$4 sm:$0xff]   ;;  %v12971_v60 = vld [vmem:[#allocation11 + $0x1d0] ss:$8 sps:$4 sm:$0xff]  }
 0x67a   :  { %10306 = vmatprep.subr.bf16.mxu1 %v12850_v45  ;;  %v12976_v45 = vld [vmem:[#allocation11 + $0x1c4] ss:$8 sps:$4 sm:$0xff]  }
 0x67d   :  { %10307 = vmatpush1.bf16.msra.mxu1 %v12848_v7  ;;  %v10041_v7 = vpop.f32.mrf.mxu0 }
 0x67e   :  { %10308 = vmatprep.subr.bf16.mxu1 %v12853_v32  ;;  %v12974_v32 = vld [vmem:[#allocation11 + $0x1c0] ss:$8 sps:$4 sm:$0xff]  }
 0x681   :  { %10309 = vmatpush1.bf16.msra.mxu1 %v12851_v35  ;;  %v10043_v35 = vpop.f32.mrf.mxu0 }
 0x682   :  { %10310 = vmatprep.subr.bf16.mxu1 %v12856_v36 }
 0x683   :  { %v10123_v36 = vpop.f32.mrf.mxu0 }
 0x685   :  { %10311 = vmatpush1.bf16.msra.mxu1 %v12854_v42  ;;  %v13749_v42 = vld [vmem:[#allocation14 + $0x3] ss:$8 sm:$0xf] }
 0x686   :  { %10312 = vmatprep.subr.bf16.mxu1 %v12859_v30  ;;  %v10125_v30 = vpop.f32.mrf.mxu0  ;;  %v8710_v51 = vrot.slane %v13749_v42, %v13331_v16 }
 0x689   :  { %10313 = vmatpush1.bf16.msra.mxu1 %v12857_v25  ;;  %v8706_v25 = vrot.slane %v13749_v42, %v13336_v18 }
 0x68a   :  { %10314 = vmatprep.subr.bf16.mxu1 %v12862_v5  ;;  %v10086_v5 = vpop.f32.mrf.mxu1 }
 0x68d   :  { %10315 = vmatpush1.bf16.msra.mxu1 %v12860_v41  ;;  %v10127_v41 = vpop.f32.mrf.mxu0 }
 0x68e   :  { %10316 = vmatprep.subr.bf16.mxu1 %v12865_v40  ;;  %v10040_v40 = vadd.f32 %v10039_v48, %v8710_v51  ;;  %v12998_v48 = vld [vmem:[#allocation13 + $0x18] sm:$0xff]  }
 0x691   :  { %10317 = vmatpush1.bf16.msra.mxu1 %v12863_v43  ;;  %v10042_v43 = vadd.f32 %v10041_v7, %v8706_v25 }
 0x692   :  { %10318 = vmatprep.subr.bf16.mxu1 %v12868_v34  ;;  %v10038_v34 = vadd.f32 %v10037_v44, %v8706_v25  ;;  %v12995_v44 = vld [vmem:[#allocation13 + $0x60] sm:$0xff]  }
 0x695   :  { %10319 = vmatpush1.bf16.msra.mxu1 %v12866_v1 }
 0x696   :  { %10320 = vmatprep.subr.bf16.mxu1 %v12871_v10  ;;  %v12982_v10 = vld [vmem:[#allocation11 + $0x1a4] ss:$8 sps:$4 sm:$0xff]  }
 0x699   :  { %10321 = vmatpush2.bf16.msra.mxu1 %v12869_v37  ;;  %v10044_v37 = vadd.f32 %v10043_v35, %v8710_v51 }
 0x69a   :  { %10322 = vmatprep.subr.bf16.mxu1 %v12874_v56  ;;  %v10083_v56 = vadd.f32 %v10082_v22, %v10040_v40  ;;  %v8718_v22 = vrot.slane %v13749_v42, %v13339_v19 }
 0x69d   :  { %10323 = vmatpush2.bf16.msra.mxu1 %v12872_v29  ;;  %v10085_v29 = vadd.f32 %v10084_v46, %v10042_v43 }
 0x69e   :  { %10324 = vmatprep.subr.bf16.mxu1 %v12877_v53  ;;  %v12980_v53 = vld [vmem:[#allocation11 + $0x1a0] ss:$8 sps:$4 sm:$0xff]  }
 0x6a1   :  { %10325 = vmatpush2.bf16.msra.mxu1 %v12875_v8  ;;  %v10081_v8 = vadd.f32 %v10080_v38, %v10038_v34 }
 0x6a2   :  { %10326 = vmatprep.subr.bf16.mxu1 %v12880_v59  ;;  %v10129_v59 = vpop.f32.mrf.mxu0 }
 0x6a5   :  { %10327 = vmatpush2.bf16.msra.mxu1 %v12878_v57 }
 0x6a6   :  { %10328 = vmatprep.subr.bf16.mxu1 %v12883_v15  ;;  %v10087_v15 = vadd.f32 %v10086_v5, %v10044_v37 }
 0x6a9   :  { %10329 = vmatpush2.bf16.msra.mxu1 %v12881_v23  ;;  %v10126_v23 = vadd.f32 %v10125_v30, %v10083_v56 }
 0x6aa   :  { %10330 = vmatprep.subr.bf16.mxu1 %v12886_v24  ;;  %v10128_v24 = vadd.f32 %v10127_v41, %v10085_v29 }
 0x6ad   :  { %10331 = vmatpush2.bf16.msra.mxu1 %v12884_v12  ;;  %v10124_v12 = vadd.f32 %v10123_v36, %v10081_v8  ;;  %v8714_v36 = vrot.slane %v13749_v42, %v13342_v20 }
 0x6ae   :  { %10332 = vmatprep.subr.bf16.mxu1 %v12889_v33 }
 0x6b1   :  { %10333 = vmatpush2.bf16.msra.mxu1 %v12887_v27  ;;  %v12985_v27 = vld [vmem:[#allocation11 + $0x194] ss:$8 sps:$4 sm:$0xff]  }
 0x6b2   :  { %10334 = vmatprep.subr.bf16.mxu1 %v12892_v3  ;;  %v10130_v3 = vadd.f32 %v10129_v59, %v10087_v15 }
 0x6b5   :  { %10335 = vmatpush2.bf16.msra.mxu1 %v12890_v17 }
 0x6b6   :  { %10799 = vmatprep.subr.bf16.mxu1 %v12943_v55  ;;  %v12983_v55 = vld [vmem:[#allocation11 + $0x190] ss:$8 sps:$4 sm:$0xff]  }
 0x6b8   :  { %10337 = vmatmul.mubr.bf16.vlgmr.msra.gmra.mxu1 %v13740_v47  ;;  %v12958_v47 = vld [vmem:[#allocation11 + $0x124] ss:$8 sps:$4 sm:$0xff]  }
 0x6b9   :  { %10800 = vmatpush1.bf16.msra.mxu1 %v12941_v14 }
 0x6ba   :  { %10801 = vmatprep.subr.bf16.mxu1 %v12946_v26 }
 0x6bd   :  { %10802 = vmatpush1.bf16.msra.mxu1 %v12944_v52 }
 0x6be   :  { %10803 = vmatprep.subr.bf16.mxu1 %v12949_v61 }
 0x6c1   :  { %10804 = vmatpush1.bf16.msra.mxu1 %v12947_v0 }
 0x6c2   :  { %10805 = vmatprep.subr.bf16.mxu1 %v12952_v58  ;;  %v12988_v58 = vld [vmem:[#allocation11 + $0x184] ss:$8 sps:$4 sm:$0xff]  }
 0x6c5   :  { %10806 = vmatpush1.bf16.msra.mxu1 %v12950_v21 }
 0x6c6   :  { %10807 = vmatprep.subr.bf16.mxu1 %v12955_v11 }
 0x6c9   :  { %10808 = vmatpush1.bf16.msra.mxu1 %v12953_v9  ;;  %v12986_v9 = vld [vmem:[#allocation11 + $0x180] ss:$8 sps:$4 sm:$0xff]  }
 0x6ca   :  { %10809 = vmatprep.subr.bf16.mxu1 %v12958_v47 }
 0x6cd   :  { %10810 = vmatpush1.bf16.msra.mxu1 %v12956_v4 }
 0x6ce   :  { %10811 = vmatprep.subr.bf16.mxu1 %v12961_v2 }
 0x6d1   :  { %10812 = vmatpush1.bf16.msra.mxu1 %v12959_v50  ;;  %v12989_v50 = vld [vmem:[#allocation13 + $0x78] sm:$0xff]  }
 0x6d2   :  { %10813 = vmatprep.subr.bf16.mxu1 %v12964_v13  ;;  %v12990_v13 = vld [vmem:[#allocation13 + $0x38] sm:$0xff]   ;;  %12468 = vmatprep.subr.bf16.mxu0 %v12989_v50 }
 0x6d5   :  { %10814 = vmatpush1.bf16.msra.mxu1 %v12962_v6  ;;  %v12991_v6 = vld [vmem:[#allocation13 + $0x70] sm:$0xff]  }
 0x6d6   :  { %10815 = vmatprep.subr.bf16.mxu1 %v12967_v63  ;;  %v12992_v63 = vld [vmem:[#allocation13 + $0x30] sm:$0xff]  }
 0x6d9   :  { %10816 = vmatpush2.bf16.msra.mxu1 %v12965_v31  ;;  %v12993_v31 = vld [vmem:[#allocation13 + $0x68] sm:$0xff]  }
 0x6da   :  { %10817 = vmatprep.subr.bf16.mxu1 %v12970_v62  ;;  %v12994_v62 = vld [vmem:[#allocation13 + $0x28] sm:$0xff]  }
 0x6dd   :  { %10818 = vmatpush2.bf16.msra.mxu1 %v12968_v39  ;;  %v12996_v39 = vld [vmem:[#allocation13 + $0x20] sm:$0xff]  }
 0x6de   :  { %10819 = vmatprep.subr.bf16.mxu1 %v12973_v49  ;;  %v12997_v49 = vld [vmem:[#allocation13 + $0x58] sm:$0xff]  }
 0x6e1   :  { %10820 = vmatpush2.bf16.msra.mxu1 %v12971_v60  ;;  %v10209_v60 = vpop.f32.mrf.mxu0 }
 0x6e2   :  { %10821 = vmatprep.subr.bf16.mxu1 %v12976_v45  ;;  %v10210_v25 = vadd.f32 %v10209_v60, %v8714_v36 }
 0x6e3   :  { %v10211_v45 = vpop.f32.mrf.mxu0 }
 0x6e4   :  { %v10212_v30 = vadd.f32 %v10211_v45, %v8718_v22 }
 0x6e5   :  { %10822 = vmatpush2.bf16.msra.mxu1 %v12974_v32  ;;  %v10213_v7 = vpop.f32.mrf.mxu0 }
 0x6e6   :  { %10823 = vmatprep.subr.bf16.mxu1 %v12979_v28  ;;  %v10214_v51 = vadd.f32 %v10213_v7, %v8714_v36  ;;  %v10880_v36 = vld [vmem:[#allocation14 + $0x5] ss:$0 sm:$0xff] }
 0x6e7   :  { %v10215_v32 = vpop.f32.mrf.mxu0 }
 0x6e8   :  { %v10216_v41 = vadd.f32 %v10215_v32, %v8718_v22 }
 0x6e9   :  { %10824 = vmatpush2.bf16.msra.mxu1 %v12977_v54 }
 0x6ea   :  { %10825 = vmatprep.subr.bf16.mxu1 %v12982_v10 }
 0x6ed   :  { %10826 = vmatpush2.bf16.msra.mxu1 %v12980_v53 }
 0x6ee   :  { %10827 = vmatprep.subr.bf16.mxu1 %v12985_v27 }
 0x6f1   :  { %10828 = vmatpush2.bf16.msra.mxu1 %v12983_v55  ;;  %v12999_v55 = vld [vmem:[#allocation13 + $0x50] sm:$0xff]  }
 0x6f2   :  { %10829 = vmatprep.subr.bf16.mxu1 %v12988_v58  ;;  %v13004_v58 = vld [vmem:[#allocation13] sm:$0xff]  }
 0x6f5   :  { %10830 = vmatpush2.bf16.msra.mxu1 %v12986_v9  ;;  %v10424_v9 = vld [vmem:[#allocation14 + $0x4] ss:$8 sm:$0x3] }
 0x6f8   :  { %v10166_v1 = vpop.f32.mrf.mxu1  ;;  %v10295_v35 = vpop.f32.mrf.mxu0 }
 0x6f9   :  { %v10167_v26 = vadd.f32 %v10166_v1, %v10124_v12 }
 0x6fa   :  { %v10168_v57 = vpop.f32.mrf.mxu1  ;;  %v10297_v46 = vpop.f32.mrf.mxu0 }
 0x6fb   :  { %v10169_v17 = vadd.f32 %v10168_v57, %v10126_v23  ;;  %v10347_v47 = vmax.f32 %v10167_v26, 0.0  ;;  %v13000_v26 = vld [vmem:[#allocation13 + $0x10] sm:$0xff]  }
 0x6fc   :  { %v10170_v33 = vpop.f32.mrf.mxu1  ;;  %v10299_v34 = vpop.f32.mrf.mxu0 }
 0x6fd   :  { %v10171_v14 = vadd.f32 %v10170_v33, %v10128_v24  ;;  %v10348_v21 = vmax.f32 %v10169_v17, 0.0 }
 0x6fe   :  { %v10172_v52 = vpop.f32.mrf.mxu1  ;;  %v10301_v19 = vpop.f32.mrf.mxu0 }
 0x6ff   :  { %v10173_v61 = vadd.f32 %v10172_v52, %v10130_v3  ;;  %v10351_v0 = vmax.f32 %v10171_v14, 0.0  ;;  %v13001_v52 = vld [vmem:[#allocation13 + $0x48] sm:$0xff]  }
 0x701   :  { %v10352_v11 = vmax.f32 %v10173_v61, 0.0  ;;  %v10355_v2 = vpack.c.bf16 %v10351_v0, %v10347_v47  ;;  %v13002_v61 = vld [vmem:[#allocation13 + $0x8] sm:$0xff]   ;;  %v13003_v0 = vld [vmem:[#allocation13 + $0x40] sm:$0xff]  }
 0x703   :  { %v10356_v4 = vpack.c.bf16 %v10352_v11, %v10348_v21 }
 0x705   :  { %10788 = vmatprep.mubr.bf16.mxu0 %v10356_v4  ;;  %v10433_v4 = vrot.slane %v10424_v9, %v13331_v16 }
 0x706   :  { %10789 = vmatmul.mubr.bf16.vlgmr.msra.gmra.mxu0 %v10355_v2  ;;  %v10429_v2 = vrot.slane %v10424_v9, %v13336_v18 }
 0x707   :  { %12469 = vmatpush3.bf16.msra.mxu0 %v12990_v13 }
 0x708   :  { %12470 = vmatprep.subr.bf16.mxu0 %v12991_v6 }
 0x70b   :  { %12471 = vmatpush3.bf16.msra.mxu0 %v12992_v63 }
 0x70c   :  { %12472 = vmatprep.subr.bf16.mxu0 %v12993_v31 }
 0x70f   :  { %12473 = vmatpush3.bf16.msra.mxu0 %v12994_v62 }
 0x710   :  { %12474 = vmatprep.subr.bf16.mxu0 %v12995_v44 }
 0x713   :  { %12475 = vmatpush3.bf16.msra.mxu0 %v12996_v39 }
 0x714   :  { %12476 = vmatprep.subr.bf16.mxu0 %v12997_v49 }
 0x717   :  { %12477 = vmatpush3.bf16.msra.mxu0 %v12998_v48 }
 0x718   :  { %12478 = vmatprep.subr.bf16.mxu0 %v12999_v55 }
 0x71b   :  { %12479 = vmatpush3.bf16.msra.mxu0 %v13000_v26 }
 0x71c   :  { %12480 = vmatprep.subr.bf16.mxu0 %v13001_v52 }
 0x71f   :  { %12481 = vmatpush3.bf16.msra.mxu0 %v13002_v61 }
 0x720   :  { %12482 = vmatprep.subr.bf16.mxu0 %v13003_v0 }
 0x723   :  { %12483 = vmatpush3.bf16.msra.mxu0 %v13004_v58 }
 0x738   :  { %v10252_v38 = vpop.f32.mrf.mxu1 }
 0x739   :  { %v10253_v1 = vadd.f32 %v10252_v38, %v10210_v25 }
 0x73a   :  { %v10254_v28 = vpop.f32.mrf.mxu1 }
 0x73b   :  { %v10255_v40 = vadd.f32 %v10254_v28, %v10212_v30  ;;  %v10296_v8 = vadd.f32 %v10295_v35, %v10253_v1 }
 0x73c   :  { %v10256_v54 = vpop.f32.mrf.mxu1 }
 0x73d   :  { %v10257_v43 = vadd.f32 %v10256_v54, %v10214_v51  ;;  %v10298_v29 = vadd.f32 %v10297_v46, %v10255_v40 }
 0x73e   :  { %v10258_v5 = vpop.f32.mrf.mxu1 }
 0x73f   :  { %v10259_v37 = vadd.f32 %v10258_v5, %v10216_v41  ;;  %v10300_v53 = vadd.f32 %v10299_v34, %v10257_v43 }
 0x741   :  { %v10302_v57 = vadd.f32 %v10301_v19, %v10259_v37 }
 0x778   :  { %v10338_v10 = vpop.f32.mrf.mxu1 }
 0x779   :  { %v10339_v15 = vadd.f32 %v10338_v10, %v10296_v8 }
 0x77a   :  { %v10340_v56 = vpop.f32.mrf.mxu1 }
 0x77b   :  { %v10341_v20 = vadd.f32 %v10340_v56, %v10298_v29  ;;  %v10349_v3 = vmax.f32 %v10339_v15, 0.0 }
 0x77c   :  { %v10342_v59 = vpop.f32.mrf.mxu1 }
 0x77d   :  { %v10343_v42 = vadd.f32 %v10342_v59, %v10300_v53  ;;  %v10350_v33 = vmax.f32 %v10341_v20, 0.0 }
 0x77e   :  { %v10344_v23 = vpop.f32.mrf.mxu1 }
 0x77f   :  { %v10345_v24 = vadd.f32 %v10344_v23, %v10302_v57  ;;  %v10353_v12 = vmax.f32 %v10343_v42, 0.0 }
 0x781   :  { %v10354_v27 = vmax.f32 %v10345_v24, 0.0  ;;  %v10357_v14 = vpack.c.bf16 %v10353_v12, %v10349_v3 }
 0x783   :  { %v10358_v17 = vpack.c.bf16 %v10354_v27, %v10350_v33 }
 0x785   :  { %10831 = vmatprep.mubr.bf16.mxu1 %v10358_v17 }
 0x786   :  { %10832 = vmatmul.mubr.bf16.vlgmr.msra.gmra.mxu1 %v10357_v14 }
 0x7c6   :  { %v10790_v21 = vpop.f32.mrf.mxu0 }
 0x7c7   :  { %v10791_v62 = vadd.f32 %v10790_v21, %v10429_v2 }
 0x7c8   :  { %v10792_v11 = vpop.f32.mrf.mxu0 }
 0x7c9   :  { %v10793_v63 = vadd.f32 %v10792_v11, %v10433_v4 }
 0x7ca   :  { %v10794_v47 = vpop.f32.mrf.mxu0 }
 0x7cb   :  { %v10795_v31 = vadd.f32 %v10794_v47, %v10429_v2 }
 0x7cc   :  { %v10796_v13 = vpop.f32.mrf.mxu0 }
 0x7cd   :  { %v10797_v39 = vadd.f32 %v10796_v13, %v10433_v4 }
 0x846   :  { %v10833_v50 = vpop.f32.mrf.mxu1 }
 0x847   :  { %v10834_v60 = vadd.f32 %v10833_v50, %v10791_v62 }
 0x848   :  { %v10835_v6 = vpop.f32.mrf.mxu1 }
 0x849   :  { %v10836_v49 = vadd.f32 %v10835_v6, %v10793_v63  ;;  %v10842_v35 = vmax.f32 %v10834_v60, 0.0 }
 0x84a   :  { %v10837_v44 = vpop.f32.mrf.mxu1 }
 0x84b   :  { %v10838_v48 = vadd.f32 %v10837_v44, %v10795_v31  ;;  %v10843_v32 = vmax.f32 %v10836_v49, 0.0 }
 0x84c   :  { %v10839_v45 = vpop.f32.mrf.mxu1 }
 0x84d   :  { %v10840_v7 = vadd.f32 %v10839_v45, %v10797_v39  ;;  %v10844_v38 = vmax.f32 %v10838_v48, 0.0 }
 0x84f   :  { %v10845_v28 = vmax.f32 %v10840_v7, 0.0  ;;  %v10846_v22 = vpack.c.bf16 %v10844_v38, %v10842_v35 }
 0x851   :  { %v10847_v16 = vpack.c.bf16 %v10845_v28, %v10843_v32 }
 0x853   :  { %11009 = vmatprep.mubr.bf16.mxu0 %v10847_v16 }
 0x854   :  { %11010 = vmatmul.mubr.bf16.vlgmr.msra.gmra.mxu0 %v10846_v22 }
 0x914   :  { %v12484_v18 = vpop.f32.mrf.mxu0 }
 0x916   :  { %v12485_v54 = vpop.f32.mrf.mxu0 }
 0x917   :  { %v12486_v46 = vadd.f32 %v12485_v54, %v12484_v18 }
 0x918   :  { %v12487_v30 = vpop.f32.mrf.mxu0 }
 0x919   :  { %v11012_v51 = vadd.f32 %v12486_v46, %v10880_v36 }
 0x91a   :  { %v12488_v25 = vpop.f32.mrf.mxu0 }
 0x91b   :  { %v11018_v5 = vmax.f32 %v11012_v51, 0.0  ;;  %v12489_v41 = vadd.f32 %v12488_v25, %v12487_v30 }
 0x91d   :  { %11020 = vst [vmem:[#allocation16] sm:$0xff] %v11018_v5  ;;  %v11015_v40 = vadd.f32 %v12489_v41, %v10880_v36 }
 0x91f   :  { %v11019_v43 = vmax.f32 %v11015_v40, 0.0 }
 0x921   :  { %11021 = vst [vmem:[#allocation16 + $0x8] sm:$0xff] %v11019_v43 }
 0x922   :  { %13176 = shalt.err (!%p13173_p2)
}
 0x923   :  { %11033 = dma.vmem_to_hbm [thread:$0]  %s11028_s7, 256, %s13775_s8, [#allocation4], %s13202_s19, %s13202_s19, %s13203_s20  }
 0x924   :  { %13195 = dma.done.wait [#allocation4], 256  }
 0x925   :  { %13196 = vsyncadd [#allocation4], 4294967040 }
 0x926   :  { %11037 = vsyncpa [#allocation3], 1 }
 0x927   :  { %11038 = vsyncpa [#allocation6], 1 }
 0x928   :  { %11039 = vsyncpa [#allocation9], 1 }
 0x929   :  { %11040 = vsyncpa [#allocation12], 1 }
 0x92a   :  { %11041 = vsyncpa [#allocation15], 1 }
 0x92b   :  { %11042 = vsyncpa [#allocation4], 1 }

</bundles_post_ra>
